<compile_context>
chip_gen: v5e
topology: v5e:2x2
jax: 0.10.0
libtpu: 0.0.40
codegen_flags: <defaults>
</compile_context>

<pallas_src>
import functools

import jax
import jax.numpy as jnp
import numpy as np
from jax import lax
from jax.experimental import pallas as pl
from jax.experimental.pallas import tpu as pltpu

LANE = 128     # lane width
ALIGN = 16     # padded-row width alignment (bf16 sublane tile = 16)
GUARD = 16     # guard rows around the relu scratch (taps poke +-1 flat row)


def _round_up(x, m):
    return ((x + m - 1) // m) * m


def _pick_chunk_rows(h, wp, target=256):
    """Largest divisor of h whose chunk (rows * padded width) stays <= target."""
    best = 1
    for r in range(1, h + 1):
        if h % r == 0 and r * wp <= target:
            best = r
    return best


# ----------------------------- Pallas kernel --------------------------------

def _residual_stack_kernel(x_ref, w3_ref, w1_ref, o_ref, t_ref, *,
                           H, W, Wp, R, n_chunks):
    """Fused ResidualStack for one image (flat padded layout).

    x_ref : (Npad, Cp)  f32    flat zero-padded input image, Npad = (H+2)*Wp
    w3_ref: (L*9, Cp, Crp) bf16 3x3 conv taps as matmul matrices (tap = ki*3+kj)
    w1_ref: (L, Crp, Cp) bf16   1x1 conv matrices
    o_ref : (Npad, Cp)  f32    output block; also the VMEM-resident activation
    t_ref : (Npad + 2*GUARD, Cp) bf16  ReLU(activation) scratch (+guard rows)
    """
    Npad = x_ref.shape[0]
    Cp = x_ref.shape[1]
    Crp = w3_ref.shape[-1]
    L = w1_ref.shape[0]
    M = R * Wp                                   # flat rows per chunk

    # Bring the image into the output block; it stays VMEM-resident across the
    # whole layer stack (one HBM read + one HBM write per image).
    o_ref[...] = x_ref[...]

    # Guard rows are only ever read for pad-column outputs (masked below), but
    # zero them once so no uninitialized VMEM enters the MXU.
    t_ref[0:GUARD, :] = jnp.zeros((GUARD, Cp), jnp.bfloat16)
    t_ref[GUARD + Npad:GUARD + Npad + GUARD, :] = jnp.zeros((GUARD, Cp),
                                                            jnp.bfloat16)

    # Column-interior mask for one chunk.  Chunks start on padded-row
    # boundaries, so the pattern is chunk-invariant; hoisted out of all loops.
    col = lax.broadcasted_iota(jnp.int32, (M, 1), 0) % Wp
    interior = jnp.logical_and(col >= 1, col <= W)

    def layer_body(l, carry):
        # ReLU over the whole padded image, once per layer, stored bf16 for the
        # MXU.  relu(0) == 0, so the zero border doubles as conv zero padding.
        t_ref[GUARD:GUARD + Npad, :] = (
            jnp.maximum(o_ref[...], 0.0).astype(jnp.bfloat16))

        for c in range(n_chunks):                 # static; chunk-local work
            q0 = (1 + c * R) * Wp                 # first interior row of chunk
            xi = o_ref[q0:q0 + M, :]              # residual source, f32

            # 3x3 conv as 9 flat-shifted bf16 matmuls chained into one small
            # f32 accumulator (no im2col, no strided-slice reshapes).
            acc = jnp.zeros((M, Crp), jnp.float32)
            for ki in range(3):
                for kj in range(3):
                    s = GUARD + q0 + (ki - 1) * Wp + (kj - 1)
                    acc = acc + jnp.dot(t_ref[s:s + M, :],
                                        w3_ref[l * 9 + ki * 3 + kj],
                                        preferred_element_type=jnp.float32)

            h = jnp.maximum(acc, 0.0).astype(jnp.bfloat16)                 # ReLU
            y = jnp.dot(h, w1_ref[l], preferred_element_type=jnp.float32)  # 1x1
            # Residual add; keep the 1-px zero border (and lane pad) intact.
            o_ref[q0:q0 + M, :] = jnp.where(interior, xi + y, xi)
        return carry

    lax.fori_loop(0, L, layer_body, 0)

    # Final F.relu over the stack output (zero border stays zero).
    o_ref[...] = jnp.maximum(o_ref[...], 0.0)


# ------------------------------- wrapper -------------------------------------

def residual_stack_forward(x_nchw, params):
    """ResidualStack.forward.  x_nchw: (B, C, H, W).
    params: list of (w3, w1) with PyTorch conv weight shapes
    w3 = (Cr, C, 3, 3), w1 = (C, Cr, 1, 1); both convs are bias-free."""
    B, C, H, W = x_nchw.shape
    L = len(params)
    Cr = params[0][0].shape[0]
    Cp = _round_up(C, LANE)          # lane-dense channels
    Crp = _round_up(Cr, LANE)        # lane-dense bottleneck (never past 128+)
    Hp = H + 2
    Wp = _round_up(W + 2, ALIGN)     # flat rows start tile-aligned
    Npad = Hp * Wp
    R = _pick_chunk_rows(H, Wp)      # chunk rows (divides H)
    n_chunks = H // R

    # ---- glue (layout only): NCHW->NHWC, channel pad, 1-px spatial zero pad,
    # flatten rows.  XLA fuses this into one copy.
    x = jnp.transpose(x_nchw, (0, 2, 3, 1)).astype(jnp.float32)
    x = jnp.pad(x, ((0, 0), (1, 1), (1, Wp - 1 - W), (0, Cp - C)))
    x_flat = x.reshape(B, Npad, Cp)

    # Pack conv weights once into stacked bf16 matmul matrices.
    w3_mats, w1_mats = [], []
    for (w3, w1) in params:
        w3t = jnp.transpose(w3, (2, 3, 1, 0)).reshape(9, C, Cr)   # tap = ki*3+kj
        w3_mats.append(jnp.pad(w3t, ((0, 0), (0, Cp - C), (0, Crp - Cr))))
        w1t = jnp.transpose(w1[:, :, 0, 0], (1, 0))               # (Cr, C)
        w1_mats.append(jnp.pad(w1t, ((0, Crp - Cr), (0, Cp - C))))
    w3_stack = jnp.concatenate(w3_mats, 0).astype(jnp.bfloat16)   # (L*9,Cp,Crp)
    w1_stack = jnp.stack(w1_mats, 0).astype(jnp.bfloat16)         # (L,Crp,Cp)

    # Explicit VMEM budget (v5e default scoped limit is only 16 MiB).
    est = (4 * Npad * Cp * 4                           # x & o blocks, dbl-buffered
           + (Npad + 2 * GUARD) * Cp * 2               # bf16 relu scratch
           + 2 * (w3_stack.size + w1_stack.size) * 2   # weight stacks
           + 8 * R * Wp * max(Cp, Crp) * 4)            # per-chunk temporaries
    vmem_limit = int(min(96 * 2**20, max(32 * 2**20, int(1.5 * est))))

    kernel = functools.partial(_residual_stack_kernel,
                               H=H, W=W, Wp=Wp, R=R, n_chunks=n_chunks)

    out_flat = pl.pallas_call(
        kernel,
        out_shape=jax.ShapeDtypeStruct((B, Npad, Cp), jnp.float32),
        grid=(B,),
        in_specs=[
            pl.BlockSpec((None, Npad, Cp), lambda b: (b, 0, 0)),
            pl.BlockSpec((L * 9, Cp, Crp), lambda b: (0, 0, 0)),
            pl.BlockSpec((L, Crp, Cp), lambda b: (0, 0, 0)),
        ],
        out_specs=pl.BlockSpec((None, Npad, Cp), lambda b: (b, 0, 0)),
        scratch_shapes=[pltpu.VMEM((Npad + 2 * GUARD, Cp), jnp.bfloat16)],
        compiler_params=pltpu.CompilerParams(
            dimension_semantics=("parallel",),   # images shard across TCs (v7x)
            vmem_limit_bytes=vmem_limit),
    )(x_flat, w3_stack, w1_stack)

    # TODO(synk): for B == 1 (or odd B) on v7x add a second parallel grid axis
    # over row bands (1-row halo per layer) so both TensorCores stay busy.
    out = out_flat.reshape(B, Hp, Wp, Cp)[:, 1:H + 1, 1:W + 1, :C]
    return jnp.transpose(out, (0, 3, 1, 2)).astype(x_nchw.dtype)


# ------------------------------- reference -----------------------------------

def residual_stack_reference(x_nchw, params):
    """bf16-operand / f32-accumulate reference matching the kernel's numerics."""
    x = jnp.transpose(x_nchw, (0, 2, 3, 1)).astype(jnp.float32)
    for (w3, w1) in params:
        t = jnp.maximum(x, 0.0).astype(jnp.bfloat16)
        t = lax.conv_general_dilated(
            t, jnp.transpose(w3, (2, 3, 1, 0)).astype(jnp.bfloat16), (1, 1),
            "SAME", dimension_numbers=("NHWC", "HWIO", "NHWC"),
            preferred_element_type=jnp.float32)
        t = jnp.maximum(t, 0.0).astype(jnp.bfloat16)
        t = lax.conv_general_dilated(
            t, jnp.transpose(w1, (2, 3, 1, 0)).astype(jnp.bfloat16), (1, 1),
            "SAME", dimension_numbers=("NHWC", "HWIO", "NHWC"),
            preferred_element_type=jnp.float32)
        x = x + t
    x = jnp.maximum(x, 0.0)
    return jnp.transpose(x, (0, 3, 1, 2)).astype(x_nchw.dtype)


# --------------------------------- main ---------------------------------------

if __name__ == "__main__":
    # Forward-consistent shapes: in_channels == num_hiddens (required by the
    # residual add); num_residual_hiddens is the bottleneck width.
    B, H, W = 2, 16, 16
    num_hiddens = 8
    num_residual_hiddens = 4
    num_residual_layers = 2

    key = jax.random.PRNGKey(0)
    kx, *kw = jax.random.split(key, 1 + 2 * num_residual_layers)

    x = jax.random.normal(kx, (B, num_hiddens, H, W), dtype=jnp.float32)

    params = []
    for l in range(num_residual_layers):
        w3 = 0.2 * jax.random.normal(
            kw[2 * l], (num_residual_hiddens, num_hiddens, 3, 3),
            dtype=jnp.float32)
        w1 = 0.2 * jax.random.normal(
            kw[2 * l + 1], (num_hiddens, num_residual_hiddens, 1, 1),
            dtype=jnp.float32)
        params.append((w3, w1))

    fwd = jax.jit(residual_stack_forward)
    out = jax.block_until_ready(fwd(x, params))
    ref = jax.block_until_ready(residual_stack_reference(x, params))

    assert out.shape == (B, num_hiddens, H, W)
    np.testing.assert_allclose(np.asarray(out), np.asarray(ref),
                               rtol=1e-2, atol=1e-2)

    print("KERNEL_OK")
</pallas_src>

<mosaic_0001>
module attributes {stable_mosaic.version = 11 : i64} {
  func.func @_residual_stack_kernel(%arg0: i32, %arg1: memref<1x576x128xf32, #tpu.memory_space<vmem>>, %arg2: memref<18x128x128xbf16, #tpu.memory_space<vmem>>, %arg3: memref<2x128x128xbf16, #tpu.memory_space<vmem>>, %arg4: memref<1x576x128xf32, #tpu.memory_space<vmem>>, %arg5: memref<608x128xbf16, #tpu.memory_space<vmem>>) attributes {dimension_semantics = [#tpu.dimension_semantics<parallel>], iteration_bounds = array<i64: 2>, scalar_prefetch = 0 : i64, scratch_operands = 1 : i64, tpu.core_type = #tpu.core_type<tc>, window_params = [{transform_indices = @transform_0, window_bounds = array<i64: 1, 576, 128>}, {pipeline_mode = #tpu.pipeline_mode<synchronous>, transform_indices = @transform_1, window_bounds = array<i64: 18, 128, 128>}, {pipeline_mode = #tpu.pipeline_mode<synchronous>, transform_indices = @transform_2, window_bounds = array<i64: 2, 128, 128>}, {transform_indices = @transform_3, window_bounds = array<i64: 1, 576, 128>}]} {
    %c0 = arith.constant 0 : index
    %c0_0 = arith.constant 0 : index
    %c0_1 = arith.constant 0 : index
    %0 = vector.load %arg1[%c0, %c0_0, %c0_1] : memref<1x576x128xf32, #tpu.memory_space<vmem>>, vector<1x576x128xf32>
    %1 = vector.shape_cast %0 : vector<1x576x128xf32> to vector<576x128xf32>
    %c0_2 = arith.constant 0 : index
    %c0_3 = arith.constant 0 : index
    %c0_4 = arith.constant 0 : index
    %2 = vector.load %arg4[%c0_2, %c0_3, %c0_4] : memref<1x576x128xf32, #tpu.memory_space<vmem>>, vector<1x576x128xf32>
    %3 = vector.shape_cast %2 : vector<1x576x128xf32> to vector<576x128xf32>
    %4 = vector.shape_cast %1 : vector<576x128xf32> to vector<1x576x128xf32>
    tpu.vector_store %arg4[%c0_2, %c0_3, %c0_4], %4 {strides = array<i32>} : memref<1x576x128xf32, #tpu.memory_space<vmem>>, vector<1x576x128xf32>,
    %cst = arith.constant 0.000000e+00 : bf16
    %5 = vector.broadcast %cst : bf16 to vector<16x128xbf16>
    %c0_5 = arith.constant 0 : index
    %c0_6 = arith.constant 0 : index
    %6 = vector.load %arg5[%c0_5, %c0_6] : memref<608x128xbf16, #tpu.memory_space<vmem>>, vector<16x128xbf16>
    tpu.vector_store %arg5[%c0_5, %c0_6], %5 {strides = array<i32>} : memref<608x128xbf16, #tpu.memory_space<vmem>>, vector<16x128xbf16>,
    %cst_7 = arith.constant 0.000000e+00 : bf16
    %7 = vector.broadcast %cst_7 : bf16 to vector<16x128xbf16>
    %c592 = arith.constant 592 : index
    %c0_8 = arith.constant 0 : index
    %8 = vector.load %arg5[%c592, %c0_8] : memref<608x128xbf16, #tpu.memory_space<vmem>>, vector<16x128xbf16>
    tpu.vector_store %arg5[%c592, %c0_8], %7 {strides = array<i32>} : memref<608x128xbf16, #tpu.memory_space<vmem>>, vector<16x128xbf16>,
    %9 = tpu.iota {dimensions = array<i32: 0>} : vector<256x1xi32>
    %c32_i32 = arith.constant 32 : i32
    %c0_i32 = arith.constant 0 : i32
    %10 = arith.cmpi eq, %c32_i32, %c0_i32 : i32
    %c1_i32 = arith.constant 1 : i32
    %11 = arith.select %10, %c1_i32, %c32_i32 : i32
    %12 = vector.broadcast %11 : i32 to vector<256x1xi32>
    %13 = arith.remsi %9, %12 : vector<256x1xi32>
    %c0_i32_9 = arith.constant 0 : i32
    %14 = vector.broadcast %c0_i32_9 : i32 to vector<256x1xi32>
    %15 = arith.cmpi ne, %13, %14 : vector<256x1xi32>
    %c0_i32_10 = arith.constant 0 : i32
    %16 = vector.broadcast %c0_i32_10 : i32 to vector<256x1xi32>
    %17 = arith.cmpi slt, %13, %16 : vector<256x1xi32>
    %c0_i32_11 = arith.constant 0 : i32
    %18 = arith.cmpi slt, %11, %c0_i32_11 : i32
    %19 = vector.broadcast %18 : i1 to vector<256x1xi1>
    %20 = vector.broadcast %19 : vector<256x1xi1> to vector<256x1xi1>
    %21 = arith.xori %17, %20 : vector<256x1xi1>
    %22 = arith.andi %21, %15 : vector<256x1xi1>
    %23 = vector.broadcast %11 : i32 to vector<256x1xi32>
    %24 = arith.addi %13, %23 : vector<256x1xi32>
    %25 = arith.select %22, %24, %13 : vector<256x1xi1>, vector<256x1xi32>
    %c1_i32_12 = arith.constant 1 : i32
    %26 = vector.broadcast %c1_i32_12 : i32 to vector<256x1xi32>
    %27 = arith.cmpi sge, %25, %26 : vector<256x1xi32>
    %c16_i32 = arith.constant 16 : i32
    %28 = vector.broadcast %c16_i32 : i32 to vector<256x1xi32>
    %29 = arith.cmpi sle, %25, %28 : vector<256x1xi32>
    %30 = arith.andi %27, %29 : vector<256x1xi1>
    %c0_i32_13 = arith.constant 0 : i32
    %c2_i32 = arith.constant 2 : i32
    %31 = arith.addi %c0_i32_13, %c2_i32 : i32
    %c1_i32_14 = arith.constant 1 : i32
    scf.for %arg6 = %c0_i32_13 to %31 step %c1_i32_14  : i32 {
      %c0_23 = arith.constant 0 : index
      %c0_24 = arith.constant 0 : index
      %c0_25 = arith.constant 0 : index
      %39 = vector.load %arg4[%c0_23, %c0_24, %c0_25] : memref<1x576x128xf32, #tpu.memory_space<vmem>>, vector<1x576x128xf32>
      %40 = vector.shape_cast %39 : vector<1x576x128xf32> to vector<576x128xf32>
      %cst_26 = arith.constant 0.000000e+00 : f32
      %41 = vector.broadcast %cst_26 : f32 to vector<576x128xf32>
      %42 = arith.maximumf %40, %41 : vector<576x128xf32>
      %43 = arith.truncf %42 : vector<576x128xf32> to vector<576x128xbf16>
      %c16 = arith.constant 16 : index
      %c0_27 = arith.constant 0 : index
      %44 = vector.load %arg5[%c16, %c0_27] : memref<608x128xbf16, #tpu.memory_space<vmem>>, vector<576x128xbf16>
      tpu.vector_store %arg5[%c16, %c0_27], %43 {strides = array<i32>} : memref<608x128xbf16, #tpu.memory_space<vmem>>, vector<576x128xbf16>,
      %c0_28 = arith.constant 0 : index
      %c32 = arith.constant 32 : index
      %c0_29 = arith.constant 0 : index
      %45 = vector.load %arg4[%c0_28, %c32, %c0_29] : memref<1x576x128xf32, #tpu.memory_space<vmem>>, vector<1x256x128xf32>
      %46 = vector.shape_cast %45 : vector<1x256x128xf32> to vector<256x128xf32>
      %cst_30 = arith.constant 0.000000e+00 : f32
      %47 = vector.broadcast %cst_30 : f32 to vector<256x128xf32>
      %c15 = arith.constant 15 : index
      %c0_31 = arith.constant 0 : index
      %48 = vector.load %arg5[%c15, %c0_31] : memref<608x128xbf16, #tpu.memory_space<vmem>>, vector<256x128xbf16>
      %c9_i32 = arith.constant 9 : i32
      %49 = arith.muli %arg6, %c9_i32 : i32
      %c0_i32_32 = arith.constant 0 : i32
      %50 = arith.addi %49, %c0_i32_32 : i32
      %c0_i32_33 = arith.constant 0 : i32
      %51 = arith.addi %50, %c0_i32_33 : i32
      %52 = arith.index_cast %51 : i32 to index
      %c0_34 = arith.constant 0 : index
      %c0_35 = arith.constant 0 : index
      %53 = vector.load %arg2[%52, %c0_34, %c0_35] : memref<18x128x128xbf16, #tpu.memory_space<vmem>>, vector<1x128x128xbf16>
      %54 = vector.shape_cast %53 : vector<1x128x128xbf16> to vector<128x128xbf16>
      %cst_36 = arith.constant dense<0.000000e+00> : vector<256x128xf32>
      %55 = tpu.matmul %48, %54, %cst_36 {dimension_numbers = #tpu.dot_dimension_numbers<[1], [0], [0], [1], [0, 0, 1, 1], [], []>} : vector<256x128xbf16>, vector<128x128xbf16>, vector<256x128xf32> -> vector<256x128xf32>
      %56 = arith.addf %47, %55 : vector<256x128xf32>
      %c16_37 = arith.constant 16 : index
      %c0_38 = arith.constant 0 : index
      %57 = vector.load %arg5[%c16_37, %c0_38] : memref<608x128xbf16, #tpu.memory_space<vmem>>, vector<256x128xbf16>
      %c9_i32_39 = arith.constant 9 : i32
      %58 = arith.muli %arg6, %c9_i32_39 : i32
      %c0_i32_40 = arith.constant 0 : i32
      %59 = arith.addi %58, %c0_i32_40 : i32
      %c1_i32_41 = arith.constant 1 : i32
      %60 = arith.addi %59, %c1_i32_41 : i32
      %61 = arith.index_cast %60 : i32 to index
      %c0_42 = arith.constant 0 : index
      %c0_43 = arith.constant 0 : index
      %62 = vector.load %arg2[%61, %c0_42, %c0_43] : memref<18x128x128xbf16, #tpu.memory_space<vmem>>, vector<1x128x128xbf16>
      %63 = vector.shape_cast %62 : vector<1x128x128xbf16> to vector<128x128xbf16>
      %cst_44 = arith.constant dense<0.000000e+00> : vector<256x128xf32>
      %64 = tpu.matmul %57, %63, %cst_44 {dimension_numbers = #tpu.dot_dimension_numbers<[1], [0], [0], [1], [0, 0, 1, 1], [], []>} : vector<256x128xbf16>, vector<128x128xbf16>, vector<256x128xf32> -> vector<256x128xf32>
      %65 = arith.addf %56, %64 : vector<256x128xf32>
      %c17 = arith.constant 17 : index
      %c0_45 = arith.constant 0 : index
      %66 = vector.load %arg5[%c17, %c0_45] : memref<608x128xbf16, #tpu.memory_space<vmem>>, vector<256x128xbf16>
      %c9_i32_46 = arith.constant 9 : i32
      %67 = arith.muli %arg6, %c9_i32_46 : i32
      %c0_i32_47 = arith.constant 0 : i32
      %68 = arith.addi %67, %c0_i32_47 : i32
      %c2_i32_48 = arith.constant 2 : i32
      %69 = arith.addi %68, %c2_i32_48 : i32
      %70 = arith.index_cast %69 : i32 to index
      %c0_49 = arith.constant 0 : index
      %c0_50 = arith.constant 0 : index
      %71 = vector.load %arg2[%70, %c0_49, %c0_50] : memref<18x128x128xbf16, #tpu.memory_space<vmem>>, vector<1x128x128xbf16>
      %72 = vector.shape_cast %71 : vector<1x128x128xbf16> to vector<128x128xbf16>
      %cst_51 = arith.constant dense<0.000000e+00> : vector<256x128xf32>
      %73 = tpu.matmul %66, %72, %cst_51 {dimension_numbers = #tpu.dot_dimension_numbers<[1], [0], [0], [1], [0, 0, 1, 1], [], []>} : vector<256x128xbf16>, vector<128x128xbf16>, vector<256x128xf32> -> vector<256x128xf32>
      %74 = arith.addf %65, %73 : vector<256x128xf32>
      %c47 = arith.constant 47 : index
      %c0_52 = arith.constant 0 : index
      %75 = vector.load %arg5[%c47, %c0_52] : memref<608x128xbf16, #tpu.memory_space<vmem>>, vector<256x128xbf16>
      %c9_i32_53 = arith.constant 9 : i32
      %76 = arith.muli %arg6, %c9_i32_53 : i32
      %c3_i32 = arith.constant 3 : i32
      %77 = arith.addi %76, %c3_i32 : i32
      %c0_i32_54 = arith.constant 0 : i32
      %78 = arith.addi %77, %c0_i32_54 : i32
      %79 = arith.index_cast %78 : i32 to index
      %c0_55 = arith.constant 0 : index
      %c0_56 = arith.constant 0 : index
      %80 = vector.load %arg2[%79, %c0_55, %c0_56] : memref<18x128x128xbf16, #tpu.memory_space<vmem>>, vector<1x128x128xbf16>
      %81 = vector.shape_cast %80 : vector<1x128x128xbf16> to vector<128x128xbf16>
      %cst_57 = arith.constant dense<0.000000e+00> : vector<256x128xf32>
      %82 = tpu.matmul %75, %81, %cst_57 {dimension_numbers = #tpu.dot_dimension_numbers<[1], [0], [0], [1], [0, 0, 1, 1], [], []>} : vector<256x128xbf16>, vector<128x128xbf16>, vector<256x128xf32> -> vector<256x128xf32>
      %83 = arith.addf %74, %82 : vector<256x128xf32>
      %c48 = arith.constant 48 : index
      %c0_58 = arith.constant 0 : index
      %84 = vector.load %arg5[%c48, %c0_58] : memref<608x128xbf16, #tpu.memory_space<vmem>>, vector<256x128xbf16>
      %c9_i32_59 = arith.constant 9 : i32
      %85 = arith.muli %arg6, %c9_i32_59 : i32
      %c3_i32_60 = arith.constant 3 : i32
      %86 = arith.addi %85, %c3_i32_60 : i32
      %c1_i32_61 = arith.constant 1 : i32
      %87 = arith.addi %86, %c1_i32_61 : i32
      %88 = arith.index_cast %87 : i32 to index
      %c0_62 = arith.constant 0 : index
      %c0_63 = arith.constant 0 : index
      %89 = vector.load %arg2[%88, %c0_62, %c0_63] : memref<18x128x128xbf16, #tpu.memory_space<vmem>>, vector<1x128x128xbf16>
      %90 = vector.shape_cast %89 : vector<1x128x128xbf16> to vector<128x128xbf16>
      %cst_64 = arith.constant dense<0.000000e+00> : vector<256x128xf32>
      %91 = tpu.matmul %84, %90, %cst_64 {dimension_numbers = #tpu.dot_dimension_numbers<[1], [0], [0], [1], [0, 0, 1, 1], [], []>} : vector<256x128xbf16>, vector<128x128xbf16>, vector<256x128xf32> -> vector<256x128xf32>
      %92 = arith.addf %83, %91 : vector<256x128xf32>
      %c49 = arith.constant 49 : index
      %c0_65 = arith.constant 0 : index
      %93 = vector.load %arg5[%c49, %c0_65] : memref<608x128xbf16, #tpu.memory_space<vmem>>, vector<256x128xbf16>
      %c9_i32_66 = arith.constant 9 : i32
      %94 = arith.muli %arg6, %c9_i32_66 : i32
      %c3_i32_67 = arith.constant 3 : i32
      %95 = arith.addi %94, %c3_i32_67 : i32
      %c2_i32_68 = arith.constant 2 : i32
      %96 = arith.addi %95, %c2_i32_68 : i32
      %97 = arith.index_cast %96 : i32 to index
      %c0_69 = arith.constant 0 : index
      %c0_70 = arith.constant 0 : index
      %98 = vector.load %arg2[%97, %c0_69, %c0_70] : memref<18x128x128xbf16, #tpu.memory_space<vmem>>, vector<1x128x128xbf16>
      %99 = vector.shape_cast %98 : vector<1x128x128xbf16> to vector<128x128xbf16>
      %cst_71 = arith.constant dense<0.000000e+00> : vector<256x128xf32>
      %100 = tpu.matmul %93, %99, %cst_71 {dimension_numbers = #tpu.dot_dimension_numbers<[1], [0], [0], [1], [0, 0, 1, 1], [], []>} : vector<256x128xbf16>, vector<128x128xbf16>, vector<256x128xf32> -> vector<256x128xf32>
      %101 = arith.addf %92, %100 : vector<256x128xf32>
      %c79 = arith.constant 79 : index
      %c0_72 = arith.constant 0 : index
      %102 = vector.load %arg5[%c79, %c0_72] : memref<608x128xbf16, #tpu.memory_space<vmem>>, vector<256x128xbf16>
      %c9_i32_73 = arith.constant 9 : i32
      %103 = arith.muli %arg6, %c9_i32_73 : i32
      %c6_i32 = arith.constant 6 : i32
      %104 = arith.addi %103, %c6_i32 : i32
      %c0_i32_74 = arith.constant 0 : i32
      %105 = arith.addi %104, %c0_i32_74 : i32
      %106 = arith.index_cast %105 : i32 to index
      %c0_75 = arith.constant 0 : index
      %c0_76 = arith.constant 0 : index
      %107 = vector.load %arg2[%106, %c0_75, %c0_76] : memref<18x128x128xbf16, #tpu.memory_space<vmem>>, vector<1x128x128xbf16>
      %108 = vector.shape_cast %107 : vector<1x128x128xbf16> to vector<128x128xbf16>
      %cst_77 = arith.constant dense<0.000000e+00> : vector<256x128xf32>
      %109 = tpu.matmul %102, %108, %cst_77 {dimension_numbers = #tpu.dot_dimension_numbers<[1], [0], [0], [1], [0, 0, 1, 1], [], []>} : vector<256x128xbf16>, vector<128x128xbf16>, vector<256x128xf32> -> vector<256x128xf32>
      %110 = arith.addf %101, %109 : vector<256x128xf32>
      %c80 = arith.constant 80 : index
      %c0_78 = arith.constant 0 : index
      %111 = vector.load %arg5[%c80, %c0_78] : memref<608x128xbf16, #tpu.memory_space<vmem>>, vector<256x128xbf16>
      %c9_i32_79 = arith.constant 9 : i32
      %112 = arith.muli %arg6, %c9_i32_79 : i32
      %c6_i32_80 = arith.constant 6 : i32
      %113 = arith.addi %112, %c6_i32_80 : i32
      %c1_i32_81 = arith.constant 1 : i32
      %114 = arith.addi %113, %c1_i32_81 : i32
      %115 = arith.index_cast %114 : i32 to index
      %c0_82 = arith.constant 0 : index
      %c0_83 = arith.constant 0 : index
      %116 = vector.load %arg2[%115, %c0_82, %c0_83] : memref<18x128x128xbf16, #tpu.memory_space<vmem>>, vector<1x128x128xbf16>
      %117 = vector.shape_cast %116 : vector<1x128x128xbf16> to vector<128x128xbf16>
      %cst_84 = arith.constant dense<0.000000e+00> : vector<256x128xf32>
      %118 = tpu.matmul %111, %117, %cst_84 {dimension_numbers = #tpu.dot_dimension_numbers<[1], [0], [0], [1], [0, 0, 1, 1], [], []>} : vector<256x128xbf16>, vector<128x128xbf16>, vector<256x128xf32> -> vector<256x128xf32>
      %119 = arith.addf %110, %118 : vector<256x128xf32>
      %c81 = arith.constant 81 : index
      %c0_85 = arith.constant 0 : index
      %120 = vector.load %arg5[%c81, %c0_85] : memref<608x128xbf16, #tpu.memory_space<vmem>>, vector<256x128xbf16>
      %c9_i32_86 = arith.constant 9 : i32
      %121 = arith.muli %arg6, %c9_i32_86 : i32
      %c6_i32_87 = arith.constant 6 : i32
      %122 = arith.addi %121, %c6_i32_87 : i32
      %c2_i32_88 = arith.constant 2 : i32
      %123 = arith.addi %122, %c2_i32_88 : i32
      %124 = arith.index_cast %123 : i32 to index
      %c0_89 = arith.constant 0 : index
      %c0_90 = arith.constant 0 : index
      %125 = vector.load %arg2[%124, %c0_89, %c0_90] : memref<18x128x128xbf16, #tpu.memory_space<vmem>>, vector<1x128x128xbf16>
      %126 = vector.shape_cast %125 : vector<1x128x128xbf16> to vector<128x128xbf16>
      %cst_91 = arith.constant dense<0.000000e+00> : vector<256x128xf32>
      %127 = tpu.matmul %120, %126, %cst_91 {dimension_numbers = #tpu.dot_dimension_numbers<[1], [0], [0], [1], [0, 0, 1, 1], [], []>} : vector<256x128xbf16>, vector<128x128xbf16>, vector<256x128xf32> -> vector<256x128xf32>
      %128 = arith.addf %119, %127 : vector<256x128xf32>
      %cst_92 = arith.constant 0.000000e+00 : f32
      %129 = vector.broadcast %cst_92 : f32 to vector<256x128xf32>
      %130 = arith.maximumf %128, %129 : vector<256x128xf32>
      %131 = arith.truncf %130 : vector<256x128xf32> to vector<256x128xbf16>
      %132 = arith.index_cast %arg6 : i32 to index
      %c0_93 = arith.constant 0 : index
      %c0_94 = arith.constant 0 : index
      %133 = vector.load %arg3[%132, %c0_93, %c0_94] : memref<2x128x128xbf16, #tpu.memory_space<vmem>>, vector<1x128x128xbf16>
      %134 = vector.shape_cast %133 : vector<1x128x128xbf16> to vector<128x128xbf16>
      %cst_95 = arith.constant dense<0.000000e+00> : vector<256x128xf32>
      %135 = tpu.matmul %131, %134, %cst_95 {dimension_numbers = #tpu.dot_dimension_numbers<[1], [0], [0], [1], [0, 0, 1, 1], [], []>} : vector<256x128xbf16>, vector<128x128xbf16>, vector<256x128xf32> -> vector<256x128xf32>
      %136 = arith.addf %46, %135 : vector<256x128xf32>
      %137 = vector.shape_cast %30 : vector<256x1xi1> to vector<256x1xi1>
      %138 = vector.broadcast %137 : vector<256x1xi1> to vector<256x128xi1>
      %139 = arith.select %138, %136, %46 : vector<256x128xi1>, vector<256x128xf32>
      %c0_96 = arith.constant 0 : index
      %c32_97 = arith.constant 32 : index
      %c0_98 = arith.constant 0 : index
      %140 = vector.load %arg4[%c0_96, %c32_97, %c0_98] : memref<1x576x128xf32, #tpu.memory_space<vmem>>, vector<1x256x128xf32>
      %141 = vector.shape_cast %140 : vector<1x256x128xf32> to vector<256x128xf32>
      %142 = vector.shape_cast %139 : vector<256x128xf32> to vector<1x256x128xf32>
      tpu.vector_store %arg4[%c0_96, %c32_97, %c0_98], %142 {strides = array<i32>} : memref<1x576x128xf32, #tpu.memory_space<vmem>>, vector<1x256x128xf32>,
      %c0_99 = arith.constant 0 : index
      %c288 = arith.constant 288 : index
      %c0_100 = arith.constant 0 : index
      %143 = vector.load %arg4[%c0_99, %c288, %c0_100] : memref<1x576x128xf32, #tpu.memory_space<vmem>>, vector<1x256x128xf32>
      %144 = vector.shape_cast %143 : vector<1x256x128xf32> to vector<256x128xf32>
      %cst_101 = arith.constant 0.000000e+00 : f32
      %145 = vector.broadcast %cst_101 : f32 to vector<256x128xf32>
      %c271 = arith.constant 271 : index
      %c0_102 = arith.constant 0 : index
      %146 = vector.load %arg5[%c271, %c0_102] : memref<608x128xbf16, #tpu.memory_space<vmem>>, vector<256x128xbf16>
      %c9_i32_103 = arith.constant 9 : i32
      %147 = arith.muli %arg6, %c9_i32_103 : i32
      %c0_i32_104 = arith.constant 0 : i32
      %148 = arith.addi %147, %c0_i32_104 : i32
      %c0_i32_105 = arith.constant 0 : i32
      %149 = arith.addi %148, %c0_i32_105 : i32
      %150 = arith.index_cast %149 : i32 to index
      %c0_106 = arith.constant 0 : index
      %c0_107 = arith.constant 0 : index
      %151 = vector.load %arg2[%150, %c0_106, %c0_107] : memref<18x128x128xbf16, #tpu.memory_space<vmem>>, vector<1x128x128xbf16>
      %152 = vector.shape_cast %151 : vector<1x128x128xbf16> to vector<128x128xbf16>
      %cst_108 = arith.constant dense<0.000000e+00> : vector<256x128xf32>
      %153 = tpu.matmul %146, %152, %cst_108 {dimension_numbers = #tpu.dot_dimension_numbers<[1], [0], [0], [1], [0, 0, 1, 1], [], []>} : vector<256x128xbf16>, vector<128x128xbf16>, vector<256x128xf32> -> vector<256x128xf32>
      %154 = arith.addf %145, %153 : vector<256x128xf32>
      %c272 = arith.constant 272 : index
      %c0_109 = arith.constant 0 : index
      %155 = vector.load %arg5[%c272, %c0_109] : memref<608x128xbf16, #tpu.memory_space<vmem>>, vector<256x128xbf16>
      %c9_i32_110 = arith.constant 9 : i32
      %156 = arith.muli %arg6, %c9_i32_110 : i32
      %c0_i32_111 = arith.constant 0 : i32
      %157 = arith.addi %156, %c0_i32_111 : i32
      %c1_i32_112 = arith.constant 1 : i32
      %158 = arith.addi %157, %c1_i32_112 : i32
      %159 = arith.index_cast %158 : i32 to index
      %c0_113 = arith.constant 0 : index
      %c0_114 = arith.constant 0 : index
      %160 = vector.load %arg2[%159, %c0_113, %c0_114] : memref<18x128x128xbf16, #tpu.memory_space<vmem>>, vector<1x128x128xbf16>
      %161 = vector.shape_cast %160 : vector<1x128x128xbf16> to vector<128x128xbf16>
      %cst_115 = arith.constant dense<0.000000e+00> : vector<256x128xf32>
      %162 = tpu.matmul %155, %161, %cst_115 {dimension_numbers = #tpu.dot_dimension_numbers<[1], [0], [0], [1], [0, 0, 1, 1], [], []>} : vector<256x128xbf16>, vector<128x128xbf16>, vector<256x128xf32> -> vector<256x128xf32>
      %163 = arith.addf %154, %162 : vector<256x128xf32>
      %c273 = arith.constant 273 : index
      %c0_116 = arith.constant 0 : index
      %164 = vector.load %arg5[%c273, %c0_116] : memref<608x128xbf16, #tpu.memory_space<vmem>>, vector<256x128xbf16>
      %c9_i32_117 = arith.constant 9 : i32
      %165 = arith.muli %arg6, %c9_i32_117 : i32
      %c0_i32_118 = arith.constant 0 : i32
      %166 = arith.addi %165, %c0_i32_118 : i32
      %c2_i32_119 = arith.constant 2 : i32
      %167 = arith.addi %166, %c2_i32_119 : i32
      %168 = arith.index_cast %167 : i32 to index
      %c0_120 = arith.constant 0 : index
      %c0_121 = arith.constant 0 : index
      %169 = vector.load %arg2[%168, %c0_120, %c0_121] : memref<18x128x128xbf16, #tpu.memory_space<vmem>>, vector<1x128x128xbf16>
      %170 = vector.shape_cast %169 : vector<1x128x128xbf16> to vector<128x128xbf16>
      %cst_122 = arith.constant dense<0.000000e+00> : vector<256x128xf32>
      %171 = tpu.matmul %164, %170, %cst_122 {dimension_numbers = #tpu.dot_dimension_numbers<[1], [0], [0], [1], [0, 0, 1, 1], [], []>} : vector<256x128xbf16>, vector<128x128xbf16>, vector<256x128xf32> -> vector<256x128xf32>
      %172 = arith.addf %163, %171 : vector<256x128xf32>
      %c303 = arith.constant 303 : index
      %c0_123 = arith.constant 0 : index
      %173 = vector.load %arg5[%c303, %c0_123] : memref<608x128xbf16, #tpu.memory_space<vmem>>, vector<256x128xbf16>
      %c9_i32_124 = arith.constant 9 : i32
      %174 = arith.muli %arg6, %c9_i32_124 : i32
      %c3_i32_125 = arith.constant 3 : i32
      %175 = arith.addi %174, %c3_i32_125 : i32
      %c0_i32_126 = arith.constant 0 : i32
      %176 = arith.addi %175, %c0_i32_126 : i32
      %177 = arith.index_cast %176 : i32 to index
      %c0_127 = arith.constant 0 : index
      %c0_128 = arith.constant 0 : index
      %178 = vector.load %arg2[%177, %c0_127, %c0_128] : memref<18x128x128xbf16, #tpu.memory_space<vmem>>, vector<1x128x128xbf16>
      %179 = vector.shape_cast %178 : vector<1x128x128xbf16> to vector<128x128xbf16>
      %cst_129 = arith.constant dense<0.000000e+00> : vector<256x128xf32>
      %180 = tpu.matmul %173, %179, %cst_129 {dimension_numbers = #tpu.dot_dimension_numbers<[1], [0], [0], [1], [0, 0, 1, 1], [], []>} : vector<256x128xbf16>, vector<128x128xbf16>, vector<256x128xf32> -> vector<256x128xf32>
      %181 = arith.addf %172, %180 : vector<256x128xf32>
      %c304 = arith.constant 304 : index
      %c0_130 = arith.constant 0 : index
      %182 = vector.load %arg5[%c304, %c0_130] : memref<608x128xbf16, #tpu.memory_space<vmem>>, vector<256x128xbf16>
      %c9_i32_131 = arith.constant 9 : i32
      %183 = arith.muli %arg6, %c9_i32_131 : i32
      %c3_i32_132 = arith.constant 3 : i32
      %184 = arith.addi %183, %c3_i32_132 : i32
      %c1_i32_133 = arith.constant 1 : i32
      %185 = arith.addi %184, %c1_i32_133 : i32
      %186 = arith.index_cast %185 : i32 to index
      %c0_134 = arith.constant 0 : index
      %c0_135 = arith.constant 0 : index
      %187 = vector.load %arg2[%186, %c0_134, %c0_135] : memref<18x128x128xbf16, #tpu.memory_space<vmem>>, vector<1x128x128xbf16>
      %188 = vector.shape_cast %187 : vector<1x128x128xbf16> to vector<128x128xbf16>
      %cst_136 = arith.constant dense<0.000000e+00> : vector<256x128xf32>
      %189 = tpu.matmul %182, %188, %cst_136 {dimension_numbers = #tpu.dot_dimension_numbers<[1], [0], [0], [1], [0, 0, 1, 1], [], []>} : vector<256x128xbf16>, vector<128x128xbf16>, vector<256x128xf32> -> vector<256x128xf32>
      %190 = arith.addf %181, %189 : vector<256x128xf32>
      %c305 = arith.constant 305 : index
      %c0_137 = arith.constant 0 : index
      %191 = vector.load %arg5[%c305, %c0_137] : memref<608x128xbf16, #tpu.memory_space<vmem>>, vector<256x128xbf16>
      %c9_i32_138 = arith.constant 9 : i32
      %192 = arith.muli %arg6, %c9_i32_138 : i32
      %c3_i32_139 = arith.constant 3 : i32
      %193 = arith.addi %192, %c3_i32_139 : i32
      %c2_i32_140 = arith.constant 2 : i32
      %194 = arith.addi %193, %c2_i32_140 : i32
      %195 = arith.index_cast %194 : i32 to index
      %c0_141 = arith.constant 0 : index
      %c0_142 = arith.constant 0 : index
      %196 = vector.load %arg2[%195, %c0_141, %c0_142] : memref<18x128x128xbf16, #tpu.memory_space<vmem>>, vector<1x128x128xbf16>
      %197 = vector.shape_cast %196 : vector<1x128x128xbf16> to vector<128x128xbf16>
      %cst_143 = arith.constant dense<0.000000e+00> : vector<256x128xf32>
      %198 = tpu.matmul %191, %197, %cst_143 {dimension_numbers = #tpu.dot_dimension_numbers<[1], [0], [0], [1], [0, 0, 1, 1], [], []>} : vector<256x128xbf16>, vector<128x128xbf16>, vector<256x128xf32> -> vector<256x128xf32>
      %199 = arith.addf %190, %198 : vector<256x128xf32>
      %c335 = arith.constant 335 : index
      %c0_144 = arith.constant 0 : index
      %200 = vector.load %arg5[%c335, %c0_144] : memref<608x128xbf16, #tpu.memory_space<vmem>>, vector<256x128xbf16>
      %c9_i32_145 = arith.constant 9 : i32
      %201 = arith.muli %arg6, %c9_i32_145 : i32
      %c6_i32_146 = arith.constant 6 : i32
      %202 = arith.addi %201, %c6_i32_146 : i32
      %c0_i32_147 = arith.constant 0 : i32
      %203 = arith.addi %202, %c0_i32_147 : i32
      %204 = arith.index_cast %203 : i32 to index
      %c0_148 = arith.constant 0 : index
      %c0_149 = arith.constant 0 : index
      %205 = vector.load %arg2[%204, %c0_148, %c0_149] : memref<18x128x128xbf16, #tpu.memory_space<vmem>>, vector<1x128x128xbf16>
      %206 = vector.shape_cast %205 : vector<1x128x128xbf16> to vector<128x128xbf16>
      %cst_150 = arith.constant dense<0.000000e+00> : vector<256x128xf32>
      %207 = tpu.matmul %200, %206, %cst_150 {dimension_numbers = #tpu.dot_dimension_numbers<[1], [0], [0], [1], [0, 0, 1, 1], [], []>} : vector<256x128xbf16>, vector<128x128xbf16>, vector<256x128xf32> -> vector<256x128xf32>
      %208 = arith.addf %199, %207 : vector<256x128xf32>
      %c336 = arith.constant 336 : index
      %c0_151 = arith.constant 0 : index
      %209 = vector.load %arg5[%c336, %c0_151] : memref<608x128xbf16, #tpu.memory_space<vmem>>, vector<256x128xbf16>
      %c9_i32_152 = arith.constant 9 : i32
      %210 = arith.muli %arg6, %c9_i32_152 : i32
      %c6_i32_153 = arith.constant 6 : i32
      %211 = arith.addi %210, %c6_i32_153 : i32
      %c1_i32_154 = arith.constant 1 : i32
      %212 = arith.addi %211, %c1_i32_154 : i32
      %213 = arith.index_cast %212 : i32 to index
      %c0_155 = arith.constant 0 : index
      %c0_156 = arith.constant 0 : index
      %214 = vector.load %arg2[%213, %c0_155, %c0_156] : memref<18x128x128xbf16, #tpu.memory_space<vmem>>, vector<1x128x128xbf16>
      %215 = vector.shape_cast %214 : vector<1x128x128xbf16> to vector<128x128xbf16>
      %cst_157 = arith.constant dense<0.000000e+00> : vector<256x128xf32>
      %216 = tpu.matmul %209, %215, %cst_157 {dimension_numbers = #tpu.dot_dimension_numbers<[1], [0], [0], [1], [0, 0, 1, 1], [], []>} : vector<256x128xbf16>, vector<128x128xbf16>, vector<256x128xf32> -> vector<256x128xf32>
      %217 = arith.addf %208, %216 : vector<256x128xf32>
      %c337 = arith.constant 337 : index
      %c0_158 = arith.constant 0 : index
      %218 = vector.load %arg5[%c337, %c0_158] : memref<608x128xbf16, #tpu.memory_space<vmem>>, vector<256x128xbf16>
      %c9_i32_159 = arith.constant 9 : i32
      %219 = arith.muli %arg6, %c9_i32_159 : i32
      %c6_i32_160 = arith.constant 6 : i32
      %220 = arith.addi %219, %c6_i32_160 : i32
      %c2_i32_161 = arith.constant 2 : i32
      %221 = arith.addi %220, %c2_i32_161 : i32
      %222 = arith.index_cast %221 : i32 to index
      %c0_162 = arith.constant 0 : index
      %c0_163 = arith.constant 0 : index
      %223 = vector.load %arg2[%222, %c0_162, %c0_163] : memref<18x128x128xbf16, #tpu.memory_space<vmem>>, vector<1x128x128xbf16>
      %224 = vector.shape_cast %223 : vector<1x128x128xbf16> to vector<128x128xbf16>
      %cst_164 = arith.constant dense<0.000000e+00> : vector<256x128xf32>
      %225 = tpu.matmul %218, %224, %cst_164 {dimension_numbers = #tpu.dot_dimension_numbers<[1], [0], [0], [1], [0, 0, 1, 1], [], []>} : vector<256x128xbf16>, vector<128x128xbf16>, vector<256x128xf32> -> vector<256x128xf32>
      %226 = arith.addf %217, %225 : vector<256x128xf32>
      %cst_165 = arith.constant 0.000000e+00 : f32
      %227 = vector.broadcast %cst_165 : f32 to vector<256x128xf32>
      %228 = arith.maximumf %226, %227 : vector<256x128xf32>
      %229 = arith.truncf %228 : vector<256x128xf32> to vector<256x128xbf16>
      %230 = arith.index_cast %arg6 : i32 to index
      %c0_166 = arith.constant 0 : index
      %c0_167 = arith.constant 0 : index
      %231 = vector.load %arg3[%230, %c0_166, %c0_167] : memref<2x128x128xbf16, #tpu.memory_space<vmem>>, vector<1x128x128xbf16>
      %232 = vector.shape_cast %231 : vector<1x128x128xbf16> to vector<128x128xbf16>
      %cst_168 = arith.constant dense<0.000000e+00> : vector<256x128xf32>
      %233 = tpu.matmul %229, %232, %cst_168 {dimension_numbers = #tpu.dot_dimension_numbers<[1], [0], [0], [1], [0, 0, 1, 1], [], []>} : vector<256x128xbf16>, vector<128x128xbf16>, vector<256x128xf32> -> vector<256x128xf32>
      %234 = arith.addf %144, %233 : vector<256x128xf32>
      %235 = vector.shape_cast %30 : vector<256x1xi1> to vector<256x1xi1>
      %236 = vector.broadcast %235 : vector<256x1xi1> to vector<256x128xi1>
      %237 = arith.select %236, %234, %144 : vector<256x128xi1>, vector<256x128xf32>
      %c0_169 = arith.constant 0 : index
      %c288_170 = arith.constant 288 : index
      %c0_171 = arith.constant 0 : index
      %238 = vector.load %arg4[%c0_169, %c288_170, %c0_171] : memref<1x576x128xf32, #tpu.memory_space<vmem>>, vector<1x256x128xf32>
      %239 = vector.shape_cast %238 : vector<1x256x128xf32> to vector<256x128xf32>
      %240 = vector.shape_cast %237 : vector<256x128xf32> to vector<1x256x128xf32>
      tpu.vector_store %arg4[%c0_169, %c288_170, %c0_171], %240 {strides = array<i32>} : memref<1x576x128xf32, #tpu.memory_space<vmem>>, vector<1x256x128xf32>,
    }
    %c2_i32_15 = arith.constant 2 : i32
    %c0_16 = arith.constant 0 : index
    %c0_17 = arith.constant 0 : index
    %c0_18 = arith.constant 0 : index
    %32 = vector.load %arg4[%c0_16, %c0_17, %c0_18] : memref<1x576x128xf32, #tpu.memory_space<vmem>>, vector<1x576x128xf32>
    %33 = vector.shape_cast %32 : vector<1x576x128xf32> to vector<576x128xf32>
    %cst_19 = arith.constant 0.000000e+00 : f32
    %34 = vector.broadcast %cst_19 : f32 to vector<576x128xf32>
    %35 = arith.maximumf %33, %34 : vector<576x128xf32>
    %c0_20 = arith.constant 0 : index
    %c0_21 = arith.constant 0 : index
    %c0_22 = arith.constant 0 : index
    %36 = vector.load %arg4[%c0_20, %c0_21, %c0_22] : memref<1x576x128xf32, #tpu.memory_space<vmem>>, vector<1x576x128xf32>
    %37 = vector.shape_cast %36 : vector<1x576x128xf32> to vector<576x128xf32>
    %38 = vector.shape_cast %35 : vector<576x128xf32> to vector<1x576x128xf32>
    tpu.vector_store %arg4[%c0_20, %c0_21, %c0_22], %38 {strides = array<i32>} : memref<1x576x128xf32, #tpu.memory_space<vmem>>, vector<1x576x128xf32>,
    return
  }
  func.func @transform_0(%arg0: i32) -> (i32, i32, i32) {
    %c0_i32 = arith.constant 0 : i32
    %c0_i32_0 = arith.constant 0 : i32
    %c0_i32_1 = arith.constant 0 : i32
    return %arg0, %c0_i32, %c0_i32_0 : i32, i32, i32
  }
  func.func @transform_1(%arg0: i32) -> (i32, i32, i32) {
    %c0_i32 = arith.constant 0 : i32
    %c0_i32_0 = arith.constant 0 : i32
    %c0_i32_1 = arith.constant 0 : i32
    %c0_i32_2 = arith.constant 0 : i32
    return %c0_i32, %c0_i32_0, %c0_i32_1 : i32, i32, i32
  }
  func.func @transform_2(%arg0: i32) -> (i32, i32, i32) {
    %c0_i32 = arith.constant 0 : i32
    %c0_i32_0 = arith.constant 0 : i32
    %c0_i32_1 = arith.constant 0 : i32
    %c0_i32_2 = arith.constant 0 : i32
    return %c0_i32, %c0_i32_0, %c0_i32_1 : i32, i32, i32
  }
  func.func @transform_3(%arg0: i32) -> (i32, i32, i32) {
    %c0_i32 = arith.constant 0 : i32
    %c0_i32_0 = arith.constant 0 : i32
    %c0_i32_1 = arith.constant 0 : i32
    return %arg0, %c0_i32, %c0_i32_0 : i32, i32, i32
  }
}

</mosaic_0001>

<bundles_post_ra>
// kernel: residual_stack_forward.1
= control target key start
LH: loop header
LB: loop body
LE: loop exit
PB: predicated region body
PF: predicated region fallthrough
CT: control target
= control target key end

     0   :  { %s11855_s12 = smov 0   ;;  %s13934_s0 = inlined_call_operand.vmem [shape: f32[2,576,128], index: 0, kind: input, shape index: {}]   ;;  %s13935_s1 = inlined_call_operand.vmem [shape: bf16[18,128,128], index: 1, kind: input, shape index: {}]   ;;  %s13936_s2 = inlined_call_operand.vmem [shape: bf16[2,128,128], index: 2, kind: input, shape index: {}]   ;;  %s13937_s3 = inlined_call_operand.vmem [shape: f32[2,576,128], index: 3, kind: output, shape index: {}]  }
   0x1 LB: > { %s8884_s13 = sadd.s32 4294967295, %s11828_s12   ;;  %p8888_p0 = scmp.ge.s32.totalorder %s11828_s12, 1  ;;  %s11828_s12 = sphi %s11855_s12, %s13_s12  }
   0x2   : > { %p137_p1 = scmp.lt.s32.totalorder %s11828_s12, 3 }
   0x4   : > { %p138_p2 = pnand %p8888_p0, %p137_p1 }
   0x6   : > { %141 = sbr.rel (%p138_p2) target bundleno = 1835 (0x72b), region = 32 }
   0xb   : > { %p161_p3 = scmp.lt.s32.totalorder %s8884_s13, 1  ;;  %v320_v39 = vlaneseq  ;;  %s12081_s21 = smov 0  }
   0xd   : > { %s14120_s13 = smov (!%p161_p3, %s8884_s13), 1  ;;  %v321_v42 = vshrl.u32 %v320_v39, 7 }
   0xe   : > { %s11799_s14 = smul.u32 576, %s14120_s13 }
   0xf   : > { %v323_v45 = vadd.s32 16, %v321_v42  ;;  %v325_v46 = vadd.s32 32, %v321_v42  ;;  %v327_v47 = vadd.s32 48, %v321_v42  ;;  %v329_v48 = vadd.s32 64, %v321_v42 }
  0x10   : > { %s11866_s17 = scalar_lea.vmem %s13934_s0, %s11799_s14  ;;  %s11871_s20 = scalar_lea.vmem %s13937_s3, %s11799_s14  ;;  %v331_v50 = vadd.s32 80, %v321_v42  ;;  %v333_v51 = vadd.s32 96, %v321_v42  ;;  %v335_v52 = vadd.s32 112, %v321_v42  ;;  %v337_v53 = vadd.s32 128, %v321_v42 }
  0x11   : > { %v172_v0 = vld [vmem:[%s11866_s17] sm:$0xff]  ;;  %v173_v1 = vld [vmem:[%s11866_s17 + $0x8] sm:$0xff]  ;;  %v174_v2 = vld [vmem:[%s11866_s17 + $0x10] sm:$0xff]  ;;  %v339_v55 = vadd.s32 144, %v321_v42  ;;  %v341_v56 = vadd.s32 160, %v321_v42  ;;  %v343_v57 = vadd.s32 176, %v321_v42 }
  0x12   : > { %244 = vst [vmem:[%s11871_s20] sm:$0xff] %v172_v0  ;;  %v175_v3 = vld [vmem:[%s11866_s17 + $0x18] sm:$0xff]  ;;  %v176_v4 = vld [vmem:[%s11866_s17 + $0x20] sm:$0xff]  ;;  %v177_v5 = vld [vmem:[%s11866_s17 + $0x28] sm:$0xff]  ;;  %v345_v58 = vadd.s32 192, %v321_v42  ;;  %v347_v60 = vadd.s32 208, %v321_v42  ;;  %v349_v61 = vadd.s32 224, %v321_v42 }
  0x13   : > { %245 = vst [vmem:[%s11871_s20 + $0x8] sm:$0xff] %v173_v1  ;;  %v178_v6 = vld [vmem:[%s11866_s17 + $0x30] sm:$0xff]  ;;  %v179_v7 = vld [vmem:[%s11866_s17 + $0x38] sm:$0xff]  ;;  %v180_v8 = vld [vmem:[%s11866_s17 + $0x40] sm:$0xff]  ;;  %v351_v62 = vadd.s32 240, %v321_v42  ;;  %v357_v63 = vand.u32 31, %v321_v42 }
  0x14   : > { %246 = vst [vmem:[%s11871_s20 + $0x10] sm:$0xff] %v174_v2  ;;  %v181_v9 = vld [vmem:[%s11866_s17 + $0x48] sm:$0xff]  ;;  %v182_v10 = vld [vmem:[%s11866_s17 + $0x50] sm:$0xff]  ;;  %v183_v11 = vld [vmem:[%s11866_s17 + $0x58] sm:$0xff]  ;;  %v371_v1 = vand.u32 31, %v323_v45  ;;  %v385_v2 = vand.u32 31, %v325_v46 }
  0x15   : > { %247 = vst [vmem:[%s11871_s20 + $0x18] sm:$0xff] %v175_v3  ;;  %v184_v12 = vld [vmem:[%s11866_s17 + $0x60] sm:$0xff]  ;;  %v185_v13 = vld [vmem:[%s11866_s17 + $0x68] sm:$0xff]  ;;  %v186_v14 = vld [vmem:[%s11866_s17 + $0x70] sm:$0xff]  ;;  %v399_v3 = vand.u32 31, %v327_v47  ;;  %vm11970_vm0 = vcmp.ge.s32.totalorder %v357_v63, 1 }
  0x16   : > { %248 = vst [vmem:[%s11871_s20 + $0x20] sm:$0xff] %v176_v4  ;;  %v187_v15 = vld [vmem:[%s11866_s17 + $0x78] sm:$0xff]  ;;  %v188_v16 = vld [vmem:[%s11866_s17 + $0x80] sm:$0xff]  ;;  %v189_v17 = vld [vmem:[%s11866_s17 + $0x88] sm:$0xff]  ;;  %v413_v4 = vand.u32 31, %v329_v48  ;;  %vm11976_vm1 = vcmp.ge.s32.totalorder %v385_v2, 1 }
  0x17   : > { %249 = vst [vmem:[%s11871_s20 + $0x28] sm:$0xff] %v177_v5  ;;  %v190_v18 = vld [vmem:[%s11866_s17 + $0x90] sm:$0xff]  ;;  %v191_v19 = vld [vmem:[%s11866_s17 + $0x98] sm:$0xff]  ;;  %v192_v20 = vld [vmem:[%s11866_s17 + $0xa0] sm:$0xff]  ;;  %vm12006_vm8 = vcmp.le.s32.totalorder %v371_v1, 16  ;;  %vm12012_vm9 = vcmp.le.s32.totalorder %v399_v3, 16 }
  0x18   : > { %250 = vst [vmem:[%s11871_s20 + $0x30] sm:$0xff] %v178_v6  ;;  %v193_v21 = vld [vmem:[%s11866_s17 + $0xa8] sm:$0xff]  ;;  %v194_v22 = vld [vmem:[%s11866_s17 + $0xb0] sm:$0xff]  ;;  %v195_v23 = vld [vmem:[%s11866_s17 + $0xb8] sm:$0xff]  ;;  %v427_v6 = vand.u32 31, %v331_v50  ;;  %vm11980_vm2 = vcmp.ge.s32.totalorder %v413_v4, 1 }
  0x19   : > { %251 = vst [vmem:[%s11871_s20 + $0x38] sm:$0xff] %v179_v7  ;;  %v196_v24 = vld [vmem:[%s11866_s17 + $0xc0] sm:$0xff]  ;;  %v197_v25 = vld [vmem:[%s11866_s17 + $0xc8] sm:$0xff]  ;;  %v198_v26 = vld [vmem:[%s11866_s17 + $0xd0] sm:$0xff]  ;;  %v441_v7 = vand.u32 31, %v333_v51 }
  0x1a   : > { %252 = vst [vmem:[%s11871_s20 + $0x40] sm:$0xff] %v180_v8  ;;  %v199_v27 = vld [vmem:[%s11866_s17 + $0xd8] sm:$0xff]  ;;  %v200_v28 = vld [vmem:[%s11866_s17 + $0xe0] sm:$0xff]  ;;  %v201_v29 = vld [vmem:[%s11866_s17 + $0xe8] sm:$0xff]  ;;  %v455_v8 = vand.u32 31, %v335_v52  ;;  %vm12016_vm10 = vcmp.le.s32.totalorder %v427_v6, 16 }
  0x1b   : > { %253 = vst [vmem:[%s11871_s20 + $0x48] sm:$0xff] %v181_v9  ;;  %v202_v30 = vld [vmem:[%s11866_s17 + $0xf0] sm:$0xff]  ;;  %v203_v31 = vld [vmem:[%s11866_s17 + $0xf8] sm:$0xff]  ;;  %v204_v32 = vld [vmem:[%s11866_s17 + $0x100] sm:$0xff]  ;;  %v469_v9 = vand.u32 31, %v337_v53  ;;  %vm11984_vm3 = vcmp.ge.s32.totalorder %v441_v7, 1 }
  0x1c   : > { %254 = vst [vmem:[%s11871_s20 + $0x50] sm:$0xff] %v182_v10  ;;  %v205_v33 = vld [vmem:[%s11866_s17 + $0x108] sm:$0xff]  ;;  %v206_v34 = vld [vmem:[%s11866_s17 + $0x110] sm:$0xff]  ;;  %v207_v35 = vld [vmem:[%s11866_s17 + $0x118] sm:$0xff]  ;;  %vm12020_vm11 = vcmp.le.s32.totalorder %v455_v8, 16 }
  0x1d   : > { %255 = vst [vmem:[%s11871_s20 + $0x58] sm:$0xff] %v183_v11  ;;  %v208_v36 = vld [vmem:[%s11866_s17 + $0x120] sm:$0xff]  ;;  %v209_v37 = vld [vmem:[%s11866_s17 + $0x128] sm:$0xff]  ;;  %v210_v38 = vld [vmem:[%s11866_s17 + $0x130] sm:$0xff]  ;;  %v483_v11 = vand.u32 31, %v339_v55  ;;  %vm11988_vm4 = vcmp.ge.s32.totalorder %v469_v9, 1 }
  0x1e   : > { %256 = vst [vmem:[%s11871_s20 + $0x60] sm:$0xff] %v184_v12  ;;  %v211_v40 = vld [vmem:[%s11866_s17 + $0x138] sm:$0xff]  ;;  %v212_v41 = vld [vmem:[%s11866_s17 + $0x140] sm:$0xff]  ;;  %v213_v43 = vld [vmem:[%s11866_s17 + $0x148] sm:$0xff]  ;;  %v497_v12 = vand.u32 31, %v341_v56 }
  0x1f   : > { %257 = vst [vmem:[%s11871_s20 + $0x68] sm:$0xff] %v185_v13  ;;  %v214_v44 = vld [vmem:[%s11866_s17 + $0x150] sm:$0xff]  ;;  %v215_v49 = vld [vmem:[%s11866_s17 + $0x158] sm:$0xff]  ;;  %v216_v54 = vld [vmem:[%s11866_s17 + $0x160] sm:$0xff]  ;;  %v511_v13 = vand.u32 31, %v343_v57  ;;  %vm12024_vm12 = vcmp.le.s32.totalorder %v483_v11, 16 }
  0x20   : > { %258 = vst [vmem:[%s11871_s20 + $0x70] sm:$0xff] %v186_v14  ;;  %v217_v59 = vld [vmem:[%s11866_s17 + $0x168] sm:$0xff]  ;;  %v218_v0 = vld [vmem:[%s11866_s17 + $0x170] sm:$0xff]  ;;  %v219_v5 = vld [vmem:[%s11866_s17 + $0x178] sm:$0xff]  ;;  %v525_v14 = vand.u32 31, %v345_v58  ;;  %vm11994_vm5 = vcmp.ge.s32.totalorder %v497_v12, 1 }
  0x21   : > { %259 = vst [vmem:[%s11871_s20 + $0x78] sm:$0xff] %v187_v15  ;;  %v220_v10 = vld [vmem:[%s11866_s17 + $0x180] sm:$0xff]  ;;  %v221_v15 = vld [vmem:[%s11866_s17 + $0x188] sm:$0xff]  ;;  %vm12030_vm13 = vcmp.le.s32.totalorder %v511_v13, 16  ;;  %v226_v39 = vld [vmem:[%s11866_s17 + $0x1b0] sm:$0xff]  ;;  %v11834_v57 = vmov 0  }
  0x22   : > { %260 = vst [vmem:[%s11871_s20 + $0x80] sm:$0xff] %v188_v16  ;;  %v539_v16 = vand.u32 31, %v347_v60  ;;  %vm11998_vm6 = vcmp.ge.s32.totalorder %v525_v14, 1  ;;  %v229_v42 = vld [vmem:[%s11866_s17 + $0x1c8] sm:$0xff]  ;;  %v232_v45 = vld [vmem:[%s11866_s17 + $0x1e0] sm:$0xff]  ;;  %v234_v47 = vld [vmem:[%s11866_s17 + $0x1f0] sm:$0xff] }
  0x23   : > { %261 = vst [vmem:[%s11871_s20 + $0x88] sm:$0xff] %v189_v17  ;;  %v553_v17 = vand.u32 31, %v349_v61  ;;  %v233_v46 = vld [vmem:[%s11866_s17 + $0x1e8] sm:$0xff]  ;;  %v235_v48 = vld [vmem:[%s11866_s17 + $0x1f8] sm:$0xff]  ;;  %v238_v51 = vld [vmem:[%s11866_s17 + $0x210] sm:$0xff] }
  0x24   : > { %262 = vst [vmem:[%s11871_s20 + $0x90] sm:$0xff] %v190_v18  ;;  %v567_v18 = vand.u32 31, %v351_v62  ;;  %vm12034_vm14 = vcmp.le.s32.totalorder %v539_v16, 16  ;;  %v237_v50 = vld [vmem:[%s11866_s17 + $0x208] sm:$0xff]  ;;  %v239_v52 = vld [vmem:[%s11866_s17 + $0x218] sm:$0xff]  ;;  %v240_v53 = vld [vmem:[%s11866_s17 + $0x220] sm:$0xff] }
  0x25   : > { %263 = vst [vmem:[%s11871_s20 + $0x98] sm:$0xff] %v191_v19  ;;  %v13972_v19 = vmov 0  ;;  %vm12002_vm7 = vcmp.ge.s32.totalorder %v553_v17, 1  ;;  %v242_v55 = vld [vmem:[%s11866_s17 + $0x230] sm:$0xff]  ;;  %v243_v56 = vld [vmem:[%s11866_s17 + $0x238] sm:$0xff] }
  0x26   : > { %264 = vst [vmem:[%s11871_s20 + $0xa0] sm:$0xff] %v192_v20  ;;  %v13973_v19 = vsel %vm11970_vm0, 4294967295, %v13972_v19  ;;  %v222_v20 = vld [vmem:[%s11866_s17 + $0x190] sm:$0xff]  ;;  %vm12038_vm15 = vcmp.le.s32.totalorder %v567_v18, 16 }
  0x27   : > { %265 = vst [vmem:[%s11871_s20 + $0xa8] sm:$0xff] %v193_v21  ;;  %v13975_v21 = vmov 0 }
  0x28   : > { %266 = vst [vmem:[%s11871_s20 + $0xb0] sm:$0xff] %v194_v22  ;;  %v13976_v21 = vsel %vm11976_vm1, 4294967295, %v13975_v21  ;;  %v13978_v22 = vmov 0 }
  0x29   : > { %267 = vst [vmem:[%s11871_s20 + $0xb8] sm:$0xff] %v195_v23  ;;  %v13979_v22 = vsel %vm11980_vm2, 4294967295, %v13978_v22  ;;  %v13981_v23 = vmov 0 }
  0x2a   : > { %268 = vst [vmem:[%s11871_s20 + $0xc0] sm:$0xff] %v196_v24  ;;  %v13982_v23 = vsel %vm11984_vm3, 4294967295, %v13981_v23  ;;  %v13984_v24 = vmov 0 }
  0x2b   : > { %269 = vst [vmem:[%s11871_s20 + $0xc8] sm:$0xff] %v197_v25  ;;  %v13985_v24 = vsel %vm11988_vm4, 4294967295, %v13984_v24  ;;  %v223_v25 = vld [vmem:[%s11866_s17 + $0x198] sm:$0xff] }
  0x2c   : > { %270 = vst [vmem:[%s11871_s20 + $0xd0] sm:$0xff] %v198_v26  ;;  %v13987_v26 = vmov 0 }
  0x2d   : > { %271 = vst [vmem:[%s11871_s20 + $0xd8] sm:$0xff] %v199_v27  ;;  %v13988_v26 = vsel %vm11994_vm5, 4294967295, %v13987_v26  ;;  %v13990_v27 = vmov 0 }
  0x2e   : > { %272 = vst [vmem:[%s11871_s20 + $0xe0] sm:$0xff] %v200_v28  ;;  %v13991_v27 = vsel %vm11998_vm6, 4294967295, %v13990_v27  ;;  %v13993_v28 = vmov 0 }
  0x2f   : > { %273 = vst [vmem:[%s11871_s20 + $0xe8] sm:$0xff] %v201_v29  ;;  %v13994_v28 = vsel %vm12002_vm7, 4294967295, %v13993_v28  ;;  %v13996_v29 = vmov 0 }
  0x30   : > { %274 = vst [vmem:[%s11871_s20 + $0xf0] sm:$0xff] %v202_v30  ;;  %v13997_v29 = vsel %vm12006_vm8, 4294967295, %v13996_v29  ;;  %v224_v30 = vld [vmem:[%s11866_s17 + $0x1a0] sm:$0xff] }
  0x31   : > { %275 = vst [vmem:[%s11871_s20 + $0xf8] sm:$0xff] %v203_v31  ;;  %v13999_v31 = vmov 0 }
  0x32   : > { %276 = vst [vmem:[%s11871_s20 + $0x100] sm:$0xff] %v204_v32  ;;  %v14000_v31 = vsel %vm12012_vm9, 4294967295, %v13999_v31  ;;  %v14002_v32 = vmov 0 }
  0x33   : > { %277 = vst [vmem:[%s11871_s20 + $0x108] sm:$0xff] %v205_v33  ;;  %v14003_v32 = vsel %vm12016_vm10, 4294967295, %v14002_v32  ;;  %v14005_v33 = vmov 0 }
  0x34   : > { %278 = vst [vmem:[%s11871_s20 + $0x110] sm:$0xff] %v206_v34  ;;  %v14006_v33 = vsel %vm12020_vm11, 4294967295, %v14005_v33  ;;  %v14008_v34 = vmov 0 }
  0x35   : > { %279 = vst [vmem:[%s11871_s20 + $0x118] sm:$0xff] %v207_v35  ;;  %v14009_v34 = vsel %vm12024_vm12, 4294967295, %v14008_v34  ;;  %v225_v35 = vld [vmem:[%s11866_s17 + $0x1a8] sm:$0xff] }
  0x36   : > { %280 = vst [vmem:[%s11871_s20 + $0x120] sm:$0xff] %v208_v36  ;;  %v14011_v36 = vmov 0 }
  0x37   : > { %281 = vst [vmem:[%s11871_s20 + $0x128] sm:$0xff] %v209_v37  ;;  %v14012_v36 = vsel %vm12030_vm13, 4294967295, %v14011_v36  ;;  %v14014_v37 = vmov 0 }
  0x38   : > { %282 = vst [vmem:[%s11871_s20 + $0x130] sm:$0xff] %v210_v38  ;;  %v14015_v37 = vsel %vm12034_vm14, 4294967295, %v14014_v37  ;;  %v14017_v38 = vmov 0 }
  0x39   : > { %283 = vst [vmem:[%s11871_s20 + $0x138] sm:$0xff] %v211_v40  ;;  %v14018_v38 = vsel %vm12038_vm15, 4294967295, %v14017_v38  ;;  %v227_v40 = vld [vmem:[%s11866_s17 + $0x1b8] sm:$0xff] }
  0x3a   : > { %284 = vst [vmem:[%s11871_s20 + $0x140] sm:$0xff] %v212_v41  ;;  %v228_v41 = vld [vmem:[%s11866_s17 + $0x1c0] sm:$0xff] }
  0x3b   : > { %285 = vst [vmem:[%s11871_s20 + $0x148] sm:$0xff] %v213_v43  ;;  %v230_v43 = vld [vmem:[%s11866_s17 + $0x1d0] sm:$0xff] }
  0x3c   : > { %286 = vst [vmem:[%s11871_s20 + $0x150] sm:$0xff] %v214_v44  ;;  %v231_v44 = vld [vmem:[%s11866_s17 + $0x1d8] sm:$0xff] }
  0x3d   : > { %287 = vst [vmem:[%s11871_s20 + $0x158] sm:$0xff] %v215_v49  ;;  %v236_v49 = vld [vmem:[%s11866_s17 + $0x200] sm:$0xff] }
  0x3e   : > { %288 = vst [vmem:[%s11871_s20 + $0x160] sm:$0xff] %v216_v54  ;;  %v241_v54 = vld [vmem:[%s11866_s17 + $0x228] sm:$0xff] }
  0x3f   : > { %289 = vst [vmem:[%s11871_s20 + $0x168] sm:$0xff] %v217_v59 }
  0x40   : > { %290 = vst [vmem:[%s11871_s20 + $0x170] sm:$0xff] %v218_v0 }
  0x41   : > { %13974 = vst [vmem:[#allocation3_spill] sm:$0xff] %v13973_v19 }
  0x42   : > { %291 = vst [vmem:[%s11871_s20 + $0x178] sm:$0xff] %v219_v5 }
  0x43   : > { %13977 = vst [vmem:[#allocation4_spill] sm:$0xff] %v13976_v21 }
  0x44   : > { %13980 = vst [vmem:[#allocation5_spill] sm:$0xff] %v13979_v22 }
  0x45   : > { %13983 = vst [vmem:[#allocation6_spill] sm:$0xff] %v13982_v23 }
  0x46   : > { %13986 = vst [vmem:[#allocation7_spill] sm:$0xff] %v13985_v24 }
  0x47   : > { %292 = vst [vmem:[%s11871_s20 + $0x180] sm:$0xff] %v220_v10 }
  0x48   : > { %13989 = vst [vmem:[#allocation8_spill] sm:$0xff] %v13988_v26 }
  0x49   : > { %13992 = vst [vmem:[#allocation9_spill] sm:$0xff] %v13991_v27 }
  0x4a   : > { %13995 = vst [vmem:[#allocation10_spill] sm:$0xff] %v13994_v28 }
  0x4b   : > { %13998 = vst [vmem:[#allocation11_spill] sm:$0xff] %v13997_v29 }
  0x4c   : > { %293 = vst [vmem:[%s11871_s20 + $0x188] sm:$0xff] %v221_v15 }
  0x4d   : > { %14001 = vst [vmem:[#allocation12_spill] sm:$0xff] %v14000_v31 }
  0x4e   : > { %14004 = vst [vmem:[#allocation13_spill] sm:$0xff] %v14003_v32 }
  0x4f   : > { %14007 = vst [vmem:[#allocation14_spill] sm:$0xff] %v14006_v33 }
  0x50   : > { %14010 = vst [vmem:[#allocation15_spill] sm:$0xff] %v14009_v34 }
  0x51   : > { %294 = vst [vmem:[%s11871_s20 + $0x190] sm:$0xff] %v222_v20 }
  0x52   : > { %14013 = vst [vmem:[#allocation16_spill] sm:$0xff] %v14012_v36 }
  0x53   : > { %14016 = vst [vmem:[#allocation17_spill] sm:$0xff] %v14015_v37 }
  0x54   : > { %14019 = vst [vmem:[#allocation18_spill] sm:$0xff] %v14018_v38 }
  0x55   : > { %295 = vst [vmem:[%s11871_s20 + $0x198] sm:$0xff] %v223_v25 }
  0x56   : > { %296 = vst [vmem:[%s11871_s20 + $0x1a0] sm:$0xff] %v224_v30 }
  0x57   : > { %297 = vst [vmem:[%s11871_s20 + $0x1a8] sm:$0xff] %v225_v35 }
  0x58   : > { %298 = vst [vmem:[%s11871_s20 + $0x1b0] sm:$0xff] %v226_v39 }
  0x59   : > { %299 = vst [vmem:[%s11871_s20 + $0x1b8] sm:$0xff] %v227_v40 }
  0x5a   : > { %300 = vst [vmem:[%s11871_s20 + $0x1c0] sm:$0xff] %v228_v41 }
  0x5b   : > { %301 = vst [vmem:[%s11871_s20 + $0x1c8] sm:$0xff] %v229_v42 }
  0x5c   : > { %302 = vst [vmem:[%s11871_s20 + $0x1d0] sm:$0xff] %v230_v43 }
  0x5d   : > { %303 = vst [vmem:[%s11871_s20 + $0x1d8] sm:$0xff] %v231_v44 }
  0x5e   : > { %304 = vst [vmem:[%s11871_s20 + $0x1e0] sm:$0xff] %v232_v45 }
  0x5f   : > { %305 = vst [vmem:[%s11871_s20 + $0x1e8] sm:$0xff] %v233_v46 }
  0x60   : > { %306 = vst [vmem:[%s11871_s20 + $0x1f0] sm:$0xff] %v234_v47 }
  0x61   : > { %307 = vst [vmem:[%s11871_s20 + $0x1f8] sm:$0xff] %v235_v48 }
  0x62   : > { %308 = vst [vmem:[%s11871_s20 + $0x200] sm:$0xff] %v236_v49 }
  0x63   : > { %309 = vst [vmem:[%s11871_s20 + $0x208] sm:$0xff] %v237_v50 }
  0x64   : > { %310 = vst [vmem:[%s11871_s20 + $0x210] sm:$0xff] %v238_v51 }
  0x65   : > { %311 = vst [vmem:[%s11871_s20 + $0x218] sm:$0xff] %v239_v52 }
  0x66   : > { %312 = vst [vmem:[%s11871_s20 + $0x220] sm:$0xff] %v240_v53 }
  0x67   : > { %313 = vst [vmem:[%s11871_s20 + $0x228] sm:$0xff] %v241_v54 }
  0x68   : > { %314 = vst [vmem:[%s11871_s20 + $0x230] sm:$0xff] %v242_v55 }
  0x69   : > { %315 = vst [vmem:[%s11871_s20 + $0x238] sm:$0xff] %v243_v56 }
  0x6a   : > { %317 = vst [vmem:[#allocation2 + $0x4] sm:$0xf] %v11834_v57 }
  0x6b   : > { %318 = vst [vmem:[#allocation2 + $0x128] sm:$0xf] %v11834_v57 }
  0x6c LB: >> { %v839_v58 = vld [vmem:[%s11871_s20] sm:$0xff]  ;;  %v840_v59 = vld [vmem:[%s11871_s20 + $0x8] sm:$0xff]  ;;  %v841_v60 = vld [vmem:[%s11871_s20 + $0x10] sm:$0xff]  ;;  %s10185_s22 = smul.u32 576, %s11832_s21  ;;  %vm1484_vm15 = vsmask.f32 4352  ;;  %s11832_s21 = sphi %s12081_s21, %s838_s21  }
  0x6d   : >> { %v911_v61 = vmax.f32 %v839_v58, 0.0  ;;  %v912_v62 = vmax.f32 %v840_v59, 0.0  ;;  %v842_v63 = vld [vmem:[%s11871_s20 + $0x18] sm:$0xff]  ;;  %v913_v0 = vmax.f32 %v841_v60, 0.0  ;;  %v843_v2 = vld [vmem:[%s11871_s20 + $0x20] sm:$0xff]  ;;  %v844_v3 = vld [vmem:[%s11871_s20 + $0x28] sm:$0xff] }
  0x6e   : >> { %v914_v1 = vmax.f32 %v842_v63, 0.0  ;;  %v845_v4 = vld [vmem:[%s11871_s20 + $0x30] sm:$0xff]  ;;  %v846_v6 = vld [vmem:[%s11871_s20 + $0x38] sm:$0xff]  ;;  %v915_v7 = vmax.f32 %v843_v2, 0.0  ;;  %v916_v8 = vmax.f32 %v844_v3, 0.0  ;;  %s12100_s25 = scalar_lea.vmem %s13935_s1, %s10185_s22  ;;  %v847_v12 = vld [vmem:[%s11871_s20 + $0x40] sm:$0xff] }
  0x6f   : >> { %v12094_v5 = vpack.c.bf16 %v912_v62, %v911_v61  ;;  %v917_v9 = vmax.f32 %v845_v4, 0.0  ;;  %v918_v11 = vmax.f32 %v846_v6, 0.0  ;;  %v848_v13 = vld [vmem:[%s11871_s20 + $0x48] sm:$0xff]  ;;  %v10201_v14 = vld [vmem:[%s12100_s25 + $0x78] sm:$0xff]  ;;  %v10200_v25 = vld [vmem:[%s12100_s25 + $0x70] sm:$0xff]  ;;  %v919_v35 = vmax.f32 %v847_v12, 0.0 }
  0x70   : >> { %v12102_v10 = vpack.c.bf16 %v914_v1, %v913_v0  ;;  %v10193_v15 = vld [vmem:[%s12100_s25 + $0x38] sm:$0xff]  ;;  %v12110_v17 = vpack.c.bf16 %v916_v8, %v915_v7  ;;  %1376 = vmatpush.bf16.msra.mxu0 %v10201_v14  ;;  %v10192_v30 = vld [vmem:[%s12100_s25 + $0x30] sm:$0xff]  ;;  %v920_v39 = vmax.f32 %v848_v13, 0.0  ;;  %v10199_v43 = vld [vmem:[%s12100_s25 + $0x68] sm:$0xff]  ;;  %vm1926_vm7 = vsmask.f32 7424 }
  0x71   : >> { %v10225_v16 = vld [vmem:[%s12100_s25 + $0xb8] sm:$0xff]  ;;  %11007 = vst [vmem:[#allocation2 + $0x8] sm:$0xff] %v12094_v5   ;;  %v12114_v20 = vpack.c.bf16 %v918_v11, %v917_v9  ;;  %1701 = vmatpush.bf16.msra.mxu1 %v10193_v15  ;;  %v10224_v40 = vld [vmem:[%s12100_s25 + $0xb0] sm:$0xff]  ;;  %v10191_v44 = vld [vmem:[%s12100_s25 + $0x28] sm:$0xff]  ;;  %s10306_s26 = sshll.u32 %s11832_s21, 6  ;;  %s838_s21 = sadd.s32 1, %s11832_s21  }
  0x72   : >> { %v10233_v18 = vld [vmem:[%s12100_s25 + $0xf8] sm:$0xff]  ;;  %11008 = vst [vmem:[#allocation2 + $0x10] sm:$0xff] %v12102_v10   ;;  %2123 = vmatpush.bf16.msra.mxu2 %v10225_v16  ;;  %v10232_v41 = vld [vmem:[%s12100_s25 + $0xf0] sm:$0xff]  ;;  %v12122_v42 = vpack.c.bf16 %v920_v39, %v919_v35  ;;  %v10223_v45 = vld [vmem:[%s12100_s25 + $0xa8] sm:$0xff]  ;;  %s12461_s29 = scalar_lea.vmem %s13936_s2, %s10306_s26  ;;  %p835_p4 = scmp.ge.s32.totalorder %s838_s21, 2  }
  0x73   : >> { %11009 = vst [vmem:[#allocation2 + $0x18] sm:$0xff] %v12110_v17   ;;  %2596 = vmatpush.bf16.msra.mxu3 %v10233_v18  ;;  %v10231_v46 = vld [vmem:[%s12100_s25 + $0xe8] sm:$0xff]  ;;  %v11061_v47 = vld [vmem:[#allocation2 + $0x4] sm:$0x8]  ;;  %v10197_v57 = vld [vmem:[%s12100_s25 + $0x58] sm:$0xff] }
  0x74   : >> { %11010 = vst [vmem:[#allocation2 + $0x20] sm:$0xff] %v12114_v20   ;;  %1377 = vmatpush.bf16.msra.mxu0 %v10200_v25  ;;  %v10198_v48 = vld [vmem:[%s12100_s25 + $0x60] sm:$0xff]  ;;  %v10189_v58 = vld [vmem:[%s12100_s25 + $0x18] sm:$0xff]  ;;  %v10196_v0 = vld [vmem:[%s12100_s25 + $0x50] sm:$0xff] }
  0x75   : >> { %1702 = vmatpush.bf16.msra.mxu1 %v10192_v30  ;;  %11011 = vst [vmem:[#allocation2 + $0x28] sm:$0xff] %v12122_v42   ;;  %v10190_v49 = vld [vmem:[%s12100_s25 + $0x20] sm:$0xff]  ;;  %v10221_v60 = vld [vmem:[%s12100_s25 + $0x98] sm:$0xff]  ;;  %v10188_v6 = vld [vmem:[%s12100_s25 + $0x10] sm:$0xff] }
  0x76   : >> { %2124 = vmatpush.bf16.msra.mxu2 %v10224_v40  ;;  %v10222_v51 = vld [vmem:[%s12100_s25 + $0xa0] sm:$0xff]  ;;  %v10229_v61 = vld [vmem:[%s12100_s25 + $0xd8] sm:$0xff]  ;;  %v10220_v7 = vld [vmem:[%s12100_s25 + $0x90] sm:$0xff] }
  0x77   : >> { %2597 = vmatpush.bf16.msra.mxu3 %v10232_v41  ;;  %v10230_v52 = vld [vmem:[%s12100_s25 + $0xe0] sm:$0xff]  ;;  %v10228_v8 = vld [vmem:[%s12100_s25 + $0xd0] sm:$0xff]  ;;  %v850_v18 = vld [vmem:[%s11871_s20 + $0x58] sm:$0xff] }
  0x78   : >> { %1378 = vmatpush.bf16.msra.mxu0 %v10199_v43  ;;  %v11298_v50 = vld [vmem:[#allocation2 + $0x4] sm:$0xf0]   ;;  %v849_v16 = vld [vmem:[%s11871_s20 + $0x50] sm:$0xff] }
  0x79   : >> { %1703 = vmatpush.bf16.msra.mxu1 %v10191_v44  ;;  %v11330_v53 = vld [vmem:[#allocation2 + $0x14] sm:$0x8]  ;;  %v11300_v55 = vld [vmem:[#allocation2 + $0xc] sm:$0xff]   ;;  %v11062_v56 = vor.u32 %v11298_v50, %v11061_v47  ;;  %v922_v47 = vmax.f32 %v850_v18, 0.0 }
  0x7a   : >> { %2125 = vmatpush.bf16.msra.mxu2 %v10223_v45  ;;  %v11676_v54 = vld [vmem:[#allocation2 + $0x14] sm:$0xf0]   ;;  %v10202_v59 = vld [vmem:[#allocation2 + $0x8] sm:$0xff]  ;;  %v1494_v3 = vshrl.u32 %v11300_v55, 16  ;;  %v12138_v4 = vld [vmem:[#allocation2 + $0x10] sm:$0xff]  ;;  %v1497_v9 = vshll.u32 %v11300_v55, 16 }
  0x7b   : >> { %2598 = vmatpush.bf16.msra.mxu3 %v10231_v46  ;;  %v11678_v62 = vld [vmem:[#allocation2 + $0x1c] sm:$0xff]   ;;  %v11331_v63 = vor.u32 %v11676_v54, %v11330_v53  ;;  %v1486_v1 = vshrl.u32 %v11062_v56, 16  ;;  %v1489_v2 = vshll.u32 %v11062_v56, 16  ;;  %v1930_v11 = vshll.u32 %v10202_v59, 16  ;;  %v10195_v41 = vld [vmem:[%s12100_s25 + $0x48] sm:$0xff]  ;;  %v10313_v22 = vld [vmem:[%s12461_s29 + $0x30] sm:$0xff] }
  0x7c   : >> { %1379 = vmatpush.bf16.msra.mxu0 %v10198_v48  ;;  %v2389_v14 = vshrl.u32 %v11678_v62, 16  ;;  %v2392_v15 = vshll.u32 %v11678_v62, 16  ;;  %v1928_v25 = vshrl.u32 %v10202_v59, 16  ;;  %v1496_v39 = vrot.slane %v1494_v3, 3  ;;  %v10187_v43 = vld [vmem:[%s12100_s25 + $0x8] sm:$0xff]  ;;  %v10194_v55 = vld [vmem:[%s12100_s25 + $0x40] sm:$0xff] }
  0x7d   : >> { %1704 = vmatpush.bf16.msra.mxu1 %v10190_v49  ;;  %v2381_v12 = vshrl.u32 %v11331_v63, 16  ;;  %v2384_v13 = vshll.u32 %v11331_v63, 16  ;;  %v1488_v30 = vrot.slane %v1486_v1, 3  ;;  %v1491_v35 = vrot.slane %v1489_v2, 4  ;;  %v10219_v48 = vld [vmem:[%s12100_s25 + $0x88] sm:$0xff]  ;;  %v10186_v56 = vld [vmem:[%s12100_s25] sm:$0xff] }
  0x7e   : >> { %2126 = vmatpush.bf16.msra.mxu2 %v10222_v51  ;;  %v1935_v40 = vshll.u32 %v12138_v4, 16  ;;  %v1499_v44 = vrot.slane %v1497_v9, 4  ;;  %v1932_v45 = vrot.slane %v1930_v11, 1  ;;  %v921_v46 = vmax.f32 %v849_v16, 0.0  ;;  %v10227_v49 = vld [vmem:[%s12100_s25 + $0xc8] sm:$0xff]  ;;  %v10218_v59 = vld [vmem:[%s12100_s25 + $0x80] sm:$0xff] }
  0x7f   : >> { %2599 = vmatpush.bf16.msra.mxu3 %v10230_v52  ;;  %v2383_v50 = vrot.slane %v2381_v12, 3  ;;  %v2386_v51 = vrot.slane %v2384_v13, 4  ;;  %v2391_v52 = vrot.slane %v2389_v14, 3  ;;  %v2394_v53 = vrot.slane %v2392_v15, 4  ;;  %v10241_v1 = vld [vmem:[%s12100_s25 + $0x138] sm:$0xff]  ;;  %v851_v9 = vld [vmem:[%s11871_s20 + $0x60] sm:$0xff] }
  0x80   : >> { %1380 = vmatpush.bf16.msra.mxu0 %v10197_v57  ;;  %v12150_v54 = vpack.c.bf16 %v922_v47, %v921_v46  ;;  %v1492_v57 = vor.u32 %v1491_v35, %v1488_v30  ;;  %v1937_v62 = vrot.slane %v1935_v40, 1  ;;  %v11302_v3 = vld [vmem:[#allocation2 + $0x14] sm:$0xff]   ;;  %v852_v11 = vld [vmem:[%s11871_s20 + $0x68] sm:$0xff]  ;;  %v923_v12 = vmax.f32 %v851_v9, 0.0 }
  0x81   : >> { %1705 = vmatpush.bf16.msra.mxu1 %v10189_v58  ;;  %v1500_v58 = vor.u32 %v1499_v44, %v1496_v39  ;;  %v2387_v63 = vor.u32 %v2386_v51, %v2383_v50  ;;  %v924_v13 = vmax.f32 %v852_v11, 0.0  ;;  %v1503_v14 = vshrl.u32 %v11302_v3, 16  ;;  %v10240_v16 = vld [vmem:[%s12100_s25 + $0x130] sm:$0xff]  ;;  %v11304_v50 = vld [vmem:[#allocation2 + $0x1c] sm:$0xff]  }
  0x82   : >> { %2127 = vmatpush.bf16.msra.mxu2 %v10221_v60  ;;  %11012 = vst [vmem:[#allocation2 + $0x30] sm:$0xff] %v12150_v54   ;;  %v10226_v60 = vld [vmem:[%s12100_s25 + $0xc0] sm:$0xff]  ;;  %v1506_v15 = vshll.u32 %v11302_v3, 16 }
  0x83   : >> { %2600 = vmatpush.bf16.msra.mxu3 %v10229_v61  ;;  %v1933_v61 = vor.u32 %v1932_v45, %v1928_v25  ;;  %v1501_v2 = vsel %vm1484_vm15, %v1492_v57, %v1500_v58  ;;  %v12165_v18 = vpack.c.bf16 %v924_v13, %v923_v12  ;;  %v10204_v25 = vld [vmem:[#allocation2 + $0x18] sm:$0xff]  ;;  %v1505_v39 = vrot.slane %v1503_v14, 3  ;;  %v11306_v13 = vld [vmem:[#allocation2 + $0x24] sm:$0xff]  }
  0x84   : >> { %1381 = vmatpush.bf16.msra.mxu0 %v10196_v0  ;;  %v2395_v0 = vor.u32 %v2394_v53, %v2391_v52  ;;  %v1508_v40 = vrot.slane %v1506_v15, 4 }
  0x85   : >> { %1706 = vmatpush.bf16.msra.mxu1 %v10188_v6  ;;  %v1938_v6 = vsel %vm1926_vm7, %v1933_v61, %v1937_v62  ;;  %11013 = vst [vmem:[#allocation2 + $0x38] sm:$0xff] %v12165_v18  }
  0x86   : >> { %2128 = vmatpush.bf16.msra.mxu2 %v10220_v7  ;;  %v2396_v7 = vsel %vm1484_vm15, %v2387_v63, %v2395_v0  ;;  %v1509_v45 = vor.u32 %v1508_v40, %v1505_v39  ;;  %v1521_v40 = vshrl.u32 %v11306_v13, 16 }
  0x87   : >> { %2601 = vmatpush.bf16.msra.mxu3 %v10228_v8  ;;  %v11680_v8 = vld [vmem:[#allocation2 + $0x24] sm:$0xff]  }
  0x88   : >> { %1382 = vmatpush.bf16.msra.mxu0 %v10195_v41  ;;  %v2398_v30 = vshrl.u32 %v11680_v8, 16  ;;  %v2401_v35 = vshll.u32 %v11680_v8, 16  ;;  %v1943_v41 = vshll.u32 %v10204_v25, 16 }
  0x89   : >> { %1707 = vmatpush.bf16.msra.mxu1 %v10187_v43  ;;  %v11682_v53 = vld [vmem:[#allocation2 + $0x2c] sm:$0xff]  }
  0x8a   : >> { %2129 = vmatpush.bf16.msra.mxu2 %v10219_v48  ;;  %v2400_v43 = vrot.slane %v2398_v30, 3  ;;  %v2403_v44 = vrot.slane %v2401_v35, 4  ;;  %v1945_v47 = vrot.slane %v1943_v41, 1  ;;  %v2410_v63 = vshll.u32 %v11682_v53, 16  ;;  %v855_v30 = vld [vmem:[%s11871_s20 + $0x80] sm:$0xff]  ;;  %v856_v35 = vld [vmem:[%s11871_s20 + $0x88] sm:$0xff] }
  0x8b   : >> { %2602 = vmatpush.bf16.msra.mxu3 %v10227_v49  ;;  %v1510_v49 = vsel %vm1484_vm15, %v1500_v58, %v1509_v45  ;;  %v10205_v58 = vld [vmem:[#allocation2 + $0x20] sm:$0xff]  ;;  %v927_v39 = vmax.f32 %v855_v30, 0.0  ;;  %v10239_v41 = vld [vmem:[%s12100_s25 + $0x128] sm:$0xff] }
  0x8c   : >> { %1383 = vmatpush.bf16.msra.mxu0 %v10194_v55  ;;  %v2404_v48 = vor.u32 %v2403_v44, %v2400_v43  ;;  %v853_v55 = vld [vmem:[%s11871_s20 + $0x70] sm:$0xff]  ;;  %v1951_v3 = vshll.u32 %v10205_v58, 16  ;;  %v10206_v44 = vld [vmem:[#allocation2 + $0x28] sm:$0xff] }
  0x8d   : >> { %1708 = vmatpush.bf16.msra.mxu1 %v10186_v56  ;;  %v854_v56 = vld [vmem:[%s11871_s20 + $0x78] sm:$0xff]  ;;  %v925_v57 = vmax.f32 %v853_v55, 0.0 }
  0x8e   : >> { %2130 = vmatpush.bf16.msra.mxu2 %v10218_v59  ;;  %v2405_v52 = vsel %vm1484_vm15, %v2395_v0, %v2404_v48  ;;  %v926_v59 = vmax.f32 %v854_v56, 0.0  ;;  %v1953_v9 = vrot.slane %v1951_v3, 1 }
  0x8f   : >> { %2603 = vmatpush.bf16.msra.mxu3 %v10226_v60  ;;  %1384 = vmatmul.bf16.vlgmr.msra.gmra.mxu0 %v12094_v5  ;;  %v1939_v5 = vshrl.u32 %v12138_v4, 16  ;;  %v1512_v4 = vshrl.u32 %v11304_v50, 16  ;;  %v1515_v60 = vshll.u32 %v11304_v50, 16 }
  0x90   : >> { %2817 = vmatpush.bf16.msrb.mxu0 %v10241_v1  ;;  %1709 = vmatmul.bf16.vlgmr.msra.gmra.mxu1 %v1501_v2  ;;  %v12175_v61 = vpack.c.bf16 %v926_v59, %v925_v57  ;;  %v1947_v2 = vshrl.u32 %v10204_v25, 16  ;;  %v928_v25 = vmax.f32 %v856_v35, 0.0  ;;  %v11308_v59 = vld [vmem:[#allocation2 + $0x2c] sm:$0xff]  }
  0x91   : >> { %2131 = vmatmul.bf16.vlgmr.msra.gmra.mxu2 %v1938_v6  ;;  %v1941_v46 = vor.u32 %v1939_v5, %v1937_v62  ;;  %v2407_v62 = vshrl.u32 %v11682_v53, 16  ;;  %v1514_v0 = vrot.slane %v1512_v4, 3  ;;  %v1517_v1 = vrot.slane %v1515_v60, 4 }
  0x92   : >> { %2604 = vmatmul.bf16.vlgmr.msra.gmra.mxu3 %v2396_v7  ;;  %11014 = vst [vmem:[#allocation2 + $0x40] sm:$0xff] %v12175_v61   ;;  %v1949_v8 = vor.u32 %v1947_v2, %v1945_v47  ;;  %v1524_v5 = vshll.u32 %v11306_v13, 16  ;;  %v12185_v43 = vpack.c.bf16 %v928_v25, %v927_v39  ;;  %v1533_v3 = vshll.u32 %v11308_v59, 16  ;;  %v11310_v25 = vld [vmem:[#allocation2 + $0x34] sm:$0xff]  }
  0x93   : >> { %v1946_v51 = vsel %vm1926_vm7, %v1941_v46, %v1945_v47  ;;  %v2409_v6 = vrot.slane %v2407_v62, 3  ;;  %v1518_v7 = vor.u32 %v1517_v1, %v1514_v0  ;;  %v1523_v47 = vrot.slane %v1521_v40, 3  ;;  %v858_v0 = vld [vmem:[%s11871_s20 + $0x98] sm:$0xff] }
  0x94   : >> { %2818 = vmatpush.bf16.msrb.mxu0 %v10240_v16  ;;  %v1954_v14 = vsel %vm1926_vm7, %v1949_v8, %v1953_v9  ;;  %v11684_v16 = vld [vmem:[#allocation2 + $0x34] sm:$0xff]   ;;  %11015 = vst [vmem:[#allocation2 + $0x48] sm:$0xff] %v12185_v43   ;;  %v930_v2 = vmax.f32 %v858_v0, 0.0 }
  0x95   : >> { %v1519_v12 = vsel %vm1484_vm15, %v1509_v45, %v1518_v7  ;;  %v2416_v45 = vshrl.u32 %v11684_v16, 16  ;;  %v2419_v46 = vshll.u32 %v11684_v16, 16 }
  0x97   : >> { %v2418_v50 = vrot.slane %v2416_v45, 3  ;;  %v859_v45 = vld [vmem:[%s11871_s20 + $0xa0] sm:$0xff] }
  0x98   : >> { %2819 = vmatpush.bf16.msrb.mxu0 %v10239_v41 }
  0x99   : >> { %v11686_v62 = vld [vmem:[#allocation2 + $0x3c] sm:$0xff]  }
  0x9a   : >> { %v2428_v8 = vshll.u32 %v11686_v62, 16 }
  0x9b   : >> { %v11688_v41 = vld [vmem:[#allocation2 + $0x44] sm:$0xff]  }
  0x9c   : >> { %v12426_v37 = vld [vmem:[#allocation2 + $0x48] sm:$0xff]  }
  0x9f   : >> { %1389 = vmatmul.bf16.gmra.mxu0 %v12102_v10  ;;  %v2412_v10 = vrot.slane %v2410_v63, 4  ;;  %v857_v63 = vld [vmem:[%s11871_s20 + $0x90] sm:$0xff] }
  0xa0   : >> { %1714 = vmatmul.bf16.gmra.mxu1 %v1510_v49  ;;  %v1955_v49 = vshrl.u32 %v10205_v58, 16  ;;  %v929_v1 = vmax.f32 %v857_v63, 0.0  ;;  %v1530_v58 = vshrl.u32 %v11308_v59, 16 }
  0xa1   : >> { %2136 = vmatmul.bf16.gmra.mxu2 %v1946_v51  ;;  %v2413_v11 = vor.u32 %v2412_v10, %v2409_v6  ;;  %v2421_v51 = vrot.slane %v2419_v46, 4  ;;  %v10207_v10 = vld [vmem:[#allocation2 + $0x30] sm:$0xff]  ;;  %v860_v46 = vld [vmem:[%s11871_s20 + $0xa8] sm:$0xff] }
  0xa2   : >> { %2609 = vmatmul.bf16.gmra.mxu3 %v2405_v52  ;;  %v1957_v53 = vor.u32 %v1955_v49, %v1953_v9  ;;  %v12194_v6 = vpack.c.bf16 %v930_v2, %v929_v1  ;;  %v1532_v9 = vrot.slane %v1530_v58, 3  ;;  %v1967_v13 = vshll.u32 %v10207_v10, 16  ;;  %v11312_v2 = vld [vmem:[#allocation2 + $0x3c] sm:$0xff]  }
  0xa3   : >> { %v2414_v15 = vsel %vm1484_vm15, %v2404_v48, %v2413_v11  ;;  %v1526_v48 = vrot.slane %v1524_v5, 4  ;;  %v2422_v56 = vor.u32 %v2421_v51, %v2418_v50  ;;  %v1542_v49 = vshll.u32 %v11310_v25, 16  ;;  %v10208_v51 = vld [vmem:[#allocation2 + $0x38] sm:$0xff] }
  0xa4   : >> { %11016 = vst [vmem:[#allocation2 + $0x50] sm:$0xff] %v12194_v6   ;;  %v1969_v30 = vrot.slane %v1967_v13, 1  ;;  %v1551_v13 = vshll.u32 %v11312_v2, 16 }
  0xa5   : >> { %v1527_v52 = vor.u32 %v1526_v48, %v1523_v47  ;;  %v2423_v60 = vsel %vm1484_vm15, %v2413_v11, %v2422_v56  ;;  %v1535_v11 = vrot.slane %v1533_v3, 4  ;;  %v931_v47 = vmax.f32 %v859_v45, 0.0 }
  0xa6   : >> { %v1539_v48 = vshrl.u32 %v11310_v25, 16 }
  0xa7   : >> { %v1528_v57 = vsel %vm1484_vm15, %v1518_v7, %v1527_v52  ;;  %v2425_v7 = vshrl.u32 %v11686_v62, 16 }
  0xaf   : >> { %1394 = vmatmul.bf16.gmra.mxu0 %v12110_v17  ;;  %v1959_v17 = vshll.u32 %v10206_v44, 16 }
  0xb0   : >> { %1719 = vmatmul.bf16.gmra.mxu1 %v1519_v12  ;;  %v1963_v12 = vshrl.u32 %v10206_v44, 16  ;;  %v932_v44 = vmax.f32 %v860_v46, 0.0 }
  0xb1   : >> { %2141 = vmatmul.bf16.gmra.mxu2 %v1954_v14  ;;  %v1961_v55 = vrot.slane %v1959_v17, 1  ;;  %v2427_v14 = vrot.slane %v2425_v7, 3  ;;  %v10238_v17 = vld [vmem:[%s12100_s25 + $0x120] sm:$0xff]  ;;  %v11690_v7 = vld [vmem:[#allocation2 + $0x4c] sm:$0xff]  }
  0xb2   : >> { %2614 = vmatmul.bf16.gmra.mxu3 %v2414_v15  ;;  %v1536_v15 = vor.u32 %v1535_v11, %v1532_v9  ;;  %v12204_v50 = vpack.c.bf16 %v932_v44, %v931_v47  ;;  %2820 = vmatpush.bf16.msrb.mxu0 %v10238_v17  ;;  %v862_v9 = vld [vmem:[%s11871_s20 + $0xb8] sm:$0xff]  ;;  %v11314_v44 = vld [vmem:[#allocation2 + $0x44] sm:$0xff]  }
  0xb3   : >> { %v1962_v4 = vsel %vm1926_vm7, %v1957_v53, %v1961_v55  ;;  %v1965_v16 = vor.u32 %v1963_v12, %v1961_v55  ;;  %v2437_v53 = vshll.u32 %v11688_v41, 16  ;;  %v1541_v55 = vrot.slane %v1539_v48, 3 }
  0xb4   : >> { %v1537_v39 = vsel %vm1484_vm15, %v1527_v52, %v1536_v15  ;;  %v2434_v52 = vshrl.u32 %v11688_v41, 16  ;;  %11017 = vst [vmem:[#allocation2 + $0x58] sm:$0xff] %v12204_v50   ;;  %v934_v12 = vmax.f32 %v862_v9, 0.0 }
  0xb5   : >> { %v1970_v40 = vsel %vm1926_vm7, %v1965_v16, %v1969_v30  ;;  %v2446_v16 = vshll.u32 %v11690_v7, 16 }
  0xb6   : >> { %v2436_v59 = vrot.slane %v2434_v52, 3  ;;  %v863_v52 = vld [vmem:[%s11871_s20 + $0xc0] sm:$0xff] }
  0xbb   : >> { %v11692_v17 = vld [vmem:[#allocation2 + $0x54] sm:$0xff]  }
  0xbc   : >> { %v12447_v34 = vld [vmem:[#allocation2 + $0x58] sm:$0xff]  }
  0xbf   : >> { %1399 = vmatmul.bf16.gmra.mxu0 %v12114_v20  ;;  %v2430_v20 = vrot.slane %v2428_v8, 4  ;;  %v861_v8 = vld [vmem:[%s11871_s20 + $0xb0] sm:$0xff] }
  0xc0   : >> { %1724 = vmatmul.bf16.gmra.mxu1 %v1528_v57  ;;  %v1971_v57 = vshrl.u32 %v10207_v10, 16  ;;  %v933_v11 = vmax.f32 %v861_v8, 0.0  ;;  %v1548_v10 = vshrl.u32 %v11312_v2, 16 }
  0xc1   : >> { %2146 = vmatmul.bf16.gmra.mxu2 %v1962_v4  ;;  %v2431_v35 = vor.u32 %v2430_v20, %v2427_v14  ;;  %v2439_v4 = vrot.slane %v2437_v53, 4  ;;  %v10209_v20 = vld [vmem:[#allocation2 + $0x40] sm:$0xff]  ;;  %v864_v53 = vld [vmem:[%s11871_s20 + $0xc8] sm:$0xff] }
  0xc2   : >> { %2619 = vmatmul.bf16.gmra.mxu3 %v2423_v60  ;;  %v1973_v62 = vor.u32 %v1971_v57, %v1969_v30  ;;  %v12213_v14 = vpack.c.bf16 %v934_v12, %v933_v11  ;;  %v1550_v30 = vrot.slane %v1548_v10, 3  ;;  %v1983_v25 = vshll.u32 %v10209_v20, 16  ;;  %v11316_v10 = vld [vmem:[#allocation2 + $0x4c] sm:$0xff]  }
  0xc3   : >> { %v2432_v5 = vsel %vm1484_vm15, %v2422_v56, %v2431_v35  ;;  %v1544_v56 = vrot.slane %v1542_v49, 4  ;;  %v2440_v0 = vor.u32 %v2439_v4, %v2436_v59  ;;  %v1560_v57 = vshll.u32 %v11314_v44, 16  ;;  %v10210_v4 = vld [vmem:[#allocation2 + $0x48] sm:$0xff] }
  0xc4   : >> { %11018 = vst [vmem:[#allocation2 + $0x60] sm:$0xff] %v12213_v14   ;;  %v1985_v45 = vrot.slane %v1983_v25, 1 }
  0xc5   : >> { %v1545_v60 = vor.u32 %v1544_v56, %v1541_v55  ;;  %v2441_v3 = vsel %vm1484_vm15, %v2431_v35, %v2440_v0  ;;  %v1553_v35 = vrot.slane %v1551_v13, 4  ;;  %v935_v55 = vmax.f32 %v863_v52, 0.0  ;;  %v10265_v13 = vld [vmem:[%s12100_s25 + $0x178] sm:$0xff] }
  0xc6   : >> { %v1557_v56 = vshrl.u32 %v11314_v44, 16  ;;  %3270 = vmatpush.bf16.msrb.mxu1 %v10265_v13 }
  0xc7   : >> { %v1546_v1 = vsel %vm1484_vm15, %v1536_v15, %v1545_v60  ;;  %v2443_v15 = vshrl.u32 %v11690_v7, 16 }
  0xcf   : >> { %1404 = vmatmul.bf16.gmra.mxu0 %v12122_v42  ;;  %v1975_v42 = vshll.u32 %v10208_v51, 16 }
  0xd0   : >> { %1729 = vmatmul.bf16.gmra.mxu1 %v1537_v39  ;;  %v1979_v39 = vshrl.u32 %v10208_v51, 16  ;;  %v936_v51 = vmax.f32 %v864_v53, 0.0 }
  0xd1   : >> { %2151 = vmatmul.bf16.gmra.mxu2 %v1970_v40  ;;  %v1977_v63 = vrot.slane %v1975_v42, 1  ;;  %v2445_v40 = vrot.slane %v2443_v15, 3  ;;  %v10237_v42 = vld [vmem:[%s12100_s25 + $0x118] sm:$0xff] }
  0xd2   : >> { %2624 = vmatmul.bf16.gmra.mxu3 %v2432_v5  ;;  %v1554_v5 = vor.u32 %v1553_v35, %v1550_v30  ;;  %v12223_v59 = vpack.c.bf16 %v936_v51, %v935_v55  ;;  %2821 = vmatpush.bf16.msrb.mxu0 %v10237_v42  ;;  %v865_v30 = vld [vmem:[%s11871_s20 + $0xd0] sm:$0xff]  ;;  %v866_v35 = vld [vmem:[%s11871_s20 + $0xd8] sm:$0xff] }
  0xd3   : >> { %v1978_v58 = vsel %vm1926_vm7, %v1973_v62, %v1977_v63  ;;  %v1981_v41 = vor.u32 %v1979_v39, %v1977_v63  ;;  %v2455_v62 = vshll.u32 %v11692_v17, 16  ;;  %v1559_v63 = vrot.slane %v1557_v56, 3 }
  0xd4   : >> { %v1555_v47 = vsel %vm1484_vm15, %v1545_v60, %v1554_v5  ;;  %v2452_v60 = vshrl.u32 %v11692_v17, 16  ;;  %11019 = vst [vmem:[#allocation2 + $0x68] sm:$0xff] %v12223_v59   ;;  %v937_v39 = vmax.f32 %v865_v30, 0.0  ;;  %v938_v25 = vmax.f32 %v866_v35, 0.0 }
  0xd5   : >> { %v1986_v48 = vsel %vm1926_vm7, %v1981_v41, %v1985_v45  ;;  %v10211_v41 = vld [vmem:[#allocation2 + $0x50] sm:$0xff] }
  0xd6   : >> { %v2454_v2 = vrot.slane %v2452_v60, 3  ;;  %v11318_v60 = vld [vmem:[#allocation2 + $0x54] sm:$0xff]  }
  0xdf   : >> { %1409 = vmatmul.bf16.gmra.mxu0 %v12150_v54  ;;  %v2448_v54 = vrot.slane %v2446_v16, 4 }
  0xe0   : >> { %1734 = vmatmul.bf16.gmra.mxu1 %v1546_v1  ;;  %v1987_v1 = vshrl.u32 %v10209_v20, 16  ;;  %v11694_v20 = vld [vmem:[#allocation2 + $0x5c] sm:$0xff]  }
  0xe1   : >> { %2156 = vmatmul.bf16.gmra.mxu2 %v1978_v58  ;;  %v2449_v46 = vor.u32 %v2448_v54, %v2445_v40  ;;  %v2457_v58 = vrot.slane %v2455_v62, 4  ;;  %v1566_v40 = vshrl.u32 %v11316_v10, 16  ;;  %v1569_v54 = vshll.u32 %v11316_v10, 16 }
  0xe2   : >> { %2629 = vmatmul.bf16.gmra.mxu3 %v2441_v3  ;;  %v10273_v3 = vld [vmem:[%s12100_s25 + $0x1b8] sm:$0xff]  ;;  %v1989_v8 = vor.u32 %v1987_v1, %v1985_v45  ;;  %v2461_v45 = vshrl.u32 %v11694_v20, 16  ;;  %v867_v1 = vld [vmem:[%s11871_s20 + $0xe0] sm:$0xff] }
  0xe3   : >> { %v2450_v49 = vsel %vm1484_vm15, %v2440_v0, %v2449_v46  ;;  %v1562_v0 = vrot.slane %v1560_v57, 4  ;;  %3743 = vmatpush.bf16.msrb.mxu2 %v10273_v3  ;;  %v2458_v11 = vor.u32 %v2457_v58, %v2454_v2  ;;  %v1571_v44 = vrot.slane %v1569_v54, 4 }
  0xe4   : >> { %v2463_v17 = vrot.slane %v2461_v45, 3  ;;  %v939_v2 = vmax.f32 %v867_v1, 0.0  ;;  %v1575_v3 = vshrl.u32 %v11318_v60, 16 }
  0xe5   : >> { %v1563_v7 = vor.u32 %v1562_v0, %v1559_v63  ;;  %v2459_v16 = vsel %vm1484_vm15, %v2449_v46, %v2458_v11  ;;  %v1568_v46 = vrot.slane %v1566_v40, 3  ;;  %v11696_v0 = vld [vmem:[#allocation2 + $0x64] sm:$0xff]  }
  0xe6   : >> { %v2470_v10 = vshrl.u32 %v11696_v0, 16  ;;  %v2473_v13 = vshll.u32 %v11696_v0, 16  ;;  %v1577_v30 = vrot.slane %v1575_v3, 3 }
  0xe7   : >> { %v1564_v12 = vsel %vm1484_vm15, %v1554_v5, %v1563_v7  ;;  %v12234_v5 = vpack.c.bf16 %v938_v25, %v937_v39  ;;  %v1572_v52 = vor.u32 %v1571_v44, %v1568_v46  ;;  %v2003_v39 = vshrl.u32 %v10211_v41, 16  ;;  %v10272_v46 = vld [vmem:[%s12100_s25 + $0x1b0] sm:$0xff] }
  0xe8   : >> { %v2472_v54 = vrot.slane %v2470_v10, 3  ;;  %v2475_v45 = vrot.slane %v2473_v13, 4  ;;  %3744 = vmatpush.bf16.msrb.mxu2 %v10272_v46 }
  0xe9   : >> { %11020 = vst [vmem:[#allocation2 + $0x70] sm:$0xff] %v12234_v5   ;;  %v1573_v42 = vsel %vm1484_vm15, %v1563_v7, %v1572_v52  ;;  %v10236_v7 = vld [vmem:[%s12100_s25 + $0x110] sm:$0xff] }
  0xea   : >> { %2822 = vmatpush.bf16.msrb.mxu0 %v10236_v7  ;;  %v12262_v7 = vld [vmem:[#allocation2 + $0x60] sm:$0xff] }
  0xef   : >> { %1414 = vmatmul.bf16.gmra.mxu0 %v12165_v18  ;;  %v1991_v18 = vshll.u32 %v10210_v4, 16 }
  0xf0   : >> { %1739 = vmatmul.bf16.gmra.mxu1 %v1555_v47  ;;  %v2464_v47 = vshll.u32 %v11694_v20, 16  ;;  %v11698_v1 = vld [vmem:[#allocation2 + $0x6c] sm:$0xff]  }
  0xf1   : >> { %2161 = vmatmul.bf16.gmra.mxu2 %v1986_v48  ;;  %v1993_v9 = vrot.slane %v1991_v18, 1  ;;  %v1995_v48 = vshrl.u32 %v10210_v4, 16  ;;  %v868_v18 = vld [vmem:[%s11871_s20 + $0xe8] sm:$0xff]  ;;  %v2479_v10 = vshrl.u32 %v11698_v1, 16  ;;  %v2482_v13 = vshll.u32 %v11698_v1, 16 }
  0xf2   : >> { %2634 = vmatmul.bf16.gmra.mxu3 %v2450_v49  ;;  %v1999_v49 = vshll.u32 %v10211_v41, 16  ;;  %v940_v58 = vmax.f32 %v868_v18, 0.0  ;;  %v869_v18 = vld [vmem:[%s11871_s20 + $0xf0] sm:$0xff] }
  0xf3   : >> { %v1994_v15 = vsel %vm1926_vm7, %v1989_v8, %v1993_v9  ;;  %v1997_v53 = vor.u32 %v1995_v48, %v1993_v9  ;;  %v1578_v8 = vshll.u32 %v11318_v60, 16  ;;  %v11320_v60 = vld [vmem:[#allocation2 + $0x5c] sm:$0xff]  }
  0xf4   : >> { %v2001_v55 = vrot.slane %v1999_v49, 1  ;;  %v12244_v9 = vpack.c.bf16 %v940_v58, %v939_v2  ;;  %v941_v58 = vmax.f32 %v869_v18, 0.0  ;;  %v871_v18 = vld [vmem:[%s11871_s20 + $0x100] sm:$0xff] }
  0xf5   : >> { %v1580_v35 = vrot.slane %v1578_v8, 4  ;;  %v1587_v8 = vshll.u32 %v11320_v60, 16 }
  0xf6   : >> { %v2002_v63 = vsel %vm1926_vm7, %v1997_v53, %v2001_v55  ;;  %11021 = vst [vmem:[#allocation2 + $0x78] sm:$0xff] %v12244_v9   ;;  %v2005_v48 = vor.u32 %v2003_v39, %v2001_v55  ;;  %v870_v55 = vld [vmem:[%s11871_s20 + $0xf8] sm:$0xff] }
  0xf7   : >> { %v1581_v44 = vor.u32 %v1580_v35, %v1577_v30  ;;  %v942_v3 = vmax.f32 %v870_v55, 0.0  ;;  %v1589_v30 = vrot.slane %v1587_v8, 4  ;;  %v872_v55 = vld [vmem:[%s11871_s20 + $0x108] sm:$0xff] }
  0xf8   : >> { %v10235_v8 = vld [vmem:[%s12100_s25 + $0x108] sm:$0xff] }
  0xf9   : >> { %2823 = vmatpush.bf16.msrb.mxu0 %v10235_v8 }
  0xfd   : >> { %v11700_v1 = vld [vmem:[#allocation2 + $0x74] sm:$0xff]  }
  0xff   : >> { %1419 = vmatmul.bf16.gmra.mxu0 %v12175_v61  ;;  %v2466_v61 = vrot.slane %v2464_v47, 4 }
 0x100   : >> { %1744 = vmatmul.bf16.gmra.mxu1 %v1564_v12  ;;  %v12246_v12 = vld [vmem:[#allocation2 + $0x58] sm:$0xff] }
 0x101   : >> { %2166 = vmatmul.bf16.gmra.mxu2 %v1994_v15  ;;  %v2467_v51 = vor.u32 %v2466_v61, %v2463_v17  ;;  %v2007_v40 = vshll.u32 %v12246_v12, 16  ;;  %v2476_v17 = vor.u32 %v2475_v45, %v2472_v54  ;;  %v2011_v35 = vshrl.u32 %v12246_v12, 16 }
 0x102   : >> { %2639 = vmatmul.bf16.gmra.mxu3 %v2459_v16  ;;  %v2484_v54 = vrot.slane %v2482_v13, 4  ;;  %v2488_v13 = vshrl.u32 %v11700_v1, 16 }
 0x103   : >> { %v2468_v4 = vsel %vm1484_vm15, %v2458_v11, %v2467_v51  ;;  %v2009_v49 = vrot.slane %v2007_v40, 1  ;;  %v2477_v0 = vsel %vm1484_vm15, %v2467_v51, %v2476_v17  ;;  %v12264_v51 = vpack.c.bf16 %v942_v3, %v941_v58 }
 0x104   : >> { %v2481_v40 = vrot.slane %v2479_v10, 3  ;;  %v943_v58 = vmax.f32 %v871_v18, 0.0  ;;  %v944_v3 = vmax.f32 %v872_v55, 0.0  ;;  %v12280_v10 = vld [vmem:[#allocation2 + $0x68] sm:$0xff] }
 0x105   : >> { %11022 = vst [vmem:[#allocation2 + $0x80] sm:$0xff] %v12264_v51   ;;  %v10263_v18 = vld [vmem:[%s12100_s25 + $0x168] sm:$0xff] }
 0x10c   : >> { %v1385_v56 = vpop.f32.mrf.mxu0 }
 0x10d   : >> { %v1710_v57 = vpop.f32.mrf.mxu1 }
 0x10e   : >> { %v1711_v62 = vadd.f32 %v1710_v57, %v1385_v56 }
 0x10f   : >> { %1424 = vmatmul.bf16.gmra.mxu0 %v12185_v43 }
 0x110   : >> { %1749 = vmatmul.bf16.gmra.mxu1 %v1573_v42  ;;  %v1582_v42 = vsel %vm1484_vm15, %v1572_v52, %v1581_v44  ;;  %v1584_v52 = vshrl.u32 %v11320_v60, 16 }
 0x111   : >> { %2171 = vmatmul.bf16.gmra.mxu2 %v2002_v63 }
 0x112   : >> { %2644 = vmatmul.bf16.gmra.mxu3 %v2468_v4  ;;  %v2010_v4 = vsel %vm1926_vm7, %v2005_v48, %v2009_v49  ;;  %v2013_v48 = vor.u32 %v2011_v35, %v2009_v49  ;;  %v2019_v35 = vshrl.u32 %v12262_v7, 16 }
 0x114   : >> { %v2132_v11 = vpop.f32.mrf.mxu2  ;;  %v1387_v43 = vpop.f32.mrf.mxu0 }
 0x115   : >> { %v2605_v15 = vpop.f32.mrf.mxu3  ;;  %v2212_v16 = vadd.f32 %v2132_v11, %v1711_v62  ;;  %v1712_v20 = vpop.f32.mrf.mxu1  ;;  %v10264_v62 = vld [vmem:[%s12100_s25 + $0x170] sm:$0xff] }
 0x116   : >> { %v1713_v25 = vadd.f32 %v1712_v20, %v1387_v43  ;;  %3271 = vmatpush.bf16.msrb.mxu1 %v10264_v62  ;;  %v11322_v62 = vld [vmem:[#allocation2 + $0x64] sm:$0xff]  }
 0x117   : >> { %v12250_v47 = vadd.f32 %v2605_v15, %v2212_v16 }
 0x11a   : >> { %3272 = vmatpush.bf16.msrb.mxu1 %v10263_v18 }
 0x11c   : >> { %v2134_v61 = vpop.f32.mrf.mxu2  ;;  %v1390_v41 = vpop.f32.mrf.mxu0 }
 0x11d   : >> { %v2607_v53 = vpop.f32.mrf.mxu3  ;;  %v2213_v56 = vadd.f32 %v2134_v61, %v1713_v25  ;;  %v1715_v57 = vpop.f32.mrf.mxu1  ;;  %v2015_v25 = vshll.u32 %v12262_v7, 16 }
 0x11e   : >> { %v1716_v63 = vadd.f32 %v1715_v57, %v1390_v41 }
 0x11f   : >> { %v12259_v2 = vadd.f32 %v2607_v53, %v2213_v56  ;;  %1429 = vmatmul.bf16.gmra.mxu0 %v12194_v6  ;;  %v1586_v6 = vrot.slane %v1584_v52, 3  ;;  %v2017_v61 = vrot.slane %v2015_v25, 1  ;;  %v2485_v53 = vor.u32 %v2484_v54, %v2481_v40 }
 0x120   : >> { %1754 = vmatmul.bf16.gmra.mxu1 %v1582_v42  ;;  %v1596_v52 = vshll.u32 %v11322_v62, 16  ;;  %v2023_v25 = vshll.u32 %v12280_v10, 16  ;;  %v2490_v40 = vrot.slane %v2488_v13, 3 }
 0x121   : >> { %2176 = vmatmul.bf16.gmra.mxu2 %v2010_v4  ;;  %v1590_v46 = vor.u32 %v1589_v30, %v1586_v6  ;;  %v2018_v4 = vsel %vm1926_vm7, %v2013_v48, %v2017_v61 }
 0x122   : >> { %2649 = vmatmul.bf16.gmra.mxu3 %v2477_v0  ;;  %v2486_v0 = vsel %vm1484_vm15, %v2476_v17, %v2485_v53  ;;  %v10526_v17 = vpack.c.bf16 %v944_v3, %v943_v58  ;;  %v1598_v30 = vrot.slane %v1596_v52, 4  ;;  %v873_v52 = vld [vmem:[%s11871_s20 + $0x110] sm:$0xff] }
 0x123   : >> { %v1591_v12 = vsel %vm1484_vm15, %v1581_v44, %v1590_v46  ;;  %v1593_v44 = vshrl.u32 %v11322_v62, 16  ;;  %v945_v13 = vmax.f32 %v873_v52, 0.0 }
 0x124   : >> { %v2137_v11 = vpop.f32.mrf.mxu2  ;;  %v1392_v43 = vpop.f32.mrf.mxu0  ;;  %11023 = vst [vmem:[#allocation2 + $0x88] sm:$0xff] %v10526_v17  }
 0x125   : >> { %v2610_v15 = vpop.f32.mrf.mxu3  ;;  %v2214_v16 = vadd.f32 %v2137_v11, %v1716_v63  ;;  %v1717_v20 = vpop.f32.mrf.mxu1  ;;  %v2491_v11 = vshll.u32 %v11700_v1, 16  ;;  %v1595_v6 = vrot.slane %v1593_v44, 3  ;;  %v11324_v1 = vld [vmem:[#allocation2 + $0x6c] sm:$0xff]   ;;  %v11702_v44 = vld [vmem:[#allocation2 + $0x7c] sm:$0xff]  }
 0x126   : >> { %v1718_v39 = vadd.f32 %v1717_v20, %v1392_v43  ;;  %v1605_v17 = vshll.u32 %v11324_v1, 16 }
 0x127   : >> { %v12269_v45 = vadd.f32 %v2610_v15, %v2214_v16  ;;  %v2493_v54 = vrot.slane %v2491_v11, 4 }
 0x12c   : >> { %v2139_v56 = vpop.f32.mrf.mxu2  ;;  %v1395_v42 = vpop.f32.mrf.mxu0 }
 0x12d   : >> { %v2612_v41 = vpop.f32.mrf.mxu3  ;;  %v2215_v57 = vadd.f32 %v2139_v56, %v1718_v39  ;;  %v1720_v60 = vpop.f32.mrf.mxu1  ;;  %v10271_v56 = vld [vmem:[%s12100_s25 + $0x1a8] sm:$0xff] }
 0x12e   : >> { %v1721_v63 = vadd.f32 %v1720_v60, %v1395_v42  ;;  %3745 = vmatpush.bf16.msrb.mxu2 %v10271_v56  ;;  %v2025_v42 = vrot.slane %v2023_v25, 1  ;;  %v2494_v60 = vor.u32 %v2493_v54, %v2490_v40  ;;  %v2027_v25 = vshrl.u32 %v12280_v10, 16  ;;  %v11326_v10 = vld [vmem:[#allocation2 + $0x74] sm:$0xff]  }
 0x12f   : >> { %v12276_v49 = vadd.f32 %v2612_v41, %v2215_v57  ;;  %1434 = vmatmul.bf16.gmra.mxu0 %v12204_v50  ;;  %v1599_v41 = vor.u32 %v1598_v30, %v1595_v6  ;;  %v2021_v57 = vor.u32 %v2019_v35, %v2017_v61  ;;  %v874_v61 = vld [vmem:[%s11871_s20 + $0x118] sm:$0xff] }
 0x130   : >> { %1759 = vmatmul.bf16.gmra.mxu1 %v1591_v12  ;;  %v2495_v3 = vsel %vm1484_vm15, %v2485_v53, %v2494_v60  ;;  %v946_v11 = vmax.f32 %v874_v61, 0.0 }
 0x131   : >> { %2181 = vmatmul.bf16.gmra.mxu2 %v2018_v4  ;;  %v2026_v58 = vsel %vm1926_vm7, %v2021_v57, %v2025_v42 }
 0x132   : >> { %2654 = vmatmul.bf16.gmra.mxu3 %v2486_v0  ;;  %v1600_v0 = vsel %vm1484_vm15, %v1590_v46, %v1599_v41  ;;  %v1602_v46 = vshrl.u32 %v11324_v1, 16  ;;  %v12298_v53 = vpack.c.bf16 %v946_v11, %v945_v13  ;;  %v11704_v13 = vld [vmem:[#allocation2 + $0x84] sm:$0xff]  }
 0x134   : >> { %v2142_v15 = vpop.f32.mrf.mxu2  ;;  %v1397_v20 = vpop.f32.mrf.mxu0  ;;  %11024 = vst [vmem:[#allocation2 + $0x90] sm:$0xff] %v12298_v53  }
 0x135   : >> { %v2615_v16 = vpop.f32.mrf.mxu3  ;;  %v2216_v43 = vadd.f32 %v2142_v15, %v1721_v63  ;;  %v1722_v50 = vpop.f32.mrf.mxu1  ;;  %v12296_v15 = vld [vmem:[#allocation2 + $0x70] sm:$0xff] }
 0x136   : >> { %v1723_v39 = vadd.f32 %v1722_v50, %v1397_v20  ;;  %v2031_v54 = vshll.u32 %v12296_v15, 16 }
 0x137   : >> { %v12284_v48 = vadd.f32 %v2615_v16, %v2216_v43  ;;  %v2497_v16 = vshrl.u32 %v11702_v44, 16  ;;  %v2500_v43 = vshll.u32 %v11702_v44, 16 }
 0x139   : >> { %v2499_v56 = vrot.slane %v2497_v16, 3  ;;  %v2502_v57 = vrot.slane %v2500_v43, 4  ;;  %v12312_v16 = vld [vmem:[#allocation2 + $0x78] sm:$0xff]  ;;  %v2509_v43 = vshll.u32 %v11704_v13, 16 }
 0x13c   : >> { %v2144_v12 = vpop.f32.mrf.mxu2  ;;  %v1400_v7 = vpop.f32.mrf.mxu0 }
 0x13d   : >> { %v2617_v62 = vpop.f32.mrf.mxu3  ;;  %v2217_v63 = vadd.f32 %v2144_v12, %v1723_v39  ;;  %v1725_v4 = vpop.f32.mrf.mxu1  ;;  %v1607_v39 = vrot.slane %v1605_v17, 4  ;;  %v10234_v17 = vld [vmem:[%s12100_s25 + $0x100] sm:$0xff] }
 0x13e   : >> { %v1726_v55 = vadd.f32 %v1725_v4, %v1400_v7  ;;  %v2033_v7 = vrot.slane %v2031_v54, 1  ;;  %v2503_v4 = vor.u32 %v2502_v57, %v2499_v56  ;;  %2824 = vmatpush.bf16.msrb.mxu0 %v10234_v17  ;;  %v2511_v56 = vrot.slane %v2509_v43, 4  ;;  %v10280_v57 = vld [vmem:[%s12100_s25 + $0x1f0] sm:$0xff] }
 0x13f   : >> { %v12293_v8 = vadd.f32 %v2617_v62, %v2217_v63  ;;  %1439 = vmatmul.bf16.gmra.mxu0 %v12213_v14  ;;  %v1604_v14 = vrot.slane %v1602_v46, 3  ;;  %v2029_v63 = vor.u32 %v2027_v25, %v2025_v42  ;;  %v1611_v42 = vshrl.u32 %v11326_v10, 16  ;;  %v11705_v43 = vld [vmem:[#allocation2 + $0x8c] sm:$0xff]  }
 0x140   : >> { %1764 = vmatmul.bf16.gmra.mxu1 %v1600_v0  ;;  %v2504_v61 = vsel %vm1484_vm15, %v2494_v60, %v2503_v4  ;;  %v1614_v46 = vshll.u32 %v11326_v10, 16 }
 0x141   : >> { %2186 = vmatmul.bf16.gmra.mxu2 %v2026_v58  ;;  %v1608_v62 = vor.u32 %v1607_v39, %v1604_v14  ;;  %v2034_v52 = vsel %vm1926_vm7, %v2029_v63, %v2033_v7  ;;  %v2035_v39 = vshrl.u32 %v12296_v15, 16  ;;  %v10279_v15 = vld [vmem:[%s12100_s25 + $0x1e8] sm:$0xff] }
 0x142   : >> { %2659 = vmatmul.bf16.gmra.mxu3 %v2495_v3  ;;  %v1616_v14 = vrot.slane %v1614_v46, 4  ;;  %v10262_v46 = vld [vmem:[%s12100_s25 + $0x160] sm:$0xff] }
 0x143   : >> { %v1609_v3 = vsel %vm1484_vm15, %v1599_v41, %v1608_v62  ;;  %v2506_v41 = vshrl.u32 %v11704_v13, 16  ;;  %3273 = vmatpush.bf16.msrb.mxu1 %v10262_v46 }
 0x144   : >> { %v2147_v20 = vpop.f32.mrf.mxu2  ;;  %v1402_v30 = vpop.f32.mrf.mxu0 }
 0x145   : >> { %v2620_v50 = vpop.f32.mrf.mxu3  ;;  %v2218_v6 = vadd.f32 %v2147_v20, %v1726_v55  ;;  %v1727_v35 = vpop.f32.mrf.mxu1  ;;  %v10281_v20 = vld [vmem:[%s12100_s25 + $0x1f8] sm:$0xff]  ;;  %v2508_v54 = vrot.slane %v2506_v41, 3 }
 0x146   : >> { %v1728_v40 = vadd.f32 %v1727_v35, %v1402_v30  ;;  %3964 = vmatpush.bf16.msrb.mxu3 %v10281_v20  ;;  %v1613_v35 = vrot.slane %v1611_v42, 3  ;;  %v10278_v20 = vld [vmem:[%s12100_s25 + $0x1e0] sm:$0xff] }
 0x147   : >> { %v12303_v12 = vadd.f32 %v2620_v50, %v2218_v6 }
 0x14a   : >> { %3965 = vmatpush.bf16.msrb.mxu3 %v10280_v57 }
 0x14c   : >> { %v2149_v0 = vpop.f32.mrf.mxu2  ;;  %v1405_v55 = vpop.f32.mrf.mxu0 }
 0x14d   : >> { %v2622_v1 = vpop.f32.mrf.mxu3  ;;  %v2219_v18 = vadd.f32 %v2149_v0, %v1728_v40  ;;  %v1730_v58 = vpop.f32.mrf.mxu1  ;;  %v2039_v40 = vshll.u32 %v12312_v16, 16  ;;  %v10270_v0 = vld [vmem:[%s12100_s25 + $0x1a0] sm:$0xff] }
 0x14e   : >> { %v1731_v44 = vadd.f32 %v1730_v58, %v1405_v55  ;;  %3746 = vmatpush.bf16.msrb.mxu2 %v10270_v0  ;;  %v12323_v58 = vor.u32 %v2511_v56, %v2508_v54  ;;  %3966 = vmatpush.bf16.msrb.mxu3 %v10279_v15 }
 0x14f   : >> { %v12308_v11 = vadd.f32 %v2622_v1, %v2219_v18  ;;  %1444 = vmatmul.bf16.gmra.mxu0 %v12223_v59  ;;  %v12321_v1 = vor.u32 %v1616_v14, %v1613_v35  ;;  %v2037_v18 = vor.u32 %v2035_v39, %v2033_v7  ;;  %v2041_v55 = vrot.slane %v2039_v40, 1  ;;  %v10261_v35 = vld [vmem:[%s12100_s25 + $0x158] sm:$0xff]  ;;  %v10268_v40 = vld [vmem:[%s12100_s25 + $0x190] sm:$0xff] }
 0x150   : >> { %1769 = vmatmul.bf16.gmra.mxu1 %v1609_v3  ;;  %v2513_v41 = vsel %vm1484_vm15, %v2503_v4, %v12323_v58  ;;  %v2518_v4 = vshll.u32 %v11705_v43, 16  ;;  %v10277_v14 = vld [vmem:[%s12100_s25 + $0x1d8] sm:$0xff] }
 0x151   : >> { %2191 = vmatmul.bf16.gmra.mxu2 %v2034_v52  ;;  %v1618_v42 = vsel %vm1484_vm15, %v1608_v62, %v12321_v1  ;;  %v2042_v7 = vsel %vm1926_vm7, %v2037_v18, %v2041_v55  ;;  %v10269_v62 = vld [vmem:[%s12100_s25 + $0x198] sm:$0xff]  ;;  %3274 = vmatpush.bf16.msrb.mxu1 %v10261_v35  ;;  %v2043_v18 = vshrl.u32 %v12312_v16, 16 }
 0x152   : >> { %2664 = vmatmul.bf16.gmra.mxu3 %v2504_v61  ;;  %3747 = vmatpush.bf16.msrb.mxu2 %v10269_v62  ;;  %v1822_v62 = vld [vmem:[#allocation2 + $0x88] sm:$0x1] }
 0x153   : >> { %3967 = vmatpush.bf16.msrb.mxu3 %v10278_v20  ;;  %v10259_v20 = vld [vmem:[%s12100_s25 + $0x148] sm:$0xff] }
 0x154   : >> { %v2152_v60 = vpop.f32.mrf.mxu2  ;;  %v1407_v30 = vpop.f32.mrf.mxu0 }
 0x155   : >> { %v2625_v50 = vpop.f32.mrf.mxu3  ;;  %v2220_v6 = vadd.f32 %v2152_v60, %v1731_v44  ;;  %v1732_v59 = vpop.f32.mrf.mxu1  ;;  %v11327_v44 = vld [vmem:[#allocation2 + $0x7c] sm:$0xff]  }
 0x156   : >> { %v1733_v25 = vadd.f32 %v1732_v59, %v1407_v30  ;;  %v12337_v30 = vld [vmem:[#allocation2 + $0x80] sm:$0xff]  ;;  %v2515_v59 = vshrl.u32 %v11705_v43, 16  ;;  %3748 = vmatpush.bf16.msrb.mxu2 %v10268_v40  ;;  %v10750_v43 = vunpack.c.h.b16 %v12298_v53 }
 0x157   : >> { %v12318_v63 = vadd.f32 %v2625_v50, %v2220_v6  ;;  %v1620_v50 = vshrl.u32 %v11327_v44, 16  ;;  %v1623_v6 = vshll.u32 %v11327_v44, 16  ;;  %v2047_v15 = vshll.u32 %v12337_v30, 16  ;;  %3968 = vmatpush.bf16.msrb.mxu3 %v10277_v14 }
 0x158   : >> { %v2520_v44 = vrot.slane %v2518_v4, 4  ;;  %v10266_v4 = vld [vmem:[%s12100_s25 + $0x180] sm:$0xff] }
 0x159   : >> { %v1625_v0 = vrot.slane %v1623_v6, 4  ;;  %v2049_v16 = vrot.slane %v2047_v15, 1 }
 0x15c   : >> { %v2154_v3 = vpop.f32.mrf.mxu2  ;;  %v1410_v61 = vpop.f32.mrf.mxu0 }
 0x15d   : >> { %v2627_v10 = vpop.f32.mrf.mxu3  ;;  %v2221_v52 = vadd.f32 %v2154_v3, %v1733_v25  ;;  %v1735_v13 = vpop.f32.mrf.mxu1 }
 0x15e   : >> { %v1736_v17 = vadd.f32 %v1735_v13, %v1410_v61  ;;  %v10276_v61 = vld [vmem:[%s12100_s25 + $0x1d0] sm:$0xff] }
 0x15f   : >> { %v12333_v60 = vadd.f32 %v2627_v10, %v2221_v52  ;;  %1449 = vmatmul.bf16.gmra.mxu0 %v12234_v5  ;;  %v1622_v5 = vrot.slane %v1620_v50, 3  ;;  %v2517_v10 = vrot.slane %v2515_v59, 3  ;;  %v10260_v52 = vld [vmem:[%s12100_s25 + $0x150] sm:$0xff]  ;;  %3969 = vmatpush.bf16.msrb.mxu3 %v10276_v61  ;;  %v10275_v50 = vld [vmem:[%s12100_s25 + $0x1c8] sm:$0xff] }
 0x160   : >> { %1774 = vmatmul.bf16.gmra.mxu1 %v1618_v42  ;;  %v10267_v42 = vld [vmem:[%s12100_s25 + $0x188] sm:$0xff] }
 0x161   : >> { %2196 = vmatmul.bf16.gmra.mxu2 %v2042_v7  ;;  %3275 = vmatpush.bf16.msrb.mxu1 %v10260_v52  ;;  %v12349_v46 = vor.u32 %v1625_v0, %v1622_v5  ;;  %v10686_v7 = vunpack.c.h.b16 %v12264_v51  ;;  %v10274_v0 = vld [vmem:[%s12100_s25 + $0x1c0] sm:$0xff] }
 0x162   : >> { %2669 = vmatmul.bf16.gmra.mxu3 %v2513_v41  ;;  %v12352_v41 = vor.u32 %v2520_v44, %v2517_v10  ;;  %3749 = vmatpush.bf16.msrb.mxu2 %v10267_v42 }
 0x163   : >> { %3970 = vmatpush.bf16.msrb.mxu3 %v10275_v50 }
 0x164   : >> { %v2157_v39 = vpop.f32.mrf.mxu2  ;;  %v1412_v56 = vpop.f32.mrf.mxu0  ;;  %v2522_v40 = vsel %vm1484_vm15, %v12323_v58, %v12352_v41 }
 0x165   : >> { %v2630_v25 = vpop.f32.mrf.mxu3  ;;  %v2222_v54 = vadd.f32 %v2157_v39, %v1736_v17  ;;  %v1737_v57 = vpop.f32.mrf.mxu1  ;;  %v2045_v17 = vor.u32 %v2043_v18, %v2041_v55  ;;  %3276 = vmatpush.bf16.msrb.mxu1 %v10259_v20  ;;  %v1627_v39 = vsel %vm1484_vm15, %v12321_v1, %v12349_v46 }
 0x166   : >> { %v1738_v3 = vadd.f32 %v1737_v57, %v1412_v56  ;;  %v2379_v56 = vpack.c.b16 %v10750_v43, %v10750_v43  ;;  %3750 = vmatpush.bf16.msrb.mxu2 %v10266_v4  ;;  %v10258_v57 = vld [vmem:[%s12100_s25 + $0x140] sm:$0xff] }
 0x167   : >> { %v12346_v13 = vadd.f32 %v2630_v25, %v2222_v54  ;;  %v2050_v53 = vsel %vm1926_vm7, %v2045_v17, %v2049_v16  ;;  %v1483_v25 = vpack.c.b16 %v10686_v7, %v10686_v7  ;;  %v1908_v54 = vunpack.c.l.b16 %v1822_v62  ;;  %3971 = vmatpush.bf16.msrb.mxu3 %v10274_v0 }
 0x168   : >> { %v2524_v44 = vshrl.u32 %v2379_v56, 16  ;;  %v2527_v52 = vshll.u32 %v2379_v56, 16 }
 0x169   : >> { %v1629_v1 = vshrl.u32 %v1483_v25, 16  ;;  %v1632_v15 = vshll.u32 %v1483_v25, 16  ;;  %v1925_v10 = vpack.c.b16 %v1908_v54, %v1908_v54  ;;  %3277 = vmatpush.bf16.msrb.mxu1 %v10258_v57 }
 0x16b   : >> { %v1631_v43 = vrot.slane %v1629_v1, 3  ;;  %v1634_v20 = vrot.slane %v1632_v15, 4  ;;  %v2055_v62 = vshll.u32 %v1925_v10, 16  ;;  %v10242_v1 = vld [vmem:[#allocation2 + $0x18] sm:$0xff] }
 0x16c   : >> { %v2159_v6 = vpop.f32.mrf.mxu2  ;;  %v1415_v55 = vpop.f32.mrf.mxu0 }
 0x16d   : >> { %v2632_v59 = vpop.f32.mrf.mxu3  ;;  %v2223_v35 = vadd.f32 %v2159_v6, %v1738_v3  ;;  %v1740_v14 = vpop.f32.mrf.mxu1  ;;  %v10305_v3 = vld [vmem:[%s12100_s25 + $0x238] sm:$0xff]  ;;  %v2526_v6 = vrot.slane %v2524_v44, 3  ;;  %v11709_v44 = vld [vmem:[#allocation2 + $0x2c] sm:$0xff]  }
 0x16e   : >> { %v1741_v5 = vadd.f32 %v1740_v14, %v1415_v55  ;;  %4417 = vmatpush.bf16.msra.mxu0 %v10305_v3  ;;  %v11409_v55 = vld [vmem:[#allocation2 + $0x24] sm:$0x8]  ;;  %v11707_v14 = vld [vmem:[#allocation2 + $0x24] sm:$0xf0]  }
 0x16f   : >> { %v12367_v18 = vadd.f32 %v2632_v59, %v2223_v35  ;;  %1454 = vmatmul.bf16.gmra.mxu0 %v12244_v9  ;;  %v2051_v9 = vshrl.u32 %v12337_v30, 16  ;;  %v2529_v59 = vrot.slane %v2527_v52, 4  ;;  %v1635_v35 = vor.u32 %v1634_v20, %v1631_v43 }
 0x170   : >> { %1779 = vmatmul.bf16.gmra.mxu1 %v1627_v39  ;;  %v11410_v54 = vor.u32 %v11707_v14, %v11409_v55 }
 0x171   : >> { %2201 = vmatmul.bf16.gmra.mxu2 %v2050_v53  ;;  %v2053_v39 = vor.u32 %v2051_v9, %v2049_v16  ;;  %v2057_v53 = vrot.slane %v2055_v62, 1  ;;  %v2530_v25 = vor.u32 %v2529_v59, %v2526_v6  ;;  %v1636_v30 = vsel %vm1484_vm15, %v12349_v46, %v1635_v35 }
 0x172   : >> { %2674 = vmatmul.bf16.gmra.mxu3 %v2522_v40  ;;  %v3528_v52 = vshrl.u32 %v11410_v54, 16  ;;  %v3536_v46 = vshrl.u32 %v11709_v44, 16  ;;  %v3075_v62 = vshrl.u32 %v10242_v1, 16 }
 0x173   : >> { %v2058_v3 = vsel %vm1926_vm7, %v2053_v39, %v2057_v53  ;;  %v2531_v10 = vsel %vm1484_vm15, %v12352_v41, %v2530_v25 }
 0x174   : >> { %v2162_v58 = vpop.f32.mrf.mxu2  ;;  %v1417_v17 = vpop.f32.mrf.mxu0  ;;  %v3530_v20 = vrot.slane %v3528_v52, 3  ;;  %v3538_v55 = vrot.slane %v3536_v46, 3  ;;  %v11711_v52 = vld [vmem:[#allocation2 + $0x34] sm:$0xff]  }
 0x175   : >> { %v2635_v61 = vpop.f32.mrf.mxu3  ;;  %v2224_v42 = vadd.f32 %v2162_v58, %v1741_v5  ;;  %v1742_v7 = vpop.f32.mrf.mxu1  ;;  %v10243_v58 = vld [vmem:[#allocation2 + $0x20] sm:$0xff]  ;;  %v10304_v46 = vld [vmem:[%s12100_s25 + $0x230] sm:$0xff] }
 0x176   : >> { %v1743_v50 = vadd.f32 %v1742_v7, %v1417_v17  ;;  %v3539_v17 = vshll.u32 %v11709_v44, 16  ;;  %v3082_v59 = vshll.u32 %v10243_v58, 16  ;;  %v12386_v44 = vld [vmem:[#allocation2 + $0x28] sm:$0xff]   ;;  %4418 = vmatpush.bf16.msra.mxu0 %v10304_v46 }
 0x177   : >> { %v12372_v4 = vadd.f32 %v2635_v61, %v2224_v42  ;;  %v3077_v61 = vshll.u32 %v10242_v1, 16  ;;  %v3531_v42 = vshll.u32 %v11410_v54, 16 }
 0x178   : >> { %v3541_v14 = vrot.slane %v3539_v17, 4  ;;  %v3084_v25 = vrot.slane %v3082_v59, 1  ;;  %v3545_v17 = vshrl.u32 %v11711_v52, 16 }
 0x179   : >> { %v3079_v6 = vrot.slane %v3077_v61, 1 }
 0x17b   : >> { %v3080_v53 = vor.u32 %v3079_v6, %v3075_v62  ;;  %v3086_v62 = vshrl.u32 %v10243_v58, 16 }
 0x17c   : >> { %v2164_v40 = vpop.f32.mrf.mxu2  ;;  %v1420_v57 = vpop.f32.mrf.mxu0 }
 0x17d   : >> { %v2637_v5 = vpop.f32.mrf.mxu3  ;;  %v2225_v56 = vadd.f32 %v2164_v40, %v1743_v50  ;;  %v1745_v0 = vpop.f32.mrf.mxu1  ;;  %v3085_v1 = vsel %vm1926_vm7, %v3080_v53, %v3084_v25 }
 0x17e   : >> { %v1746_v15 = vadd.f32 %v1745_v0, %v1420_v57 }
 0x17f   : >> { %v12379_v16 = vadd.f32 %v2637_v5, %v2225_v56  ;;  %1459 = vmatmul.bf16.gmra.mxu0 %v12264_v51  ;;  %v3533_v51 = vrot.slane %v3531_v42, 4  ;;  %v3542_v5 = vor.u32 %v3541_v14, %v3538_v55  ;;  %v10244_v42 = vld [vmem:[#allocation2 + $0x28] sm:$0xff]  ;;  %v3088_v14 = vor.u32 %v3086_v62, %v3084_v25  ;;  %v10245_v25 = vld [vmem:[#allocation2 + $0x30] sm:$0xff] }
 0x180   : >> { %1784 = vmatmul.bf16.gmra.mxu1 %v1636_v30  ;;  %v3090_v6 = vshll.u32 %v10244_v42, 16  ;;  %v3094_v62 = vshrl.u32 %v10244_v42, 16 }
 0x181   : >> { %2206 = vmatmul.bf16.gmra.mxu2 %v2058_v3  ;;  %v3534_v40 = vor.u32 %v3533_v51, %v3530_v20 }
 0x182   : >> { %2679 = vmatmul.bf16.gmra.mxu3 %v2531_v10  ;;  %v3092_v53 = vrot.slane %v3090_v6, 1 }
 0x183   : >> { %v3543_v10 = vsel %vm1484_vm15, %v3534_v40, %v3542_v5 }
 0x184   : >> { %v2167_v7 = vpop.f32.mrf.mxu2  ;;  %v1422_v50 = vpop.f32.mrf.mxu0 }
 0x185   : >> { %v2640_v43 = vpop.f32.mrf.mxu3  ;;  %v2226_v9 = vadd.f32 %v2167_v7, %v1746_v15  ;;  %v1747_v41 = vpop.f32.mrf.mxu1  ;;  %v11138_v15 = vld [vmem:[#allocation2 + $0x18] sm:$0xff]   ;;  %v3548_v7 = vshll.u32 %v11711_v52, 16 }
 0x186   : >> { %v1748_v35 = vadd.f32 %v1747_v41, %v1422_v50  ;;  %v11713_v52 = vld [vmem:[#allocation2 + $0x3c] sm:$0xff]  }
 0x187   : >> { %v12382_v39 = vadd.f32 %v2640_v43, %v2226_v9  ;;  %v3550_v51 = vrot.slane %v3548_v7, 4  ;;  %v3557_v7 = vshll.u32 %v11713_v52, 16 }
 0x18c   : >> { %v2169_v54 = vpop.f32.mrf.mxu2  ;;  %v1425_v0 = vpop.f32.mrf.mxu0 }
 0x18d   : >> { %v2642_v56 = vpop.f32.mrf.mxu3  ;;  %v2227_v57 = vadd.f32 %v2169_v54, %v1748_v35  ;;  %v1750_v30 = vpop.f32.mrf.mxu1  ;;  %v3547_v35 = vrot.slane %v3545_v17, 3  ;;  %v3554_v17 = vshrl.u32 %v11713_v52, 16  ;;  %v12405_v52 = vld [vmem:[#allocation2 + $0x38] sm:$0xff]  }
 0x18e   : >> { %v1751_v3 = vadd.f32 %v1750_v30, %v1425_v0 }
 0x18f   : >> { %v12388_v61 = vadd.f32 %v2642_v56, %v2227_v57  ;;  %2825 = vmatmul.bf16.vlgmr.msrb.gmra.mxu0 %v11138_v15  ;;  %v3551_v40 = vor.u32 %v3550_v51, %v3547_v35  ;;  %v11139_v15 = vld [vmem:[#allocation2 + $0x20] sm:$0xff]   ;;  %v3559_v35 = vrot.slane %v3557_v7, 4 }
 0x190   : >> { %3278 = vmatmul.bf16.vlgmr.msrb.gmra.mxu1 %v3085_v1  ;;  %v3093_v1 = vsel %vm1926_vm7, %v3088_v14, %v3092_v53  ;;  %v3096_v14 = vor.u32 %v3094_v62, %v3092_v53  ;;  %v10246_v53 = vld [vmem:[#allocation2 + $0x38] sm:$0xff] }
 0x191   : >> { %3751 = vmatmul.bf16.vlgmr.msrb.gmra.mxu2 %v3543_v10  ;;  %v3552_v58 = vsel %vm1484_vm15, %v3542_v5, %v3551_v40  ;;  %v12396_v10 = vld [vmem:[#allocation2 + $0x30] sm:$0xff]   ;;  %v3098_v5 = vshll.u32 %v10245_v25, 16 }
 0x192   : >> { %3972 = vmatmul.bf16.vlgmr.msrb.gmra.mxu3 %v12386_v44 }
 0x194   : >> { %v2172_v43 = vpop.f32.mrf.mxu2  ;;  %v1427_v50 = vpop.f32.mrf.mxu0 }
 0x195   : >> { %v2645_v20 = vpop.f32.mrf.mxu3  ;;  %v2228_v9 = vadd.f32 %v2172_v43, %v1751_v3  ;;  %v1752_v41 = vpop.f32.mrf.mxu1 }
 0x196   : >> { %v1753_v59 = vadd.f32 %v1752_v41, %v1427_v50 }
 0x197   : >> { %v12392_v55 = vadd.f32 %v2645_v20, %v2228_v9 }
 0x19c   : >> { %v2174_v54 = vpop.f32.mrf.mxu2  ;;  %v1430_v0 = vpop.f32.mrf.mxu0 }
 0x19d   : >> { %v2647_v56 = vpop.f32.mrf.mxu3  ;;  %v2229_v57 = vadd.f32 %v2174_v54, %v1753_v59  ;;  %v1755_v30 = vpop.f32.mrf.mxu1  ;;  %v3556_v59 = vrot.slane %v3554_v17, 3  ;;  %v3100_v54 = vrot.slane %v3098_v5, 1  ;;  %v11715_v17 = vld [vmem:[#allocation2 + $0x44] sm:$0xff]  }
 0x19e   : >> { %v1756_v3 = vadd.f32 %v1755_v30, %v1430_v0 }
 0x19f   : >> { %v12398_v46 = vadd.f32 %v2647_v56, %v2229_v57  ;;  %2830 = vmatmul.bf16.gmra.mxu0 %v11139_v15  ;;  %v3560_v56 = vor.u32 %v3559_v35, %v3556_v59  ;;  %v3106_v59 = vshll.u32 %v10246_v53, 16 }
 0x1a0   : >> { %3283 = vmatmul.bf16.gmra.mxu1 %v3093_v1 }
 0x1a1   : >> { %3756 = vmatmul.bf16.gmra.mxu2 %v3552_v58  ;;  %v3561_v42 = vsel %vm1484_vm15, %v3551_v40, %v3560_v56 }
 0x1a2   : >> { %3977 = vmatmul.bf16.gmra.mxu3 %v12396_v10 }
 0x1a4   : >> { %v2177_v43 = vpop.f32.mrf.mxu2  ;;  %v1432_v50 = vpop.f32.mrf.mxu0 }
 0x1a5   : >> { %v2650_v20 = vpop.f32.mrf.mxu3  ;;  %v2230_v9 = vadd.f32 %v2177_v43, %v1756_v3  ;;  %v1757_v41 = vpop.f32.mrf.mxu1  ;;  %v3101_v3 = vsel %vm1926_vm7, %v3096_v14, %v3100_v54  ;;  %v10303_v43 = vld [vmem:[%s12100_s25 + $0x228] sm:$0xff] }
 0x1a6   : >> { %v1758_v6 = vadd.f32 %v1757_v41, %v1432_v50  ;;  %4419 = vmatpush.bf16.msra.mxu0 %v10303_v43 }
 0x1a7   : >> { %v12401_v51 = vadd.f32 %v2650_v20, %v2230_v9  ;;  %v3563_v20 = vshrl.u32 %v11715_v17, 16  ;;  %v3566_v9 = vshll.u32 %v11715_v17, 16 }
 0x1a9   : >> { %v3565_v14 = vrot.slane %v3563_v20, 3 }
 0x1ac   : >> { %v2179_v57 = vpop.f32.mrf.mxu2  ;;  %v1435_v15 = vpop.f32.mrf.mxu0 }
 0x1ad   : >> { %v2652_v0 = vpop.f32.mrf.mxu3  ;;  %v2231_v30 = vadd.f32 %v2179_v57, %v1758_v6  ;;  %v1760_v1 = vpop.f32.mrf.mxu1  ;;  %v3102_v6 = vshrl.u32 %v10245_v25, 16  ;;  %v3568_v57 = vrot.slane %v3566_v9, 4  ;;  %v12416_v25 = vld [vmem:[#allocation2 + $0x40] sm:$0xff]  }
 0x1ae   : >> { %v1761_v58 = vadd.f32 %v1760_v1, %v1435_v15 }
 0x1af   : >> { %v12407_v7 = vadd.f32 %v2652_v0, %v2231_v30  ;;  %2835 = vmatmul.bf16.gmra.mxu0 %v12386_v44  ;;  %v3104_v0 = vor.u32 %v3102_v6, %v3100_v54  ;;  %v3108_v30 = vrot.slane %v3106_v59, 1  ;;  %v3569_v15 = vor.u32 %v3568_v57, %v3565_v14  ;;  %v10247_v54 = vld [vmem:[#allocation2 + $0x40] sm:$0xff] }
 0x1b0   : >> { %3288 = vmatmul.bf16.gmra.mxu1 %v3101_v3  ;;  %v3114_v14 = vshll.u32 %v10247_v54, 16 }
 0x1b1   : >> { %3761 = vmatmul.bf16.gmra.mxu2 %v3561_v42  ;;  %v3109_v38 = vsel %vm1926_vm7, %v3104_v0, %v3108_v30 }
 0x1b2   : >> { %3982 = vmatmul.bf16.gmra.mxu3 %v12405_v52 }
 0x1b4   : >> { %v2182_v50 = vpop.f32.mrf.mxu2  ;;  %v1437_v40 = vpop.f32.mrf.mxu0 }
 0x1b5   : >> { %v2655_v41 = vpop.f32.mrf.mxu3  ;;  %v2232_v62 = vadd.f32 %v2182_v50, %v1761_v58  ;;  %v1762_v5 = vpop.f32.mrf.mxu1  ;;  %v3570_v50 = vsel %vm1484_vm15, %v3560_v56, %v3569_v15  ;;  %v3110_v56 = vshrl.u32 %v10246_v53, 16 }
 0x1b6   : >> { %v1763_v35 = vadd.f32 %v1762_v5, %v1437_v40  ;;  %v11717_v40 = vld [vmem:[#allocation2 + $0x4c] sm:$0xff]  }
 0x1b7   : >> { %v12412_v44 = vadd.f32 %v2655_v41, %v2232_v62  ;;  %v3572_v9 = vshrl.u32 %v11717_v40, 16  ;;  %v3575_v41 = vshll.u32 %v11717_v40, 16 }
 0x1b9   : >> { %v3574_v0 = vrot.slane %v3572_v9, 3  ;;  %v11719_v9 = vld [vmem:[#allocation2 + $0x54] sm:$0xff]  }
 0x1bc   : >> { %v2184_v1 = vpop.f32.mrf.mxu2  ;;  %v1440_v17 = vpop.f32.mrf.mxu0 }
 0x1bd   : >> { %v2657_v3 = vpop.f32.mrf.mxu3  ;;  %v2233_v42 = vadd.f32 %v2184_v1, %v1763_v35  ;;  %v1765_v43 = vpop.f32.mrf.mxu1  ;;  %v3577_v1 = vrot.slane %v3575_v41, 4 }
 0x1be   : >> { %v1766_v58 = vadd.f32 %v1765_v43, %v1440_v17 }
 0x1bf   : >> { %v12418_v20 = vadd.f32 %v2657_v3, %v2233_v42  ;;  %2840 = vmatmul.bf16.gmra.mxu0 %v12396_v10  ;;  %v3112_v10 = vor.u32 %v3110_v56, %v3108_v30  ;;  %v3578_v42 = vor.u32 %v3577_v1, %v3574_v0  ;;  %v10248_v30 = vld [vmem:[#allocation2 + $0x48] sm:$0xff] }
 0x1c0   : >> { %3293 = vmatmul.bf16.gmra.mxu1 %v3109_v38  ;;  %v3116_v38 = vrot.slane %v3114_v14, 1  ;;  %v3122_v0 = vshll.u32 %v10248_v30, 16 }
 0x1c1   : >> { %3766 = vmatmul.bf16.gmra.mxu2 %v3570_v50  ;;  %v3579_v53 = vsel %vm1484_vm15, %v3569_v15, %v3578_v42 }
 0x1c2   : >> { %3987 = vmatmul.bf16.gmra.mxu3 %v12416_v25 }
 0x1c4   : >> { %v2187_v62 = vpop.f32.mrf.mxu2  ;;  %v1442_v59 = vpop.f32.mrf.mxu0 }
 0x1c5   : >> { %v2660_v5 = vpop.f32.mrf.mxu3  ;;  %v2234_v6 = vadd.f32 %v2187_v62, %v1766_v58  ;;  %v1767_v35 = vpop.f32.mrf.mxu1  ;;  %v3117_v58 = vsel %vm1926_vm7, %v3112_v10, %v3116_v38 }
 0x1c6   : >> { %v1768_v57 = vadd.f32 %v1767_v35, %v1442_v59  ;;  %v3584_v59 = vshll.u32 %v11719_v9, 16 }
 0x1c7   : >> { %v12422_v3 = vadd.f32 %v2660_v5, %v2234_v6  ;;  %v10302_v5 = vld [vmem:[%s12100_s25 + $0x220] sm:$0xff]  ;;  %v3581_v6 = vshrl.u32 %v11719_v9, 16 }
 0x1c8   : >> { %4420 = vmatpush.bf16.msra.mxu0 %v10302_v5 }
 0x1c9   : >> { %v3583_v10 = vrot.slane %v3581_v6, 3 }
 0x1cc   : >> { %v2189_v17 = vpop.f32.mrf.mxu2  ;;  %v1445_v40 = vpop.f32.mrf.mxu0 }
 0x1cd   : >> { %v2662_v43 = vpop.f32.mrf.mxu3  ;;  %v2235_v50 = vadd.f32 %v2189_v17, %v1768_v57  ;;  %v1770_v28 = vpop.f32.mrf.mxu1  ;;  %v3118_v57 = vshrl.u32 %v10247_v54, 16  ;;  %v3586_v17 = vrot.slane %v3584_v59, 4  ;;  %v12437_v54 = vld [vmem:[#allocation2 + $0x50] sm:$0xff]  }
 0x1ce   : >> { %v1771_v62 = vadd.f32 %v1770_v28, %v1445_v40 }
 0x1cf   : >> { %v12428_v41 = vadd.f32 %v2662_v43, %v2235_v50  ;;  %2845 = vmatmul.bf16.gmra.mxu0 %v12405_v52  ;;  %v3120_v43 = vor.u32 %v3118_v57, %v3116_v38  ;;  %v3124_v50 = vrot.slane %v3122_v0, 1  ;;  %v3587_v40 = vor.u32 %v3586_v17, %v3583_v10  ;;  %v10249_v38 = vld [vmem:[#allocation2 + $0x50] sm:$0xff] }
 0x1d0   : >> { %3298 = vmatmul.bf16.gmra.mxu1 %v3117_v58  ;;  %v3130_v10 = vshll.u32 %v10249_v38, 16 }
 0x1d1   : >> { %3771 = vmatmul.bf16.gmra.mxu2 %v3579_v53  ;;  %v3125_v36 = vsel %vm1926_vm7, %v3120_v43, %v3124_v50 }
 0x1d2   : >> { %3992 = vmatmul.bf16.gmra.mxu3 %v12426_v37 }
 0x1d4   : >> { %v2192_v35 = vpop.f32.mrf.mxu2  ;;  %v1447_v15 = vpop.f32.mrf.mxu0 }
 0x1d5   : >> { %v2665_v28 = vpop.f32.mrf.mxu3  ;;  %v2236_v56 = vadd.f32 %v2192_v35, %v1771_v62  ;;  %v1772_v14 = vpop.f32.mrf.mxu1  ;;  %v3588_v35 = vsel %vm1484_vm15, %v3578_v42, %v3587_v40  ;;  %v3126_v42 = vshrl.u32 %v10248_v30, 16 }
 0x1d6   : >> { %v1773_v1 = vadd.f32 %v1772_v14, %v1447_v15  ;;  %v11721_v15 = vld [vmem:[#allocation2 + $0x5c] sm:$0xff]  }
 0x1d7   : >> { %v12433_v52 = vadd.f32 %v2665_v28, %v2236_v56  ;;  %v3590_v59 = vshrl.u32 %v11721_v15, 16  ;;  %v3593_v28 = vshll.u32 %v11721_v15, 16 }
 0x1d9   : >> { %v3592_v43 = vrot.slane %v3590_v59, 3  ;;  %v11723_v59 = vld [vmem:[#allocation2 + $0x64] sm:$0xff]  }
 0x1dc   : >> { %v2194_v58 = vpop.f32.mrf.mxu2  ;;  %v1450_v9 = vpop.f32.mrf.mxu0 }
 0x1dd   : >> { %v2667_v53 = vpop.f32.mrf.mxu3  ;;  %v2237_v27 = vadd.f32 %v2194_v58, %v1773_v1  ;;  %v1775_v5 = vpop.f32.mrf.mxu1 }
 0x1de   : >> { %v1776_v62 = vadd.f32 %v1775_v5, %v1450_v9 }
 0x1df   : >> { %v12439_v6 = vadd.f32 %v2667_v53, %v2237_v27  ;;  %2850 = vmatmul.bf16.gmra.mxu0 %v12416_v25  ;;  %v3595_v27 = vrot.slane %v3593_v28, 4  ;;  %v3128_v25 = vor.u32 %v3126_v42, %v3124_v50  ;;  %v10250_v50 = vld [vmem:[#allocation2 + $0x58] sm:$0xff] }
 0x1e0   : >> { %3303 = vmatmul.bf16.gmra.mxu1 %v3125_v36  ;;  %v3132_v36 = vrot.slane %v3130_v10, 1 }
 0x1e1   : >> { %3776 = vmatmul.bf16.gmra.mxu2 %v3588_v35  ;;  %v3596_v53 = vor.u32 %v3595_v27, %v3592_v43  ;;  %v3138_v43 = vshll.u32 %v10250_v50, 16 }
 0x1e2   : >> { %3997 = vmatmul.bf16.gmra.mxu3 %v12437_v54 }
 0x1e3   : >> { %v3597_v30 = vsel %vm1484_vm15, %v3587_v40, %v3596_v53 }
 0x1e4   : >> { %v2197_v56 = vpop.f32.mrf.mxu2  ;;  %v1452_v0 = vpop.f32.mrf.mxu0 }
 0x1e5   : >> { %v2670_v14 = vpop.f32.mrf.mxu3  ;;  %v2238_v57 = vadd.f32 %v2197_v56, %v1776_v62  ;;  %v1777_v1 = vpop.f32.mrf.mxu1  ;;  %v3133_v62 = vsel %vm1926_vm7, %v3128_v25, %v3132_v36 }
 0x1e6   : >> { %v1778_v17 = vadd.f32 %v1777_v1, %v1452_v0  ;;  %v3602_v0 = vshll.u32 %v11723_v59, 16 }
 0x1e7   : >> { %v12443_v58 = vadd.f32 %v2670_v14, %v2238_v57  ;;  %v10301_v14 = vld [vmem:[%s12100_s25 + $0x218] sm:$0xff]  ;;  %v3599_v57 = vshrl.u32 %v11723_v59, 16 }
 0x1e8   : >> { %4421 = vmatpush.bf16.msra.mxu0 %v10301_v14  ;;  %v3604_v25 = vrot.slane %v3602_v0, 4  ;;  %v10314_v0 = vld [vmem:[%s12461_s29 + $0x38] sm:$0xff] }
 0x1e9   : >> { %4653 = vmatpush.bf16.msra.mxu1 %v10314_v0 }
 0x1ec   : >> { %v2199_v9 = vpop.f32.mrf.mxu2  ;;  %v1455_v15 = vpop.f32.mrf.mxu0 }
 0x1ed   : >> { %v2672_v5 = vpop.f32.mrf.mxu3  ;;  %v2239_v35 = vadd.f32 %v2199_v9, %v1778_v17  ;;  %v1780_v26 = vpop.f32.mrf.mxu1  ;;  %v3134_v17 = vshrl.u32 %v10249_v38, 16  ;;  %4654 = vmatpush.bf16.msra.mxu1 %v10313_v22 }
 0x1ee   : >> { %v1781_v56 = vadd.f32 %v1780_v26, %v1455_v15  ;;  %v3140_v15 = vrot.slane %v3138_v43, 1 }
 0x1ef   : >> { %v12449_v28 = vadd.f32 %v2672_v5, %v2239_v35  ;;  %2855 = vmatmul.bf16.gmra.mxu0 %v12426_v37  ;;  %v3601_v37 = vrot.slane %v3599_v57, 3  ;;  %v10330_v5 = vld [vmem:[%s12100_s25 + $0x78] sm:$0xff]  ;;  %v3136_v35 = vor.u32 %v3134_v17, %v3132_v36 }
 0x1f0   : >> { %3308 = vmatmul.bf16.gmra.mxu1 %v3133_v62  ;;  %5143 = vmatpush.bf16.msra.mxu2 %v10330_v5 }
 0x1f1   : >> { %3781 = vmatmul.bf16.gmra.mxu2 %v3597_v30  ;;  %v3605_v62 = vor.u32 %v3604_v25, %v3601_v37  ;;  %v3141_v57 = vsel %vm1926_vm7, %v3136_v35, %v3140_v15  ;;  %v3142_v35 = vshrl.u32 %v10250_v50, 16 }
 0x1f2   : >> { %4002 = vmatmul.bf16.gmra.mxu3 %v12447_v34 }
 0x1f3   : >> { %v3606_v36 = vsel %vm1484_vm15, %v3596_v53, %v3605_v62 }
 0x1f4   : >> { %v2202_v26 = vpop.f32.mrf.mxu2  ;;  %v1457_v42 = vpop.f32.mrf.mxu0 }
 0x1f5   : >> { %v2675_v40 = vpop.f32.mrf.mxu3  ;;  %v2240_v1 = vadd.f32 %v2202_v26, %v1781_v56  ;;  %v1782_v10 = vpop.f32.mrf.mxu1 }
 0x1f6   : >> { %v1783_v27 = vadd.f32 %v1782_v10, %v1457_v42  ;;  %v10251_v10 = vld [vmem:[#allocation2 + $0x60] sm:$0xff] }
 0x1f7   : >> { %v12454_v9 = vadd.f32 %v2675_v40, %v2240_v1  ;;  %v12466_v40 = vld [vmem:[#allocation2 + $0x60] sm:$0xff]   ;;  %v11725_v1 = vld [vmem:[#allocation2 + $0x6c] sm:$0xff]  }
 0x1f8   : >> { %v3608_v17 = vshrl.u32 %v11725_v1, 16  ;;  %v3611_v43 = vshll.u32 %v11725_v1, 16 }
 0x1fc   : >> { %v2204_v56 = vpop.f32.mrf.mxu2  ;;  %v1460_v59 = vpop.f32.mrf.mxu0 }
 0x1fd   : >> { %v2677_v38 = vpop.f32.mrf.mxu3  ;;  %v2241_v30 = vadd.f32 %v2204_v56, %v1783_v27  ;;  %v1785_v14 = vpop.f32.mrf.mxu1  ;;  %v3146_v56 = vshll.u32 %v10251_v10, 16 }
 0x1fe   : >> { %v1786_v26 = vadd.f32 %v1785_v14, %v1460_v59 }
 0x1ff   : >> { %v12468_v42 = vadd.f32 %v2677_v38, %v2241_v30  ;;  %2860 = vmatmul.bf16.gmra.mxu0 %v12437_v54  ;;  %v3610_v38 = vrot.slane %v3608_v17, 3  ;;  %v3613_v30 = vrot.slane %v3611_v43, 4  ;;  %v3144_v54 = vor.u32 %v3142_v35, %v3140_v15  ;;  %v11727_v17 = vld [vmem:[#allocation2 + $0x74] sm:$0xff]  }
 0x200   : >> { %3313 = vmatmul.bf16.gmra.mxu1 %v3141_v57  ;;  %v3148_v57 = vrot.slane %v3146_v56, 1  ;;  %v3620_v35 = vshll.u32 %v11727_v17, 16 }
 0x201   : >> { %3786 = vmatmul.bf16.gmra.mxu2 %v3606_v36  ;;  %v3614_v0 = vor.u32 %v3613_v30, %v3610_v38 }
 0x202   : >> { %4007 = vmatmul.bf16.gmra.mxu3 %v12466_v40  ;;  %v3622_v30 = vrot.slane %v3620_v35, 4  ;;  %v12492_v35 = vld [vmem:[#allocation2 + $0x70] sm:$0xff]  }
 0x203   : >> { %v3615_v50 = vsel %vm1484_vm15, %v3605_v62, %v3614_v0 }
 0x204   : >> { %v2207_v27 = vpop.f32.mrf.mxu2  ;;  %v1462_v5 = vpop.f32.mrf.mxu0 }
 0x205   : >> { %v2680_v37 = vpop.f32.mrf.mxu3  ;;  %v2242_v25 = vadd.f32 %v2207_v27, %v1786_v26  ;;  %v1787_v53 = vpop.f32.mrf.mxu1  ;;  %v3149_v26 = vsel %vm1926_vm7, %v3144_v54, %v3148_v57 }
 0x206   : >> { %v1788_v59 = vadd.f32 %v1787_v53, %v1462_v5  ;;  %v12477_v5 = vld [vmem:[#allocation2 + $0x68] sm:$0xff]   ;;  %v3617_v53 = vshrl.u32 %v11727_v17, 16 }
 0x207   : >> { %v12472_v14 = vadd.f32 %v2680_v37, %v2242_v25  ;;  %v10252_v37 = vld [vmem:[#allocation2 + $0x68] sm:$0xff]  ;;  %v10300_v25 = vld [vmem:[%s12100_s25 + $0x210] sm:$0xff] }
 0x208   : >> { %4422 = vmatpush.bf16.msra.mxu0 %v10300_v25 }
 0x20c   : >> { %v2209_v36 = vpop.f32.mrf.mxu2  ;;  %v2826_v1 = vpop.f32.mrf.mxu0 }
 0x20d   : >> { %v2682_v24 = vpop.f32.mrf.mxu3  ;;  %v2243_v33 = vadd.f32 %v2209_v36, %v1788_v59  ;;  %v3279_v23 = vpop.f32.mrf.mxu1  ;;  %v2906_v27 = vadd.f32 %v2826_v1, %v12250_v47  ;;  %v10329_v1 = vld [vmem:[%s12100_s25 + $0x70] sm:$0xff] }
 0x20e   : >> { %5144 = vmatpush.bf16.msra.mxu2 %v10329_v1 }
 0x20f   : >> { %v12479_v43 = vadd.f32 %v2682_v24, %v2243_v33  ;;  %v3359_v15 = vadd.f32 %v3279_v23, %v2906_v27  ;;  %2865 = vmatmul.bf16.gmra.mxu0 %v12447_v34  ;;  %v3150_v24 = vshrl.u32 %v10251_v10, 16  ;;  %v3154_v33 = vshll.u32 %v10252_v37, 16 }
 0x210   : >> { %3318 = vmatmul.bf16.gmra.mxu1 %v3149_v26  ;;  %v3619_v34 = vrot.slane %v3617_v53, 3 }
 0x211   : >> { %3791 = vmatmul.bf16.gmra.mxu2 %v3615_v50  ;;  %v3152_v26 = vor.u32 %v3150_v24, %v3148_v57  ;;  %v3156_v27 = vrot.slane %v3154_v33, 1 }
 0x212   : >> { %4012 = vmatmul.bf16.gmra.mxu3 %v12477_v5  ;;  %v3623_v50 = vor.u32 %v3622_v30, %v3619_v34  ;;  %v3158_v30 = vshrl.u32 %v10252_v37, 16 }
 0x213   : >> { %v3157_v10 = vsel %vm1926_vm7, %v3152_v26, %v3156_v27 }
 0x214   : >> { %v3752_v47 = vpop.f32.mrf.mxu2  ;;  %v2828_v59 = vpop.f32.mrf.mxu0  ;;  %v3624_v53 = vsel %vm1484_vm15, %v3614_v0, %v3623_v50 }
 0x215   : >> { %v3973_v62 = vpop.f32.mrf.mxu3  ;;  %v3832_v56 = vadd.f32 %v3752_v47, %v3359_v15  ;;  %v3281_v38 = vpop.f32.mrf.mxu1  ;;  %v2907_v23 = vadd.f32 %v2828_v59, %v12259_v2  ;;  %v10253_v59 = vld [vmem:[#allocation2 + $0x70] sm:$0xff] }
 0x217   : >> { %v12485_v54 = vadd.f32 %v3973_v62, %v3832_v56  ;;  %v3360_v36 = vadd.f32 %v3281_v38, %v2907_v23  ;;  %v11729_v62 = vld [vmem:[#allocation2 + $0x7c] sm:$0xff]  }
 0x218   : >> { %v3626_v38 = vshrl.u32 %v11729_v62, 16  ;;  %v3629_v24 = vshll.u32 %v11729_v62, 16 }
 0x21c   : >> { %v3754_v17 = vpop.f32.mrf.mxu2  ;;  %v2831_v47 = vpop.f32.mrf.mxu0 }
 0x21d   : >> { %v3975_v25 = vpop.f32.mrf.mxu3  ;;  %v3833_v15 = vadd.f32 %v3754_v17, %v3360_v36  ;;  %v3284_v32 = vpop.f32.mrf.mxu1  ;;  %v2908_v2 = vadd.f32 %v2831_v47, %v12269_v45  ;;  %v3162_v36 = vshll.u32 %v10253_v59, 16  ;;  %v3160_v17 = vor.u32 %v3158_v30, %v3156_v27  ;;  %v11731_v27 = vld [vmem:[#allocation2 + $0x84] sm:$0xff]   ;;  %v12514_v30 = vld [vmem:[#allocation2 + $0x78] sm:$0xff] }
 0x21f   : >> { %v12494_v56 = vadd.f32 %v3975_v25, %v3833_v15  ;;  %v3361_v57 = vadd.f32 %v3284_v32, %v2908_v2  ;;  %2870 = vmatmul.bf16.gmra.mxu0 %v12466_v40  ;;  %v3628_v32 = vrot.slane %v3626_v38, 3  ;;  %v3631_v40 = vrot.slane %v3629_v24, 4  ;;  %v875_v2 = vld [vmem:[%s11871_s20 + $0x120] sm:$0xff] }
 0x220   : >> { %3323 = vmatmul.bf16.gmra.mxu1 %v3157_v10  ;;  %v3164_v25 = vrot.slane %v3162_v36, 1  ;;  %v947_v31 = vmax.f32 %v875_v2, 0.0  ;;  %v10299_v36 = vld [vmem:[%s12100_s25 + $0x208] sm:$0xff] }
 0x221   : >> { %3796 = vmatmul.bf16.gmra.mxu2 %v3624_v53  ;;  %v3632_v15 = vor.u32 %v3631_v40, %v3628_v32  ;;  %v876_v53 = vld [vmem:[%s11871_s20 + $0x128] sm:$0xff]  ;;  %4423 = vmatpush.bf16.msra.mxu0 %v10299_v36 }
 0x222   : >> { %4017 = vmatmul.bf16.gmra.mxu3 %v12492_v35  ;;  %v3165_v37 = vsel %vm1926_vm7, %v3160_v17, %v3164_v25  ;;  %v3170_v17 = vshll.u32 %v12514_v30, 16 }
 0x223   : >> { %v3633_v24 = vsel %vm1484_vm15, %v3623_v50, %v3632_v15  ;;  %v3638_v50 = vshll.u32 %v11731_v27, 16 }
 0x224   : >> { %v3757_v33 = vpop.f32.mrf.mxu2  ;;  %v2833_v23 = vpop.f32.mrf.mxu0 }
 0x225   : >> { %v3978_v45 = vpop.f32.mrf.mxu3  ;;  %v3834_v0 = vadd.f32 %v3757_v33, %v3361_v57  ;;  %v3286_v34 = vpop.f32.mrf.mxu1  ;;  %v2909_v22 = vadd.f32 %v2833_v23, %v12276_v49  ;;  %v948_v49 = vmax.f32 %v876_v53, 0.0  ;;  %v3640_v2 = vrot.slane %v3638_v50, 4 }
 0x227   : >> { %v12499_v1 = vadd.f32 %v3978_v45, %v3834_v0  ;;  %v3362_v26 = vadd.f32 %v3286_v34, %v2909_v22  ;;  %v12506_v45 = vld [vmem:[#allocation2 + $0x78] sm:$0xff]   ;;  %v12510_v23 = vpack.c.bf16 %v948_v49, %v947_v31 }
 0x229   : >> { %11025 = vst [vmem:[#allocation2 + $0x98] sm:$0xff] %v12510_v23  }
 0x22c   : >> { %v3759_v47 = vpop.f32.mrf.mxu2  ;;  %v2836_v57 = vpop.f32.mrf.mxu0 }
 0x22d   : >> { %v3980_v10 = vpop.f32.mrf.mxu3  ;;  %v3835_v62 = vadd.f32 %v3759_v47, %v3362_v26  ;;  %v3289_v33 = vpop.f32.mrf.mxu1  ;;  %v2910_v38 = vadd.f32 %v2836_v57, %v12284_v48  ;;  %v3635_v48 = vshrl.u32 %v11731_v27, 16  ;;  %v10328_v57 = vld [vmem:[%s12100_s25 + $0x68] sm:$0xff]  ;;  %v877_v27 = vld [vmem:[%s11871_s20 + $0x130] sm:$0xff] }
 0x22e   : >> { %5145 = vmatpush.bf16.msra.mxu2 %v10328_v57  ;;  %v949_v50 = vmax.f32 %v877_v27, 0.0 }
 0x22f   : >> { %v12508_v0 = vadd.f32 %v3980_v10, %v3835_v62  ;;  %v3363_v34 = vadd.f32 %v3289_v33, %v2910_v38  ;;  %2875 = vmatmul.bf16.gmra.mxu0 %v12477_v5  ;;  %v3166_v5 = vshrl.u32 %v10253_v59, 16  ;;  %v3637_v10 = vrot.slane %v3635_v48, 3  ;;  %v10312_v48 = vld [vmem:[%s12461_s29 + $0x28] sm:$0xff] }
 0x230   : >> { %3328 = vmatmul.bf16.gmra.mxu1 %v3165_v37  ;;  %v3172_v37 = vrot.slane %v3170_v17, 1 }
 0x231   : >> { %3801 = vmatmul.bf16.gmra.mxu2 %v3633_v24  ;;  %v3168_v33 = vor.u32 %v3166_v5, %v3164_v25  ;;  %v3641_v49 = vor.u32 %v3640_v2, %v3637_v10  ;;  %v12529_v25 = vld [vmem:[#allocation2 + $0x80] sm:$0xff]   ;;  %4655 = vmatpush.bf16.msra.mxu1 %v10312_v48 }
 0x232   : >> { %4022 = vmatmul.bf16.gmra.mxu3 %v12506_v45  ;;  %v10255_v10 = vld [vmem:[#allocation2 + $0x80] sm:$0xff] }
 0x233   : >> { %v3178_v27 = vshll.u32 %v10255_v10, 16 }
 0x234   : >> { %v3762_v22 = vpop.f32.mrf.mxu2  ;;  %v2838_v40 = vpop.f32.mrf.mxu0 }
 0x235   : >> { %v3983_v32 = vpop.f32.mrf.mxu3  ;;  %v3836_v31 = vadd.f32 %v3762_v22, %v3363_v34  ;;  %v3291_v26 = vpop.f32.mrf.mxu1  ;;  %v2911_v47 = vadd.f32 %v2838_v40, %v12293_v8  ;;  %v878_v34 = vld [vmem:[%s11871_s20 + $0x138] sm:$0xff]  ;;  %v3173_v8 = vsel %vm1926_vm7, %v3168_v33, %v3172_v37  ;;  %v3180_v48 = vrot.slane %v3178_v27, 1 }
 0x236   : >> { %v950_v40 = vmax.f32 %v878_v34, 0.0 }
 0x237   : >> { %v12520_v53 = vadd.f32 %v3983_v32, %v3836_v31  ;;  %v3364_v62 = vadd.f32 %v3291_v26, %v2911_v47  ;;  %v3642_v31 = vsel %vm1484_vm15, %v3632_v15, %v3641_v49  ;;  %v11733_v26 = vld [vmem:[#allocation2 + $0x8c] sm:$0xff]  }
 0x238   : >> { %v12533_v17 = vpack.c.bf16 %v950_v40, %v949_v50  ;;  %v3647_v15 = vshll.u32 %v11733_v26, 16 }
 0x23a   : >> { %11026 = vst [vmem:[#allocation2 + $0xa0] sm:$0xff] %v12533_v17  }
 0x23c   : >> { %v3764_v38 = vpop.f32.mrf.mxu2  ;;  %v2841_v36 = vpop.f32.mrf.mxu0 }
 0x23d   : >> { %v3985_v24 = vpop.f32.mrf.mxu3  ;;  %v3837_v59 = vadd.f32 %v3764_v38, %v3364_v62  ;;  %v3294_v22 = vpop.f32.mrf.mxu1  ;;  %v2912_v32 = vadd.f32 %v2841_v36, %v12303_v12  ;;  %v3644_v12 = vshrl.u32 %v11733_v26, 16 }
 0x23f   : >> { %v12531_v5 = vadd.f32 %v3985_v24, %v3837_v59  ;;  %v3365_v47 = vadd.f32 %v3294_v22, %v2912_v32  ;;  %2880 = vmatmul.bf16.gmra.mxu0 %v12492_v35  ;;  %v3174_v24 = vshrl.u32 %v12514_v30, 16  ;;  %v3646_v35 = vrot.slane %v3644_v12, 3  ;;  %v12545_v12 = vld [vmem:[#allocation2 + $0x88] sm:$0xff]  }
 0x240   : >> { %3333 = vmatmul.bf16.gmra.mxu1 %v3173_v8  ;;  %v3649_v59 = vrot.slane %v3647_v15, 4  ;;  %v11735_v15 = vld [vmem:[#allocation2 + $0x94] sm:$0xff]  }
 0x241   : >> { %3806 = vmatmul.bf16.gmra.mxu2 %v3642_v31  ;;  %v3176_v8 = vor.u32 %v3174_v24, %v3172_v37  ;;  %v3656_v24 = vshll.u32 %v11735_v15, 16 }
 0x242   : >> { %4027 = vmatmul.bf16.gmra.mxu3 %v12529_v25  ;;  %v3650_v50 = vor.u32 %v3649_v59, %v3646_v35  ;;  %v3182_v59 = vshrl.u32 %v10255_v10, 16 }
 0x244   : >> { %v3767_v2 = vpop.f32.mrf.mxu2  ;;  %v2843_v33 = vpop.f32.mrf.mxu0 }
 0x245   : >> { %v3988_v62 = vpop.f32.mrf.mxu3  ;;  %v3838_v57 = vadd.f32 %v3767_v2, %v3365_v47  ;;  %v3296_v38 = vpop.f32.mrf.mxu1  ;;  %v2913_v34 = vadd.f32 %v2843_v33, %v12308_v11  ;;  %v3181_v2 = vsel %vm1926_vm7, %v3176_v8, %v3180_v48  ;;  %v3651_v11 = vsel %vm1484_vm15, %v3641_v49, %v3650_v50  ;;  %v10298_v33 = vld [vmem:[%s12100_s25 + $0x200] sm:$0xff] }
 0x246   : >> { %4424 = vmatpush.bf16.msra.mxu0 %v10298_v33  ;;  %v10311_v33 = vld [vmem:[%s12461_s29 + $0x20] sm:$0xff] }
 0x247   : >> { %v12540_v36 = vadd.f32 %v3988_v62, %v3838_v57  ;;  %v3366_v22 = vadd.f32 %v3296_v38, %v2913_v34  ;;  %v10256_v57 = vld [vmem:[#allocation2 + $0x88] sm:$0xff]  ;;  %v3653_v38 = vshrl.u32 %v11735_v15, 16  ;;  %4656 = vmatpush.bf16.msra.mxu1 %v10311_v33 }
 0x249   : >> { %v3655_v8 = vrot.slane %v3653_v38, 3 }
 0x24c   : >> { %v3769_v40 = vpop.f32.mrf.mxu2  ;;  %v2846_v26 = vpop.f32.mrf.mxu0 }
 0x24d   : >> { %v3990_v32 = vpop.f32.mrf.mxu3  ;;  %v3839_v31 = vadd.f32 %v3769_v40, %v3366_v22  ;;  %v3299_v47 = vpop.f32.mrf.mxu1  ;;  %v2914_v30 = vadd.f32 %v2846_v26, %v12318_v63  ;;  %v3186_v22 = vshll.u32 %v10256_v57, 16  ;;  %v3658_v40 = vrot.slane %v3656_v24, 4  ;;  %v12568_v24 = vld [vmem:[#allocation2 + $0x90] sm:$0xff]  }
 0x24e   : >> { %v3184_v26 = vor.u32 %v3182_v59, %v3180_v48 }
 0x24f   : >> { %v12547_v62 = vadd.f32 %v3990_v32, %v3839_v31  ;;  %v3367_v37 = vadd.f32 %v3299_v47, %v2914_v30  ;;  %2885 = vmatmul.bf16.gmra.mxu0 %v12506_v45  ;;  %v10327_v31 = vld [vmem:[%s12100_s25 + $0x60] sm:$0xff]  ;;  %v3188_v47 = vrot.slane %v3186_v22, 1 }
 0x250   : >> { %3338 = vmatmul.bf16.gmra.mxu1 %v3181_v2  ;;  %v3659_v2 = vor.u32 %v3658_v40, %v3655_v8  ;;  %5146 = vmatpush.bf16.msra.mxu2 %v10327_v31 }
 0x251   : >> { %3811 = vmatmul.bf16.gmra.mxu2 %v3651_v11 }
 0x252   : >> { %4032 = vmatmul.bf16.gmra.mxu3 %v12545_v12  ;;  %v3660_v38 = vsel %vm1484_vm15, %v3650_v50, %v3659_v2  ;;  %v3190_v50 = vshrl.u32 %v10256_v57, 16 }
 0x254   : >> { %v3772_v63 = vpop.f32.mrf.mxu2  ;;  %v2848_v34 = vpop.f32.mrf.mxu0 }
 0x255   : >> { %v3993_v49 = vpop.f32.mrf.mxu3  ;;  %v3840_v27 = vadd.f32 %v3772_v63, %v3367_v37  ;;  %v12552_v35 = vpop.f32.mrf.mxu1  ;;  %v12555_v45 = vadd.f32 %v2848_v34, %v12333_v60  ;;  %v3189_v37 = vsel %vm1926_vm7, %v3184_v26, %v3188_v47  ;;  %v11736_v63 = vld [vmem:[#allocation2 + $0x9c] sm:$0xff]  }
 0x256   : >> { %v3665_v34 = vshll.u32 %v11736_v63, 16 }
 0x257   : >> { %v12557_v32 = vadd.f32 %v3993_v49, %v3840_v27  ;;  %v10257_v49 = vld [vmem:[#allocation2 + $0x90] sm:$0xff]  ;;  %v3662_v27 = vshrl.u32 %v11736_v63, 16  ;;  %v2970_v63 = vld [vmem:[#allocation2 + $0x98] sm:$0x1] }
 0x258   : >> { %v3194_v31 = vshll.u32 %v10257_v49, 16 }
 0x25a   : >> { %v3196_v33 = vrot.slane %v3194_v31, 1 }
 0x25c   : >> { %v12560_v30 = vpop.f32.mrf.mxu2  ;;  %v2851_v15 = vpop.f32.mrf.mxu0 }
 0x25d   : >> { %v12562_v11 = vpop.f32.mrf.mxu3  ;;  %v3304_v10 = vpop.f32.mrf.mxu1  ;;  %v2916_v60 = vadd.f32 %v2851_v15, %v12346_v13  ;;  %v3664_v15 = vrot.slane %v3662_v27, 3 }
 0x25f   : >> { %v3369_v48 = vadd.f32 %v3304_v10, %v2916_v60  ;;  %2890 = vmatmul.bf16.gmra.mxu0 %v12529_v25  ;;  %v3667_v25 = vrot.slane %v3665_v34, 4 }
 0x260   : >> { %3343 = vmatmul.bf16.gmra.mxu1 %v3189_v37  ;;  %v3192_v37 = vor.u32 %v3190_v50, %v3188_v47 }
 0x261   : >> { %3816 = vmatmul.bf16.gmra.mxu2 %v3660_v38  ;;  %v3668_v60 = vor.u32 %v3667_v25, %v3664_v15  ;;  %v10814_v38 = vunpack.c.h.b16 %v12533_v17 }
 0x262   : >> { %4037 = vmatmul.bf16.gmra.mxu3 %v12568_v24  ;;  %v3197_v29 = vsel %vm1926_vm7, %v3192_v37, %v3196_v33 }
 0x263   : >> { %v3669_v34 = vsel %vm1484_vm15, %v3659_v2, %v3668_v60 }
 0x264   : >> { %v3777_v59 = vpop.f32.mrf.mxu2  ;;  %v2853_v13 = vpop.f32.mrf.mxu0 }
 0x265   : >> { %v3998_v22 = vpop.f32.mrf.mxu3  ;;  %v3842_v8 = vadd.f32 %v3777_v59, %v3369_v48  ;;  %v12572_v40 = vpop.f32.mrf.mxu1  ;;  %v12575_v26 = vadd.f32 %v2853_v13, %v12367_v18  ;;  %v3056_v18 = vunpack.c.l.b16 %v2970_v63 }
 0x267   : >> { %v12577_v10 = vadd.f32 %v3998_v22, %v3842_v8  ;;  %v3526_v22 = vpack.c.b16 %v10814_v38, %v10814_v38  ;;  %v3073_v8 = vpack.c.b16 %v3056_v18, %v3056_v18 }
 0x269   : >> { %v3671_v13 = vshrl.u32 %v3526_v22, 16  ;;  %v3674_v50 = vshll.u32 %v3526_v22, 16  ;;  %v3202_v2 = vshll.u32 %v3073_v8, 16 }
 0x26c   : >> { %v12580_v21 = vpop.f32.mrf.mxu2  ;;  %v2856_v59 = vpop.f32.mrf.mxu0 }
 0x26d   : >> { %v12582_v48 = vpop.f32.mrf.mxu3  ;;  %v3309_v57 = vpop.f32.mrf.mxu1  ;;  %v2918_v27 = vadd.f32 %v2856_v59, %v12372_v4  ;;  %v3198_v4 = vshrl.u32 %v10257_v49, 16  ;;  %v3676_v59 = vrot.slane %v3674_v50, 4 }
 0x26f   : >> { %v3371_v47 = vadd.f32 %v3309_v57, %v2918_v27  ;;  %2895 = vmatmul.bf16.gmra.mxu0 %v12545_v12  ;;  %v10326_v27 = vld [vmem:[%s12100_s25 + $0x58] sm:$0xff]  ;;  %v3200_v18 = vor.u32 %v3198_v4, %v3196_v33  ;;  %v11817_v33 = vld [vmem:[#allocation2 + $0x90] sm:$0xff] }
 0x270   : >> { %3348 = vmatmul.bf16.gmra.mxu1 %v3197_v29  ;;  %v3673_v29 = vrot.slane %v3671_v13, 3  ;;  %5147 = vmatpush.bf16.msra.mxu2 %v10326_v27 }
 0x271   : >> { %3821 = vmatmul.bf16.gmra.mxu2 %v3669_v34  ;;  %v3204_v34 = vrot.slane %v3202_v2, 1 }
 0x272   : >> { %4042 = vmatmul.bf16.gmra.mxu3 %v12510_v23  ;;  %v3677_v22 = vor.u32 %v3676_v59, %v3673_v29 }
 0x273   : >> { %v3205_v8 = vsel %vm1926_vm7, %v3200_v18, %v3204_v34 }
 0x274   : >> { %v3782_v31 = vpop.f32.mrf.mxu2  ;;  %v2858_v37 = vpop.f32.mrf.mxu0  ;;  %v3678_v50 = vsel %vm1484_vm15, %v3668_v60, %v3677_v22 }
 0x275   : >> { %v4003_v15 = vpop.f32.mrf.mxu3  ;;  %v3844_v25 = vadd.f32 %v3782_v31, %v3371_v47  ;;  %v12589_v63 = vpop.f32.mrf.mxu1  ;;  %v12592_v38 = vadd.f32 %v2858_v37, %v12379_v16  ;;  %v10310_v16 = vld [vmem:[%s12461_s29 + $0x18] sm:$0xff] }
 0x276   : >> { %14020 = vst [vmem:[#allocation19_spill] sm:$0xff] %v12589_v63  ;;  %v10282_v63 = vld [vmem:[#allocation2 + $0x28] sm:$0xff]  ;;  %4657 = vmatpush.bf16.msra.mxu1 %v10310_v16 }
 0x277   : >> { %v12594_v57 = vadd.f32 %v4003_v15, %v3844_v25  ;;  %v10283_v25 = vld [vmem:[#allocation2 + $0x30] sm:$0xff]  ;;  %v4224_v37 = vshll.u32 %v10282_v63, 16 }
 0x278   : >> { %v4229_v60 = vshll.u32 %v10283_v25, 16 }
 0x279   : >> { %v4226_v18 = vrot.slane %v4224_v37, 1 }
 0x27c   : >> { %v12597_v19 = vpop.f32.mrf.mxu2  ;;  %v2861_v31 = vpop.f32.mrf.mxu0 }
 0x27d   : >> { %v12599_v47 = vpop.f32.mrf.mxu3  ;;  %v3314_v49 = vpop.f32.mrf.mxu1  ;;  %v2920_v13 = vadd.f32 %v2861_v31, %v12382_v39  ;;  %v4222_v39 = vshrl.u32 %v10282_v63, 16  ;;  %v10322_v31 = vld [vmem:[%s12100_s25 + $0x38] sm:$0xff] }
 0x27e   : >> { %5467 = vmatpush.bf16.msra.mxu3 %v10322_v31 }
 0x27f   : >> { %v3373_v15 = vadd.f32 %v3314_v49, %v2920_v13  ;;  %2900 = vmatmul.bf16.gmra.mxu0 %v11817_v33  ;;  %v4227_v49 = vor.u32 %v4226_v18, %v4222_v39  ;;  %v4233_v18 = vshrl.u32 %v10283_v25, 16  ;;  %v10309_v25 = vld [vmem:[%s12461_s29 + $0x10] sm:$0xff] }
 0x280   : >> { %3353 = vmatmul.bf16.gmra.mxu1 %v3205_v8  ;;  %v4231_v8 = vrot.slane %v4229_v60, 1 }
 0x281   : >> { %3826 = vmatmul.bf16.gmra.mxu2 %v3678_v50  ;;  %4658 = vmatpush.bf16.msra.mxu1 %v10309_v25 }
 0x282   : >> { %4047 = vmatmul.bf16.gmra.mxu3 %v12533_v17  ;;  %v4232_v63 = vsel %vm1926_vm7, %v4227_v49, %v4231_v8  ;;  %v10325_v49 = vld [vmem:[%s12100_s25 + $0x50] sm:$0xff] }
 0x283   : >> { %5148 = vmatpush.bf16.msra.mxu2 %v10325_v49 }
 0x284   : >> { %v3787_v4 = vpop.f32.mrf.mxu2  ;;  %v2863_v59 = vpop.f32.mrf.mxu0 }
 0x285   : >> { %v4008_v2 = vpop.f32.mrf.mxu3  ;;  %v3846_v29 = vadd.f32 %v3787_v4, %v3373_v15  ;;  %v12606_v27 = vpop.f32.mrf.mxu1  ;;  %v12609_v34 = vadd.f32 %v2863_v59, %v12388_v61  ;;  %v10284_v61 = vld [vmem:[#allocation2 + $0x38] sm:$0xff] }
 0x286   : >> { %v4237_v60 = vshll.u32 %v10284_v61, 16  ;;  %v4241_v49 = vshrl.u32 %v10284_v61, 16 }
 0x287   : >> { %v12611_v22 = vadd.f32 %v4008_v2, %v3846_v29 }
 0x289   : >> { %14021 = vst [vmem:[#allocation20_spill] sm:$0xff] %v12611_v22 }
 0x28c   : >> { %v12614_v16 = vpop.f32.mrf.mxu2  ;;  %v2866_v50 = vpop.f32.mrf.mxu0 }
 0x28d   : >> { %v12616_v13 = vpop.f32.mrf.mxu3  ;;  %v3319_v15 = vpop.f32.mrf.mxu1  ;;  %v2922_v33 = vadd.f32 %v2866_v50, %v12392_v55  ;;  %v4239_v55 = vrot.slane %v4237_v60, 1 }
 0x28e   : >> { %14022 = vst [vmem:[#allocation21_spill] sm:$0xff] %v12616_v13  ;;  %v4235_v13 = vor.u32 %v4233_v18, %v4231_v8 }
 0x28f   : >> { %v3375_v37 = vadd.f32 %v3319_v15, %v2922_v33  ;;  %4425 = vmatmul.bf16.vlgmr.msra.gmra.mxu0 %v4232_v63 }
 0x294   : >> { %v3792_v4 = vpop.f32.mrf.mxu2  ;;  %v2868_v59 = vpop.f32.mrf.mxu0 }
 0x295   : >> { %v4013_v2 = vpop.f32.mrf.mxu3  ;;  %v3848_v29 = vadd.f32 %v3792_v4, %v3375_v37  ;;  %v12620_v39 = vpop.f32.mrf.mxu1  ;;  %v12623_v31 = vadd.f32 %v2868_v59, %v12398_v46  ;;  %v4240_v37 = vsel %vm1926_vm7, %v4235_v13, %v4239_v55 }
 0x296   : >> { %14023 = vst [vmem:[#allocation22_spill] sm:$0xff] %v12620_v39  ;;  %v4243_v39 = vor.u32 %v4241_v49, %v4239_v55 }
 0x297   : >> { %v12625_v22 = vadd.f32 %v4013_v2, %v3848_v29  ;;  %v10285_v2 = vld [vmem:[#allocation2 + $0x40] sm:$0xff] }
 0x299   : >> { %14024 = vst [vmem:[#allocation23_spill] sm:$0xff] %v12625_v22  ;;  %v4245_v22 = vshll.u32 %v10285_v2, 16 }
 0x29c   : >> { %v12628_v50 = vpop.f32.mrf.mxu2  ;;  %v2871_v63 = vpop.f32.mrf.mxu0 }
 0x29d   : >> { %14025 = vst [vmem:[#allocation24_spill] sm:$0xff] %v12628_v50  ;;  %v12630_v15 = vpop.f32.mrf.mxu3  ;;  %v3324_v33 = vpop.f32.mrf.mxu1  ;;  %v2924_v4 = vadd.f32 %v2871_v63, %v12401_v51  ;;  %v10321_v50 = vld [vmem:[%s12100_s25 + $0x30] sm:$0xff]  ;;  %v4247_v51 = vrot.slane %v4245_v22, 1 }
 0x29e   : >> { %14026 = vst [vmem:[#allocation25_spill] sm:$0xff] %v12630_v15  ;;  %5468 = vmatpush.bf16.msra.mxu3 %v10321_v50  ;;  %v4249_v50 = vshrl.u32 %v10285_v2, 16  ;;  %v10308_v2 = vld [vmem:[%s12461_s29 + $0x8] sm:$0xff] }
 0x29f   : >> { %v3377_v46 = vadd.f32 %v3324_v33, %v2924_v4  ;;  %4430 = vmatmul.bf16.gmra.mxu0 %v4240_v37  ;;  %v4248_v4 = vsel %vm1926_vm7, %v4243_v39, %v4247_v51  ;;  %v10324_v39 = vld [vmem:[%s12100_s25 + $0x48] sm:$0xff]  ;;  %4659 = vmatpush.bf16.msra.mxu1 %v10308_v2 }
 0x2a0   : >> { %5149 = vmatpush.bf16.msra.mxu2 %v10324_v39 }
 0x2a4   : >> { %v3797_v29 = vpop.f32.mrf.mxu2  ;;  %v2873_v18 = vpop.f32.mrf.mxu0 }
 0x2a5   : >> { %v4018_v8 = vpop.f32.mrf.mxu3  ;;  %v3850_v59 = vadd.f32 %v3797_v29, %v3377_v46  ;;  %v12635_v60 = vpop.f32.mrf.mxu1  ;;  %v12638_v15 = vadd.f32 %v2873_v18, %v12407_v7  ;;  %v10286_v7 = vld [vmem:[#allocation2 + $0x48] sm:$0xff] }
 0x2a6   : >> { %v4253_v18 = vshll.u32 %v10286_v7, 16  ;;  %v4257_v39 = vshrl.u32 %v10286_v7, 16 }
 0x2a7   : >> { %v12640_v13 = vadd.f32 %v4018_v8, %v3850_v59 }
 0x2a9   : >> { %14027 = vst [vmem:[#allocation26_spill] sm:$0xff] %v12640_v13 }
 0x2ac   : >> { %v12643_v63 = vpop.f32.mrf.mxu2  ;;  %v2876_v37 = vpop.f32.mrf.mxu0 }
 0x2ad   : >> { %v12645_v33 = vpop.f32.mrf.mxu3  ;;  %v3329_v25 = vpop.f32.mrf.mxu1  ;;  %v2926_v61 = vadd.f32 %v2876_v37, %v12412_v44  ;;  %v4255_v44 = vrot.slane %v4253_v18, 1 }
 0x2ae   : >> { %14028 = vst [vmem:[#allocation27_spill] sm:$0xff] %v12645_v33  ;;  %v4251_v33 = vor.u32 %v4249_v50, %v4247_v51 }
 0x2af   : >> { %v3379_v46 = vadd.f32 %v3329_v25, %v2926_v61  ;;  %4435 = vmatmul.bf16.gmra.mxu0 %v4248_v4 }
 0x2b4   : >> { %v3802_v29 = vpop.f32.mrf.mxu2  ;;  %v2878_v22 = vpop.f32.mrf.mxu0 }
 0x2b5   : >> { %v4023_v8 = vpop.f32.mrf.mxu3  ;;  %v3852_v59 = vadd.f32 %v3802_v29, %v3379_v46  ;;  %v12649_v55 = vpop.f32.mrf.mxu1  ;;  %v12652_v49 = vadd.f32 %v2878_v22, %v12418_v20  ;;  %v4256_v46 = vsel %vm1926_vm7, %v4251_v33, %v4255_v44 }
 0x2b6   : >> { %14029 = vst [vmem:[#allocation28_spill] sm:$0xff] %v12649_v55  ;;  %v4259_v55 = vor.u32 %v4257_v39, %v4255_v44 }
 0x2b7   : >> { %v12654_v13 = vadd.f32 %v4023_v8, %v3852_v59  ;;  %v10287_v8 = vld [vmem:[#allocation2 + $0x50] sm:$0xff] }
 0x2b9   : >> { %14030 = vst [vmem:[#allocation29_spill] sm:$0xff] %v12654_v13  ;;  %v4261_v13 = vshll.u32 %v10287_v8, 16 }
 0x2bc   : >> { %v12657_v37 = vpop.f32.mrf.mxu2  ;;  %v2881_v4 = vpop.f32.mrf.mxu0 }
 0x2bd   : >> { %14031 = vst [vmem:[#allocation30_spill] sm:$0xff] %v12657_v37  ;;  %v12659_v25 = vpop.f32.mrf.mxu3  ;;  %v3334_v61 = vpop.f32.mrf.mxu1  ;;  %v2928_v29 = vadd.f32 %v2881_v4, %v12422_v3  ;;  %v10320_v37 = vld [vmem:[%s12100_s25 + $0x28] sm:$0xff]  ;;  %v4263_v3 = vrot.slane %v4261_v13, 1 }
 0x2be   : >> { %14032 = vst [vmem:[#allocation31_spill] sm:$0xff] %v12659_v25  ;;  %5469 = vmatpush.bf16.msra.mxu3 %v10320_v37 }
 0x2bf   : >> { %v3381_v20 = vadd.f32 %v3334_v61, %v2928_v29  ;;  %4440 = vmatmul.bf16.gmra.mxu0 %v4256_v46  ;;  %v4264_v29 = vsel %vm1926_vm7, %v4259_v55, %v4263_v3  ;;  %v10323_v55 = vld [vmem:[%s12100_s25 + $0x40] sm:$0xff] }
 0x2c0   : >> { %5150 = vmatpush.bf16.msra.mxu2 %v10323_v55 }
 0x2c3   : >> { %5151 = vmatmul.bf16.vlgmr.msra.gmra.mxu2 %v12545_v12 }
 0x2c4   : >> { %v3807_v59 = vpop.f32.mrf.mxu2  ;;  %v2883_v50 = vpop.f32.mrf.mxu0 }
 0x2c5   : >> { %v4028_v51 = vpop.f32.mrf.mxu3  ;;  %v3854_v22 = vadd.f32 %v3807_v59, %v3381_v20  ;;  %v12664_v18 = vpop.f32.mrf.mxu1  ;;  %v12667_v25 = vadd.f32 %v2883_v50, %v12428_v41  ;;  %v10288_v41 = vld [vmem:[#allocation2 + $0x58] sm:$0xff] }
 0x2c6   : >> { %v4269_v50 = vshll.u32 %v10288_v41, 16 }
 0x2c7   : >> { %v12669_v33 = vadd.f32 %v4028_v51, %v3854_v22  ;;  %v4265_v22 = vshrl.u32 %v10287_v8, 16 }
 0x2c9   : >> { %14033 = vst [vmem:[#allocation32_spill] sm:$0xff] %v12669_v33 }
 0x2cc   : >> { %v12672_v4 = vpop.f32.mrf.mxu2  ;;  %v2886_v46 = vpop.f32.mrf.mxu0 }
 0x2cd   : >> { %v12674_v61 = vpop.f32.mrf.mxu3  ;;  %v3339_v2 = vpop.f32.mrf.mxu1  ;;  %v2930_v7 = vadd.f32 %v2886_v46, %v12433_v52  ;;  %v4267_v52 = vor.u32 %v4265_v22, %v4263_v3  ;;  %v4271_v46 = vrot.slane %v4269_v50, 1  ;;  %v10317_v50 = vld [vmem:[%s12100_s25 + $0x10] sm:$0xff] }
 0x2ce   : >> { %14034 = vst [vmem:[#allocation33_spill] sm:$0xff] %v12674_v61 }
 0x2cf   : >> { %v3383_v20 = vadd.f32 %v3339_v2, %v2930_v7  ;;  %4445 = vmatmul.bf16.gmra.mxu0 %v4264_v29  ;;  %v10319_v7 = vld [vmem:[%s12100_s25 + $0x20] sm:$0xff]  ;;  %v4272_v8 = vsel %vm1926_vm7, %v4267_v52, %v4271_v46  ;;  %v4273_v52 = vshrl.u32 %v10288_v41, 16 }
 0x2d0   : >> { %5470 = vmatpush.bf16.msra.mxu3 %v10319_v7  ;;  %v11487_v7 = vld [vmem:[#allocation2 + $0x84] sm:$0xf0]  }
 0x2d3   : >> { %5156 = vmatmul.bf16.gmra.mxu2 %v12568_v24 }
 0x2d4   : >> { %v3812_v59 = vpop.f32.mrf.mxu2  ;;  %v2888_v13 = vpop.f32.mrf.mxu0 }
 0x2d5   : >> { %v4033_v51 = vpop.f32.mrf.mxu3  ;;  %v3856_v44 = vadd.f32 %v3812_v59, %v3383_v20  ;;  %v12678_v37 = vpop.f32.mrf.mxu1  ;;  %v12681_v39 = vadd.f32 %v2888_v13, %v12439_v6 }
 0x2d6   : >> { %14035 = vst [vmem:[#allocation34_spill] sm:$0xff] %v12678_v37  ;;  %v10307_v37 = vld [vmem:[%s12461_s29] sm:$0xff] }
 0x2d7   : >> { %14036 = vst [vmem:[#allocation35_spill] sm:$0xff] %v12681_v39  ;;  %v12683_v33 = vadd.f32 %v4033_v51, %v3856_v44  ;;  %4660 = vmatpush.bf16.msra.mxu1 %v10307_v37  ;;  %v10318_v51 = vld [vmem:[%s12100_s25 + $0x18] sm:$0xff]  ;;  %v10289_v44 = vld [vmem:[#allocation2 + $0x60] sm:$0xff] }
 0x2d8   : >> { %5471 = vmatpush.bf16.msra.mxu3 %v10318_v51  ;;  %v11188_v37 = vld [vmem:[#allocation2 + $0x84] sm:$0x8]  ;;  %v4281_v24 = vshrl.u32 %v10289_v44, 16 }
 0x2d9   : >> { %14037 = vst [vmem:[#allocation36_spill] sm:$0xff] %v12683_v33 }
 0x2dc   : >> { %v12686_v2 = vpop.f32.mrf.mxu2  ;;  %v2891_v20 = vpop.f32.mrf.mxu0  ;;  %5472 = vmatpush.bf16.msra.mxu3 %v10317_v50 }
 0x2dd   : >> { %14038 = vst [vmem:[#allocation37_spill] sm:$0xff] %v12686_v2  ;;  %v12688_v29 = vpop.f32.mrf.mxu3  ;;  %v3344_v59 = vpop.f32.mrf.mxu1  ;;  %v2932_v6 = vadd.f32 %v2891_v20, %v12443_v58  ;;  %v4277_v2 = vshll.u32 %v10289_v44, 16  ;;  %v10316_v20 = vld [vmem:[%s12100_s25 + $0x8] sm:$0xff]  ;;  %v10362_v44 = vld [vmem:[%s12100_s25 + $0xf8] sm:$0xff] }
 0x2de   : >> { %14039 = vst [vmem:[#allocation38_spill] sm:$0xff] %v12688_v29  ;;  %6353 = vmatpush.bf16.msrb.mxu1 %v10362_v44  ;;  %v11493_v44 = vld [vmem:[#allocation2 + $0x9c] sm:$0xff]  }
 0x2df   : >> { %v3385_v3 = vadd.f32 %v3344_v59, %v2932_v6  ;;  %4450 = vmatmul.bf16.gmra.mxu0 %v4272_v8  ;;  %v11489_v59 = vld [vmem:[#allocation2 + $0x8c] sm:$0xff]   ;;  %v11189_v8 = vor.u32 %v11487_v7, %v11188_v37  ;;  %v4275_v6 = vor.u32 %v4273_v52, %v4271_v46  ;;  %v4279_v51 = vrot.slane %v4277_v2, 1 }
 0x2e0   : >> { %5473 = vmatpush.bf16.msra.mxu3 %v10316_v20  ;;  %v5263_v41 = vshll.u32 %v11489_v59, 16  ;;  %v10290_v20 = vld [vmem:[#allocation2 + $0x68] sm:$0xff] }
 0x2e2   : >> { %v5265_v37 = vrot.slane %v5263_v41, 4 }
 0x2e3   : >> { %5161 = vmatmul.bf16.gmra.mxu2 %v12510_v23 }
 0x2e4   : >> { %v3817_v13 = vpop.f32.mrf.mxu2  ;;  %v2893_v33 = vpop.f32.mrf.mxu0 }
 0x2e5   : >> { %v4038_v22 = vpop.f32.mrf.mxu3  ;;  %v3858_v55 = vadd.f32 %v3817_v13, %v3385_v3  ;;  %v12697_v29 = vpop.f32.mrf.mxu1  ;;  %v12700_v12 = vadd.f32 %v2893_v33, %v12449_v28  ;;  %v5252_v3 = vshrl.u32 %v11189_v8, 16  ;;  %v5255_v13 = vshll.u32 %v11189_v8, 16  ;;  %v10315_v33 = vld [vmem:[%s12100_s25] sm:$0xff] }
 0x2e6   : >> { %14040 = vst [vmem:[#allocation39_spill] sm:$0xff] %v12697_v29  ;;  %v5260_v29 = vshrl.u32 %v11489_v59, 16  ;;  %5474 = vmatpush.bf16.msra.mxu3 %v10315_v33 }
 0x2e7   : >> { %14041 = vst [vmem:[#allocation40_spill] sm:$0xff] %v12700_v12  ;;  %v12702_v58 = vadd.f32 %v4038_v22, %v3858_v55  ;;  %v5254_v50 = vrot.slane %v5252_v3, 3  ;;  %v5257_v22 = vrot.slane %v5255_v13, 4  ;;  %v4280_v12 = vsel %vm1926_vm7, %v4275_v6, %v4279_v51 }
 0x2e8   : >> { %v5262_v61 = vrot.slane %v5260_v29, 3 }
 0x2e9   : >> { %14042 = vst [vmem:[#allocation41_spill] sm:$0xff] %v12702_v58  ;;  %v5258_v2 = vor.u32 %v5257_v22, %v5254_v50  ;;  %v10370_v50 = vld [vmem:[%s12100_s25 + $0x138] sm:$0xff] }
 0x2ea   : >> { %v5266_v52 = vor.u32 %v5265_v37, %v5262_v61  ;;  %v10354_v22 = vld [vmem:[%s12100_s25 + $0xb8] sm:$0xff]  ;;  %6570 = vmatpush.bf16.msrb.mxu2 %v10370_v50 }
 0x2eb   : >> { %5884 = vmatpush.bf16.msrb.mxu0 %v10354_v22 }
 0x2ec   : >> { %v12705_v39 = vpop.f32.mrf.mxu2  ;;  %v2896_v55 = vpop.f32.mrf.mxu0  ;;  %v5267_v59 = vsel %vm1484_vm15, %v5258_v2, %v5266_v52 }
 0x2ed   : >> { %v12707_v28 = vpop.f32.mrf.mxu3  ;;  %v3349_v58 = vpop.f32.mrf.mxu1  ;;  %v2934_v46 = vadd.f32 %v2896_v55, %v12454_v9  ;;  %5475 = vmatmul.bf16.vlgmr.msra.gmra.mxu3 %v5267_v59  ;;  %v4285_v9 = vshll.u32 %v10290_v20, 16 }
 0x2ef   : >> { %v3387_v7 = vadd.f32 %v3349_v58, %v2934_v46  ;;  %4455 = vmatmul.bf16.gmra.mxu0 %v4280_v12  ;;  %v11491_v12 = vld [vmem:[#allocation2 + $0x94] sm:$0xff]   ;;  %v4283_v58 = vor.u32 %v4281_v24, %v4279_v51  ;;  %v4287_v33 = vrot.slane %v4285_v9, 1 }
 0x2f0   : >> { %v5269_v55 = vshrl.u32 %v11491_v12, 16  ;;  %v5272_v37 = vshll.u32 %v11491_v12, 16  ;;  %v10291_v9 = vld [vmem:[#allocation2 + $0x70] sm:$0xff] }
 0x2f2   : >> { %v5274_v59 = vrot.slane %v5272_v37, 4  ;;  %v4289_v37 = vshrl.u32 %v10290_v20, 16 }
 0x2f3   : >> { %5166 = vmatmul.bf16.gmra.mxu2 %v12533_v17 }
 0x2f4   : >> { %v3822_v8 = vpop.f32.mrf.mxu2  ;;  %v2898_v29 = vpop.f32.mrf.mxu0 }
 0x2f5   : >> { %v4043_v3 = vpop.f32.mrf.mxu3  ;;  %v3860_v6 = vadd.f32 %v3822_v8, %v3387_v7  ;;  %v12714_v13 = vpop.f32.mrf.mxu1  ;;  %v12717_v41 = vadd.f32 %v2898_v29, %v12468_v42  ;;  %v5271_v7 = vrot.slane %v5269_v55, 3 }
 0x2f7   : >> { %v12719_v61 = vadd.f32 %v4043_v3, %v3860_v6  ;;  %v4288_v3 = vsel %vm1926_vm7, %v4283_v58, %v4287_v33  ;;  %v5275_v6 = vor.u32 %v5274_v59, %v5271_v7  ;;  %v4293_v58 = vshll.u32 %v10291_v9, 16 }
 0x2f8   : >> { %v4291_v7 = vor.u32 %v4289_v37, %v4287_v33 }
 0x2f9   : >> { %v5276_v24 = vsel %vm1484_vm15, %v5266_v52, %v5275_v6  ;;  %v4295_v59 = vrot.slane %v4293_v58, 1  ;;  %v5281_v52 = vshll.u32 %v11493_v44, 16  ;;  %v4297_v58 = vshrl.u32 %v10291_v9, 16 }
 0x2fc   : >> { %v12723_v46 = vpop.f32.mrf.mxu2  ;;  %v2901_v42 = vpop.f32.mrf.mxu0 }
 0x2fd   : >> { %v12725_v2 = vpop.f32.mrf.mxu3  ;;  %v3354_v8 = vpop.f32.mrf.mxu1  ;;  %v2936_v51 = vadd.f32 %v2901_v42, %v12472_v14  ;;  %5480 = vmatmul.bf16.gmra.mxu3 %v5276_v24  ;;  %v5278_v42 = vshrl.u32 %v11493_v44, 16  ;;  %v880_v24 = vld [vmem:[%s11871_s20 + $0x148] sm:$0xff] }
 0x2fe   : >> { %14043 = vst [vmem:[#allocation42_spill] sm:$0xff] %v12725_v2 }
 0x2ff   : >> { %v3389_v29 = vadd.f32 %v3354_v8, %v2936_v51  ;;  %4460 = vmatmul.bf16.gmra.mxu0 %v4288_v3  ;;  %v5280_v8 = vrot.slane %v5278_v42, 3  ;;  %v5283_v3 = vrot.slane %v5281_v52, 4  ;;  %v879_v51 = vld [vmem:[%s11871_s20 + $0x140] sm:$0xff]  ;;  %v10369_v52 = vld [vmem:[%s12100_s25 + $0x130] sm:$0xff] }
 0x300   : >> { %v951_v20 = vmax.f32 %v879_v51, 0.0  ;;  %v4299_v51 = vor.u32 %v4297_v58, %v4295_v59  ;;  %6571 = vmatpush.bf16.msrb.mxu2 %v10369_v52 }
 0x304   : >> { %v3827_v12 = vpop.f32.mrf.mxu2  ;;  %v2903_v55 = vpop.f32.mrf.mxu0 }
 0x305   : >> { %v4048_v50 = vpop.f32.mrf.mxu3  ;;  %v3862_v22 = vadd.f32 %v3827_v12, %v3389_v29  ;;  %v12733_v23 = vadd.f32 %v2903_v55, %v12479_v43  ;;  %v4296_v29 = vsel %vm1926_vm7, %v4291_v7, %v4295_v59  ;;  %v952_v43 = vmax.f32 %v880_v24, 0.0 }
 0x306   : >> { %v5284_v12 = vor.u32 %v5283_v3, %v5280_v8  ;;  %v10353_v8 = vld [vmem:[%s12100_s25 + $0xb0] sm:$0xff] }
 0x307   : >> { %v12735_v14 = vadd.f32 %v4048_v50, %v3862_v22  ;;  %v10546_v50 = vpack.c.bf16 %v952_v43, %v951_v20  ;;  %v10292_v22 = vld [vmem:[#allocation2 + $0x78] sm:$0xff]  ;;  %5885 = vmatpush.bf16.msrb.mxu0 %v10353_v8  ;;  %v881_v43 = vld [vmem:[%s11871_s20 + $0x150] sm:$0xff] }
 0x308   : >> { %v5285_v33 = vsel %vm1484_vm15, %v5275_v6, %v5284_v12  ;;  %v4301_v44 = vshll.u32 %v10292_v22, 16  ;;  %v4305_v8 = vshrl.u32 %v10292_v22, 16 }
 0x309   : >> { %11027 = vst [vmem:[#allocation2 + $0xa8] sm:$0xff] %v10546_v50   ;;  %5171 = vmatmul.bf16.gmra.mxu2 %v10546_v50 }
 0x30a   : >> { %v4303_v6 = vrot.slane %v4301_v44, 1  ;;  %v10293_v44 = vld [vmem:[#allocation2 + $0x80] sm:$0xff] }
 0x30c   : >> { %v4426_v2 = vpop.f32.mrf.mxu0 }
 0x30d   : >> { %5485 = vmatmul.bf16.gmra.mxu3 %v5285_v33  ;;  %v4506_v55 = vadd.f32 %v4426_v2, %v12485_v54  ;;  %v10361_v2 = vld [vmem:[%s12100_s25 + $0xf0] sm:$0xff]  ;;  %v4304_v33 = vsel %vm1926_vm7, %v4299_v51, %v4303_v6 }
 0x30e   : >> { %6354 = vmatpush.bf16.msrb.mxu1 %v10361_v2 }
 0x30f   : >> { %4465 = vmatmul.bf16.gmra.mxu0 %v4296_v29  ;;  %v4538_v7 = vmax.f32 %v4506_v55, 0.0  ;;  %v882_v55 = vld [vmem:[%s11871_s20 + $0x158] sm:$0xff] }
 0x310   : >> { %v11495_v3 = vld [vmem:[#allocation2 + $0xa4] sm:$0xff]   ;;  %v954_v59 = vmax.f32 %v882_v55, 0.0 }
 0x311   : >> { %v5287_v29 = vshrl.u32 %v11495_v3, 16  ;;  %v5290_v54 = vshll.u32 %v11495_v3, 16  ;;  %v4309_v3 = vshll.u32 %v10293_v44, 16 }
 0x313   : >> { %v5289_v9 = vrot.slane %v5287_v29, 3  ;;  %v5292_v20 = vrot.slane %v5290_v54, 4  ;;  %v4307_v29 = vor.u32 %v4305_v8, %v4303_v6  ;;  %v4311_v54 = vrot.slane %v4309_v3, 1  ;;  %v10294_v6 = vld [vmem:[#allocation2 + $0x88] sm:$0xff] }
 0x314   : >> { %v4428_v37 = vpop.f32.mrf.mxu0  ;;  %v4313_v3 = vshrl.u32 %v10293_v44, 16  ;;  %v10360_v44 = vld [vmem:[%s12100_s25 + $0xe8] sm:$0xff] }
 0x315   : >> { %v4507_v17 = vadd.f32 %v4428_v37, %v12494_v56  ;;  %v953_v37 = vmax.f32 %v881_v43, 0.0  ;;  %v883_v43 = vld [vmem:[%s11871_s20 + $0x160] sm:$0xff]  ;;  %6355 = vmatpush.bf16.msrb.mxu1 %v10360_v44  ;;  %v888_v44 = vld [vmem:[%s11871_s20 + $0x188] sm:$0xff] }
 0x317   : >> { %v4539_v42 = vmax.f32 %v4507_v17, 0.0  ;;  %v5293_v17 = vor.u32 %v5292_v20, %v5289_v9 }
 0x319   : >> { %v4570_v24 = vpack.c.bf16 %v4539_v42, %v4538_v7  ;;  %v5294_v58 = vsel %vm1484_vm15, %v5284_v12, %v5293_v17  ;;  %v10551_v7 = vpack.c.bf16 %v954_v59, %v953_v37  ;;  %v4312_v37 = vsel %vm1926_vm7, %v4307_v29, %v4311_v54  ;;  %v10368_v29 = vld [vmem:[%s12100_s25 + $0x128] sm:$0xff] }
 0x31a   : >> { %6572 = vmatpush.bf16.msrb.mxu2 %v10368_v29 }
 0x31b   : >> { %4661 = vmatmul.bf16.vlgmr.msra.gmra.mxu1 %v4570_v24  ;;  %11028 = vst [vmem:[#allocation2 + $0xb0] sm:$0xff] %v10551_v7   ;;  %5176 = vmatmul.bf16.gmra.mxu2 %v10551_v7  ;;  %v4317_v7 = vshll.u32 %v10294_v6, 16 }
 0x31c   : >> { %v4431_v56 = vpop.f32.mrf.mxu0 }
 0x31d   : >> { %5490 = vmatmul.bf16.gmra.mxu3 %v5294_v58  ;;  %v4508_v42 = vadd.f32 %v4431_v56, %v12499_v1  ;;  %v955_v1 = vmax.f32 %v883_v43, 0.0 }
 0x31f   : >> { %4470 = vmatmul.bf16.gmra.mxu0 %v4304_v33  ;;  %v4540_v51 = vmax.f32 %v4508_v42, 0.0  ;;  %v884_v33 = vld [vmem:[%s11871_s20 + $0x168] sm:$0xff] }
 0x320   : >> { %v956_v22 = vmax.f32 %v884_v33, 0.0 }
 0x322   : >> { %v11497_v9 = vld [vmem:[#allocation2 + $0xac] sm:$0xff]   ;;  %v10556_v59 = vpack.c.bf16 %v956_v22, %v955_v1  ;;  %v886_v22 = vld [vmem:[%s11871_s20 + $0x178] sm:$0xff] }
 0x323   : >> { %v5296_v12 = vshrl.u32 %v11497_v9, 16  ;;  %v5299_v20 = vshll.u32 %v11497_v9, 16 }
 0x324   : >> { %v4433_v52 = vpop.f32.mrf.mxu0  ;;  %11029 = vst [vmem:[#allocation2 + $0xb8] sm:$0xff] %v10556_v59  }
 0x325   : >> { %v4509_v50 = vadd.f32 %v4433_v52, %v12508_v0  ;;  %v5298_v56 = vrot.slane %v5296_v12, 3  ;;  %v5301_v0 = vrot.slane %v5299_v20, 4  ;;  %v4315_v12 = vor.u32 %v4313_v3, %v4311_v54 }
 0x326   : >> { %v4319_v20 = vrot.slane %v4317_v7, 1  ;;  %v958_v54 = vmax.f32 %v886_v22, 0.0  ;;  %v10296_v22 = vld [vmem:[#allocation2 + $0x98] sm:$0xff] }
 0x327   : >> { %v4541_v24 = vmax.f32 %v4509_v50, 0.0  ;;  %v5302_v58 = vor.u32 %v5301_v0, %v5298_v56 }
 0x328   : >> { %v4320_v1 = vsel %vm1926_vm7, %v4315_v12, %v4319_v20 }
 0x329   : >> { %v4571_v2 = vpack.c.bf16 %v4541_v24, %v4540_v51  ;;  %v5303_v42 = vsel %vm1484_vm15, %v5293_v17, %v5302_v58 }
 0x32b   : >> { %4666 = vmatmul.bf16.gmra.mxu1 %v4571_v2  ;;  %v10352_v2 = vld [vmem:[%s12100_s25 + $0xa8] sm:$0xff]  ;;  %v11499_v9 = vld [vmem:[#allocation2 + $0xb4] sm:$0xff]   ;;  %5181 = vmatmul.bf16.gmra.mxu2 %v10556_v59 }
 0x32c   : >> { %v4436_v55 = vpop.f32.mrf.mxu0  ;;  %5886 = vmatpush.bf16.msrb.mxu0 %v10352_v2  ;;  %v5308_v17 = vshll.u32 %v11499_v9, 16 }
 0x32d   : >> { %v4510_v52 = vadd.f32 %v4436_v55, %v12520_v53  ;;  %5495 = vmatmul.bf16.gmra.mxu3 %v5303_v42  ;;  %v5305_v53 = vshrl.u32 %v11499_v9, 16  ;;  %v10295_v42 = vld [vmem:[#allocation2 + $0x90] sm:$0xff] }
 0x32e   : >> { %v5310_v55 = vrot.slane %v5308_v17, 4  ;;  %v887_v17 = vld [vmem:[%s11871_s20 + $0x180] sm:$0xff] }
 0x32f   : >> { %4475 = vmatmul.bf16.gmra.mxu0 %v4312_v37  ;;  %v4542_v51 = vmax.f32 %v4510_v52, 0.0  ;;  %v5307_v33 = vrot.slane %v5305_v53, 3  ;;  %v885_v37 = vld [vmem:[%s11871_s20 + $0x170] sm:$0xff] }
 0x330   : >> { %v957_v56 = vmax.f32 %v885_v37, 0.0 }
 0x331   : >> { %v5311_v0 = vor.u32 %v5310_v55, %v5307_v33  ;;  %v959_v55 = vmax.f32 %v887_v17, 0.0 }
 0x333   : >> { %v5312_v52 = vsel %vm1484_vm15, %v5302_v58, %v5311_v0 }
 0x334   : >> { %v4438_v8 = vpop.f32.mrf.mxu0 }
 0x335   : >> { %v4511_v50 = vadd.f32 %v4438_v8, %v12531_v5  ;;  %v10561_v8 = vpack.c.bf16 %v958_v54, %v957_v56 }
 0x337   : >> { %v4543_v24 = vmax.f32 %v4511_v50, 0.0  ;;  %11030 = vst [vmem:[#allocation2 + $0xc0] sm:$0xff] %v10561_v8   ;;  %v4321_v50 = vshrl.u32 %v10294_v6, 16  ;;  %v960_v6 = vmax.f32 %v888_v44, 0.0  ;;  %v890_v44 = vld [vmem:[%s11871_s20 + $0x198] sm:$0xff] }
 0x339   : >> { %v4572_v43 = vpack.c.bf16 %v4543_v24, %v4542_v51  ;;  %v4325_v51 = vshll.u32 %v10295_v42, 16  ;;  %v4323_v2 = vor.u32 %v4321_v50, %v4319_v20  ;;  %v10566_v20 = vpack.c.bf16 %v960_v6, %v959_v55 }
 0x33a   : >> { %v962_v55 = vmax.f32 %v890_v44, 0.0 }
 0x33b   : >> { %4671 = vmatmul.bf16.gmra.mxu1 %v4572_v43  ;;  %v4327_v9 = vrot.slane %v4325_v51, 1  ;;  %5186 = vmatmul.bf16.gmra.mxu2 %v10561_v8  ;;  %11031 = vst [vmem:[#allocation2 + $0xc8] sm:$0xff] %v10566_v20   ;;  %v10367_v51 = vld [vmem:[%s12100_s25 + $0x120] sm:$0xff] }
 0x33c   : >> { %v4441_v5 = vpop.f32.mrf.mxu0  ;;  %6573 = vmatpush.bf16.msrb.mxu2 %v10367_v51  ;;  %v10347_v51 = vld [vmem:[%s12100_s25 + $0x80] sm:$0xff] }
 0x33d   : >> { %v4512_v3 = vadd.f32 %v4441_v5, %v12540_v36  ;;  %5500 = vmatmul.bf16.gmra.mxu3 %v5312_v52  ;;  %v4328_v36 = vsel %vm1926_vm7, %v4323_v2, %v4327_v9 }
 0x33e   : >> { %v11501_v43 = vld [vmem:[#allocation2 + $0xbc] sm:$0xff]  }
 0x33f   : >> { %4480 = vmatmul.bf16.gmra.mxu0 %v4320_v1  ;;  %v4544_v24 = vmax.f32 %v4512_v3, 0.0  ;;  %v5314_v58 = vshrl.u32 %v11501_v43, 16  ;;  %v5317_v53 = vshll.u32 %v11501_v43, 16 }
 0x341   : >> { %v5316_v37 = vrot.slane %v5314_v58, 3  ;;  %v5319_v5 = vrot.slane %v5317_v53, 4  ;;  %v889_v58 = vld [vmem:[%s11871_s20 + $0x190] sm:$0xff] }
 0x343   : >> { %v5320_v56 = vor.u32 %v5319_v5, %v5316_v37  ;;  %v10297_v37 = vld [vmem:[#allocation2 + $0xa0] sm:$0xff] }
 0x344   : >> { %v4443_v7 = vpop.f32.mrf.mxu0 }
 0x345   : >> { %v4513_v59 = vadd.f32 %v4443_v7, %v12547_v62  ;;  %v3368_v62 = vadd.f32 %v12552_v35, %v12555_v45  ;;  %v5321_v54 = vsel %vm1484_vm15, %v5311_v0, %v5320_v56  ;;  %v4329_v35 = vshrl.u32 %v10295_v42, 16  ;;  %v10359_v42 = vld [vmem:[%s12100_s25 + $0xe0] sm:$0xff] }
 0x346   : >> { %v4333_v45 = vshll.u32 %v10296_v22, 16  ;;  %6356 = vmatpush.bf16.msrb.mxu1 %v10359_v42 }
 0x347   : >> { %v4545_v29 = vmax.f32 %v4513_v59, 0.0  ;;  %v3841_v1 = vadd.f32 %v12560_v30, %v3368_v62  ;;  %v10351_v59 = vld [vmem:[%s12100_s25 + $0xa0] sm:$0xff]  ;;  %v10350_v62 = vld [vmem:[%s12100_s25 + $0x98] sm:$0xff] }
 0x348   : >> { %v4335_v2 = vrot.slane %v4333_v45, 1  ;;  %5887 = vmatpush.bf16.msrb.mxu0 %v10351_v59  ;;  %v10348_v45 = vld [vmem:[%s12100_s25 + $0x88] sm:$0xff] }
 0x349   : >> { %v4573_v12 = vpack.c.bf16 %v4545_v29, %v4544_v24  ;;  %v4062_v52 = vadd.f32 %v12562_v11, %v3841_v1  ;;  %v11503_v24 = vld [vmem:[#allocation2 + $0xc4] sm:$0xff]   ;;  %v4331_v29 = vor.u32 %v4329_v35, %v4327_v9  ;;  %v3370_v9 = vadd.f32 %v12572_v40, %v12575_v26  ;;  %v10349_v40 = vld [vmem:[%s12100_s25 + $0x90] sm:$0xff] }
 0x34a   : >> { %v5323_v11 = vshrl.u32 %v11503_v24, 16 }
 0x34b   : >> { %4676 = vmatmul.bf16.gmra.mxu1 %v4573_v12  ;;  %v4336_v17 = vsel %vm1926_vm7, %v4331_v29, %v4335_v2  ;;  %5191 = vmatmul.bf16.gmra.mxu2 %v10566_v20  ;;  %v3843_v6 = vadd.f32 %v12580_v21, %v3370_v9  ;;  %v12796_v29 = vpop.f32.mrf.mxu3 }
 0x34c   : >> { %v4446_v33 = vpop.f32.mrf.mxu0  ;;  %v5325_v12 = vrot.slane %v5323_v11, 3  ;;  %5888 = vmatpush.bf16.msrb.mxu0 %v10350_v62 }
 0x34d   : >> { %v4514_v8 = vadd.f32 %v4446_v33, %v12557_v32  ;;  %5505 = vmatmul.bf16.gmra.mxu3 %v5321_v54  ;;  %v5326_v32 = vshll.u32 %v11503_v24, 16  ;;  %v961_v33 = vmax.f32 %v889_v58, 0.0  ;;  %v4064_v20 = vadd.f32 %v12582_v48, %v3843_v6  ;;  %v891_v24 = vld [vmem:[%s11871_s20 + $0x1a0] sm:$0xff] }
 0x34e   : >> { %v963_v42 = vmax.f32 %v891_v24, 0.0 }
 0x34f   : >> { %4485 = vmatmul.bf16.gmra.mxu0 %v4328_v36  ;;  %v4546_v50 = vmax.f32 %v4514_v8, 0.0  ;;  %v5328_v43 = vrot.slane %v5326_v32, 4  ;;  %v10571_v1 = vpack.c.bf16 %v962_v55, %v961_v33  ;;  %v4341_v8 = vshll.u32 %v10297_v37, 16 }
 0x350   : >> { %5889 = vmatpush.bf16.msrb.mxu0 %v10349_v40 }
 0x351   : >> { %v5329_v36 = vor.u32 %v5328_v43, %v5325_v12  ;;  %11032 = vst [vmem:[#allocation2 + $0xd0] sm:$0xff] %v10571_v1   ;;  %v14044_v12 = vld [vmem:[#allocation19_spill] sm:$0xff] }
 0x352   : >> { %v3372_v43 = vadd.f32 %v14044_v12, %v12592_v38 }
 0x353   : >> { %v5330_v5 = vsel %vm1484_vm15, %v5320_v56, %v5329_v36 }
 0x354   : >> { %v4448_v3 = vpop.f32.mrf.mxu0  ;;  %5890 = vmatpush.bf16.msrb.mxu0 %v10348_v45  ;;  %v3845_v44 = vadd.f32 %v12597_v19, %v3372_v43 }
 0x355   : >> { %v4515_v7 = vadd.f32 %v4448_v3, %v4062_v52  ;;  %v4337_v52 = vshrl.u32 %v10296_v22, 16 }
 0x357   : >> { %v4547_v30 = vmax.f32 %v4515_v7, 0.0  ;;  %v4339_v56 = vor.u32 %v4337_v52, %v4335_v2  ;;  %v4343_v7 = vrot.slane %v4341_v8, 1  ;;  %v892_v2 = vld [vmem:[%s11871_s20 + $0x1a8] sm:$0xff] }
 0x358   : >> { %5891 = vmatpush.bf16.msrb.mxu0 %v10347_v51  ;;  %v10331_v51 = vld [vmem:[#allocation2 + $0x88] sm:$0xff] }
 0x359   : >> { %v4574_v0 = vpack.c.bf16 %v4547_v30, %v4546_v50  ;;  %v12792_v50 = vpop.f32.mrf.mxu2  ;;  %v4117_v30 = vld [vmem:[#allocation2 + $0xa8] sm:$0x1]  ;;  %v4344_v11 = vsel %vm1926_vm7, %v4339_v56, %v4343_v7  ;;  %v893_v56 = vld [vmem:[%s11871_s20 + $0x1b0] sm:$0xff] }
 0x35a   : >> { %v4203_v32 = vunpack.c.l.b16 %v4117_v30  ;;  %v965_v24 = vmax.f32 %v893_v56, 0.0 }
 0x35b   : >> { %4681 = vmatmul.bf16.gmra.mxu1 %v4574_v0  ;;  %5196 = vmatmul.bf16.gmra.mxu2 %v10571_v1 }
 0x35c   : >> { %v4451_v53 = vpop.f32.mrf.mxu0  ;;  %v4220_v9 = vpack.c.b16 %v4203_v32, %v4203_v32 }
 0x35d   : >> { %v4516_v54 = vadd.f32 %v4451_v53, %v12577_v10  ;;  %5510 = vmatmul.bf16.gmra.mxu3 %v5330_v5  ;;  %v11505_v10 = vld [vmem:[#allocation2 + $0xcc] sm:$0xff]   ;;  %v4066_v5 = vadd.f32 %v12599_v47, %v3845_v44  ;;  %v14045_v44 = vld [vmem:[#allocation21_spill] sm:$0xff] }
 0x35e   : >> { %v5332_v59 = vshrl.u32 %v11505_v10, 16  ;;  %v5335_v22 = vshll.u32 %v11505_v10, 16 }
 0x35f   : >> { %4490 = vmatmul.bf16.gmra.mxu0 %v4336_v17  ;;  %v4548_v3 = vmax.f32 %v4516_v54, 0.0  ;;  %v964_v17 = vmax.f32 %v892_v2, 0.0  ;;  %v4349_v54 = vshll.u32 %v4220_v9, 16 }
 0x360   : >> { %v5334_v58 = vrot.slane %v5332_v59, 3  ;;  %v5337_v53 = vrot.slane %v5335_v22, 4  ;;  %v10358_v22 = vld [vmem:[%s12100_s25 + $0xd8] sm:$0xff] }
 0x361   : >> { %v10576_v55 = vpack.c.bf16 %v964_v17, %v963_v42  ;;  %v5152_v62 = vpop.f32.mrf.mxu2  ;;  %6357 = vmatpush.bf16.msrb.mxu1 %v10358_v22 }
 0x362   : >> { %v5338_v33 = vor.u32 %v5337_v53, %v5334_v58  ;;  %v12818_v58 = vld [vmem:[#allocation2 + $0x90] sm:$0xff]  ;;  %v5691_v53 = vshll.u32 %v10331_v51, 16 }
 0x363   : >> { %11033 = vst [vmem:[#allocation2 + $0xd8] sm:$0xff] %v10576_v55  }
 0x364   : >> { %v4453_v26 = vpop.f32.mrf.mxu0  ;;  %v5339_v6 = vsel %vm1484_vm15, %v5329_v36, %v5338_v33 }
 0x365   : >> { %v4517_v21 = vadd.f32 %v4453_v26, %v4064_v20  ;;  %v4345_v20 = vshrl.u32 %v10297_v37, 16 }
 0x367   : >> { %v4549_v35 = vmax.f32 %v4517_v21, 0.0  ;;  %v10366_v21 = vld [vmem:[%s12100_s25 + $0x118] sm:$0xff]  ;;  %v4347_v36 = vor.u32 %v4345_v20, %v4343_v7  ;;  %v3374_v7 = vadd.f32 %v12606_v27, %v12609_v34 }
 0x368   : >> { %6574 = vmatpush.bf16.msrb.mxu2 %v10366_v21 }
 0x369   : >> { %v4575_v48 = vpack.c.bf16 %v4549_v35, %v4548_v3  ;;  %v4351_v3 = vrot.slane %v4349_v54, 1  ;;  %v3847_v12 = vadd.f32 %v12614_v16, %v3374_v7 }
 0x36a   : >> { %v11507_v47 = vld [vmem:[#allocation2 + $0xd4] sm:$0xff]  }
 0x36b   : >> { %4686 = vmatmul.bf16.gmra.mxu1 %v4575_v48  ;;  %v5341_v45 = vshrl.u32 %v11507_v47, 16  ;;  %v5344_v37 = vshll.u32 %v11507_v47, 16  ;;  %v894_v48 = vld [vmem:[%s11871_s20 + $0x1b8] sm:$0xff]  ;;  %v4352_v10 = vsel %vm1926_vm7, %v4347_v36, %v4351_v3  ;;  %5201 = vmatmul.bf16.gmra.mxu2 %v10576_v55  ;;  %v4068_v9 = vadd.f32 %v14045_v44, %v3847_v12  ;;  %v12835_v12 = vpop.f32.mrf.mxu1 }
 0x36c   : >> { %v4456_v0 = vpop.f32.mrf.mxu0  ;;  %v14046_v55 = vld [vmem:[#allocation20_spill] sm:$0xff] }
 0x36d   : >> { %v4518_v1 = vadd.f32 %v4456_v0, %v12594_v57  ;;  %5515 = vmatmul.bf16.gmra.mxu3 %v5339_v6  ;;  %v5154_v57 = vpop.f32.mrf.mxu2  ;;  %v966_v0 = vmax.f32 %v894_v48, 0.0  ;;  %v5343_v32 = vrot.slane %v5341_v45, 3  ;;  %v5346_v2 = vrot.slane %v5344_v37, 4  ;;  %v896_v45 = vld [vmem:[%s11871_s20 + $0x1c8] sm:$0xff]  ;;  %v10394_v48 = vld [vmem:[%s12100_s25 + $0x178] sm:$0xff] }
 0x36e   : >> { %7019 = vmatpush.bf16.msrb.mxu3 %v10394_v48  ;;  %v898_v48 = vld [vmem:[%s11871_s20 + $0x1d8] sm:$0xff] }
 0x36f   : >> { %4495 = vmatmul.bf16.gmra.mxu0 %v4344_v11  ;;  %v4550_v52 = vmax.f32 %v4518_v1, 0.0  ;;  %v10581_v42 = vpack.c.bf16 %v966_v0, %v965_v24  ;;  %v5347_v43 = vor.u32 %v5346_v2, %v5343_v32  ;;  %v5696_v1 = vshll.u32 %v12818_v58, 16  ;;  %v14048_v32 = vld [vmem:[#allocation24_spill] sm:$0xff] }
 0x370   : >> { %v5476_v40 = vpop.f32.mrf.mxu3 }
 0x371   : >> { %v12806_v26 = vadd.f32 %v5476_v40, %v5152_v62  ;;  %11034 = vst [vmem:[#allocation2 + $0xe0] sm:$0xff] %v10581_v42   ;;  %v5348_v17 = vsel %vm1484_vm15, %v5338_v33, %v5347_v43  ;;  %v5689_v62 = vshrl.u32 %v10331_v51, 16  ;;  %v968_v51 = vmax.f32 %v896_v45, 0.0 }
 0x374   : >> { %v4458_v38 = vpop.f32.mrf.mxu0 }
 0x375   : >> { %v4519_v19 = vadd.f32 %v4458_v38, %v4066_v5  ;;  %v5157_v34 = vpop.f32.mrf.mxu2  ;;  %v5693_v5 = vrot.slane %v5691_v53, 1  ;;  %v12837_v53 = vld [vmem:[#allocation2 + $0x98] sm:$0xff] }
 0x377   : >> { %v4551_v8 = vmax.f32 %v4519_v19, 0.0  ;;  %v5694_v19 = vor.u32 %v5693_v5, %v5689_v62 }
 0x378   : >> { %v5478_v59 = vpop.f32.mrf.mxu3  ;;  %v11509_v40 = vld [vmem:[#allocation2 + $0xdc] sm:$0xff]  }
 0x379   : >> { %v4576_v35 = vpack.c.bf16 %v4551_v8, %v4550_v52  ;;  %v12815_v11 = vadd.f32 %v5478_v59, %v5154_v57  ;;  %v5698_v52 = vrot.slane %v5696_v1, 1  ;;  %v5350_v21 = vshrl.u32 %v11509_v40, 16  ;;  %v895_v57 = vld [vmem:[%s11871_s20 + $0x1c0] sm:$0xff]  ;;  %v14047_v59 = vld [vmem:[#allocation22_spill] sm:$0xff] }
 0x37a   : >> { %v5353_v36 = vshll.u32 %v11509_v40, 16  ;;  %v3376_v22 = vadd.f32 %v14047_v59, %v12623_v31  ;;  %v14050_v31 = vld [vmem:[#allocation23_spill] sm:$0xff] }
 0x37b   : >> { %4691 = vmatmul.bf16.gmra.mxu1 %v4576_v35  ;;  %v5352_v35 = vrot.slane %v5350_v21, 3  ;;  %v5699_v56 = vsel %vm1926_vm7, %v5694_v19, %v5698_v52  ;;  %5206 = vmatmul.bf16.gmra.mxu2 %v10581_v42 }
 0x37c   : >> { %v4461_v30 = vpop.f32.mrf.mxu0  ;;  %v5355_v47 = vrot.slane %v5353_v36, 4  ;;  %v3849_v2 = vadd.f32 %v14048_v32, %v3376_v22  ;;  %v970_v22 = vmax.f32 %v898_v48, 0.0  ;;  %v3378_v32 = vadd.f32 %v12635_v60, %v12638_v15  ;;  %v14053_v15 = vld [vmem:[#allocation26_spill] sm:$0xff] }
 0x37d   : >> { %v4520_v27 = vadd.f32 %v4461_v30, %v14046_v55  ;;  %5520 = vmatmul.bf16.gmra.mxu3 %v5348_v17  ;;  %v5159_v3 = vpop.f32.mrf.mxu2  ;;  %v14049_v17 = vld [vmem:[#allocation25_spill] sm:$0xff] }
 0x37e   : >> { %v5356_v0 = vor.u32 %v5355_v47, %v5352_v35  ;;  %v4070_v44 = vadd.f32 %v14049_v17, %v3849_v2  ;;  %v1128_v17 = vld [vmem:[%s11871_s20 + $0x28] sm:$0xff] }
 0x37f   : >> { %4500 = vmatmul.bf16.gmra.mxu0 %v4352_v10  ;;  %v4552_v54 = vmax.f32 %v4520_v27, 0.0  ;;  %v967_v10 = vmax.f32 %v895_v57, 0.0 }
 0x380   : >> { %v5481_v16 = vpop.f32.mrf.mxu3  ;;  %v5357_v42 = vsel %vm1484_vm15, %v5347_v43, %v5356_v0  ;;  %v10365_v43 = vld [vmem:[%s12100_s25 + $0x110] sm:$0xff] }
 0x381   : >> { %v12824_v20 = vadd.f32 %v5481_v16, %v5157_v34  ;;  %v10586_v7 = vpack.c.bf16 %v968_v51, %v967_v10  ;;  %v5700_v34 = vshrl.u32 %v12818_v58, 16  ;;  %v1127_v16 = vld [vmem:[%s11871_s20 + $0x20] sm:$0xff]  ;;  %6575 = vmatpush.bf16.msrb.mxu2 %v10365_v43  ;;  %v10357_v51 = vld [vmem:[%s12100_s25 + $0xd0] sm:$0xff] }
 0x382   : >> { %6358 = vmatpush.bf16.msrb.mxu1 %v10357_v51 }
 0x383   : >> { %11035 = vst [vmem:[#allocation2 + $0xe8] sm:$0xff] %v10586_v7   ;;  %v5702_v19 = vor.u32 %v5700_v34, %v5698_v52  ;;  %v14052_v34 = vld [vmem:[#allocation27_spill] sm:$0xff] }
 0x384   : >> { %v4463_v6 = vpop.f32.mrf.mxu0 }
 0x385   : >> { %v4521_v38 = vadd.f32 %v4463_v6, %v4068_v9  ;;  %v5162_v55 = vpop.f32.mrf.mxu2  ;;  %v5704_v6 = vshll.u32 %v12837_v53, 16 }
 0x387   : >> { %v4553_v33 = vmax.f32 %v4521_v38, 0.0 }
 0x388   : >> { %v5483_v30 = vpop.f32.mrf.mxu3 }
 0x389   : >> { %v4577_v8 = vpack.c.bf16 %v4553_v33, %v4552_v54  ;;  %v12832_v24 = vadd.f32 %v5483_v30, %v5159_v3 }
 0x38a   : >> { %v11511_v33 = vld [vmem:[#allocation2 + $0xe4] sm:$0xff]  }
 0x38b   : >> { %4696 = vmatmul.bf16.gmra.mxu1 %v4577_v8  ;;  %v5706_v8 = vrot.slane %v5704_v6, 1  ;;  %v5359_v36 = vshrl.u32 %v11511_v33, 16  ;;  %v5362_v3 = vshll.u32 %v11511_v33, 16  ;;  %5211 = vmatmul.bf16.gmra.mxu2 %v10586_v7  ;;  %v1129_v33 = vld [vmem:[%s11871_s20 + $0x30] sm:$0xff] }
 0x38c   : >> { %v4466_v37 = vpop.f32.mrf.mxu0 }
 0x38d   : >> { %v4522_v9 = vadd.f32 %v4466_v37, %v14050_v31  ;;  %5525 = vmatmul.bf16.gmra.mxu3 %v5357_v42  ;;  %v5164_v57 = vpop.f32.mrf.mxu2  ;;  %v5361_v45 = vrot.slane %v5359_v36, 3  ;;  %v5364_v37 = vrot.slane %v5362_v3, 4  ;;  %v5707_v52 = vsel %vm1926_vm7, %v5702_v19, %v5706_v8 }
 0x38e   : >> { %v3851_v31 = vadd.f32 %v12643_v63, %v3378_v32 }
 0x38f   : >> { %5892 = vmatmul.bf16.vlgmr.msrb.gmra.mxu0 %v5699_v56  ;;  %v4554_v38 = vmax.f32 %v4522_v9, 0.0  ;;  %v897_v56 = vld [vmem:[%s11871_s20 + $0x1d0] sm:$0xff]  ;;  %v5365_v42 = vor.u32 %v5364_v37, %v5361_v45 }
 0x390   : >> { %v5486_v62 = vpop.f32.mrf.mxu3  ;;  %v969_v59 = vmax.f32 %v897_v56, 0.0  ;;  %v4072_v6 = vadd.f32 %v14052_v34, %v3851_v31  ;;  %v14055_v31 = vld [vmem:[#allocation28_spill] sm:$0xff]  ;;  %v10429_v45 = vld [vmem:[%s12100_s25 + $0x210] sm:$0xff] }
 0x391   : >> { %v12844_v1 = vadd.f32 %v5486_v62, %v5162_v55  ;;  %v12861_v55 = vld [vmem:[#allocation2 + $0xa0] sm:$0xff]  ;;  %v5366_v7 = vsel %vm1484_vm15, %v5356_v0, %v5365_v42 }
 0x392   : >> { %v5712_v63 = vshll.u32 %v12861_v55, 16 }
 0x394   : >> { %v4468_v27 = vpop.f32.mrf.mxu0  ;;  %v5714_v36 = vrot.slane %v5712_v63, 1  ;;  %v14058_v63 = vld [vmem:[#allocation29_spill] sm:$0xff] }
 0x395   : >> { %v4523_v5 = vadd.f32 %v4468_v27, %v4070_v44  ;;  %v10591_v44 = vpack.c.bf16 %v970_v22, %v969_v59  ;;  %v5167_v62 = vpop.f32.mrf.mxu2 }
 0x397   : >> { %v4555_v54 = vmax.f32 %v4523_v5, 0.0  ;;  %11036 = vst [vmem:[#allocation2 + $0xf0] sm:$0xff] %v10591_v44  }
 0x398   : >> { %v4662_v40 = vpop.f32.mrf.mxu1  ;;  %v5488_v10 = vpop.f32.mrf.mxu3 }
 0x399   : >> { %v4742_v21 = vadd.f32 %v4662_v40, %v1127_v16  ;;  %v4578_v58 = vpack.c.bf16 %v4555_v54, %v4554_v38  ;;  %v12857_v2 = vadd.f32 %v5488_v10, %v5164_v57  ;;  %v900_v10 = vld [vmem:[%s11871_s20 + $0x1e8] sm:$0xff] }
 0x39b   : >> { %v4838_v47 = vsel %vm11970_vm0, %v4742_v21, %v1127_v16  ;;  %4701 = vmatmul.bf16.gmra.mxu1 %v4578_v58  ;;  %v5708_v16 = vshrl.u32 %v12837_v53, 16  ;;  %5216 = vmatmul.bf16.gmra.mxu2 %v10591_v44 }
 0x39c   : >> { %4870 = vst [vmem:[%s11871_s20 + $0x20] sm:$0xff] %v4838_v47  ;;  %v4471_v30 = vpop.f32.mrf.mxu0 }
 0x39d   : >> { %v4524_v60 = vadd.f32 %v4471_v30, %v14053_v15  ;;  %5530 = vmatmul.bf16.gmra.mxu3 %v5366_v7  ;;  %v5710_v58 = vor.u32 %v5708_v16, %v5706_v8  ;;  %v5169_v56 = vpop.f32.mrf.mxu2  ;;  %v10393_v8 = vld [vmem:[%s12100_s25 + $0x170] sm:$0xff] }
 0x39e   : >> { %v11513_v19 = vld [vmem:[#allocation2 + $0xec] sm:$0xff]   ;;  %7020 = vmatpush.bf16.msrb.mxu3 %v10393_v8 }
 0x39f   : >> { %5897 = vmatmul.bf16.gmra.mxu0 %v5707_v52  ;;  %v4556_v0 = vmax.f32 %v4524_v60, 0.0  ;;  %v5368_v53 = vshrl.u32 %v11513_v19, 16  ;;  %v5371_v57 = vshll.u32 %v11513_v19, 16  ;;  %v899_v52 = vld [vmem:[%s11871_s20 + $0x1e0] sm:$0xff]  ;;  %v5715_v59 = vsel %vm1926_vm7, %v5710_v58, %v5714_v36 }
 0x3a0   : >> { %v4664_v9 = vpop.f32.mrf.mxu1  ;;  %v5491_v38 = vpop.f32.mrf.mxu3  ;;  %v971_v32 = vmax.f32 %v899_v52, 0.0  ;;  %v1131_v19 = vld [vmem:[%s11871_s20 + $0x40] sm:$0xff] }
 0x3a1   : >> { %v4743_v27 = vadd.f32 %v4664_v9, %v1128_v17  ;;  %v12869_v43 = vadd.f32 %v5491_v38, %v5167_v62  ;;  %v5370_v48 = vrot.slane %v5368_v53, 3  ;;  %v5373_v30 = vrot.slane %v5371_v57, 4  ;;  %v12884_v62 = vld [vmem:[#allocation2 + $0xa8] sm:$0xff] }
 0x3a2   : >> { %v972_v17 = vmax.f32 %v900_v10, 0.0  ;;  %v3380_v9 = vadd.f32 %v14055_v31, %v12652_v49 }
 0x3a3   : >> { %4871 = vst [vmem:[%s11871_s20 + $0x28] sm:$0xff] %v4743_v27  ;;  %v5374_v27 = vor.u32 %v5373_v30, %v5370_v48 }
 0x3a4   : >> { %v4473_v5 = vpop.f32.mrf.mxu0  ;;  %v10596_v34 = vpack.c.bf16 %v972_v17, %v971_v32  ;;  %v901_v32 = vld [vmem:[%s11871_s20 + $0x1f0] sm:$0xff]  ;;  %v902_v17 = vld [vmem:[%s11871_s20 + $0x1f8] sm:$0xff] }
 0x3a5   : >> { %v4525_v54 = vadd.f32 %v4473_v5, %v4072_v6  ;;  %v14056_v6 = vld [vmem:[#allocation30_spill] sm:$0xff]  ;;  %v5375_v44 = vsel %vm1484_vm15, %v5365_v42, %v5374_v27  ;;  %v14057_v5 = vld [vmem:[#allocation31_spill] sm:$0xff]  ;;  %v5172_v38 = vpop.f32.mrf.mxu2 }
 0x3a6   : >> { %v3853_v15 = vadd.f32 %v14056_v6, %v3380_v9  ;;  %11037 = vst [vmem:[#allocation2 + $0xf8] sm:$0xff] %v10596_v34   ;;  %v10364_v42 = vld [vmem:[%s12100_s25 + $0x108] sm:$0xff]  ;;  %v973_v6 = vmax.f32 %v901_v32, 0.0 }
 0x3a7   : >> { %v4557_v40 = vmax.f32 %v4525_v54, 0.0  ;;  %6576 = vmatpush.bf16.msrb.mxu2 %v10364_v42  ;;  %v10356_v9 = vld [vmem:[%s12100_s25 + $0xc8] sm:$0xff] }
 0x3a8   : >> { %v4667_v21 = vpop.f32.mrf.mxu1  ;;  %v5493_v22 = vpop.f32.mrf.mxu3  ;;  %v4074_v16 = vadd.f32 %v14057_v5, %v3853_v15  ;;  %v974_v15 = vmax.f32 %v902_v17, 0.0  ;;  %v1132_v5 = vld [vmem:[%s11871_s20 + $0x48] sm:$0xff]  ;;  %6359 = vmatpush.bf16.msrb.mxu1 %v10356_v9 }
 0x3a9   : >> { %v4744_v3 = vadd.f32 %v4667_v21, %v1129_v33  ;;  %v4579_v47 = vpack.c.bf16 %v4557_v40, %v4556_v0  ;;  %v12881_v7 = vadd.f32 %v5493_v22, %v5169_v56  ;;  %v5720_v0 = vshll.u32 %v12884_v62, 16 }
 0x3ab   : >> { %v4840_v37 = vsel %vm12006_vm8, %v4744_v3, %v1129_v33  ;;  %4706 = vmatmul.bf16.gmra.mxu1 %v4579_v47  ;;  %v5716_v33 = vshrl.u32 %v12861_v55, 16  ;;  %v5722_v56 = vrot.slane %v5720_v0, 1  ;;  %5221 = vmatmul.bf16.gmra.mxu2 %v10596_v34  ;;  %v12910_v34 = vld [vmem:[#allocation2 + $0xb0] sm:$0xff] }
 0x3ac   : >> { %4872 = vst [vmem:[%s11871_s20 + $0x30] sm:$0xff] %v4840_v37  ;;  %v4476_v51 = vpop.f32.mrf.mxu0 }
 0x3ad   : >> { %v4526_v49 = vadd.f32 %v4476_v51, %v14058_v63  ;;  %5535 = vmatmul.bf16.gmra.mxu3 %v5375_v44  ;;  %v11515_v53 = vld [vmem:[#allocation2 + $0xf4] sm:$0xff]   ;;  %v5718_v37 = vor.u32 %v5716_v33, %v5714_v36  ;;  %v12905_v63 = vpack.c.bf16 %v974_v15, %v973_v6 }
 0x3ae   : >> { %v5377_v30 = vshrl.u32 %v11515_v53, 16  ;;  %v5380_v52 = vshll.u32 %v11515_v53, 16  ;;  %v1133_v53 = vld [vmem:[%s11871_s20 + $0x50] sm:$0xff] }
 0x3af   : >> { %5902 = vmatmul.bf16.gmra.mxu0 %v5715_v59  ;;  %v4558_v58 = vmax.f32 %v4526_v49, 0.0  ;;  %v5174_v59 = vpop.f32.mrf.mxu2  ;;  %v5723_v36 = vsel %vm1926_vm7, %v5718_v37, %v5722_v56  ;;  %11038 = vst [vmem:[#allocation2 + $0x100] sm:$0xff] %v12905_v63  }
 0x3b0   : >> { %v4669_v60 = vpop.f32.mrf.mxu1  ;;  %v5496_v21 = vpop.f32.mrf.mxu3  ;;  %v5379_v8 = vrot.slane %v5377_v30, 3  ;;  %v5382_v22 = vrot.slane %v5380_v52, 4 }
 0x3b1   : >> { %v12892_v47 = vadd.f32 %v5496_v21, %v5172_v38  ;;  %v3382_v60 = vadd.f32 %v12664_v18, %v12667_v25  ;;  %v14060_v18 = vld [vmem:[#allocation33_spill] sm:$0xff] }
 0x3b2   : >> { %v5383_v44 = vor.u32 %v5382_v22, %v5379_v8 }
 0x3b3   : >> { %v3855_v49 = vadd.f32 %v12672_v4, %v3382_v60  ;;  %v10392_v60 = vld [vmem:[%s12100_s25 + $0x168] sm:$0xff] }
 0x3b4   : >> { %v4478_v54 = vpop.f32.mrf.mxu0  ;;  %v5384_v33 = vsel %vm1484_vm15, %v5374_v27, %v5383_v44  ;;  %7021 = vmatpush.bf16.msrb.mxu3 %v10392_v60 }
 0x3b5   : >> { %v4527_v40 = vadd.f32 %v4478_v54, %v4074_v16  ;;  %v4076_v0 = vadd.f32 %v14060_v18, %v3855_v49 }
 0x3b7   : >> { %v4559_v3 = vmax.f32 %v4527_v40, 0.0  ;;  %v14061_v40 = vld [vmem:[#allocation32_spill] sm:$0xff]  ;;  %v5177_v21 = vpop.f32.mrf.mxu2 }
 0x3b8   : >> { %v4672_v57 = vpop.f32.mrf.mxu1  ;;  %v5498_v16 = vpop.f32.mrf.mxu3 }
 0x3b9   : >> { %v4746_v48 = vadd.f32 %v4672_v57, %v1131_v19  ;;  %v4580_v55 = vpack.c.bf16 %v4559_v3, %v4558_v58  ;;  %v12908_v38 = vadd.f32 %v5498_v16, %v5174_v59  ;;  %v5724_v58 = vshrl.u32 %v12884_v62, 16 }
 0x3ba   : >> { %v5728_v3 = vshll.u32 %v12910_v34, 16 }
 0x3bb   : >> { %v4842_v51 = vsel %vm11976_vm1, %v4746_v48, %v1131_v19  ;;  %4711 = vmatmul.bf16.gmra.mxu1 %v4580_v55  ;;  %v11516_v55 = vld [vmem:[#allocation2 + $0xfc] sm:$0xff]   ;;  %v5726_v52 = vor.u32 %v5724_v58, %v5722_v56  ;;  %5226 = vmatmul.bf16.gmra.mxu2 %v12905_v63  ;;  %v14063_v56 = vld [vmem:[#allocation35_spill] sm:$0xff] }
 0x3bc   : >> { %4874 = vst [vmem:[%s11871_s20 + $0x40] sm:$0xff] %v4842_v51  ;;  %v4481_v31 = vpop.f32.mrf.mxu0  ;;  %v5730_v51 = vrot.slane %v5728_v3, 1  ;;  %v5386_v22 = vshrl.u32 %v11516_v55, 16  ;;  %v5389_v32 = vshll.u32 %v11516_v55, 16  ;;  %v14067_v58 = vld [vmem:[#allocation36_spill] sm:$0xff]  ;;  %v10878_v55 = vunpack.c.h.b16 %v12905_v63 }
 0x3bd   : >> { %v4528_v19 = vadd.f32 %v4481_v31, %v14061_v40  ;;  %5540 = vmatmul.bf16.gmra.mxu3 %v5384_v33  ;;  %v14065_v33 = vld [vmem:[#allocation37_spill] sm:$0xff]  ;;  %v12933_v40 = vld [vmem:[#allocation2 + $0xb8] sm:$0xff] }
 0x3be   : >> { %v5391_v9 = vrot.slane %v5389_v32, 4  ;;  %v5731_v15 = vsel %vm1926_vm7, %v5726_v52, %v5730_v51  ;;  %v5250_v32 = vpack.c.b16 %v10878_v55, %v10878_v55 }
 0x3bf   : >> { %5907 = vmatmul.bf16.gmra.mxu0 %v5723_v36  ;;  %v4560_v37 = vmax.f32 %v4528_v19, 0.0  ;;  %v5179_v31 = vpop.f32.mrf.mxu2  ;;  %v5388_v36 = vrot.slane %v5386_v22, 3 }
 0x3c0   : >> { %v4674_v54 = vpop.f32.mrf.mxu1  ;;  %v5501_v57 = vpop.f32.mrf.mxu3 }
 0x3c1   : >> { %v4747_v25 = vadd.f32 %v4674_v54, %v1132_v5  ;;  %v12920_v48 = vadd.f32 %v5501_v57, %v5177_v21  ;;  %v14064_v5 = vld [vmem:[#allocation34_spill] sm:$0xff]  ;;  %v5392_v49 = vor.u32 %v5391_v9, %v5388_v36  ;;  %v5732_v57 = vshrl.u32 %v12910_v34, 16 }
 0x3c2   : >> { %v3384_v16 = vadd.f32 %v14064_v5, %v14063_v56  ;;  %v14066_v21 = vld [vmem:[#allocation38_spill] sm:$0xff] }
 0x3c3   : >> { %4875 = vst [vmem:[%s11871_s20 + $0x48] sm:$0xff] %v4747_v25  ;;  %v5393_v19 = vsel %vm1484_vm15, %v5383_v44, %v5392_v49  ;;  %v10363_v44 = vld [vmem:[%s12100_s25 + $0x100] sm:$0xff] }
 0x3c4   : >> { %v4483_v4 = vpop.f32.mrf.mxu0  ;;  %v3857_v25 = vadd.f32 %v14065_v33, %v3384_v16  ;;  %6577 = vmatpush.bf16.msrb.mxu2 %v10363_v44 }
 0x3c5   : >> { %v4529_v42 = vadd.f32 %v4483_v4, %v4076_v0 }
 0x3c6   : >> { %v4078_v4 = vadd.f32 %v14066_v21, %v3857_v25  ;;  %v14069_v25 = vld [vmem:[#allocation40_spill] sm:$0xff] }
 0x3c7   : >> { %v4561_v27 = vmax.f32 %v4529_v42, 0.0  ;;  %v5182_v42 = vpop.f32.mrf.mxu2 }
 0x3c8   : >> { %v4677_v30 = vpop.f32.mrf.mxu1  ;;  %v5503_v54 = vpop.f32.mrf.mxu3 }
 0x3c9   : >> { %v4748_v59 = vadd.f32 %v4677_v30, %v1133_v53  ;;  %v4581_v8 = vpack.c.bf16 %v4561_v27, %v4560_v37  ;;  %v12931_v18 = vadd.f32 %v5503_v54, %v5179_v31  ;;  %v5736_v37 = vshll.u32 %v12933_v40, 16  ;;  %v1135_v30 = vld [vmem:[%s11871_s20 + $0x60] sm:$0xff] }
 0x3ca   : >> { %v5734_v31 = vor.u32 %v5732_v57, %v5730_v51  ;;  %v10355_v51 = vld [vmem:[%s12100_s25 + $0xc0] sm:$0xff] }
 0x3cb   : >> { %v4844_v17 = vsel %vm12012_vm9, %v4748_v59, %v1133_v53  ;;  %4716 = vmatmul.bf16.gmra.mxu1 %v4581_v8  ;;  %v5738_v36 = vrot.slane %v5736_v37, 1  ;;  %v12956_v57 = vld [vmem:[#allocation2 + $0xc0] sm:$0xff] }
 0x3cc   : >> { %4876 = vst [vmem:[%s11871_s20 + $0x50] sm:$0xff] %v4844_v17  ;;  %v4486_v6 = vpop.f32.mrf.mxu0  ;;  %6360 = vmatpush.bf16.msrb.mxu1 %v10355_v51  ;;  %v5744_v44 = vshll.u32 %v12956_v57, 16 }
 0x3cd   : >> { %v4530_v3 = vadd.f32 %v4486_v6, %v14067_v58  ;;  %5545 = vmatmul.bf16.gmra.mxu3 %v5393_v19  ;;  %v5395_v6 = vshrl.u32 %v5250_v32, 16  ;;  %v5739_v33 = vsel %vm1926_vm7, %v5734_v31, %v5738_v36  ;;  %v1137_v31 = vld [vmem:[%s11871_s20 + $0x70] sm:$0xff] }
 0x3cf   : >> { %5912 = vmatmul.bf16.gmra.mxu0 %v5731_v15  ;;  %v4562_v59 = vmax.f32 %v4530_v3, 0.0  ;;  %v5398_v15 = vshll.u32 %v5250_v32, 16  ;;  %v5184_v56 = vpop.f32.mrf.mxu2  ;;  %v5397_v5 = vrot.slane %v5395_v6, 3 }
 0x3d0   : >> { %v4679_v0 = vpop.f32.mrf.mxu1  ;;  %v5506_v52 = vpop.f32.mrf.mxu3 }
 0x3d1   : >> { %v12942_v22 = vadd.f32 %v5506_v52, %v5182_v42  ;;  %v5400_v16 = vrot.slane %v5398_v15, 4  ;;  %v14070_v0 = vld [vmem:[#allocation39_spill] sm:$0xff] }
 0x3d2   : >> { %v3386_v19 = vadd.f32 %v14070_v0, %v14069_v25  ;;  %v3388_v0 = vadd.f32 %v12714_v13, %v12717_v41  ;;  %v14073_v13 = vld [vmem:[#allocation42_spill] sm:$0xff] }
 0x3d3   : >> { %v5401_v21 = vor.u32 %v5400_v16, %v5397_v5  ;;  %v10390_v16 = vld [vmem:[%s12100_s25 + $0x158] sm:$0xff] }
 0x3d4   : >> { %v4488_v53 = vpop.f32.mrf.mxu0  ;;  %v3859_v3 = vadd.f32 %v12705_v39, %v3386_v19  ;;  %v5740_v39 = vshrl.u32 %v12933_v40, 16  ;;  %v10389_v19 = vld [vmem:[%s12100_s25 + $0x150] sm:$0xff] }
 0x3d5   : >> { %v4531_v27 = vadd.f32 %v4488_v53, %v4078_v4  ;;  %v1136_v4 = vld [vmem:[%s11871_s20 + $0x68] sm:$0xff]  ;;  %v5402_v37 = vsel %vm1484_vm15, %v5392_v49, %v5401_v21  ;;  %v3861_v21 = vadd.f32 %v12723_v46, %v3388_v0  ;;  %v12984_v46 = vld [vmem:[#allocation2 + $0xa0] sm:$0xff] }
 0x3d6   : >> { %v4080_v55 = vadd.f32 %v12707_v28, %v3859_v3  ;;  %v5742_v15 = vor.u32 %v5740_v39, %v5738_v36 }
 0x3d7   : >> { %v4563_v8 = vmax.f32 %v4531_v27, 0.0  ;;  %v4082_v41 = vadd.f32 %v14073_v13, %v3861_v21  ;;  %v13004_v13 = vld [vmem:[#allocation2 + $0xd0] sm:$0xff] }
 0x3d8   : >> { %v4682_v17 = vpop.f32.mrf.mxu1  ;;  %v5508_v58 = vpop.f32.mrf.mxu3 }
 0x3d9   : >> { %v4750_v9 = vadd.f32 %v4682_v17, %v1135_v30  ;;  %v4582_v34 = vpack.c.bf16 %v4563_v8, %v4562_v59  ;;  %v12954_v42 = vadd.f32 %v5508_v58, %v5184_v56  ;;  %v5187_v59 = vpop.f32.mrf.mxu2  ;;  %v10391_v17 = vld [vmem:[%s12100_s25 + $0x160] sm:$0xff]  ;;  %v11265_v58 = vld [vmem:[#allocation2 + $0x98] sm:$0xff]  }
 0x3da   : >> { %7022 = vmatpush.bf16.msrb.mxu3 %v10391_v17  ;;  %6578 = vmatmul.bf16.vlgmr.msrb.gmra.mxu2 %v11265_v58  ;;  %v10434_v17 = vld [vmem:[%s12100_s25 + $0x238] sm:$0xff] }
 0x3db   : >> { %v4846_v60 = vsel %vm11980_vm2, %v4750_v9, %v1135_v30  ;;  %4721 = vmatmul.bf16.gmra.mxu1 %v4582_v34  ;;  %v14071_v30 = vld [vmem:[#allocation41_spill] sm:$0xff]  ;;  %8154 = vmatpush.bf16.msra.mxu2 %v10434_v17 }
 0x3dc   : >> { %4878 = vst [vmem:[%s11871_s20 + $0x60] sm:$0xff] %v4846_v60  ;;  %v4491_v54 = vpop.f32.mrf.mxu0  ;;  %v5746_v60 = vrot.slane %v5744_v44, 1 }
 0x3dd   : >> { %v4532_v52 = vadd.f32 %v4491_v54, %v14071_v30  ;;  %5550 = vmatmul.bf16.gmra.mxu3 %v5402_v37  ;;  %v10388_v37 = vld [vmem:[%s12100_s25 + $0x148] sm:$0xff] }
 0x3de   : >> { %7023 = vmatpush.bf16.msrb.mxu3 %v10390_v16  ;;  %v5747_v25 = vsel %vm1926_vm7, %v5742_v15, %v5746_v60 }
 0x3df   : >> { %5917 = vmatmul.bf16.gmra.mxu0 %v5739_v33  ;;  %v4564_v49 = vmax.f32 %v4532_v52, 0.0 }
 0x3e0   : >> { %v4684_v53 = vpop.f32.mrf.mxu1  ;;  %v5511_v9 = vpop.f32.mrf.mxu3 }
 0x3e1   : >> { %v4751_v27 = vadd.f32 %v4684_v53, %v1136_v4  ;;  %v12966_v6 = vadd.f32 %v5511_v9, %v5187_v59  ;;  %v5189_v33 = vpop.f32.mrf.mxu2  ;;  %v12979_v53 = vld [vmem:[#allocation2 + $0xc8] sm:$0xff] }
 0x3e2   : >> { %7024 = vmatpush.bf16.msrb.mxu3 %v10389_v19  ;;  %v5752_v39 = vshll.u32 %v12979_v53, 16  ;;  %v10406_v19 = vld [vmem:[%s12100_s25 + $0x1d8] sm:$0xff] }
 0x3e3   : >> { %4879 = vst [vmem:[%s11871_s20 + $0x68] sm:$0xff] %v4751_v27  ;;  %v10371_v27 = vld [vmem:[#allocation2 + $0x98] sm:$0xff] }
 0x3e4   : >> { %v4493_v8 = vpop.f32.mrf.mxu0  ;;  %v6826_v52 = vshll.u32 %v10371_v27, 16 }
 0x3e5   : >> { %v4533_v32 = vadd.f32 %v4493_v8, %v4080_v55  ;;  %v5748_v8 = vshrl.u32 %v12956_v57, 16 }
 0x3e6   : >> { %7025 = vmatpush.bf16.msrb.mxu3 %v10388_v37  ;;  %v6828_v9 = vrot.slane %v6826_v52, 1  ;;  %v10402_v37 = vld [vmem:[%s12100_s25 + $0x1b8] sm:$0xff] }
 0x3e7   : >> { %v4565_v34 = vmax.f32 %v4533_v32, 0.0  ;;  %v10387_v32 = vld [vmem:[%s12100_s25 + $0x140] sm:$0xff]  ;;  %7488 = vmatpush.bf16.msra.mxu0 %v10402_v37 }
 0x3e8   : >> { %v4687_v28 = vpop.f32.mrf.mxu1  ;;  %v5513_v36 = vpop.f32.mrf.mxu3 }
 0x3e9   : >> { %v4752_v56 = vadd.f32 %v4687_v28, %v1137_v31  ;;  %v4583_v5 = vpack.c.bf16 %v4565_v34, %v4564_v49  ;;  %v12977_v4 = vadd.f32 %v5513_v36, %v5189_v33  ;;  %v5192_v30 = vpop.f32.mrf.mxu2  ;;  %v1139_v34 = vld [vmem:[%s11871_s20 + $0x80] sm:$0xff]  ;;  %v5754_v33 = vrot.slane %v5752_v39, 1 }
 0x3ea   : >> { %7026 = vmatpush.bf16.msrb.mxu3 %v10387_v32 }
 0x3eb   : >> { %v4848_v54 = vsel %vm12016_vm10, %v4752_v56, %v1137_v31  ;;  %4726 = vmatmul.bf16.gmra.mxu1 %v4583_v5  ;;  %v6824_v31 = vshrl.u32 %v10371_v27, 16  ;;  %v10410_v27 = vld [vmem:[%s12100_s25 + $0x1f8] sm:$0xff] }
 0x3ec   : >> { %4880 = vst [vmem:[%s11871_s20 + $0x70] sm:$0xff] %v4848_v54  ;;  %v4496_v51 = vpop.f32.mrf.mxu0  ;;  %v5750_v54 = vor.u32 %v5748_v8, %v5746_v60  ;;  %v3390_v60 = vadd.f32 %v12835_v12, %v12733_v23  ;;  %7705 = vmatpush.bf16.msra.mxu1 %v10410_v27  ;;  %v5756_v23 = vshrl.u32 %v12979_v53, 16  ;;  %v5760_v12 = vshll.u32 %v13004_v13, 16 }
 0x3ed   : >> { %v4534_v55 = vadd.f32 %v4496_v51, %v12719_v61  ;;  %v6831_v61 = vshll.u32 %v12984_v46, 16  ;;  %v6829_v57 = vor.u32 %v6828_v9, %v6824_v31  ;;  %v10373_v31 = vld [vmem:[#allocation2 + $0xa8] sm:$0xff] }
 0x3ef   : >> { %5922 = vmatmul.bf16.gmra.mxu0 %v5747_v25  ;;  %v4566_v49 = vmax.f32 %v4534_v55, 0.0  ;;  %v6833_v5 = vrot.slane %v6831_v61, 1  ;;  %v1140_v55 = vld [vmem:[%s11871_s20 + $0x88] sm:$0xff]  ;;  %v11519_v61 = vld [vmem:[#allocation2 + $0x94] sm:$0x8] }
 0x3f0   : >> { %v4689_v3 = vpop.f32.mrf.mxu1  ;;  %v5516_v28 = vpop.f32.mrf.mxu3 }
 0x3f1   : >> { %v12992_v56 = vadd.f32 %v5516_v28, %v5192_v30  ;;  %v6834_v0 = vsel %vm1926_vm7, %v6829_v57, %v6833_v5  ;;  %v5194_v21 = vpop.f32.mrf.mxu2  ;;  %v5755_v3 = vsel %vm1926_vm7, %v5750_v54, %v5754_v33  ;;  %v3863_v30 = vadd.f32 %v12792_v50, %v3390_v60  ;;  %v1141_v57 = vld [vmem:[%s11871_s20 + $0x90] sm:$0xff] }
 0x3f2   : >> { %7027 = vmatmul.bf16.vlgmr.msrb.gmra.mxu3 %v6834_v0  ;;  %v6839_v28 = vshll.u32 %v10373_v31, 16 }
 0x3f3   : >> { %v4084_v32 = vadd.f32 %v12796_v29, %v3863_v30 }
 0x3f4   : >> { %v4498_v59 = vpop.f32.mrf.mxu0 }
 0x3f5   : >> { %v4535_v44 = vadd.f32 %v4498_v59, %v4082_v41  ;;  %v11266_v59 = vld [vmem:[#allocation2 + $0xa0] sm:$0xff]  }
 0x3f6   : >> { %6583 = vmatmul.bf16.gmra.mxu2 %v11266_v59 }
 0x3f7   : >> { %v4567_v15 = vmax.f32 %v4535_v44, 0.0 }
 0x3f8   : >> { %v4692_v16 = vpop.f32.mrf.mxu1  ;;  %v5518_v41 = vpop.f32.mrf.mxu3 }
 0x3f9   : >> { %v4754_v51 = vadd.f32 %v4692_v16, %v1139_v34  ;;  %v4584_v25 = vpack.c.bf16 %v4567_v15, %v4566_v49  ;;  %v13007_v52 = vadd.f32 %v5518_v41, %v5194_v21  ;;  %v5197_v17 = vpop.f32.mrf.mxu2  ;;  %v11738_v49 = vld [vmem:[#allocation2 + $0x94] sm:$0xf0]   ;;  %v5758_v16 = vor.u32 %v5756_v23, %v5754_v33  ;;  %v11267_v23 = vld [vmem:[#allocation2 + $0xa8] sm:$0xff]  }
 0x3fa   : >> { %v11520_v21 = vor.u32 %v11738_v49, %v11519_v61  ;;  %v13028_v61 = vld [vmem:[#allocation2 + $0xd8] sm:$0xff] }
 0x3fb   : >> { %v4850_v36 = vsel %vm11984_vm3, %v4754_v51, %v1139_v34  ;;  %4731 = vmatmul.bf16.gmra.mxu1 %v4584_v25  ;;  %v6835_v34 = vshrl.u32 %v12984_v46, 16  ;;  %v6841_v25 = vrot.slane %v6839_v28, 1 }
 0x3fc   : >> { %4882 = vst [vmem:[%s11871_s20 + $0x80] sm:$0xff] %v4850_v36  ;;  %v4501_v58 = vpop.f32.mrf.mxu0  ;;  %v11740_v36 = vld [vmem:[#allocation2 + $0x9c] sm:$0xff]   ;;  %v6138_v41 = vshrl.u32 %v11520_v21, 16 }
 0x3fd   : >> { %v4536_v44 = vadd.f32 %v4501_v58, %v12735_v14  ;;  %v5762_v14 = vrot.slane %v5760_v12, 1  ;;  %v6837_v29 = vor.u32 %v6835_v34, %v6833_v5  ;;  %v6141_v5 = vshll.u32 %v11520_v21, 16  ;;  %v10374_v34 = vld [vmem:[#allocation2 + $0xb0] sm:$0xff] }
 0x3fe   : >> { %v6146_v30 = vshrl.u32 %v11740_v36, 16  ;;  %v6149_v59 = vshll.u32 %v11740_v36, 16  ;;  %v1143_v36 = vld [vmem:[%s11871_s20 + $0xa0] sm:$0xff] }
 0x3ff   : >> { %5927 = vmatmul.bf16.gmra.mxu0 %v5755_v3  ;;  %v4568_v15 = vmax.f32 %v4536_v44, 0.0  ;;  %v6842_v37 = vsel %vm1926_vm7, %v6837_v29, %v6841_v25  ;;  %v5763_v33 = vsel %vm1926_vm7, %v5758_v16, %v5762_v14  ;;  %v5768_v16 = vshll.u32 %v13028_v61, 16 }
 0x400   : >> { %v4694_v8 = vpop.f32.mrf.mxu1  ;;  %v5521_v54 = vpop.f32.mrf.mxu3  ;;  %v6843_v29 = vshrl.u32 %v10373_v31, 16 }
 0x401   : >> { %v4755_v39 = vadd.f32 %v4694_v8, %v1140_v55  ;;  %v13016_v51 = vadd.f32 %v5521_v54, %v5197_v17  ;;  %v5199_v60 = vpop.f32.mrf.mxu2  ;;  %v6143_v17 = vrot.slane %v6141_v5, 4 }
 0x402   : >> { %7032 = vmatmul.bf16.gmra.mxu3 %v6842_v37 }
 0x403   : >> { %4883 = vst [vmem:[%s11871_s20 + $0x88] sm:$0xff] %v4755_v39 }
 0x404   : >> { %v4503_v50 = vpop.f32.mrf.mxu0 }
 0x405   : >> { %v4537_v9 = vadd.f32 %v4503_v50, %v4084_v32  ;;  %v6140_v32 = vrot.slane %v6138_v41, 3  ;;  %v6148_v50 = vrot.slane %v6146_v30, 3 }
 0x406   : >> { %6588 = vmatmul.bf16.gmra.mxu2 %v11267_v23 }
 0x407   : >> { %v4569_v53 = vmax.f32 %v4537_v9, 0.0  ;;  %v6151_v9 = vrot.slane %v6149_v59, 4 }
 0x408   : >> { %v4697_v0 = vpop.f32.mrf.mxu1  ;;  %v5523_v39 = vpop.f32.mrf.mxu3 }
 0x409   : >> { %v4756_v58 = vadd.f32 %v4697_v0, %v1141_v57  ;;  %v4585_v3 = vpack.c.bf16 %v4569_v53, %v4568_v15  ;;  %v13026_v44 = vadd.f32 %v5523_v39, %v5199_v60  ;;  %v5202_v49 = vpop.f32.mrf.mxu2  ;;  %v6152_v15 = vor.u32 %v6151_v9, %v6148_v50  ;;  %v10433_v53 = vld [vmem:[%s12100_s25 + $0x230] sm:$0xff] }
 0x40a   : >> { %v6847_v0 = vshll.u32 %v10374_v34, 16  ;;  %8155 = vmatpush.bf16.msra.mxu2 %v10433_v53  ;;  %v5770_v60 = vrot.slane %v5768_v16, 1  ;;  %v13053_v16 = vld [vmem:[#allocation2 + $0xe0] sm:$0xff] }
 0x40b   : >> { %v4852_v27 = vsel %vm12020_vm11, %v4756_v58, %v1141_v57  ;;  %4736 = vmatmul.bf16.gmra.mxu1 %v4585_v3  ;;  %v5764_v57 = vshrl.u32 %v13004_v13, 16  ;;  %v6845_v3 = vor.u32 %v6843_v29, %v6841_v25 }
 0x40c   : >> { %4884 = vst [vmem:[%s11871_s20 + $0x90] sm:$0xff] %v4852_v27  ;;  %v5893_v55 = vpop.f32.mrf.mxu0  ;;  %v6849_v37 = vrot.slane %v6847_v0, 1 }
 0x40d   : >> { %v13024_v8 = vadd.f32 %v5893_v55, %v12806_v26  ;;  %v6144_v26 = vor.u32 %v6143_v17, %v6140_v32  ;;  %v1144_v17 = vld [vmem:[%s11871_s20 + $0xa8] sm:$0xff] }
 0x40e   : >> { %v6850_v31 = vsel %vm1926_vm7, %v6845_v3, %v6849_v37  ;;  %v5776_v3 = vshll.u32 %v13053_v16, 16 }
 0x40f   : >> { %5932 = vmatmul.bf16.gmra.mxu0 %v5763_v33  ;;  %v6153_v13 = vsel %vm1484_vm15, %v6144_v26, %v6152_v15  ;;  %v5766_v33 = vor.u32 %v5764_v57, %v5762_v14  ;;  %v10409_v14 = vld [vmem:[%s12100_s25 + $0x1f0] sm:$0xff] }
 0x410   : >> { %v4699_v12 = vpop.f32.mrf.mxu1  ;;  %v5526_v21 = vpop.f32.mrf.mxu3  ;;  %7706 = vmatpush.bf16.msra.mxu1 %v10409_v14 }
 0x411   : >> { %v13037_v58 = vadd.f32 %v5526_v21, %v5202_v49  ;;  %v5204_v30 = vpop.f32.mrf.mxu2  ;;  %v5771_v59 = vsel %vm1926_vm7, %v5766_v33, %v5770_v60  ;;  %v10401_v12 = vld [vmem:[%s12100_s25 + $0x1b0] sm:$0xff]  ;;  %v5772_v21 = vshrl.u32 %v13028_v61, 16 }
 0x412   : >> { %7037 = vmatmul.bf16.gmra.mxu3 %v6850_v31  ;;  %7489 = vmatpush.bf16.msra.mxu0 %v10401_v12  ;;  %v11268_v49 = vld [vmem:[#allocation2 + $0xb0] sm:$0xff]  }
 0x413   : >> { %v11744_v61 = vld [vmem:[#allocation2 + $0xac] sm:$0xff]  }
 0x414   : >> { %v5895_v28 = vpop.f32.mrf.mxu0 }
 0x415   : >> { %v13033_v54 = vadd.f32 %v5895_v28, %v12815_v11  ;;  %v11742_v11 = vld [vmem:[#allocation2 + $0xa4] sm:$0xff]  }
 0x416   : >> { %v6155_v39 = vshrl.u32 %v11742_v11, 16  ;;  %v6158_v23 = vshll.u32 %v11742_v11, 16  ;;  %6593 = vmatmul.bf16.gmra.mxu2 %v11268_v49  ;;  %v1145_v11 = vld [vmem:[%s11871_s20 + $0xb0] sm:$0xff]  ;;  %v6164_v49 = vshrl.u32 %v11744_v61, 16 }
 0x418   : >> { %v4702_v27 = vpop.f32.mrf.mxu1  ;;  %v5528_v50 = vpop.f32.mrf.mxu3  ;;  %v6157_v26 = vrot.slane %v6155_v39, 3  ;;  %v6160_v57 = vrot.slane %v6158_v23, 4  ;;  %v5774_v39 = vor.u32 %v5772_v21, %v5770_v60  ;;  %v5778_v23 = vrot.slane %v5776_v3, 1  ;;  %v13075_v21 = vld [vmem:[#allocation2 + $0xe8] sm:$0xff] }
 0x419   : >> { %v4758_v55 = vadd.f32 %v4702_v27, %v1143_v36  ;;  %v13051_v9 = vadd.f32 %v5528_v50, %v5204_v30  ;;  %v5207_v29 = vpop.f32.mrf.mxu2 }
 0x41b   : >> { %v4854_v5 = vsel %vm11988_vm4, %v4758_v55, %v1143_v36  ;;  %6361 = vmatmul.bf16.vlgmr.msrb.gmra.mxu1 %v6153_v13  ;;  %v6161_v36 = vor.u32 %v6160_v57, %v6157_v26  ;;  %v6851_v13 = vshrl.u32 %v10374_v34, 16  ;;  %v11269_v57 = vld [vmem:[#allocation2 + $0xb8] sm:$0xff]  }
 0x41c   : >> { %4886 = vst [vmem:[%s11871_s20 + $0xa0] sm:$0xff] %v4854_v5  ;;  %v5898_v25 = vpop.f32.mrf.mxu0 }
 0x41d   : >> { %v13048_v32 = vadd.f32 %v5898_v25, %v12824_v20  ;;  %v10375_v20 = vld [vmem:[#allocation2 + $0xb8] sm:$0xff]  ;;  %v6853_v5 = vor.u32 %v6851_v13, %v6849_v37  ;;  %v5779_v37 = vsel %vm1926_vm7, %v5774_v39, %v5778_v23  ;;  %v10376_v13 = vld [vmem:[#allocation2 + $0xc0] sm:$0xff] }
 0x41e   : >> { %v6855_v33 = vshll.u32 %v10375_v20, 16  ;;  %v6863_v39 = vshll.u32 %v10376_v13, 16 }
 0x41f   : >> { %5937 = vmatmul.bf16.gmra.mxu0 %v5771_v59  ;;  %v6162_v59 = vsel %vm1484_vm15, %v6152_v15, %v6161_v36 }
 0x420   : >> { %v4704_v28 = vpop.f32.mrf.mxu1  ;;  %v5531_v55 = vpop.f32.mrf.mxu3  ;;  %v6857_v30 = vrot.slane %v6855_v33, 1 }
 0x421   : >> { %v4759_v53 = vadd.f32 %v4704_v28, %v1144_v17  ;;  %v13062_v31 = vadd.f32 %v5531_v55, %v5207_v29  ;;  %v5209_v17 = vpop.f32.mrf.mxu2  ;;  %v6167_v28 = vshll.u32 %v11744_v61, 16  ;;  %v6166_v29 = vrot.slane %v6164_v49, 3  ;;  %v1147_v61 = vld [vmem:[%s11871_s20 + $0xc0] sm:$0xff] }
 0x422   : >> { %v6858_v14 = vsel %vm1926_vm7, %v6853_v5, %v6857_v30  ;;  %v5784_v55 = vshll.u32 %v13075_v21, 16 }
 0x423   : >> { %4887 = vst [vmem:[%s11871_s20 + $0xa8] sm:$0xff] %v4759_v53  ;;  %7042 = vmatmul.bf16.gmra.mxu3 %v6858_v14 }
 0x424   : >> { %v5900_v0 = vpop.f32.mrf.mxu0  ;;  %v5786_v49 = vrot.slane %v5784_v55, 1 }
 0x425   : >> { %v13059_v27 = vadd.f32 %v5900_v0, %v12832_v24  ;;  %v6169_v0 = vrot.slane %v6167_v28, 4 }
 0x426   : >> { %6598 = vmatmul.bf16.gmra.mxu2 %v11269_v57 }
 0x428   : >> { %v4707_v25 = vpop.f32.mrf.mxu1  ;;  %v5533_v60 = vpop.f32.mrf.mxu3 }
 0x429   : >> { %v4760_v12 = vadd.f32 %v4707_v25, %v1145_v11  ;;  %v13073_v26 = vadd.f32 %v5533_v60, %v5209_v17  ;;  %v5212_v3 = vpop.f32.mrf.mxu2  ;;  %v10432_v25 = vld [vmem:[%s12100_s25 + $0x228] sm:$0xff]  ;;  %v6865_v17 = vrot.slane %v6863_v39, 1 }
 0x42a   : >> { %8156 = vmatpush.bf16.msra.mxu2 %v10432_v25 }
 0x42b   : >> { %v4856_v34 = vsel %vm12024_vm12, %v4760_v12, %v1145_v11  ;;  %6366 = vmatmul.bf16.gmra.mxu1 %v6162_v59  ;;  %v6170_v11 = vor.u32 %v6169_v0, %v6166_v29  ;;  %v6859_v59 = vshrl.u32 %v10375_v20, 16 }
 0x42c   : >> { %4888 = vst [vmem:[%s11871_s20 + $0xb0] sm:$0xff] %v4856_v34  ;;  %v5903_v50 = vpop.f32.mrf.mxu0 }
 0x42d   : >> { %v13071_v15 = vadd.f32 %v5903_v50, %v12844_v1  ;;  %v5780_v1 = vshrl.u32 %v13053_v16, 16  ;;  %v6861_v34 = vor.u32 %v6859_v59, %v6857_v30  ;;  %v6171_v16 = vsel %vm1484_vm15, %v6161_v36, %v6170_v11  ;;  %v11270_v59 = vld [vmem:[#allocation2 + $0xc0] sm:$0xff]  }
 0x42f   : >> { %5942 = vmatmul.bf16.gmra.mxu0 %v5779_v37  ;;  %v5782_v37 = vor.u32 %v5780_v1, %v5778_v23  ;;  %v6866_v20 = vsel %vm1926_vm7, %v6861_v34, %v6865_v17  ;;  %v10408_v23 = vld [vmem:[%s12100_s25 + $0x1e8] sm:$0xff]  ;;  %v13100_v34 = vld [vmem:[#allocation2 + $0xf0] sm:$0xff] }
 0x430   : >> { %v4709_v53 = vpop.f32.mrf.mxu1  ;;  %v5536_v12 = vpop.f32.mrf.mxu3  ;;  %v1148_v1 = vld [vmem:[%s11871_s20 + $0xc8] sm:$0xff]  ;;  %7707 = vmatpush.bf16.msra.mxu1 %v10408_v23 }
 0x431   : >> { %v13084_v14 = vadd.f32 %v5536_v12, %v5212_v3  ;;  %v5214_v53 = vpop.f32.mrf.mxu2  ;;  %v5787_v29 = vsel %vm1926_vm7, %v5782_v37, %v5786_v49  ;;  %v10400_v3 = vld [vmem:[%s12100_s25 + $0x1a8] sm:$0xff] }
 0x432   : >> { %7490 = vmatpush.bf16.msra.mxu0 %v10400_v3 }
 0x433   : >> { %7047 = vmatmul.bf16.gmra.mxu3 %v6866_v20  ;;  %v5792_v20 = vshll.u32 %v13100_v34, 16 }
 0x434   : >> { %v5905_v33 = vpop.f32.mrf.mxu0 }
 0x435   : >> { %v13080_v5 = vadd.f32 %v5905_v33, %v12857_v2  ;;  %v11746_v2 = vld [vmem:[#allocation2 + $0xb4] sm:$0xff]  }
 0x436   : >> { %v6173_v0 = vshrl.u32 %v11746_v2, 16  ;;  %v6176_v36 = vshll.u32 %v11746_v2, 16  ;;  %6603 = vmatmul.bf16.gmra.mxu2 %v11270_v59  ;;  %v5794_v59 = vrot.slane %v5792_v20, 1 }
 0x438   : >> { %v4712_v50 = vpop.f32.mrf.mxu1  ;;  %v5538_v55 = vpop.f32.mrf.mxu3  ;;  %v6178_v12 = vrot.slane %v6176_v36, 4 }
 0x439   : >> { %v4762_v28 = vadd.f32 %v4712_v50, %v1147_v61  ;;  %v13098_v25 = vadd.f32 %v5538_v55, %v5214_v53  ;;  %v6867_v53 = vshrl.u32 %v10376_v13, 16  ;;  %v903_v13 = vld [vmem:[%s11871_s20 + $0x200] sm:$0xff] }
 0x43b   : >> { %v4858_v57 = vsel %vm11994_vm5, %v4762_v28, %v1147_v61  ;;  %6371 = vmatmul.bf16.gmra.mxu1 %v6171_v16  ;;  %v6175_v61 = vrot.slane %v6173_v0, 3  ;;  %v5217_v16 = vpop.f32.mrf.mxu2  ;;  %v5788_v28 = vshrl.u32 %v13075_v21, 16  ;;  %v6869_v3 = vor.u32 %v6867_v53, %v6865_v17 }
 0x43c   : >> { %4890 = vst [vmem:[%s11871_s20 + $0xc0] sm:$0xff] %v4858_v57  ;;  %v5908_v30 = vpop.f32.mrf.mxu0  ;;  %v975_v17 = vmax.f32 %v903_v13, 0.0  ;;  %v13126_v13 = vld [vmem:[#allocation2 + $0xf8] sm:$0xff] }
 0x43d   : >> { %v13095_v33 = vadd.f32 %v5908_v30, %v12869_v43  ;;  %v10377_v43 = vld [vmem:[#allocation2 + $0xc8] sm:$0xff]  ;;  %v6179_v2 = vor.u32 %v6178_v12, %v6175_v61  ;;  %v5790_v21 = vor.u32 %v5788_v28, %v5786_v49 }
 0x43e   : >> { %v6871_v30 = vshll.u32 %v10377_v43, 16  ;;  %v904_v12 = vld [vmem:[%s11871_s20 + $0x208] sm:$0xff] }
 0x43f   : >> { %5947 = vmatmul.bf16.gmra.mxu0 %v5787_v29  ;;  %v1149_v29 = vld [vmem:[%s11871_s20 + $0xd0] sm:$0xff]  ;;  %v6180_v55 = vsel %vm1484_vm15, %v6170_v11, %v6179_v2  ;;  %v976_v28 = vmax.f32 %v904_v12, 0.0 }
 0x440   : >> { %v4714_v39 = vpop.f32.mrf.mxu1  ;;  %v5541_v0 = vpop.f32.mrf.mxu3  ;;  %v6873_v23 = vrot.slane %v6871_v30, 1  ;;  %v5795_v30 = vsel %vm1926_vm7, %v5790_v21, %v5794_v59 }
 0x441   : >> { %v4763_v50 = vadd.f32 %v4714_v39, %v1148_v1  ;;  %v13109_v36 = vadd.f32 %v5541_v0, %v5217_v16  ;;  %v11748_v39 = vld [vmem:[#allocation2 + $0xbc] sm:$0xff]  }
 0x442   : >> { %v6182_v11 = vshrl.u32 %v11748_v39, 16  ;;  %v6185_v49 = vshll.u32 %v11748_v39, 16 }
 0x443   : >> { %4891 = vst [vmem:[%s11871_s20 + $0xc8] sm:$0xff] %v4763_v50  ;;  %v5219_v16 = vpop.f32.mrf.mxu2 }
 0x444   : >> { %v5910_v37 = vpop.f32.mrf.mxu0 }
 0x445   : >> { %v13106_v57 = vadd.f32 %v5910_v37, %v12881_v7  ;;  %v6874_v7 = vsel %vm1926_vm7, %v6869_v3, %v6873_v23  ;;  %v13122_v3 = vpack.c.bf16 %v976_v28, %v975_v17 }
 0x446   : >> { %7052 = vmatmul.bf16.gmra.mxu3 %v6874_v7  ;;  %v6187_v7 = vrot.slane %v6185_v49, 4  ;;  %v1151_v49 = vld [vmem:[%s11871_s20 + $0xe0] sm:$0xff] }
 0x447   : >> { %11039 = vst [vmem:[#allocation2 + $0x108] sm:$0xff] %v13122_v3  }
 0x448   : >> { %v4717_v1 = vpop.f32.mrf.mxu1  ;;  %v5543_v0 = vpop.f32.mrf.mxu3 }
 0x449   : >> { %v4764_v61 = vadd.f32 %v4717_v1, %v1149_v29  ;;  %v13124_v1 = vadd.f32 %v5543_v0, %v5219_v16  ;;  %v5800_v16 = vshll.u32 %v13126_v13, 16 }
 0x44b   : >> { %v4860_v37 = vsel %vm12030_vm13, %v4764_v61, %v1149_v29  ;;  %6376 = vmatmul.bf16.gmra.mxu1 %v6180_v55  ;;  %v11271_v29 = vld [vmem:[#allocation2 + $0xc8] sm:$0xff]   ;;  %v6184_v61 = vrot.slane %v6182_v11, 3  ;;  %v5222_v21 = vpop.f32.mrf.mxu2 }
 0x44c   : >> { %4892 = vst [vmem:[%s11871_s20 + $0xd0] sm:$0xff] %v4860_v37  ;;  %v5913_v53 = vpop.f32.mrf.mxu0  ;;  %6608 = vmatmul.bf16.gmra.mxu2 %v11271_v29  ;;  %v5796_v37 = vshrl.u32 %v13100_v34, 16 }
 0x44d   : >> { %v13120_v20 = vadd.f32 %v5913_v53, %v12892_v47  ;;  %v13129_v47 = vld [vmem:[#allocation2 + $0xd0] sm:$0xff]  ;;  %v13131_v12 = vor.u32 %v6187_v7, %v6184_v61  ;;  %v10431_v53 = vld [vmem:[%s12100_s25 + $0x220] sm:$0xff]  ;;  %v5802_v7 = vrot.slane %v5800_v16, 1 }
 0x44e   : >> { %v6879_v11 = vshll.u32 %v13129_v47, 16  ;;  %8157 = vmatpush.bf16.msra.mxu2 %v10431_v53  ;;  %v10399_v53 = vld [vmem:[%s12100_s25 + $0x1a0] sm:$0xff]  ;;  %v5588_v41 = vld [vmem:[#allocation2 + $0x108] sm:$0x1] }
 0x44f   : >> { %5952 = vmatmul.bf16.gmra.mxu0 %v5795_v30  ;;  %v6875_v30 = vshrl.u32 %v10377_v43, 16  ;;  %v6189_v34 = vsel %vm1484_vm15, %v6179_v2, %v13131_v12 }
 0x450   : >> { %v4719_v55 = vpop.f32.mrf.mxu1  ;;  %v5546_v28 = vpop.f32.mrf.mxu3  ;;  %7491 = vmatpush.bf16.msra.mxu0 %v10399_v53  ;;  %v10397_v53 = vld [vmem:[%s12100_s25 + $0x190] sm:$0xff] }
 0x451   : >> { %v13141_v0 = vadd.f32 %v5546_v28, %v5222_v21  ;;  %v6877_v29 = vor.u32 %v6875_v30, %v6873_v23  ;;  %v6881_v55 = vrot.slane %v6879_v11, 1 }
 0x453   : >> { %v6882_v50 = vsel %vm1926_vm7, %v6877_v29, %v6881_v55  ;;  %v5224_v23 = vpop.f32.mrf.mxu2  ;;  %v11272_v29 = vld [vmem:[#allocation2 + $0xd0] sm:$0xff]  }
 0x454   : >> { %v5915_v39 = vpop.f32.mrf.mxu0 }
 0x455   : >> { %v13136_v17 = vadd.f32 %v5915_v39, %v12908_v38  ;;  %v5798_v38 = vor.u32 %v5796_v37, %v5794_v59  ;;  %v11750_v39 = vld [vmem:[#allocation2 + $0xc4] sm:$0xff]  }
 0x456   : >> { %7057 = vmatmul.bf16.gmra.mxu3 %v6882_v50  ;;  %v6191_v11 = vshrl.u32 %v11750_v39, 16  ;;  %v6194_v59 = vshll.u32 %v11750_v39, 16  ;;  %v10407_v37 = vld [vmem:[%s12100_s25 + $0x1e0] sm:$0xff]  ;;  %v1152_v50 = vld [vmem:[%s11871_s20 + $0xe8] sm:$0xff] }
 0x457   : >> { %v5803_v2 = vsel %vm1926_vm7, %v5798_v38, %v5802_v7  ;;  %7708 = vmatpush.bf16.msra.mxu1 %v10407_v37 }
 0x458   : >> { %v4722_v61 = vpop.f32.mrf.mxu1  ;;  %v5548_v28 = vpop.f32.mrf.mxu3  ;;  %v6196_v38 = vrot.slane %v6194_v59, 4  ;;  %v6883_v59 = vshrl.u32 %v13129_v47, 16 }
 0x459   : >> { %v4766_v43 = vadd.f32 %v4722_v61, %v1151_v49  ;;  %v10398_v61 = vld [vmem:[%s12100_s25 + $0x198] sm:$0xff] }
 0x45a   : >> { %7492 = vmatpush.bf16.msra.mxu0 %v10398_v61  ;;  %v6885_v60 = vor.u32 %v6883_v59, %v6881_v55  ;;  %v10395_v59 = vld [vmem:[%s12100_s25 + $0x180] sm:$0xff] }
 0x45b   : >> { %v4862_v21 = vsel %vm11998_vm6, %v4766_v43, %v1151_v49  ;;  %6381 = vmatmul.bf16.gmra.mxu1 %v6189_v34  ;;  %v13156_v49 = vadd.f32 %v5548_v28, %v5224_v23  ;;  %v6193_v43 = vrot.slane %v6191_v11, 3  ;;  %v5227_v39 = vpop.f32.mrf.mxu2  ;;  %v5804_v23 = vshrl.u32 %v13126_v13, 16 }
 0x45c   : >> { %4894 = vst [vmem:[%s11871_s20 + $0xe0] sm:$0xff] %v4862_v21  ;;  %v5918_v30 = vpop.f32.mrf.mxu0  ;;  %v13159_v21 = vld [vmem:[#allocation2 + $0x100] sm:$0xff]  ;;  %6613 = vmatmul.bf16.gmra.mxu2 %v11272_v29  ;;  %7709 = vmatpush.bf16.msra.mxu1 %v10406_v19  ;;  %v10381_v19 = vld [vmem:[#allocation2 + $0xe8] sm:$0xff] }
 0x45d   : >> { %v13153_v16 = vadd.f32 %v5918_v30, %v12920_v48  ;;  %v10379_v30 = vld [vmem:[#allocation2 + $0xd8] sm:$0xff]  ;;  %v5808_v28 = vshll.u32 %v13159_v21, 16  ;;  %v5806_v24 = vor.u32 %v5804_v23, %v5802_v7  ;;  %v5670_v23 = vunpack.c.l.b16 %v5588_v41 }
 0x45e   : >> { %7493 = vmatpush.bf16.msra.mxu0 %v10397_v53  ;;  %v6887_v29 = vshll.u32 %v10379_v30, 16 }
 0x45f   : >> { %5957 = vmatmul.bf16.gmra.mxu0 %v5803_v2  ;;  %v6197_v2 = vor.u32 %v6196_v38, %v6193_v43 }
 0x460   : >> { %v4724_v34 = vpop.f32.mrf.mxu1  ;;  %v5551_v61 = vpop.f32.mrf.mxu3  ;;  %v6889_v43 = vrot.slane %v6887_v29, 1 }
 0x461   : >> { %v4767_v48 = vadd.f32 %v4724_v34, %v1152_v50  ;;  %v1153_v50 = vld [vmem:[%s11871_s20 + $0xf0] sm:$0xff]  ;;  %v13170_v34 = vadd.f32 %v5551_v61, %v5227_v39  ;;  %v6198_v13 = vsel %vm1484_vm15, %v13131_v12, %v6197_v2  ;;  %v14081_v39 = vld [vmem:[#allocation17_spill] sm:$0xff] }
 0x462   : >> { %v6890_v47 = vsel %vm1926_vm7, %v6885_v60, %v6889_v43  ;;  %vm14082_vm14 = vnez %v14081_v39  ;;  %v14083_v39 = vld [vmem:[#allocation10_spill] sm:$0xff] }
 0x463   : >> { %4895 = vst [vmem:[%s11871_s20 + $0xe8] sm:$0xff] %v4767_v48  ;;  %v10396_v48 = vld [vmem:[%s12100_s25 + $0x188] sm:$0xff]  ;;  %v5229_v55 = vpop.f32.mrf.mxu2 }
 0x464   : >> { %v5920_v37 = vpop.f32.mrf.mxu0  ;;  %7494 = vmatpush.bf16.msra.mxu0 %v10396_v48  ;;  %v11273_v48 = vld [vmem:[#allocation2 + $0xd8] sm:$0xff]  }
 0x465   : >> { %v13166_v11 = vadd.f32 %v5920_v37, %v12931_v18  ;;  %v5810_v18 = vrot.slane %v5808_v28, 1  ;;  %v11752_v37 = vld [vmem:[#allocation2 + $0xcc] sm:$0xff]  }
 0x466   : >> { %7062 = vmatmul.bf16.gmra.mxu3 %v6890_v47  ;;  %v6200_v12 = vshrl.u32 %v11752_v37, 16  ;;  %v6203_v7 = vshll.u32 %v11752_v37, 16  ;;  %v5687_v47 = vpack.c.b16 %v5670_v23, %v5670_v23  ;;  %v13188_v37 = vld [vmem:[#allocation2 + $0xe0] sm:$0xff]  ;;  %v11754_v23 = vld [vmem:[#allocation2 + $0xd4] sm:$0xff]  }
 0x467   : >> { %v5811_v46 = vsel %vm1926_vm7, %v5806_v24, %v5810_v18 }
 0x468   : >> { %v4727_v38 = vpop.f32.mrf.mxu1  ;;  %7495 = vmatpush.bf16.msra.mxu0 %v10395_v59  ;;  %v5553_v60 = vpop.f32.mrf.mxu3  ;;  %v5816_v59 = vshll.u32 %v5687_v47, 16 }
 0x469   : >> { %v4768_v53 = vadd.f32 %v4727_v38, %v1153_v50  ;;  %v13184_v38 = vadd.f32 %v5553_v60, %v5229_v55  ;;  %v10430_v55 = vld [vmem:[%s12100_s25 + $0x218] sm:$0xff] }
 0x46a   : >> { %8158 = vmatpush.bf16.msra.mxu2 %v10430_v55 }
 0x46b   : >> { %v4864_v61 = vsel %vm14082_vm14, %v4768_v53, %v1153_v50  ;;  %6386 = vmatmul.bf16.gmra.mxu1 %v6198_v13  ;;  %v6202_v13 = vrot.slane %v6200_v12, 3  ;;  %v6205_v53 = vrot.slane %v6203_v7, 4  ;;  %v13186_v24 = vpop.f32.mrf.mxu2  ;;  %v6895_v12 = vshll.u32 %v13188_v37, 16  ;;  %v1155_v7 = vld [vmem:[%s11871_s20 + $0x100] sm:$0xff] }
 0x46c   : >> { %4896 = vst [vmem:[%s11871_s20 + $0xf0] sm:$0xff] %v4864_v61  ;;  %v5923_v29 = vpop.f32.mrf.mxu0  ;;  %6618 = vmatmul.bf16.gmra.mxu2 %v11273_v48  ;;  %v5812_v61 = vshrl.u32 %v13159_v21, 16  ;;  %vm14084_vm14 = vnez %v14083_v39 }
 0x46d   : >> { %v13182_v28 = vadd.f32 %v5923_v29, %v12942_v22  ;;  %v13190_v22 = vor.u32 %v6205_v53, %v6202_v13  ;;  %v6891_v29 = vshrl.u32 %v10379_v30, 16  ;;  %v6897_v60 = vrot.slane %v6895_v12, 1 }
 0x46e   : >> { %v5814_v21 = vor.u32 %v5812_v61, %v5810_v18  ;;  %v5818_v53 = vrot.slane %v5816_v59, 1  ;;  %v11771_v61 = vld [vmem:[#allocation2 + $0xac] sm:$0xff]   ;;  %8159 = vmatpush.bf16.msra.mxu2 %v10429_v45 }
 0x46f   : >> { %5962 = vmatmul.bf16.gmra.mxu0 %v5811_v46  ;;  %v6893_v48 = vor.u32 %v6891_v29, %v6889_v43  ;;  %v6207_v13 = vsel %vm1484_vm15, %v6197_v2, %v13190_v22  ;;  %v6209_v43 = vshrl.u32 %v11754_v23, 16  ;;  %v6212_v29 = vshll.u32 %v11754_v23, 16 }
 0x470   : >> { %v4729_v50 = vpop.f32.mrf.mxu1  ;;  %v5819_v18 = vsel %vm1926_vm7, %v5814_v21, %v5818_v53  ;;  %v7281_v40 = vshrl.u32 %v11771_v61, 16  ;;  %v7284_v63 = vshll.u32 %v11771_v61, 16  ;;  %v6899_v61 = vshrl.u32 %v13188_v37, 16 }
 0x471   : >> { %v6898_v30 = vsel %vm1926_vm7, %v6893_v48, %v6897_v60  ;;  %v6211_v23 = vrot.slane %v6209_v43, 3 }
 0x472   : >> { %v7283_v62 = vrot.slane %v7281_v40, 3  ;;  %v7286_v43 = vrot.slane %v7284_v63, 4 }
 0x473   : >> { %v13204_v12 = vpop.f32.mrf.mxu2 }
 0x474   : >> { %v5925_v41 = vpop.f32.mrf.mxu0  ;;  %v7287_v40 = vor.u32 %v7286_v43, %v7283_v62  ;;  %v11773_v62 = vld [vmem:[#allocation2 + $0xb4] sm:$0xff]  }
 0x475   : >> { %v13194_v46 = vadd.f32 %v5925_v41, %v12954_v42  ;;  %v11598_v42 = vld [vmem:[#allocation2 + $0xa4] sm:$0x8]  ;;  %v11769_v41 = vld [vmem:[#allocation2 + $0xa4] sm:$0xf0]  }
 0x476   : >> { %7067 = vmatmul.bf16.gmra.mxu3 %v6898_v30  ;;  %v11599_v59 = vor.u32 %v11769_v41, %v11598_v42 }
 0x478   : >> { %v4732_v50 = vpop.f32.mrf.mxu1  ;;  %v7273_v39 = vshrl.u32 %v11599_v59, 16 }
 0x479   : >> { %v4770_v47 = vadd.f32 %v4732_v50, %v1155_v7  ;;  %v13212_v50 = vpop.f32.mrf.mxu3 }
 0x47a   : >> { %v7275_v41 = vrot.slane %v7273_v39, 3 }
 0x47b   : >> { %v4866_v55 = vsel %vm14084_vm14, %v4770_v47, %v1155_v7  ;;  %6391 = vmatmul.bf16.gmra.mxu1 %v6207_v13  ;;  %v11274_v7 = vld [vmem:[#allocation2 + $0xe0] sm:$0xff]   ;;  %v1156_v13 = vld [vmem:[%s11871_s20 + $0x108] sm:$0xff]  ;;  %v6214_v47 = vrot.slane %v6212_v29, 4 }
 0x47c   : >> { %4898 = vst [vmem:[%s11871_s20 + $0x100] sm:$0xff] %v4866_v55  ;;  %v5928_v2 = vpop.f32.mrf.mxu0  ;;  %v7276_v55 = vshll.u32 %v11599_v59, 16  ;;  %6623 = vmatmul.bf16.gmra.mxu2 %v11274_v7  ;;  %v6903_v59 = vshll.u32 %v10381_v19, 16  ;;  %v1157_v7 = vld [vmem:[%s11871_s20 + $0x110] sm:$0xff] }
 0x47d   : >> { %v13210_v48 = vadd.f32 %v5928_v2, %v12966_v6  ;;  %v6215_v53 = vor.u32 %v6214_v47, %v6211_v23  ;;  %v13216_v6 = vpop.f32.mrf.mxu2 }
 0x47e   : >> { %v7278_v2 = vrot.slane %v7276_v55, 4  ;;  %v6905_v23 = vrot.slane %v6903_v59, 1  ;;  %v11756_v55 = vld [vmem:[#allocation2 + $0xdc] sm:$0xff]   ;;  %v11275_v59 = vld [vmem:[#allocation2 + $0xe8] sm:$0xff]  }
 0x47f   : >> { %5967 = vmatmul.bf16.gmra.mxu0 %v5819_v18  ;;  %v6216_v39 = vsel %vm1484_vm15, %v13190_v22, %v6215_v53  ;;  %v6218_v22 = vshrl.u32 %v11756_v55, 16 }
 0x480   : >> { %v4734_v30 = vpop.f32.mrf.mxu1 }
 0x481   : >> { %v4771_v21 = vadd.f32 %v4734_v30, %v1156_v13  ;;  %v13221_v18 = vpop.f32.mrf.mxu3  ;;  %v6901_v13 = vor.u32 %v6899_v61, %v6897_v60  ;;  %v7279_v30 = vor.u32 %v7278_v2, %v7275_v41  ;;  %v6221_v41 = vshll.u32 %v11756_v55, 16 }
 0x483   : >> { %4899 = vst [vmem:[%s11871_s20 + $0x108] sm:$0xff] %v4771_v21  ;;  %v10442_v21 = vld [vmem:[%s12461_s29 + $0x38] sm:$0xff]  ;;  %v7288_v61 = vsel %vm1484_vm15, %v7279_v30, %v7287_v40  ;;  %v10382_v30 = vld [vmem:[#allocation2 + $0xf0] sm:$0xff] }
 0x484   : >> { %v5930_v42 = vpop.f32.mrf.mxu0  ;;  %8387 = vmatpush.bf16.msra.mxu3 %v10442_v21 }
 0x485   : >> { %v13219_v29 = vadd.f32 %v5930_v42, %v12977_v4  ;;  %v6906_v4 = vsel %vm1926_vm7, %v6901_v13, %v6905_v23  ;;  %v14085_v42 = vld [vmem:[#allocation18_spill] sm:$0xff]  ;;  %v13231_v10 = vpop.f32.mrf.mxu2  ;;  %v6220_v13 = vrot.slane %v6218_v22, 3  ;;  %v6911_v22 = vshll.u32 %v10382_v30, 16 }
 0x486   : >> { %7072 = vmatmul.bf16.gmra.mxu3 %v6906_v4  ;;  %vm14086_vm14 = vnez %v14085_v42 }
 0x488   : >> { %v4737_v47 = vpop.f32.mrf.mxu1 }
 0x489   : >> { %v4772_v63 = vadd.f32 %v4737_v47, %v1157_v7  ;;  %v13238_v43 = vpop.f32.mrf.mxu3  ;;  %v6223_v47 = vrot.slane %v6221_v41, 4 }
 0x48b   : >> { %v4868_v37 = vsel %vm14086_vm14, %v4772_v63, %v1157_v7  ;;  %6396 = vmatmul.bf16.gmra.mxu1 %v6216_v39  ;;  %v7290_v39 = vshrl.u32 %v11773_v62, 16  ;;  %v7293_v63 = vshll.u32 %v11773_v62, 16  ;;  %v6224_v55 = vor.u32 %v6223_v47, %v6220_v13 }
 0x48c   : >> { %4900 = vst [vmem:[%s11871_s20 + $0x110] sm:$0xff] %v4868_v37  ;;  %v5933_v60 = vpop.f32.mrf.mxu0  ;;  %6628 = vmatmul.bf16.gmra.mxu2 %v11275_v59  ;;  %v6913_v62 = vrot.slane %v6911_v22, 1 }
 0x48d   : >> { %v13236_v2 = vadd.f32 %v5933_v60, %v12992_v56  ;;  %v13240_v4 = vpop.f32.mrf.mxu2  ;;  %v7292_v37 = vrot.slane %v7290_v39, 3  ;;  %v7295_v42 = vrot.slane %v7293_v63, 4 }
 0x48f   : >> { %14087 = vst [vmem:[#allocation19_spill] sm:$0xff] %v13236_v2  ;;  %7496 = vmatmul.bf16.vlgmr.msra.gmra.mxu0 %v7288_v61  ;;  %v6907_v61 = vshrl.u32 %v10381_v19, 16  ;;  %v7296_v35 = vor.u32 %v7295_v42, %v7292_v37  ;;  %v11758_v2 = vld [vmem:[#allocation2 + $0xe4] sm:$0xff]   ;;  %v10405_v19 = vld [vmem:[%s12100_s25 + $0x1d0] sm:$0xff] }
 0x490   : >> { %v4739_v7 = vpop.f32.mrf.mxu1  ;;  %7710 = vmatpush.bf16.msra.mxu1 %v10405_v19  ;;  %v11276_v37 = vld [vmem:[#allocation2 + $0xf0] sm:$0xff]  }
 0x491   : >> { %v13245_v60 = vpop.f32.mrf.mxu3  ;;  %v6909_v41 = vor.u32 %v6907_v61, %v6905_v23  ;;  %v6225_v7 = vsel %vm1484_vm15, %v6215_v53, %v6224_v55  ;;  %v7297_v45 = vsel %vm1484_vm15, %v7287_v40, %v7296_v35  ;;  %v6227_v23 = vshrl.u32 %v11758_v2, 16  ;;  %v11775_v61 = vld [vmem:[#allocation2 + $0xbc] sm:$0xff]  }
 0x493   : >> { %v6914_v47 = vsel %vm1926_vm7, %v6909_v41, %v6913_v62  ;;  %v6229_v22 = vrot.slane %v6227_v23, 3 }
 0x494   : >> { %v5935_v21 = vpop.f32.mrf.mxu0 }
 0x495   : >> { %v13243_v56 = vadd.f32 %v5935_v21, %v13007_v52  ;;  %v13252_v39 = vpop.f32.mrf.mxu2  ;;  %v6230_v21 = vshll.u32 %v11758_v2, 16 }
 0x496   : >> { %7077 = vmatmul.bf16.gmra.mxu3 %v6914_v47 }
 0x497   : >> { %v6232_v41 = vrot.slane %v6230_v21, 4  ;;  %v6915_v21 = vshrl.u32 %v10382_v30, 16 }
 0x498   : >> { %v6362_v59 = vpop.f32.mrf.mxu1 }
 0x499   : >> { %v6442_v13 = vadd.f32 %v6362_v59, %v13024_v8  ;;  %v13262_v42 = vpop.f32.mrf.mxu3  ;;  %v7299_v59 = vshrl.u32 %v11775_v61, 16  ;;  %v6233_v47 = vor.u32 %v6232_v41, %v6229_v22  ;;  %v11760_v22 = vld [vmem:[#allocation2 + $0xec] sm:$0xff]  }
 0x49b   : >> { %6401 = vmatmul.bf16.gmra.mxu1 %v6225_v7  ;;  %v6659_v52 = vadd.f32 %v13186_v24, %v6442_v13  ;;  %v7302_v7 = vshll.u32 %v11775_v61, 16  ;;  %v10383_v13 = vld [vmem:[#allocation2 + $0xf8] sm:$0xff]  ;;  %v6917_v61 = vor.u32 %v6915_v21, %v6913_v62 }
 0x49c   : >> { %v5938_v63 = vpop.f32.mrf.mxu0  ;;  %6633 = vmatmul.bf16.gmra.mxu2 %v11276_v37  ;;  %v11277_v21 = vld [vmem:[#allocation2 + $0xf8] sm:$0xff]  }
 0x49d   : >> { %v13257_v53 = vadd.f32 %v5938_v63, %v13016_v51  ;;  %v13260_v8 = vadd.f32 %v13212_v50, %v6659_v52  ;;  %v13266_v51 = vpop.f32.mrf.mxu2  ;;  %v7301_v52 = vrot.slane %v7299_v59, 3  ;;  %v7304_v19 = vrot.slane %v7302_v7, 4 }
 0x49f   : >> { %7501 = vmatmul.bf16.gmra.mxu0 %v7297_v45 }
 0x4a0   : >> { %v6364_v24 = vpop.f32.mrf.mxu1 }
 0x4a1   : >> { %v6443_v40 = vadd.f32 %v6364_v24, %v13033_v54  ;;  %v13274_v23 = vpop.f32.mrf.mxu3  ;;  %v6919_v54 = vshll.u32 %v10383_v13, 16  ;;  %v6234_v24 = vsel %vm1484_vm15, %v6224_v55, %v6233_v47  ;;  %v11777_v55 = vld [vmem:[#allocation2 + $0xc4] sm:$0xff]  }
 0x4a3   : >> { %v6660_v2 = vadd.f32 %v13204_v12, %v6443_v40  ;;  %v6921_v12 = vrot.slane %v6919_v54, 1  ;;  %v7305_v40 = vor.u32 %v7304_v19, %v7301_v52 }
 0x4a4   : >> { %v5940_v50 = vpop.f32.mrf.mxu0 }
 0x4a5   : >> { %v13269_v63 = vadd.f32 %v5940_v50, %v13026_v44  ;;  %v13272_v45 = vadd.f32 %v13221_v18, %v6660_v2  ;;  %v6922_v59 = vsel %vm1926_vm7, %v6917_v61, %v6921_v12  ;;  %v10441_v44 = vld [vmem:[%s12461_s29 + $0x30] sm:$0xff]  ;;  %v13281_v7 = vpop.f32.mrf.mxu2  ;;  %v7306_v62 = vsel %vm1484_vm15, %v7296_v35, %v7305_v40 }
 0x4a6   : >> { %7082 = vmatmul.bf16.gmra.mxu3 %v6922_v59  ;;  %v6236_v2 = vshrl.u32 %v11760_v22, 16  ;;  %v6239_v50 = vshll.u32 %v11760_v22, 16 }
 0x4a7   : >> { %8388 = vmatpush.bf16.msra.mxu3 %v10441_v44 }
 0x4a8   : >> { %v6367_v37 = vpop.f32.mrf.mxu1  ;;  %v6238_v54 = vrot.slane %v6236_v2, 3  ;;  %v6241_v61 = vrot.slane %v6239_v50, 4  ;;  %v10428_v50 = vld [vmem:[%s12100_s25 + $0x208] sm:$0xff] }
 0x4a9   : >> { %v6444_v41 = vadd.f32 %v6367_v37, %v13048_v32  ;;  %v13290_v19 = vpop.f32.mrf.mxu3  ;;  %v7308_v37 = vshrl.u32 %v11777_v55, 16  ;;  %8160 = vmatpush.bf16.msra.mxu2 %v10428_v50 }
 0x4aa   : >> { %v6242_v59 = vor.u32 %v6241_v61, %v6238_v54 }
 0x4ab   : >> { %6406 = vmatmul.bf16.gmra.mxu1 %v6234_v24  ;;  %v6661_v18 = vadd.f32 %v13216_v6, %v6444_v41  ;;  %v7311_v24 = vshll.u32 %v11777_v55, 16  ;;  %v10384_v41 = vld [vmem:[#allocation2 + $0x100] sm:$0xff]  ;;  %v7310_v44 = vrot.slane %v7308_v37, 3  ;;  %v11762_v37 = vld [vmem:[#allocation2 + $0xf4] sm:$0xff]  }
 0x4ac   : >> { %v5943_v30 = vpop.f32.mrf.mxu0  ;;  %6638 = vmatmul.bf16.gmra.mxu2 %v11277_v21  ;;  %v6927_v55 = vshll.u32 %v10384_v41, 16  ;;  %v6243_v54 = vsel %vm1484_vm15, %v6233_v47, %v6242_v59  ;;  %v6248_v50 = vshll.u32 %v11762_v37, 16 }
 0x4ad   : >> { %v13285_v52 = vadd.f32 %v5943_v30, %v13037_v58  ;;  %v13288_v32 = vadd.f32 %v13238_v43, %v6661_v18  ;;  %v13294_v58 = vpop.f32.mrf.mxu2  ;;  %v7313_v18 = vrot.slane %v7311_v24, 4 }
 0x4ae   : >> { %v6929_v21 = vrot.slane %v6927_v55, 1 }
 0x4af   : >> { %7506 = vmatmul.bf16.gmra.mxu0 %v7306_v62  ;;  %v7314_v61 = vor.u32 %v7313_v18, %v7310_v44  ;;  %v11278_v18 = vld [vmem:[#allocation2 + $0x100] sm:$0xff]  }
 0x4b0   : >> { %v6369_v6 = vpop.f32.mrf.mxu1 }
 0x4b1   : >> { %v6445_v35 = vadd.f32 %v6369_v6, %v13059_v27  ;;  %v13302_v2 = vpop.f32.mrf.mxu3  ;;  %v6923_v27 = vshrl.u32 %v10383_v13, 16  ;;  %v10404_v13 = vld [vmem:[%s12100_s25 + $0x1c8] sm:$0xff] }
 0x4b2   : >> { %7711 = vmatpush.bf16.msra.mxu1 %v10404_v13 }
 0x4b3   : >> { %v6662_v22 = vadd.f32 %v13231_v10, %v6445_v35  ;;  %v6925_v10 = vor.u32 %v6923_v27, %v6921_v12  ;;  %v7315_v12 = vsel %vm1484_vm15, %v7305_v40, %v7314_v61  ;;  %v11779_v27 = vld [vmem:[#allocation2 + $0xcc] sm:$0xff]  }
 0x4b4   : >> { %v5945_v43 = vpop.f32.mrf.mxu0 }
 0x4b5   : >> { %v13297_v30 = vadd.f32 %v5945_v43, %v13051_v9  ;;  %v13300_v62 = vadd.f32 %v13245_v60, %v6662_v22  ;;  %v6930_v24 = vsel %vm1926_vm7, %v6925_v10, %v6929_v21  ;;  %v13309_v35 = vpop.f32.mrf.mxu2  ;;  %v6245_v43 = vshrl.u32 %v11762_v37, 16 }
 0x4b6   : >> { %7087 = vmatmul.bf16.gmra.mxu3 %v6930_v24  ;;  %v6250_v10 = vrot.slane %v6248_v50, 4 }
 0x4b7   : >> { %v6247_v55 = vrot.slane %v6245_v43, 3  ;;  %v6931_v43 = vshrl.u32 %v10384_v41, 16  ;;  %v10440_v41 = vld [vmem:[%s12461_s29 + $0x28] sm:$0xff] }
 0x4b8   : >> { %v6372_v6 = vpop.f32.mrf.mxu1  ;;  %8389 = vmatpush.bf16.msra.mxu3 %v10440_v41 }
 0x4b9   : >> { %v6446_v9 = vadd.f32 %v6372_v6, %v13071_v15  ;;  %v13319_v44 = vpop.f32.mrf.mxu3  ;;  %v7317_v6 = vshrl.u32 %v11779_v27, 16  ;;  %v13327_v24 = vor.u32 %v6250_v10, %v6247_v55  ;;  %v6933_v50 = vor.u32 %v6931_v43, %v6929_v21 }
 0x4bb   : >> { %6411 = vmatmul.bf16.gmra.mxu1 %v6243_v54  ;;  %v6663_v60 = vadd.f32 %v13240_v4, %v6446_v9  ;;  %v7320_v54 = vshll.u32 %v11779_v27, 16  ;;  %v6252_v10 = vsel %vm1484_vm15, %v6242_v59, %v13327_v24 }
 0x4bc   : >> { %v5948_v22 = vpop.f32.mrf.mxu0  ;;  %6643 = vmatmul.bf16.gmra.mxu2 %v11278_v18  ;;  %v905_v18 = vld [vmem:[%s11871_s20 + $0x210] sm:$0xff] }
 0x4bd   : >> { %v13314_v47 = vadd.f32 %v5948_v22, %v13062_v31  ;;  %v13317_v15 = vadd.f32 %v13262_v42, %v6663_v60  ;;  %v13323_v37 = vpop.f32.mrf.mxu2  ;;  %v13325_v42 = vld [vmem:[#allocation2 + $0x108] sm:$0xff]  ;;  %v7319_v60 = vrot.slane %v7317_v6, 3  ;;  %v7322_v13 = vrot.slane %v7320_v54, 4 }
 0x4be   : >> { %v977_v54 = vmax.f32 %v905_v18, 0.0  ;;  %v11781_v18 = vld [vmem:[#allocation2 + $0xd4] sm:$0xff]  }
 0x4bf   : >> { %7511 = vmatmul.bf16.gmra.mxu0 %v7315_v12  ;;  %v13342_v6 = vor.u32 %v7322_v13, %v7319_v60 }
 0x4c0   : >> { %v6374_v4 = vpop.f32.mrf.mxu1 }
 0x4c1   : >> { %v6447_v40 = vadd.f32 %v6374_v4, %v13080_v5  ;;  %v13335_v5 = vpop.f32.mrf.mxu3  ;;  %v906_v4 = vld [vmem:[%s11871_s20 + $0x218] sm:$0xff]  ;;  %v7324_v60 = vsel %vm1484_vm15, %v7314_v61, %v13342_v6  ;;  %v7326_v61 = vshrl.u32 %v11781_v18, 16 }
 0x4c3   : >> { %v6664_v31 = vadd.f32 %v13252_v39, %v6447_v40  ;;  %v6935_v39 = vshll.u32 %v13325_v42, 16  ;;  %v7328_v41 = vrot.slane %v7326_v61, 3 }
 0x4c4   : >> { %v5950_v9 = vpop.f32.mrf.mxu0 }
 0x4c5   : >> { %v13330_v22 = vadd.f32 %v5950_v9, %v13073_v26  ;;  %v13333_v12 = vadd.f32 %v13274_v23, %v6664_v31  ;;  %v6937_v27 = vrot.slane %v6935_v39, 1  ;;  %v11764_v26 = vld [vmem:[#allocation2 + $0xfc] sm:$0xff]   ;;  %v978_v23 = vmax.f32 %v906_v4, 0.0  ;;  %v13350_v43 = vpop.f32.mrf.mxu2 }
 0x4c6   : >> { %v6254_v13 = vshrl.u32 %v11764_v26, 16  ;;  %v6257_v39 = vshll.u32 %v11764_v26, 16  ;;  %v7329_v26 = vshll.u32 %v11781_v18, 16 }
 0x4c7   : >> { %v6938_v31 = vsel %vm1926_vm7, %v6933_v50, %v6937_v27  ;;  %v13347_v9 = vpack.c.bf16 %v978_v23, %v977_v54 }
 0x4c8   : >> { %v6377_v55 = vpop.f32.mrf.mxu1  ;;  %7092 = vmatmul.bf16.gmra.mxu3 %v6938_v31 }
 0x4c9   : >> { %v6448_v40 = vadd.f32 %v6377_v55, %v13095_v33  ;;  %11040 = vst [vmem:[#allocation2 + $0x110] sm:$0xff] %v13347_v9   ;;  %v13361_v4 = vpop.f32.mrf.mxu3  ;;  %v6256_v55 = vrot.slane %v6254_v13, 3 }
 0x4cb   : >> { %6416 = vmatmul.bf16.gmra.mxu1 %v6252_v10  ;;  %v6665_v21 = vadd.f32 %v13266_v51, %v6448_v40  ;;  %v6259_v10 = vrot.slane %v6257_v39, 4  ;;  %v6939_v39 = vshrl.u32 %v13325_v42, 16 }
 0x4cc   : >> { %v5953_v59 = vpop.f32.mrf.mxu0  ;;  %6648 = vmatmul.bf16.gmra.mxu2 %v13122_v3 }
 0x4cd   : >> { %v13356_v33 = vadd.f32 %v5953_v59, %v13084_v14  ;;  %v13359_v50 = vadd.f32 %v13290_v19, %v6665_v21  ;;  %v13370_v31 = vor.u32 %v6259_v10, %v6256_v55  ;;  %v7331_v21 = vrot.slane %v7329_v26, 4  ;;  %v907_v59 = vld [vmem:[%s11871_s20 + $0x220] sm:$0xff] }
 0x4ce   : >> { %v6941_v10 = vor.u32 %v6939_v39, %v6937_v27 }
 0x4cf   : >> { %7516 = vmatmul.bf16.gmra.mxu0 %v7324_v60  ;;  %v13366_v23 = vpop.f32.mrf.mxu2  ;;  %v908_v60 = vld [vmem:[%s11871_s20 + $0x228] sm:$0xff] }
 0x4d0   : >> { %v6379_v51 = vpop.f32.mrf.mxu1  ;;  %v13368_v19 = vld [vmem:[#allocation2 + $0x110] sm:$0xff]  ;;  %v980_v55 = vmax.f32 %v908_v60, 0.0  ;;  %v11783_v60 = vld [vmem:[#allocation2 + $0xdc] sm:$0xff]  }
 0x4d1   : >> { %v6449_v54 = vadd.f32 %v6379_v51, %v13106_v57  ;;  %v13380_v57 = vpop.f32.mrf.mxu3  ;;  %v6943_v18 = vshll.u32 %v13368_v19, 16  ;;  %v979_v51 = vmax.f32 %v907_v59, 0.0 }
 0x4d2   : >> { %14088 = vst [vmem:[#allocation21_spill] sm:$0xff] %v13380_v57 }
 0x4d3   : >> { %v6666_v14 = vadd.f32 %v13281_v7, %v6449_v54  ;;  %v10427_v7 = vld [vmem:[%s12100_s25 + $0x200] sm:$0xff]  ;;  %v6945_v61 = vrot.slane %v6943_v18, 1 }
 0x4d4   : >> { %v5955_v40 = vpop.f32.mrf.mxu0  ;;  %8161 = vmatpush.bf16.msra.mxu2 %v10427_v7  ;;  %v11766_v54 = vld [vmem:[#allocation2 + $0x104] sm:$0xff]  }
 0x4d5   : >> { %v13375_v13 = vadd.f32 %v5955_v40, %v13098_v25  ;;  %v13378_v3 = vadd.f32 %v13302_v2, %v6666_v14  ;;  %v6261_v25 = vsel %vm1484_vm15, %v13327_v24, %v13370_v31  ;;  %v7332_v2 = vor.u32 %v7331_v21, %v7328_v41  ;;  %v10403_v7 = vld [vmem:[%s12100_s25 + $0x1c0] sm:$0xff] }
 0x4d6   : >> { %v10616_v14 = vpack.c.bf16 %v980_v55, %v979_v51  ;;  %v6946_v42 = vsel %vm1926_vm7, %v6941_v10, %v6945_v61  ;;  %v6263_v41 = vshrl.u32 %v11766_v54, 16  ;;  %v6266_v21 = vshll.u32 %v11766_v54, 16  ;;  %7712 = vmatpush.bf16.msra.mxu1 %v10403_v7 }
 0x4d7   : >> { %v13391_v27 = vpop.f32.mrf.mxu2  ;;  %v7333_v24 = vsel %vm1484_vm15, %v13342_v6, %v7332_v2  ;;  %v7338_v55 = vshll.u32 %v11783_v60, 16 }
 0x4d8   : >> { %v6382_v26 = vpop.f32.mrf.mxu1  ;;  %7097 = vmatmul.bf16.gmra.mxu3 %v6946_v42  ;;  %11041 = vst [vmem:[#allocation2 + $0x118] sm:$0xff] %v10616_v14  }
 0x4d9   : >> { %v6450_v40 = vadd.f32 %v6382_v26, %v13120_v20  ;;  %v13402_v51 = vpop.f32.mrf.mxu3  ;;  %v6265_v26 = vrot.slane %v6263_v41, 3 }
 0x4db   : >> { %6421 = vmatmul.bf16.gmra.mxu1 %v6261_v25  ;;  %v6667_v59 = vadd.f32 %v13294_v58, %v6450_v40  ;;  %v7335_v58 = vshrl.u32 %v11783_v60, 16  ;;  %v6268_v25 = vrot.slane %v6266_v21, 4  ;;  %v7340_v40 = vrot.slane %v7338_v55, 4 }
 0x4dc   : >> { %v5958_v39 = vpop.f32.mrf.mxu0  ;;  %6653 = vmatmul.bf16.gmra.mxu2 %v13347_v9 }
 0x4dd   : >> { %v13397_v18 = vadd.f32 %v5958_v39, %v13109_v36  ;;  %v13400_v20 = vadd.f32 %v13319_v44, %v6667_v59  ;;  %v7337_v44 = vrot.slane %v7335_v58, 3  ;;  %v6269_v7 = vor.u32 %v6268_v25, %v6265_v26  ;;  %v10439_v25 = vld [vmem:[%s12461_s29 + $0x20] sm:$0xff] }
 0x4de   : >> { %8390 = vmatpush.bf16.msra.mxu3 %v10439_v25 }
 0x4df   : >> { %7521 = vmatmul.bf16.gmra.mxu0 %v7333_v24  ;;  %v6723_v54 = vld [vmem:[#allocation2 + $0x118] sm:$0x1]  ;;  %v13409_v42 = vpop.f32.mrf.mxu2  ;;  %v7341_v21 = vor.u32 %v7340_v40, %v7337_v44  ;;  %v6270_v55 = vsel %vm1484_vm15, %v13370_v31, %v6269_v7  ;;  %v11785_v31 = vld [vmem:[#allocation2 + $0xe4] sm:$0xff]  }
 0x4e0   : >> { %v6384_v10 = vpop.f32.mrf.mxu1  ;;  %v6805_v14 = vunpack.c.l.b16 %v6723_v54  ;;  %v7347_v57 = vshll.u32 %v11785_v31, 16 }
 0x4e1   : >> { %v6451_v6 = vadd.f32 %v6384_v10, %v13136_v17  ;;  %v13414_v24 = vpop.f32.mrf.mxu3  ;;  %v6947_v17 = vshrl.u32 %v13368_v19, 16  ;;  %v11767_v10 = vld [vmem:[#allocation2 + $0x10c] sm:$0xff]   ;;  %v7342_v44 = vsel %vm1484_vm15, %v7332_v2, %v7341_v21 }
 0x4e2   : >> { %v6822_v60 = vpack.c.b16 %v6805_v14, %v6805_v14  ;;  %14089 = vst [vmem:[#allocation20_spill] sm:$0xff] %v13414_v24  ;;  %v10412_v14 = vld [vmem:[#allocation2 + $0xb0] sm:$0xff]  ;;  %v6272_v40 = vshrl.u32 %v11767_v10, 16 }
 0x4e3   : >> { %v13407_v36 = vadd.f32 %v13309_v35, %v6451_v6  ;;  %v6949_v35 = vor.u32 %v6947_v17, %v6945_v61  ;;  %v10411_v6 = vld [vmem:[#allocation2 + $0xa8] sm:$0xff]  ;;  %v6275_v17 = vshll.u32 %v11767_v10, 16  ;;  %v7344_v10 = vshrl.u32 %v11785_v31, 16 }
 0x4e4   : >> { %v5960_v59 = vpop.f32.mrf.mxu0  ;;  %v6951_v41 = vshll.u32 %v6822_v60, 16 }
 0x4e5   : >> { %v13412_v39 = vadd.f32 %v5960_v59, %v13124_v1  ;;  %v7961_v59 = vshll.u32 %v10411_v6, 16 }
 0x4e6   : >> { %v6953_v54 = vrot.slane %v6951_v41, 1  ;;  %v7959_v41 = vshrl.u32 %v10411_v6, 16 }
 0x4e7   : >> { %v13424_v61 = vpop.f32.mrf.mxu2 }
 0x4e8   : >> { %v6387_v58 = vpop.f32.mrf.mxu1  ;;  %v6954_v1 = vsel %vm1926_vm7, %v6949_v35, %v6953_v54  ;;  %v6274_v54 = vrot.slane %v6272_v40, 3  ;;  %v7349_v40 = vrot.slane %v7347_v57, 4  ;;  %v7970_v57 = vshrl.u32 %v10412_v14, 16 }
 0x4e9   : >> { %v6452_v26 = vadd.f32 %v6387_v58, %v13153_v16  ;;  %7102 = vmatmul.bf16.gmra.mxu3 %v6954_v1  ;;  %v7963_v16 = vrot.slane %v7961_v59, 1  ;;  %v7966_v58 = vshll.u32 %v10412_v14, 16  ;;  %v6277_v1 = vrot.slane %v6275_v17, 4 }
 0x4eb   : >> { %6426 = vmatmul.bf16.gmra.mxu1 %v6270_v55  ;;  %v6669_v19 = vadd.f32 %v13323_v37, %v6452_v26  ;;  %v13432_v37 = vpop.f32.mrf.mxu3  ;;  %v7964_v2 = vor.u32 %v7963_v16, %v7959_v41  ;;  %v7968_v55 = vrot.slane %v7966_v58, 1 }
 0x4ec   : >> { %v5963_v60 = vpop.f32.mrf.mxu0 }
 0x4ed   : >> { %v13427_v24 = vadd.f32 %v5963_v60, %v13141_v0  ;;  %v13430_v35 = vadd.f32 %v13361_v4, %v6669_v19  ;;  %v7969_v6 = vsel %vm1926_vm7, %v7964_v2, %v7968_v55  ;;  %v10942_v4 = vunpack.c.h.b16 %v13347_v9  ;;  %v10413_v2 = vld [vmem:[#allocation2 + $0xb8] sm:$0xff] }
 0x4ee   : >> { %8162 = vmatmul.bf16.vlgmr.msra.gmra.mxu2 %v7969_v6  ;;  %v6278_v60 = vor.u32 %v6277_v1, %v6274_v54  ;;  %v11787_v6 = vld [vmem:[#allocation2 + $0xec] sm:$0xff]  }
 0x4ef   : >> { %7526 = vmatmul.bf16.gmra.mxu0 %v7342_v44  ;;  %v13440_v59 = vpop.f32.mrf.mxu2  ;;  %v7346_v44 = vrot.slane %v7344_v10, 3  ;;  %v6136_v41 = vpack.c.b16 %v10942_v4, %v10942_v4 }
 0x4f0   : >> { %v6389_v26 = vpop.f32.mrf.mxu1 }
 0x4f1   : >> { %v6453_v25 = vadd.f32 %v6389_v26, %v13166_v11  ;;  %v6279_v11 = vsel %vm1484_vm15, %v6269_v7, %v6278_v60  ;;  %v7350_v58 = vor.u32 %v7349_v40, %v7346_v44  ;;  %v6281_v26 = vshrl.u32 %v6136_v41, 16 }
 0x4f3   : >> { %v13437_v0 = vadd.f32 %v13350_v43, %v6453_v25  ;;  %v13445_v31 = vpop.f32.mrf.mxu3  ;;  %v7351_v10 = vsel %vm1484_vm15, %v7341_v21, %v7350_v58  ;;  %v7974_v25 = vshll.u32 %v10413_v2, 16  ;;  %v6283_v44 = vrot.slane %v6281_v26, 3 }
 0x4f4   : >> { %v5965_v19 = vpop.f32.mrf.mxu0 }
 0x4f5   : >> { %v13443_v17 = vadd.f32 %v5965_v19, %v13156_v49  ;;  %v6284_v49 = vshll.u32 %v6136_v41, 16  ;;  %v7356_v41 = vshll.u32 %v11787_v6, 16 }
 0x4f7   : >> { %v13450_v54 = vpop.f32.mrf.mxu2  ;;  %v6286_v40 = vrot.slane %v6284_v49, 4  ;;  %v7358_v26 = vrot.slane %v7356_v41, 4 }
 0x4f8   : >> { %v6392_v16 = vpop.f32.mrf.mxu1 }
 0x4f9   : >> { %v6454_v43 = vadd.f32 %v6392_v16, %v13182_v28  ;;  %v7972_v28 = vor.u32 %v7970_v57, %v7968_v55  ;;  %v7353_v16 = vshrl.u32 %v11787_v6, 16 }
 0x4fb   : >> { %6431 = vmatmul.bf16.gmra.mxu1 %v6279_v11  ;;  %v6671_v9 = vadd.f32 %v13366_v23, %v6454_v43  ;;  %v13459_v19 = vpop.f32.mrf.mxu3  ;;  %v7976_v23 = vrot.slane %v7974_v25, 1  ;;  %v6287_v43 = vor.u32 %v6286_v40, %v6283_v44  ;;  %v10438_v25 = vld [vmem:[%s12461_s29 + $0x18] sm:$0xff]  ;;  %v7978_v40 = vshrl.u32 %v10413_v2, 16 }
 0x4fc   : >> { %v5968_v1 = vpop.f32.mrf.mxu0  ;;  %8391 = vmatpush.bf16.msra.mxu3 %v10438_v25  ;;  %v11281_v25 = vld [vmem:[#allocation2 + $0xa8] sm:$0xff]  }
 0x4fd   : >> { %v13454_v4 = vadd.f32 %v5968_v1, %v13170_v34  ;;  %v13457_v7 = vadd.f32 %v13402_v51, %v6671_v9  ;;  %v7977_v21 = vsel %vm1926_vm7, %v7972_v28, %v7976_v23  ;;  %v7355_v9 = vrot.slane %v7353_v16, 3  ;;  %v11789_v16 = vld [vmem:[#allocation2 + $0xf4] sm:$0xff]  }
 0x4fe   : >> { %8167 = vmatmul.bf16.gmra.mxu2 %v7977_v21  ;;  %v6288_v49 = vsel %vm1484_vm15, %v6278_v60, %v6287_v43  ;;  %v7365_v43 = vshll.u32 %v11789_v16, 16 }
 0x4ff   : >> { %7531 = vmatmul.bf16.gmra.mxu0 %v7351_v10  ;;  %v13466_v51 = vpop.f32.mrf.mxu2  ;;  %v7359_v10 = vor.u32 %v7358_v26, %v7355_v9 }
 0x500   : >> { %v6394_v14 = vpop.f32.mrf.mxu1 }
 0x501   : >> { %v6455_v11 = vadd.f32 %v6394_v14, %v13194_v46 }
 0x503   : >> { %v13464_v34 = vadd.f32 %v13391_v27, %v6455_v11  ;;  %v13472_v6 = vpop.f32.mrf.mxu3  ;;  %v10414_v27 = vld [vmem:[#allocation2 + $0xc0] sm:$0xff] }
 0x504   : >> { %v5970_v55 = vpop.f32.mrf.mxu0  ;;  %v7982_v41 = vshll.u32 %v10414_v27, 16 }
 0x505   : >> { %v13469_v57 = vadd.f32 %v5970_v55, %v13184_v38  ;;  %v7360_v38 = vsel %vm1484_vm15, %v7350_v58, %v7359_v10 }
 0x506   : >> { %v7984_v11 = vrot.slane %v7982_v41, 1 }
 0x507   : >> { %v13477_v44 = vpop.f32.mrf.mxu2 }
 0x508   : >> { %v6397_v1 = vpop.f32.mrf.mxu1 }
 0x509   : >> { %v6456_v46 = vadd.f32 %v6397_v1, %v13210_v48  ;;  %v7980_v48 = vor.u32 %v7978_v40, %v7976_v23  ;;  %v14090_v40 = vld [vmem:[#allocation19_spill] sm:$0xff] }
 0x50b   : >> { %6436 = vmatmul.bf16.gmra.mxu1 %v6288_v49  ;;  %v6673_v28 = vadd.f32 %v13409_v42, %v6456_v46  ;;  %v7362_v42 = vshrl.u32 %v11789_v16, 16  ;;  %v7985_v9 = vsel %vm1926_vm7, %v7980_v48, %v7984_v11  ;;  %v7073_v58 = vpop.f32.mrf.mxu3  ;;  %v7367_v49 = vrot.slane %v7365_v43, 4 }
 0x50c   : >> { %v7497_v14 = vpop.f32.mrf.mxu0 }
 0x50d   : >> { %v13481_v60 = vadd.f32 %v13432_v37, %v6673_v28  ;;  %v13484_v21 = vadd.f32 %v7497_v14, %v13260_v8  ;;  %v7364_v8 = vrot.slane %v7362_v42, 3 }
 0x50e   : >> { %8172 = vmatmul.bf16.gmra.mxu2 %v7985_v9 }
 0x50f   : >> { %7536 = vmatmul.bf16.gmra.mxu0 %v7360_v38  ;;  %v13491_v37 = vpop.f32.mrf.mxu2  ;;  %v7368_v28 = vor.u32 %v7367_v49, %v7364_v8  ;;  %v10415_v38 = vld [vmem:[#allocation2 + $0xc8] sm:$0xff] }
 0x510   : >> { %v6399_v55 = vpop.f32.mrf.mxu1 }
 0x511   : >> { %v6457_v2 = vadd.f32 %v6399_v55, %v13219_v29  ;;  %v7369_v48 = vsel %vm1484_vm15, %v7359_v10, %v7368_v28  ;;  %v11791_v55 = vld [vmem:[#allocation2 + $0xfc] sm:$0xff]  }
 0x512   : >> { %v7371_v8 = vshrl.u32 %v11791_v55, 16 }
 0x513   : >> { %v13489_v26 = vadd.f32 %v13424_v61, %v6457_v2  ;;  %v7986_v61 = vshrl.u32 %v10414_v27, 16  ;;  %v13501_v42 = vpop.f32.mrf.mxu3  ;;  %v7374_v27 = vshll.u32 %v11791_v55, 16  ;;  %v10437_v55 = vld [vmem:[%s12461_s29 + $0x10] sm:$0xff] }
 0x514   : >> { %v7499_v1 = vpop.f32.mrf.mxu0  ;;  %8392 = vmatpush.bf16.msra.mxu3 %v10437_v55 }
 0x515   : >> { %v13494_v23 = vadd.f32 %v7499_v1, %v13272_v45  ;;  %v7990_v45 = vshll.u32 %v10415_v38, 16  ;;  %v7988_v2 = vor.u32 %v7986_v61, %v7984_v11  ;;  %v11282_v61 = vld [vmem:[#allocation2 + $0xb0] sm:$0xff]  }
 0x517   : >> { %v13498_v16 = vpop.f32.mrf.mxu2  ;;  %v7992_v1 = vrot.slane %v7990_v45, 1 }
 0x518   : >> { %v6402_v46 = vpop.f32.mrf.mxu1 }
 0x519   : >> { %v6458_v14 = vadd.f32 %v6402_v46, %v14090_v40  ;;  %v7993_v49 = vsel %vm1926_vm7, %v7988_v2, %v7992_v1  ;;  %v7376_v40 = vrot.slane %v7374_v27, 4  ;;  %v7994_v2 = vshrl.u32 %v10415_v38, 16 }
 0x51b   : >> { %7713 = vmatmul.bf16.vlgmr.msra.gmra.mxu1 %v11281_v25  ;;  %v6675_v29 = vadd.f32 %v13440_v59, %v6458_v14  ;;  %v7078_v14 = vpop.f32.mrf.mxu3 }
 0x51c   : >> { %v7502_v41 = vpop.f32.mrf.mxu0 }
 0x51d   : >> { %v13504_v43 = vadd.f32 %v13459_v19, %v6675_v29  ;;  %v13507_v9 = vadd.f32 %v7502_v41, %v13288_v32  ;;  %v7373_v32 = vrot.slane %v7371_v8, 3 }
 0x51e   : >> { %8177 = vmatmul.bf16.gmra.mxu2 %v7993_v49 }
 0x51f   : >> { %7541 = vmatmul.bf16.gmra.mxu0 %v7369_v48  ;;  %v13514_v19 = vpop.f32.mrf.mxu2  ;;  %v7377_v41 = vor.u32 %v7376_v40, %v7373_v32 }
 0x520   : >> { %v6404_v59 = vpop.f32.mrf.mxu1 }
 0x521   : >> { %v6459_v10 = vadd.f32 %v6404_v59, %v13243_v56  ;;  %v10416_v56 = vld [vmem:[#allocation2 + $0xd0] sm:$0xff]  ;;  %v7378_v8 = vsel %vm1484_vm15, %v7368_v28, %v7377_v41 }
 0x522   : >> { %v7998_v27 = vshll.u32 %v10416_v56, 16 }
 0x523   : >> { %v13512_v46 = vadd.f32 %v13450_v54, %v6459_v10 }
 0x524   : >> { %v7504_v25 = vpop.f32.mrf.mxu0 }
 0x525   : >> { %v13517_v11 = vadd.f32 %v7504_v25, %v13300_v62  ;;  %v11793_v62 = vld [vmem:[#allocation2 + $0x104] sm:$0xff]   ;;  %v8000_v25 = vrot.slane %v7998_v27, 1 }
 0x526   : >> { %v7380_v40 = vshrl.u32 %v11793_v62, 16 }
 0x527   : >> { %v13522_v45 = vpop.f32.mrf.mxu2 }
 0x528   : >> { %v6407_v29 = vpop.f32.mrf.mxu1 }
 0x529   : >> { %v6460_v48 = vadd.f32 %v6407_v29, %v13257_v53  ;;  %v7996_v53 = vor.u32 %v7994_v2, %v7992_v1  ;;  %v13530_v29 = vpop.f32.mrf.mxu3  ;;  %v7382_v1 = vrot.slane %v7380_v40, 3  ;;  %v11283_v2 = vld [vmem:[#allocation2 + $0xb8] sm:$0xff]  }
 0x52a   : >> { %14091 = vst [vmem:[#allocation22_spill] sm:$0xff] %v13530_v29 }
 0x52b   : >> { %7718 = vmatmul.bf16.gmra.mxu1 %v11282_v61  ;;  %v6677_v54 = vadd.f32 %v13466_v51, %v6460_v48  ;;  %v7383_v51 = vshll.u32 %v11793_v62, 16  ;;  %v8001_v38 = vsel %vm1926_vm7, %v7996_v53, %v8000_v25  ;;  %v8002_v53 = vshrl.u32 %v10416_v56, 16 }
 0x52c   : >> { %v7507_v59 = vpop.f32.mrf.mxu0 }
 0x52d   : >> { %v13525_v49 = vadd.f32 %v7073_v58, %v6677_v54  ;;  %v13528_v10 = vadd.f32 %v7507_v59, %v13317_v15  ;;  %v7385_v48 = vrot.slane %v7383_v51, 4 }
 0x52e   : >> { %8182 = vmatmul.bf16.gmra.mxu2 %v8001_v38  ;;  %v910_v38 = vld [vmem:[%s11871_s20 + $0x238] sm:$0xff] }
 0x52f   : >> { %7546 = vmatmul.bf16.gmra.mxu0 %v7378_v8  ;;  %v13537_v58 = vpop.f32.mrf.mxu2  ;;  %v7386_v59 = vor.u32 %v7385_v48, %v7382_v1  ;;  %v982_v29 = vmax.f32 %v910_v38, 0.0  ;;  %v8004_v48 = vor.u32 %v8002_v53, %v8000_v25 }
 0x530   : >> { %v6409_v32 = vpop.f32.mrf.mxu1 }
 0x531   : >> { %v6461_v61 = vadd.f32 %v6409_v32, %v13269_v63  ;;  %v10417_v63 = vld [vmem:[#allocation2 + $0xd8] sm:$0xff]  ;;  %v7083_v62 = vpop.f32.mrf.mxu3  ;;  %v909_v32 = vld [vmem:[%s11871_s20 + $0x230] sm:$0xff]  ;;  %v7387_v51 = vsel %vm1484_vm15, %v7377_v41, %v7386_v59 }
 0x533   : >> { %v13535_v28 = vadd.f32 %v13477_v44, %v6461_v61  ;;  %v8006_v61 = vshll.u32 %v10417_v63, 16 }
 0x534   : >> { %v7509_v15 = vpop.f32.mrf.mxu0 }
 0x535   : >> { %v13540_v55 = vadd.f32 %v7509_v15, %v13333_v12  ;;  %v11795_v12 = vld [vmem:[#allocation2 + $0x10c] sm:$0xff]   ;;  %v981_v15 = vmax.f32 %v909_v32, 0.0 }
 0x537   : >> { %v13544_v27 = vpop.f32.mrf.mxu2 }
 0x538   : >> { %v6412_v54 = vpop.f32.mrf.mxu1 }
 0x539   : >> { %v6462_v8 = vadd.f32 %v6412_v54, %v13285_v52  ;;  %v8008_v54 = vrot.slane %v8006_v61, 1  ;;  %v13564_v53 = vpop.f32.mrf.mxu3 }
 0x53b   : >> { %7723 = vmatmul.bf16.gmra.mxu1 %v11283_v2  ;;  %v6679_v44 = vadd.f32 %v13491_v37, %v6462_v8  ;;  %v13554_v37 = vpack.c.bf16 %v982_v29, %v981_v15  ;;  %v7389_v2 = vshrl.u32 %v11795_v12, 16  ;;  %v7392_v8 = vshll.u32 %v11795_v12, 16  ;;  %v10418_v15 = vld [vmem:[#allocation2 + $0xe0] sm:$0xff] }
 0x53c   : >> { %v7512_v40 = vpop.f32.mrf.mxu0  ;;  %v8009_v41 = vsel %vm1926_vm7, %v8004_v48, %v8008_v54 }
 0x53d   : >> { %v13549_v1 = vadd.f32 %v7078_v14, %v6679_v44  ;;  %v13552_v52 = vadd.f32 %v7512_v40, %v13359_v50  ;;  %11042 = vst [vmem:[#allocation2 + $0x120] sm:$0xff] %v13554_v37   ;;  %v7391_v29 = vrot.slane %v7389_v2, 3  ;;  %v7394_v44 = vrot.slane %v7392_v8, 4  ;;  %v11797_v8 = vld [vmem:[#allocation2 + $0x114] sm:$0xff]  }
 0x53e   : >> { %8187 = vmatmul.bf16.gmra.mxu2 %v8009_v41  ;;  %v8014_v41 = vshll.u32 %v10418_v15, 16 }
 0x53f   : >> { %7551 = vmatmul.bf16.gmra.mxu0 %v7387_v51  ;;  %v13562_v50 = vpop.f32.mrf.mxu2  ;;  %v11284_v51 = vld [vmem:[#allocation2 + $0xc0] sm:$0xff]   ;;  %v7395_v12 = vor.u32 %v7394_v44, %v7391_v29  ;;  %v7398_v44 = vshrl.u32 %v11797_v8, 16 }
 0x540   : >> { %v6414_v56 = vpop.f32.mrf.mxu1  ;;  %v8016_v29 = vrot.slane %v8014_v41, 1 }
 0x541   : >> { %v6463_v32 = vadd.f32 %v6414_v56, %v13297_v30  ;;  %v10436_v30 = vld [vmem:[%s12461_s29 + $0x8] sm:$0xff]  ;;  %v8010_v56 = vshrl.u32 %v10417_v63, 16  ;;  %v7396_v2 = vsel %vm1484_vm15, %v7386_v59, %v7395_v12 }
 0x542   : >> { %8393 = vmatpush.bf16.msra.mxu3 %v10436_v30 }
 0x543   : >> { %v13560_v14 = vadd.f32 %v13498_v16, %v6463_v32  ;;  %v8012_v32 = vor.u32 %v8010_v56, %v8008_v54  ;;  %v11285_v54 = vld [vmem:[#allocation2 + $0xc8] sm:$0xff]  }
 0x544   : >> { %v7514_v25 = vpop.f32.mrf.mxu0 }
 0x545   : >> { %v13567_v38 = vadd.f32 %v7514_v25, %v13378_v3  ;;  %v7088_v25 = vpop.f32.mrf.mxu3 }
 0x547   : >> { %v13572_v48 = vpop.f32.mrf.mxu2 }
 0x548   : >> { %v6417_v40 = vpop.f32.mrf.mxu1 }
 0x549   : >> { %v6464_v61 = vadd.f32 %v6417_v40, %v13314_v47  ;;  %v7401_v40 = vshll.u32 %v11797_v8, 16  ;;  %v10419_v8 = vld [vmem:[#allocation2 + $0xe8] sm:$0xff] }
 0x54b   : >> { %7728 = vmatmul.bf16.gmra.mxu1 %v11284_v51  ;;  %v6681_v16 = vadd.f32 %v13514_v19, %v6464_v61  ;;  %v8017_v51 = vsel %vm1926_vm7, %v8012_v32, %v8016_v29  ;;  %v7400_v61 = vrot.slane %v7398_v44, 3  ;;  %v8018_v32 = vshrl.u32 %v10418_v15, 16 }
 0x54d   : >> { %v13575_v3 = vadd.f32 %v7083_v62, %v6681_v16  ;;  %v7403_v62 = vrot.slane %v7401_v40, 4  ;;  %v13584_v56 = vpop.f32.mrf.mxu3  ;;  %v8020_v40 = vor.u32 %v8018_v32, %v8016_v29  ;;  %v11286_v29 = vld [vmem:[#allocation2 + $0xd0] sm:$0xff]  }
 0x54e   : >> { %8192 = vmatmul.bf16.gmra.mxu2 %v8017_v51  ;;  %14092 = vst [vmem:[#allocation24_spill] sm:$0xff] %v13584_v56  ;;  %v8022_v51 = vshll.u32 %v10419_v8, 16  ;;  %v10420_v56 = vld [vmem:[#allocation2 + $0xf0] sm:$0xff] }
 0x54f   : >> { %7556 = vmatmul.bf16.gmra.mxu0 %v7396_v2  ;;  %v13582_v59 = vpop.f32.mrf.mxu2  ;;  %v7404_v16 = vor.u32 %v7403_v62, %v7400_v61 }
 0x550   : >> { %v6419_v47 = vpop.f32.mrf.mxu1 }
 0x551   : >> { %v6465_v19 = vadd.f32 %v6419_v47, %v13330_v22  ;;  %v11798_v47 = vld [vmem:[#allocation2 + $0x11c] sm:$0xff]  }
 0x552   : >> { %v7407_v62 = vshrl.u32 %v11798_v47, 16 }
 0x553   : >> { %v13580_v63 = vadd.f32 %v13522_v45, %v6465_v19  ;;  %v7405_v45 = vsel %vm1484_vm15, %v7395_v12, %v7404_v16  ;;  %v8024_v19 = vrot.slane %v8022_v51, 1 }
 0x557   : >> { %v13588_v22 = vpop.f32.mrf.mxu2 }
 0x558   : >> { %v6422_v30 = vpop.f32.mrf.mxu1 }
 0x559   : >> { %v6466_v2 = vadd.f32 %v6422_v30, %v13356_v33  ;;  %v7410_v33 = vshll.u32 %v11798_v47, 16  ;;  %v8025_v30 = vsel %vm1926_vm7, %v8020_v40, %v8024_v19  ;;  %v10435_v47 = vld [vmem:[%s12461_s29] sm:$0xff] }
 0x55a   : >> { %8394 = vmatpush.bf16.msra.mxu3 %v10435_v47 }
 0x55b   : >> { %7733 = vmatmul.bf16.gmra.mxu1 %v11285_v54  ;;  %v6683_v41 = vadd.f32 %v13537_v58, %v6466_v2  ;;  %v7093_v54 = vpop.f32.mrf.mxu3  ;;  %v7409_v2 = vrot.slane %v7407_v62, 3 }
 0x55d   : >> { %v13591_v44 = vadd.f32 %v7088_v25, %v6683_v41  ;;  %v7412_v25 = vrot.slane %v7410_v33, 4 }
 0x55e   : >> { %8197 = vmatmul.bf16.gmra.mxu2 %v8025_v30 }
 0x55f   : >> { %7561 = vmatmul.bf16.gmra.mxu0 %v7405_v45  ;;  %v6654_v12 = vpop.f32.mrf.mxu2  ;;  %v7413_v32 = vor.u32 %v7412_v25, %v7409_v2  ;;  %v11006_v45 = vunpack.c.h.b16 %v13554_v37 }
 0x560   : >> { %v6424_v61 = vpop.f32.mrf.mxu1 }
 0x561   : >> { %v6467_v58 = vadd.f32 %v6424_v61, %v13375_v13  ;;  %v8026_v61 = vshrl.u32 %v10419_v8, 16  ;;  %v7414_v30 = vsel %vm1484_vm15, %v7404_v16, %v7413_v32  ;;  %v7271_v33 = vpack.c.b16 %v11006_v45, %v11006_v45 }
 0x563   : >> { %v13596_v15 = vadd.f32 %v13544_v27, %v6467_v58  ;;  %v8030_v27 = vshll.u32 %v10420_v56, 16  ;;  %v13603_v62 = vpop.f32.mrf.mxu3  ;;  %v8028_v2 = vor.u32 %v8026_v61, %v8024_v19 }
 0x565   : >> { %14093 = vst [vmem:[#allocation25_spill] sm:$0xff] %v13596_v15  ;;  %v8032_v25 = vrot.slane %v8030_v27, 1  ;;  %v7419_v15 = vshll.u32 %v7271_v33, 16  ;;  %v10421_v27 = vld [vmem:[#allocation2 + $0xf8] sm:$0xff] }
 0x567   : >> { %v6656_v40 = vpop.f32.mrf.mxu2 }
 0x568   : >> { %v6427_v41 = vpop.f32.mrf.mxu1 }
 0x569   : >> { %v6468_v51 = vadd.f32 %v6427_v41, %v13397_v18  ;;  %v8033_v18 = vsel %vm1926_vm7, %v8028_v2, %v8032_v25  ;;  %v8038_v2 = vshll.u32 %v10421_v27, 16 }
 0x56b   : >> { %7738 = vmatmul.bf16.gmra.mxu1 %v11286_v29  ;;  %v6685_v13 = vadd.f32 %v13562_v50, %v6468_v51  ;;  %v7416_v29 = vshrl.u32 %v7271_v33, 16  ;;  %v7421_v51 = vrot.slane %v7419_v15, 4  ;;  %v7098_v45 = vpop.f32.mrf.mxu3  ;;  %v8034_v33 = vshrl.u32 %v10420_v56, 16 }
 0x56c   : >> { %v8040_v15 = vrot.slane %v8038_v2, 1 }
 0x56d   : >> { %v13605_v58 = vadd.f32 %v7093_v54, %v6685_v13  ;;  %v7418_v16 = vrot.slane %v7416_v29, 3  ;;  %v11287_v13 = vld [vmem:[#allocation2 + $0xd8] sm:$0xff]  }
 0x56e   : >> { %8202 = vmatmul.bf16.gmra.mxu2 %v8033_v18 }
 0x56f   : >> { %7566 = vmatmul.bf16.gmra.mxu0 %v7414_v30  ;;  %v7422_v19 = vor.u32 %v7421_v51, %v7418_v16 }
 0x570   : >> { %v6429_v41 = vpop.f32.mrf.mxu1 }
 0x571   : >> { %v6469_v50 = vadd.f32 %v6429_v41, %v13412_v39  ;;  %v8163_v47 = vpop.f32.mrf.mxu2  ;;  %v7423_v39 = vsel %vm1484_vm15, %v7413_v32, %v7422_v19  ;;  %v8036_v41 = vor.u32 %v8034_v33, %v8032_v25  ;;  %v11288_v32 = vld [vmem:[#allocation2 + $0xe0] sm:$0xff]   ;;  %v8042_v19 = vshrl.u32 %v10421_v27, 16 }
 0x573   : >> { %v13610_v8 = vadd.f32 %v13572_v48, %v6469_v50  ;;  %v8041_v29 = vsel %vm1926_vm7, %v8036_v41, %v8040_v15  ;;  %v13618_v16 = vpop.f32.mrf.mxu3  ;;  %v8044_v2 = vor.u32 %v8042_v19, %v8040_v15 }
 0x578   : >> { %v6432_v54 = vpop.f32.mrf.mxu1 }
 0x579   : >> { %v6470_v61 = vadd.f32 %v6432_v54, %v13427_v24  ;;  %v8165_v18 = vpop.f32.mrf.mxu2  ;;  %v10422_v54 = vld [vmem:[#allocation2 + $0x100] sm:$0xff] }
 0x57b   : >> { %7743 = vmatmul.bf16.gmra.mxu1 %v11287_v13  ;;  %v6687_v30 = vadd.f32 %v13582_v59, %v6470_v61  ;;  %v7103_v25 = vpop.f32.mrf.mxu3  ;;  %v8046_v61 = vshll.u32 %v10422_v54, 16 }
 0x57d   : >> { %v13615_v48 = vadd.f32 %v7098_v45, %v6687_v30 }
 0x57e   : >> { %8207 = vmatmul.bf16.gmra.mxu2 %v8041_v29 }
 0x57f   : >> { %7571 = vmatmul.bf16.gmra.mxu0 %v7423_v39 }
 0x580   : >> { %v6434_v50 = vpop.f32.mrf.mxu1 }
 0x581   : >> { %v6471_v24 = vadd.f32 %v6434_v50, %v13443_v17  ;;  %v8168_v56 = vpop.f32.mrf.mxu2  ;;  %v8048_v17 = vrot.slane %v8046_v61, 1 }
 0x583   : >> { %v13622_v59 = vadd.f32 %v13588_v22, %v6471_v24  ;;  %v8049_v39 = vsel %vm1926_vm7, %v8044_v2, %v8048_v17  ;;  %v11289_v24 = vld [vmem:[#allocation2 + $0xe8] sm:$0xff]  }
 0x588   : >> { %v6437_v51 = vpop.f32.mrf.mxu1 }
 0x589   : >> { %v6472_v45 = vadd.f32 %v6437_v51, %v13454_v4  ;;  %v8170_v30 = vpop.f32.mrf.mxu2  ;;  %v10423_v51 = vld [vmem:[#allocation2 + $0x108] sm:$0xff] }
 0x58a   : >> { %v8054_v27 = vshll.u32 %v10423_v51, 16 }
 0x58b   : >> { %7748 = vmatmul.bf16.gmra.mxu1 %v11288_v32  ;;  %v6689_v13 = vadd.f32 %v6654_v12, %v6472_v45  ;;  %v8050_v12 = vshrl.u32 %v10422_v54, 16 }
 0x58d   : >> { %v13625_v33 = vadd.f32 %v7103_v25, %v6689_v13  ;;  %v8052_v15 = vor.u32 %v8050_v12, %v8048_v17  ;;  %v8056_v25 = vrot.slane %v8054_v27, 1  ;;  %v8058_v17 = vshrl.u32 %v10423_v51, 16 }
 0x58e   : >> { %8212 = vmatmul.bf16.gmra.mxu2 %v8049_v39 }
 0x58f   : >> { %v8057_v13 = vsel %vm1926_vm7, %v8052_v15, %v8056_v25 }
 0x590   : >> { %v6439_v22 = vpop.f32.mrf.mxu1 }
 0x591   : >> { %v6473_v41 = vadd.f32 %v6439_v22, %v13469_v57  ;;  %v8173_v4 = vpop.f32.mrf.mxu2 }
 0x593   : >> { %v13629_v29 = vadd.f32 %v6656_v40, %v6473_v41  ;;  %v13636_v41 = vpop.f32.mrf.mxu0 }
 0x595   : >> { %14094 = vst [vmem:[#allocation23_spill] sm:$0xff] %v13629_v29  ;;  %v11290_v29 = vld [vmem:[#allocation2 + $0xf0] sm:$0xff]  }
 0x598   : >> { %v7714_v50 = vpop.f32.mrf.mxu1 }
 0x599   : >> { %v8175_v32 = vpop.f32.mrf.mxu2  ;;  %v7794_v45 = vadd.f32 %v7714_v50, %v13484_v21  ;;  %v10424_v21 = vld [vmem:[#allocation2 + $0x110] sm:$0xff] }
 0x59a   : >> { %v8062_v50 = vshll.u32 %v10424_v21, 16 }
 0x59b   : >> { %7753 = vmatmul.bf16.gmra.mxu1 %v11289_v24  ;;  %v8243_v61 = vadd.f32 %v8163_v47, %v7794_v45  ;;  %v13640_v45 = vpop.f32.mrf.mxu0 }
 0x59c   : >> { %v8064_v27 = vrot.slane %v8062_v50, 1 }
 0x59d   : >> { %v8275_v39 = vmax.f32 %v8243_v61, 0.0 }
 0x59e   : >> { %8217 = vmatmul.bf16.gmra.mxu2 %v8057_v13 }
 0x5a0   : >> { %v7716_v19 = vpop.f32.mrf.mxu1 }
 0x5a1   : >> { %v7795_v57 = vadd.f32 %v7716_v19, %v13494_v23  ;;  %v13634_v2 = vpop.f32.mrf.mxu2  ;;  %v8060_v23 = vor.u32 %v8058_v17, %v8056_v25 }
 0x5a3   : >> { %v8244_v40 = vadd.f32 %v8165_v18, %v7795_v57  ;;  %v8065_v18 = vsel %vm1926_vm7, %v8060_v23, %v8064_v27  ;;  %v13645_v25 = vpop.f32.mrf.mxu0 }
 0x5a5   : >> { %v8276_v22 = vmax.f32 %v8244_v40, 0.0 }
 0x5a7   : >> { %v8307_v54 = vpack.c.bf16 %v8276_v22, %v8275_v39  ;;  %v11291_v22 = vld [vmem:[#allocation2 + $0xf8] sm:$0xff]  }
 0x5a8   : >> { %v7719_v24 = vpop.f32.mrf.mxu1 }
 0x5a9   : >> { %8395 = vmatmul.bf16.vlgmr.msra.gmra.mxu3 %v8307_v54  ;;  %v8180_v12 = vpop.f32.mrf.mxu2  ;;  %v7796_v47 = vadd.f32 %v7719_v24, %v13507_v9  ;;  %v10425_v9 = vld [vmem:[#allocation2 + $0x118] sm:$0xff]  ;;  %v8066_v54 = vshrl.u32 %v10424_v21, 16 }
 0x5aa   : >> { %v8070_v24 = vshll.u32 %v10425_v9, 16 }
 0x5ab   : >> { %7758 = vmatmul.bf16.gmra.mxu1 %v11290_v29  ;;  %v8245_v13 = vadd.f32 %v8168_v56, %v7796_v47 }
 0x5ac   : >> { %v8072_v50 = vrot.slane %v8070_v24, 1 }
 0x5ad   : >> { %v8277_v29 = vmax.f32 %v8245_v13, 0.0  ;;  %v13650_v13 = vpop.f32.mrf.mxu0 }
 0x5ae   : >> { %8222 = vmatmul.bf16.gmra.mxu2 %v8065_v18 }
 0x5b0   : >> { %v7721_v15 = vpop.f32.mrf.mxu1 }
 0x5b1   : >> { %v7797_v19 = vadd.f32 %v7721_v15, %v13517_v11  ;;  %v13643_v57 = vpop.f32.mrf.mxu2  ;;  %v8068_v11 = vor.u32 %v8066_v54, %v8064_v27  ;;  %v8074_v27 = vshrl.u32 %v10425_v9, 16  ;;  %v7858_v9 = vld [vmem:[#allocation2 + $0x128] sm:$0x1] }
 0x5b3   : >> { %v8246_v61 = vadd.f32 %v8170_v30, %v7797_v19  ;;  %v8073_v30 = vsel %vm1926_vm7, %v8068_v11, %v8072_v50 }
 0x5b5   : >> { %v8278_v51 = vmax.f32 %v8246_v61, 0.0 }
 0x5b7   : >> { %v8308_v40 = vpack.c.bf16 %v8278_v51, %v8277_v29 }
 0x5b8   : >> { %v7724_v39 = vpop.f32.mrf.mxu1 }
 0x5b9   : >> { %8400 = vmatmul.bf16.gmra.mxu3 %v8308_v40  ;;  %v8185_v17 = vpop.f32.mrf.mxu2  ;;  %v7798_v56 = vadd.f32 %v7724_v39, %v13528_v10  ;;  %v11292_v40 = vld [vmem:[#allocation2 + $0x100] sm:$0xff]  }
 0x5ba   : >> { %v10426_v10 = vld [vmem:[#allocation2 + $0x120] sm:$0xff] }
 0x5bb   : >> { %7763 = vmatmul.bf16.gmra.mxu1 %v11291_v22  ;;  %v8247_v23 = vadd.f32 %v8173_v4, %v7798_v56  ;;  %v8078_v39 = vshll.u32 %v10426_v10, 16 }
 0x5bd   : >> { %v8279_v61 = vmax.f32 %v8247_v23, 0.0  ;;  %v8080_v54 = vrot.slane %v8078_v39, 1 }
 0x5be   : >> { %8227 = vmatmul.bf16.gmra.mxu2 %v8073_v30 }
 0x5c0   : >> { %v7726_v47 = vpop.f32.mrf.mxu1 }
 0x5c1   : >> { %v7799_v18 = vadd.f32 %v7726_v47, %v13540_v55  ;;  %v13652_v19 = vpop.f32.mrf.mxu2  ;;  %v8076_v55 = vor.u32 %v8074_v27, %v8072_v50  ;;  %v11293_v50 = vld [vmem:[#allocation2 + $0x108] sm:$0xff]  }
 0x5c3   : >> { %v8248_v15 = vadd.f32 %v8175_v32, %v7799_v18  ;;  %v7527_v32 = vpop.f32.mrf.mxu0  ;;  %v8081_v24 = vsel %vm1926_vm7, %v8076_v55, %v8080_v54 }
 0x5c5   : >> { %v8280_v21 = vmax.f32 %v8248_v15, 0.0 }
 0x5c7   : >> { %v8309_v29 = vpack.c.bf16 %v8280_v21, %v8279_v61  ;;  %v7940_v21 = vunpack.c.l.b16 %v7858_v9 }
 0x5c8   : >> { %v7729_v51 = vpop.f32.mrf.mxu1 }
 0x5c9   : >> { %8405 = vmatmul.bf16.gmra.mxu3 %v8309_v29  ;;  %v8190_v22 = vpop.f32.mrf.mxu2  ;;  %v7800_v4 = vadd.f32 %v7729_v51, %v13552_v52  ;;  %v7957_v51 = vpack.c.b16 %v7940_v21, %v7940_v21 }
 0x5cb   : >> { %7768 = vmatmul.bf16.gmra.mxu1 %v11292_v40  ;;  %v8249_v11 = vadd.f32 %v13634_v2, %v7800_v4  ;;  %v7529_v29 = vpop.f32.mrf.mxu0  ;;  %v7585_v40 = vadd.f32 %v13636_v41, %v13400_v20  ;;  %v8082_v2 = vshrl.u32 %v10426_v10, 16  ;;  %v8086_v27 = vshll.u32 %v7957_v51, 16 }
 0x5cd   : >> { %v8281_v18 = vmax.f32 %v8249_v11, 0.0  ;;  %v8084_v39 = vor.u32 %v8082_v2, %v8080_v54  ;;  %v8088_v4 = vrot.slane %v8086_v27, 1  ;;  %v7587_v54 = vadd.f32 %v13645_v25, %v13430_v35  ;;  %v11295_v35 = vld [vmem:[#allocation2 + $0x118] sm:$0xff]  }
 0x5ce   : >> { %8232 = vmatmul.bf16.gmra.mxu2 %v8081_v24  ;;  %v7589_v25 = vadd.f32 %v7527_v32, %v13457_v7 }
 0x5d0   : >> { %v7731_v56 = vpop.f32.mrf.mxu1 }
 0x5d1   : >> { %v7801_v30 = vadd.f32 %v7731_v56, %v13567_v38  ;;  %v8193_v23 = vpop.f32.mrf.mxu2  ;;  %v7117_v38 = vadd.f32 %v13335_v5, %v13407_v36  ;;  %v8089_v56 = vsel %vm1926_vm7, %v8084_v39, %v8088_v4  ;;  %v11294_v5 = vld [vmem:[#allocation2 + $0x110] sm:$0xff]  }
 0x5d3   : >> { %v8250_v47 = vadd.f32 %v8180_v12, %v7801_v30  ;;  %v7586_v24 = vadd.f32 %v13640_v45, %v7117_v38  ;;  %v7532_v20 = vpop.f32.mrf.mxu0 }
 0x5d4   : >> { %v7591_v7 = vadd.f32 %v7532_v20, %v13481_v60 }
 0x5d5   : >> { %v8282_v15 = vmax.f32 %v8250_v47, 0.0 }
 0x5d7   : >> { %v8310_v61 = vpack.c.bf16 %v8282_v15, %v8281_v18 }
 0x5d8   : >> { %v7734_v52 = vpop.f32.mrf.mxu1 }
 0x5d9   : >> { %8410 = vmatmul.bf16.gmra.mxu3 %v8310_v61  ;;  %v7802_v12 = vadd.f32 %v7734_v52, %v7585_v40  ;;  %v8195_v55 = vpop.f32.mrf.mxu2  ;;  %v14095_v61 = vld [vmem:[#allocation21_spill] sm:$0xff] }
 0x5da   : >> { %v7119_v21 = vadd.f32 %v14095_v61, %v13437_v0 }
 0x5db   : >> { %7773 = vmatmul.bf16.gmra.mxu1 %v11293_v50  ;;  %v8251_v30 = vadd.f32 %v13643_v57, %v7802_v12  ;;  %v7534_v45 = vpop.f32.mrf.mxu0 }
 0x5dc   : >> { %v7588_v52 = vadd.f32 %v13650_v13, %v7119_v21 }
 0x5dd   : >> { %v8283_v10 = vmax.f32 %v8251_v30, 0.0 }
 0x5de   : >> { %8237 = vmatmul.bf16.gmra.mxu2 %v8089_v56 }
 0x5e0   : >> { %v7736_v11 = vpop.f32.mrf.mxu1 }
 0x5e1   : >> { %v7803_v47 = vadd.f32 %v7736_v11, %v7586_v24  ;;  %v8198_v36 = vpop.f32.mrf.mxu2  ;;  %v14096_v24 = vld [vmem:[#allocation20_spill] sm:$0xff] }
 0x5e2   : >> { %v7121_v13 = vadd.f32 %v14096_v24, %v13464_v34  ;;  %v7123_v34 = vadd.f32 %v13445_v31, %v13489_v26 }
 0x5e3   : >> { %v8252_v41 = vadd.f32 %v8185_v17, %v7803_v47  ;;  %v7537_v12 = vpop.f32.mrf.mxu0 }
 0x5e4   : >> { %v7590_v11 = vadd.f32 %v7529_v29, %v7121_v13  ;;  %v7592_v29 = vadd.f32 %v7534_v45, %v7123_v34  ;;  %v7593_v60 = vadd.f32 %v7537_v12, %v13504_v43 }
 0x5e5   : >> { %v8284_v18 = vmax.f32 %v8252_v41, 0.0 }
 0x5e7   : >> { %v8311_v15 = vpack.c.bf16 %v8284_v18, %v8283_v10 }
 0x5e8   : >> { %v7739_v9 = vpop.f32.mrf.mxu1 }
 0x5e9   : >> { %8415 = vmatmul.bf16.gmra.mxu3 %v8311_v15  ;;  %v7804_v57 = vadd.f32 %v7739_v9, %v7587_v54  ;;  %v8200_v40 = vpop.f32.mrf.mxu2 }
 0x5eb   : >> { %7778 = vmatmul.bf16.gmra.mxu1 %v11294_v5  ;;  %v8253_v17 = vadd.f32 %v13652_v19, %v7804_v57  ;;  %v7539_v19 = vpop.f32.mrf.mxu0 }
 0x5ed   : >> { %v8285_v27 = vmax.f32 %v8253_v17, 0.0 }
 0x5f0   : >> { %v7741_v50 = vpop.f32.mrf.mxu1 }
 0x5f1   : >> { %v7805_v51 = vadd.f32 %v7741_v50, %v7588_v52  ;;  %v8203_v0 = vpop.f32.mrf.mxu2 }
 0x5f3   : >> { %v8254_v2 = vadd.f32 %v8190_v22, %v7805_v51  ;;  %v7542_v54 = vpop.f32.mrf.mxu0 }
 0x5f5   : >> { %v8286_v38 = vmax.f32 %v8254_v2, 0.0 }
 0x5f7   : >> { %v8312_v39 = vpack.c.bf16 %v8286_v38, %v8285_v27 }
 0x5f8   : >> { %v7744_v4 = vpop.f32.mrf.mxu1 }
 0x5f9   : >> { %8420 = vmatmul.bf16.gmra.mxu3 %v8312_v39  ;;  %v7806_v56 = vadd.f32 %v7744_v4, %v7589_v25  ;;  %v8205_v15 = vpop.f32.mrf.mxu2  ;;  %v13681_v39 = vpop.f32.mrf.mxu3 }
 0x5fb   : >> { %7783 = vmatmul.bf16.gmra.mxu1 %v11295_v35  ;;  %v8255_v47 = vadd.f32 %v8193_v23, %v7806_v56  ;;  %v7544_v52 = vpop.f32.mrf.mxu0 }
 0x5fd   : >> { %v8287_v10 = vmax.f32 %v8255_v47, 0.0 }
 0x600   : >> { %v7746_v30 = vpop.f32.mrf.mxu1 }
 0x601   : >> { %v7807_v22 = vadd.f32 %v7746_v30, %v7590_v11  ;;  %v8208_v23 = vpop.f32.mrf.mxu2 }
 0x603   : >> { %v8256_v41 = vadd.f32 %v8195_v55, %v7807_v22  ;;  %v7547_v26 = vpop.f32.mrf.mxu0 }
 0x605   : >> { %v8288_v18 = vmax.f32 %v8256_v41, 0.0 }
 0x607   : >> { %v8313_v9 = vpack.c.bf16 %v8288_v18, %v8287_v10 }
 0x608   : >> { %v7749_v5 = vpop.f32.mrf.mxu1 }
 0x609   : >> { %8425 = vmatmul.bf16.gmra.mxu3 %v8313_v9  ;;  %v7808_v32 = vadd.f32 %v7749_v5, %v7591_v7  ;;  %v8210_v27 = vpop.f32.mrf.mxu2  ;;  %v4903_v9 = vld [vmem:[%s11871_s20 + $0x128] sm:$0xff] }
 0x60b   : >> { %7788 = vmatmul.bf16.gmra.mxu1 %v13554_v37  ;;  %v8257_v21 = vadd.f32 %v8198_v36, %v7808_v32  ;;  %v7125_v37 = vadd.f32 %v13472_v6, %v13512_v46  ;;  %v7549_v13 = vpop.f32.mrf.mxu0  ;;  %v4902_v6 = vld [vmem:[%s11871_s20 + $0x120] sm:$0xff]  ;;  %v7595_v46 = vadd.f32 %v7542_v54, %v13525_v49 }
 0x60d   : >> { %v8289_v50 = vmax.f32 %v8257_v21, 0.0  ;;  %v7594_v20 = vadd.f32 %v7539_v19, %v7125_v37 }
 0x610   : >> { %v7751_v61 = vpop.f32.mrf.mxu1 }
 0x611   : >> { %v7809_v55 = vadd.f32 %v7751_v61, %v7592_v29  ;;  %v8213_v4 = vpop.f32.mrf.mxu2  ;;  %v4904_v29 = vld [vmem:[%s11871_s20 + $0x130] sm:$0xff]  ;;  %v7597_v61 = vadd.f32 %v7547_v26, %v13549_v1 }
 0x613   : >> { %v8258_v57 = vadd.f32 %v8200_v40, %v7809_v55 }
 0x615   : >> { %v8290_v17 = vmax.f32 %v8258_v57, 0.0 }
 0x617   : >> { %v8314_v51 = vpack.c.bf16 %v8290_v17, %v8289_v50 }
 0x618   : >> { %v7754_v2 = vpop.f32.mrf.mxu1 }
 0x619   : >> { %8430 = vmatmul.bf16.gmra.mxu3 %v8314_v51  ;;  %v7810_v31 = vadd.f32 %v7754_v2, %v7593_v60  ;;  %v8215_v19 = vpop.f32.mrf.mxu2 }
 0x61b   : >> { %v8259_v36 = vadd.f32 %v8203_v0, %v7810_v31  ;;  %v7127_v0 = vadd.f32 %v13501_v42, %v13535_v28 }
 0x61d   : >> { %v8291_v35 = vmax.f32 %v8259_v36, 0.0  ;;  %v7596_v30 = vadd.f32 %v7544_v52, %v7127_v0 }
 0x620   : >> { %v7756_v45 = vpop.f32.mrf.mxu1 }
 0x621   : >> { %v7811_v38 = vadd.f32 %v7756_v45, %v7594_v20  ;;  %v8218_v32 = vpop.f32.mrf.mxu2 }
 0x623   : >> { %v8260_v40 = vadd.f32 %v8205_v15, %v7811_v38  ;;  %v7552_v15 = vpop.f32.mrf.mxu0 }
 0x625   : >> { %v8292_v25 = vmax.f32 %v8260_v40, 0.0  ;;  %v4906_v40 = vld [vmem:[%s11871_s20 + $0x140] sm:$0xff] }
 0x627   : >> { %v8315_v24 = vpack.c.bf16 %v8292_v25, %v8291_v35  ;;  %v7599_v35 = vadd.f32 %v7552_v15, %v13575_v3 }
 0x628   : >> { %v7759_v43 = vpop.f32.mrf.mxu1 }
 0x629   : >> { %8435 = vmatmul.bf16.gmra.mxu3 %v8315_v24  ;;  %v7812_v56 = vadd.f32 %v7759_v43, %v7595_v46  ;;  %v8220_v31 = vpop.f32.mrf.mxu2 }
 0x62b   : >> { %v8261_v10 = vadd.f32 %v8208_v23, %v7812_v56  ;;  %v7554_v21 = vpop.f32.mrf.mxu0  ;;  %v14098_v23 = vld [vmem:[#allocation22_spill] sm:$0xff] }
 0x62c   : >> { %v8396_v12 = vpop.f32.mrf.mxu3  ;;  %v7129_v57 = vadd.f32 %v14098_v23, %v13560_v14 }
 0x62d   : >> { %v8476_v11 = vadd.f32 %v8396_v12, %v4902_v6  ;;  %v8293_v54 = vmax.f32 %v8261_v10, 0.0 }
 0x62e   : >> { %v7598_v17 = vadd.f32 %v7549_v13, %v7129_v57 }
 0x62f   : >> { %v8508_v22 = vsel %vm11970_vm0, %v8476_v11, %v4902_v6 }
 0x630   : >> { %8540 = vst [vmem:[%s11871_s20 + $0x120] sm:$0xff] %v8508_v22  ;;  %v7761_v41 = vpop.f32.mrf.mxu1 }
 0x631   : >> { %v7813_v18 = vadd.f32 %v7761_v41, %v7596_v30  ;;  %v8223_v24 = vpop.f32.mrf.mxu2  ;;  %v4907_v30 = vld [vmem:[%s11871_s20 + $0x148] sm:$0xff] }
 0x633   : >> { %v8262_v49 = vadd.f32 %v8210_v27, %v7813_v18  ;;  %v7557_v36 = vpop.f32.mrf.mxu0 }
 0x634   : >> { %v8398_v5 = vpop.f32.mrf.mxu3 }
 0x635   : >> { %v8294_v7 = vmax.f32 %v8262_v49, 0.0  ;;  %v8477_v42 = vadd.f32 %v8398_v5, %v4903_v9  ;;  %v4908_v9 = vld [vmem:[%s11871_s20 + $0x150] sm:$0xff]  ;;  %v7601_v49 = vadd.f32 %v7557_v36, %v13591_v44 }
 0x637   : >> { %8541 = vst [vmem:[%s11871_s20 + $0x128] sm:$0xff] %v8477_v42  ;;  %v8316_v28 = vpack.c.bf16 %v8294_v7, %v8293_v54  ;;  %v14101_v54 = vld [vmem:[#allocation25_spill] sm:$0xff]  ;;  %v14102_v7 = vld [vmem:[#allocation24_spill] sm:$0xff] }
 0x638   : >> { %v7764_v34 = vpop.f32.mrf.mxu1  ;;  %v7133_v42 = vadd.f32 %v14102_v7, %v14101_v54 }
 0x639   : >> { %8440 = vmatmul.bf16.gmra.mxu3 %v8316_v28  ;;  %v7814_v52 = vadd.f32 %v7764_v34, %v7597_v61 }
 0x63b   : >> { %v8263_v60 = vadd.f32 %v8213_v4, %v7814_v52  ;;  %v7131_v4 = vadd.f32 %v13564_v53, %v13580_v63  ;;  %v7559_v0 = vpop.f32.mrf.mxu0  ;;  %v8225_v63 = vpop.f32.mrf.mxu2 }
 0x63c   : >> { %v8401_v55 = vpop.f32.mrf.mxu3 }
 0x63d   : >> { %v8478_v50 = vadd.f32 %v8401_v55, %v4904_v29  ;;  %v8295_v1 = vmax.f32 %v8263_v60, 0.0  ;;  %v7600_v6 = vadd.f32 %v7554_v21, %v7131_v4  ;;  %v4911_v4 = vld [vmem:[%s11871_s20 + $0x168] sm:$0xff] }
 0x63f   : >> { %v8510_v2 = vsel %vm12006_vm8, %v8478_v50, %v4904_v29  ;;  %v14106_v29 = vld [vmem:[#allocation23_spill] sm:$0xff] }
 0x640   : >> { %8542 = vst [vmem:[%s11871_s20 + $0x130] sm:$0xff] %v8510_v2  ;;  %v7766_v27 = vpop.f32.mrf.mxu1 }
 0x641   : >> { %v7815_v37 = vadd.f32 %v7766_v27, %v7598_v17 }
 0x643   : >> { %v8264_v20 = vadd.f32 %v8215_v19, %v7815_v37  ;;  %v7562_v15 = vpop.f32.mrf.mxu0  ;;  %v8228_v55 = vpop.f32.mrf.mxu2  ;;  %v4910_v37 = vld [vmem:[%s11871_s20 + $0x160] sm:$0xff] }
 0x644   : >> { %v8403_v45 = vpop.f32.mrf.mxu3 }
 0x645   : >> { %v8296_v26 = vmax.f32 %v8264_v20, 0.0  ;;  %v7135_v45 = vadd.f32 %v13603_v62, %v13610_v8 }
 0x647   : >> { %v8317_v38 = vpack.c.bf16 %v8296_v26, %v8295_v1 }
 0x648   : >> { %v7769_v14 = vpop.f32.mrf.mxu1 }
 0x649   : >> { %8445 = vmatmul.bf16.gmra.mxu3 %v8317_v38  ;;  %v7816_v13 = vadd.f32 %v7769_v14, %v7599_v35  ;;  %v4918_v14 = vld [vmem:[%s11871_s20 + $0x1a0] sm:$0xff] }
 0x64b   : >> { %v8265_v11 = vadd.f32 %v8218_v32, %v7816_v13  ;;  %v7602_v32 = vadd.f32 %v7559_v0, %v7133_v42  ;;  %v7564_v50 = vpop.f32.mrf.mxu0  ;;  %v8230_v60 = vpop.f32.mrf.mxu2  ;;  %v4914_v42 = vld [vmem:[%s11871_s20 + $0x180] sm:$0xff] }
 0x64c   : >> { %v8406_v25 = vpop.f32.mrf.mxu3  ;;  %v7604_v38 = vadd.f32 %v7564_v50, %v7135_v45 }
 0x64d   : >> { %v8480_v43 = vadd.f32 %v8406_v25, %v4906_v40  ;;  %v8297_v22 = vmax.f32 %v8265_v11, 0.0 }
 0x64f   : >> { %v8512_v12 = vsel %vm11976_vm1, %v8480_v43, %v4906_v40 }
 0x650   : >> { %8544 = vst [vmem:[%s11871_s20 + $0x140] sm:$0xff] %v8512_v12  ;;  %v7771_v56 = vpop.f32.mrf.mxu1 }
 0x651   : >> { %v7817_v19 = vadd.f32 %v7771_v56, %v7600_v6  ;;  %v4912_v56 = vld [vmem:[%s11871_s20 + $0x170] sm:$0xff] }
 0x653   : >> { %v8266_v3 = vadd.f32 %v8220_v31, %v7817_v19  ;;  %v7603_v31 = vadd.f32 %v7562_v15, %v13605_v58  ;;  %v7567_v36 = vpop.f32.mrf.mxu0  ;;  %v8233_v58 = vpop.f32.mrf.mxu2 }
 0x654   : >> { %v8408_v47 = vpop.f32.mrf.mxu3  ;;  %v7605_v11 = vadd.f32 %v7567_v36, %v13615_v48 }
 0x655   : >> { %v8298_v41 = vmax.f32 %v8266_v3, 0.0  ;;  %v8481_v53 = vadd.f32 %v8408_v47, %v4907_v30  ;;  %v7137_v30 = vadd.f32 %v13618_v16, %v13622_v59 }
 0x657   : >> { %8545 = vst [vmem:[%s11871_s20 + $0x148] sm:$0xff] %v8481_v53  ;;  %v8318_v10 = vpack.c.bf16 %v8298_v41, %v8297_v22 }
 0x658   : >> { %v7774_v18 = vpop.f32.mrf.mxu1 }
 0x659   : >> { %8450 = vmatmul.bf16.gmra.mxu3 %v8318_v10  ;;  %v7818_v28 = vadd.f32 %v7774_v18, %v7601_v49 }
 0x65b   : >> { %v8267_v23 = vadd.f32 %v8223_v24, %v7818_v28  ;;  %v7569_v12 = vpop.f32.mrf.mxu0  ;;  %v8235_v22 = vpop.f32.mrf.mxu2 }
 0x65c   : >> { %v8411_v5 = vpop.f32.mrf.mxu3  ;;  %v7606_v41 = vadd.f32 %v7569_v12, %v7137_v30 }
 0x65d   : >> { %v8482_v34 = vadd.f32 %v8411_v5, %v4908_v9  ;;  %v8299_v44 = vmax.f32 %v8267_v23, 0.0 }
 0x65f   : >> { %v8514_v61 = vsel %vm12012_vm9, %v8482_v34, %v4908_v9 }
 0x660   : >> { %8546 = vst [vmem:[%s11871_s20 + $0x150] sm:$0xff] %v8514_v61  ;;  %v7776_v21 = vpop.f32.mrf.mxu1  ;;  %v7139_v61 = vadd.f32 %v13681_v39, %v14106_v29 }
 0x661   : >> { %v7819_v57 = vadd.f32 %v7776_v21, %v7602_v32 }
 0x663   : >> { %v8268_v52 = vadd.f32 %v8225_v63, %v7819_v57  ;;  %v7572_v9 = vpop.f32.mrf.mxu0  ;;  %v8238_v16 = vpop.f32.mrf.mxu2  ;;  %v14116_v57 = vld [vmem:[#allocation10_spill] sm:$0xff] }
 0x664   : >> { %v8413_v17 = vpop.f32.mrf.mxu3  ;;  %v7607_v28 = vadd.f32 %v7572_v9, %v13625_v33  ;;  %v4915_v33 = vld [vmem:[%s11871_s20 + $0x188] sm:$0xff]  ;;  %v4926_v9 = vld [vmem:[%s11871_s20 + $0x1e0] sm:$0xff]  ;;  %vm14117_vm15 = vnez %v14116_v57 }
 0x665   : >> { %v8300_v51 = vmax.f32 %v8268_v52, 0.0 }
 0x667   : >> { %v8319_v2 = vpack.c.bf16 %v8300_v51, %v8299_v44 }
 0x668   : >> { %v7779_v27 = vpop.f32.mrf.mxu1 }
 0x669   : >> { %8455 = vmatmul.bf16.gmra.mxu3 %v8319_v2  ;;  %v7820_v1 = vadd.f32 %v7779_v27, %v7603_v31 }
 0x66b   : >> { %v8269_v25 = vadd.f32 %v8228_v55, %v7820_v1  ;;  %v7574_v34 = vpop.f32.mrf.mxu0  ;;  %v8240_v51 = vpop.f32.mrf.mxu2 }
 0x66c   : >> { %v8416_v20 = vpop.f32.mrf.mxu3  ;;  %v7608_v23 = vadd.f32 %v7574_v34, %v7139_v61 }
 0x66d   : >> { %v8484_v26 = vadd.f32 %v8416_v20, %v4910_v37  ;;  %v8301_v6 = vmax.f32 %v8269_v25, 0.0  ;;  %v4916_v20 = vld [vmem:[%s11871_s20 + $0x190] sm:$0xff] }
 0x66f   : >> { %v8516_v40 = vsel %vm11980_vm2, %v8484_v26, %v4910_v37 }
 0x670   : >> { %8548 = vst [vmem:[%s11871_s20 + $0x160] sm:$0xff] %v8516_v40  ;;  %v7781_v35 = vpop.f32.mrf.mxu1 }
 0x671   : >> { %v7821_v24 = vadd.f32 %v7781_v35, %v7604_v38 }
 0x673   : >> { %v8270_v13 = vadd.f32 %v8230_v60, %v7821_v24 }
 0x674   : >> { %v8418_v43 = vpop.f32.mrf.mxu3 }
 0x675   : >> { %v8302_v46 = vmax.f32 %v8270_v13, 0.0  ;;  %v8485_v62 = vadd.f32 %v8418_v43, %v4911_v4  ;;  %v4919_v4 = vld [vmem:[%s11871_s20 + $0x1a8] sm:$0xff]  ;;  %v4920_v43 = vld [vmem:[%s11871_s20 + $0x1b0] sm:$0xff] }
 0x677   : >> { %8549 = vst [vmem:[%s11871_s20 + $0x168] sm:$0xff] %v8485_v62  ;;  %v8320_v8 = vpack.c.bf16 %v8302_v46, %v8301_v6 }
 0x678   : >> { %v7784_v0 = vpop.f32.mrf.mxu1 }
 0x679   : >> { %8460 = vmatmul.bf16.gmra.mxu3 %v8320_v8  ;;  %v7822_v3 = vadd.f32 %v7784_v0, %v7605_v11  ;;  %v4922_v0 = vld [vmem:[%s11871_s20 + $0x1c0] sm:$0xff] }
 0x67b   : >> { %v8271_v18 = vadd.f32 %v8233_v58, %v7822_v3  ;;  %v4923_v3 = vld [vmem:[%s11871_s20 + $0x1c8] sm:$0xff] }
 0x67c   : >> { %v8421_v19 = vpop.f32.mrf.mxu3 }
 0x67d   : >> { %v8486_v47 = vadd.f32 %v8421_v19, %v4912_v56  ;;  %v8303_v48 = vmax.f32 %v8271_v18, 0.0 }
 0x67f   : >> { %v8518_v63 = vsel %vm12016_vm10, %v8486_v47, %v4912_v56 }
 0x680   : >> { %8550 = vst [vmem:[%s11871_s20 + $0x170] sm:$0xff] %v8518_v63  ;;  %v7786_v10 = vpop.f32.mrf.mxu1 }
 0x681   : >> { %v7823_v15 = vadd.f32 %v7786_v10, %v7606_v41  ;;  %v4924_v41 = vld [vmem:[%s11871_s20 + $0x1d0] sm:$0xff] }
 0x683   : >> { %v8272_v49 = vadd.f32 %v8235_v22, %v7823_v15 }
 0x684   : >> { %v8423_v5 = vpop.f32.mrf.mxu3 }
 0x685   : >> { %v8304_v54 = vmax.f32 %v8272_v49, 0.0 }
 0x687   : >> { %v8321_v7 = vpack.c.bf16 %v8304_v54, %v8303_v48 }
 0x688   : >> { %v7789_v59 = vpop.f32.mrf.mxu1 }
 0x689   : >> { %8465 = vmatmul.bf16.gmra.mxu3 %v8321_v7  ;;  %v7824_v21 = vadd.f32 %v7789_v59, %v7607_v28  ;;  %v4927_v7 = vld [vmem:[%s11871_s20 + $0x1e8] sm:$0xff] }
 0x68b   : >> { %v8273_v17 = vadd.f32 %v8238_v16, %v7824_v21  ;;  %v4930_v21 = vld [vmem:[%s11871_s20 + $0x200] sm:$0xff] }
 0x68c   : >> { %v8426_v32 = vpop.f32.mrf.mxu3 }
 0x68d   : >> { %v8488_v55 = vadd.f32 %v8426_v32, %v4914_v42  ;;  %v8305_v60 = vmax.f32 %v8273_v17, 0.0  ;;  %v14114_v32 = vld [vmem:[#allocation17_spill] sm:$0xff] }
 0x68e   : >> { %vm14115_vm7 = vnez %v14114_v32 }
 0x68f   : >> { %v8520_v52 = vsel %vm11984_vm3, %v8488_v55, %v4914_v42  ;;  %v4928_v42 = vld [vmem:[%s11871_s20 + $0x1f0] sm:$0xff] }
 0x690   : >> { %8552 = vst [vmem:[%s11871_s20 + $0x180] sm:$0xff] %v8520_v52  ;;  %v7791_v50 = vpop.f32.mrf.mxu1 }
 0x691   : >> { %v7825_v44 = vadd.f32 %v7791_v50, %v7608_v23  ;;  %v4931_v50 = vld [vmem:[%s11871_s20 + $0x208] sm:$0xff] }
 0x693   : >> { %v8274_v2 = vadd.f32 %v8240_v51, %v7825_v44  ;;  %v4932_v51 = vld [vmem:[%s11871_s20 + $0x210] sm:$0xff] }
 0x694   : >> { %v8428_v27 = vpop.f32.mrf.mxu3 }
 0x695   : >> { %v8306_v39 = vmax.f32 %v8274_v2, 0.0  ;;  %v8489_v37 = vadd.f32 %v8428_v27, %v4915_v33 }
 0x697   : >> { %8553 = vst [vmem:[%s11871_s20 + $0x188] sm:$0xff] %v8489_v37  ;;  %v8322_v31 = vpack.c.bf16 %v8306_v39, %v8305_v60  ;;  %v8572_v37 = vld [vmem:[%s11871_s20] sm:$0xff] (%p835_p4) }
 0x699   : >> { %8470 = vmatmul.bf16.gmra.mxu3 %v8322_v31  ;;  %v8573_v31 = vld [vmem:[%s11871_s20 + $0x8] sm:$0xff] (%p835_p4) }
 0x69c   : >> { %v8431_v45 = vpop.f32.mrf.mxu3 }
 0x69d   : >> { %v8490_v1 = vadd.f32 %v8431_v45, %v4916_v20  ;;  %v8644_v45 = vmax.f32 (%p835_p4), %v8572_v37, 0.0  ;;  %v8605_v37 = vld [vmem:[%s11871_s20 + $0x108] sm:$0xff] (%p835_p4) }
 0x69f   : >> { %v8522_v36 = vsel %vm12020_vm11, %v8490_v1, %v4916_v20  ;;  %v8574_v20 = vld [vmem:[%s11871_s20 + $0x10] sm:$0xff] (%p835_p4)  ;;  %v8645_v1 = vmax.f32 (%p835_p4), %v8573_v31, 0.0  ;;  %8716 = vst [vmem:[%s11871_s20] sm:$0xff] (%p835_p4), %v8644_v45 }
 0x6a0   : >> { %8554 = vst [vmem:[%s11871_s20 + $0x190] sm:$0xff] %v8522_v36  ;;  %v8646_v26 = vmax.f32 (%p835_p4), %v8574_v20, 0.0  ;;  %v8575_v36 = vld [vmem:[%s11871_s20 + $0x18] sm:$0xff] (%p835_p4)  ;;  %v8606_v20 = vld [vmem:[%s11871_s20 + $0x110] sm:$0xff] (%p835_p4) }
 0x6a1   : > { %8717 = vst [vmem:[%s11871_s20 + $0x8] sm:$0xff] (%p835_p4), %v8645_v1  ;;  %v8607_v1 = vld [vmem:[%s11871_s20 + $0x118] sm:$0xff] (%p835_p4) }
 0x6a2   : > { %8718 = vst [vmem:[%s11871_s20 + $0x10] sm:$0xff] (%p835_p4), %v8646_v26  ;;  %v8677_v26 = vmax.f32 (%p835_p4), %v8605_v37, 0.0 }
 0x6a4   : >> { %v8433_v38 = vpop.f32.mrf.mxu3  ;;  %8749 = vst [vmem:[%s11871_s20 + $0x108] sm:$0xff] (%p835_p4), %v8677_v26 }
 0x6a5   : > { %v8576_v38 = vld [vmem:[%s11871_s20 + $0x20] sm:$0xff] (%p835_p4) }
 0x6a6   : > { %v8648_v25 = vmax.f32 (%p835_p4), %v8576_v38, 0.0  ;;  %v8678_v38 = vmax.f32 (%p835_p4), %v8606_v20, 0.0 }
 0x6a8   : > { %8720 = vst [vmem:[%s11871_s20 + $0x20] sm:$0xff] (%p835_p4), %v8648_v25 }
 0x6a9   : > { %8750 = vst [vmem:[%s11871_s20 + $0x110] sm:$0xff] (%p835_p4), %v8678_v38 }
 0x6ac   : >> { %v8436_v40 = vpop.f32.mrf.mxu3 }
 0x6ad   : >> { %v8492_v35 = vadd.f32 %v8436_v40, %v4918_v14  ;;  %v8647_v40 = vmax.f32 (%p835_p4), %v8575_v36, 0.0  ;;  %v8608_v36 = vld [vmem:[%s11871_s20 + $0x120] sm:$0xff] (%p835_p4) }
 0x6ae   : > { %v8680_v25 = vmax.f32 (%p835_p4), %v8608_v36, 0.0  ;;  %v8640_v36 = vld [vmem:[%s11871_s20 + $0x220] sm:$0xff] (%p835_p4) }
 0x6af   : >> { %v8524_v24 = vsel %vm11988_vm4, %v8492_v35, %v4918_v14  ;;  %v8577_v14 = vld [vmem:[%s11871_s20 + $0x28] sm:$0xff] (%p835_p4)  ;;  %v8578_v35 = vld [vmem:[%s11871_s20 + $0x30] sm:$0xff] (%p835_p4)  ;;  %8719 = vst [vmem:[%s11871_s20 + $0x18] sm:$0xff] (%p835_p4), %v8647_v40  ;;  %v8679_v40 = vmax.f32 (%p835_p4), %v8607_v1, 0.0  ;;  %v8639_v1 = vld [vmem:[%s11871_s20 + $0x218] sm:$0xff] (%p835_p4) }
 0x6b0   : >> { %8556 = vst [vmem:[%s11871_s20 + $0x1a0] sm:$0xff] %v8524_v24  ;;  %v8579_v24 = vld [vmem:[%s11871_s20 + $0x38] sm:$0xff] (%p835_p4) }
 0x6b1   : > { %8751 = vst [vmem:[%s11871_s20 + $0x118] sm:$0xff] (%p835_p4), %v8679_v40  ;;  %v8711_v40 = vmax.f32 (%p835_p4), %v8639_v1, 0.0 }
 0x6b2   : > { %8752 = vst [vmem:[%s11871_s20 + $0x120] sm:$0xff] (%p835_p4), %v8680_v25  ;;  %v8712_v25 = vmax.f32 (%p835_p4), %v8640_v36, 0.0 }
 0x6b3   : > { %8783 = vst [vmem:[%s11871_s20 + $0x218] sm:$0xff] (%p835_p4), %v8711_v40 }
 0x6b4   : >> { %v8438_v13 = vpop.f32.mrf.mxu3  ;;  %8784 = vst [vmem:[%s11871_s20 + $0x220] sm:$0xff] (%p835_p4), %v8712_v25 }
 0x6b5   : >> { %v8493_v58 = vadd.f32 %v8438_v13, %v4919_v4  ;;  %v8649_v4 = vmax.f32 (%p835_p4), %v8577_v14, 0.0  ;;  %v8580_v13 = vld [vmem:[%s11871_s20 + $0x40] sm:$0xff] (%p835_p4)  ;;  %v8609_v14 = vld [vmem:[%s11871_s20 + $0x128] sm:$0xff] (%p835_p4) }
 0x6b6   : > { %v8652_v62 = vmax.f32 (%p835_p4), %v8580_v13, 0.0  ;;  %v8612_v13 = vld [vmem:[%s11871_s20 + $0x140] sm:$0xff] (%p835_p4) }
 0x6b7   : >> { %8557 = vst [vmem:[%s11871_s20 + $0x1a8] sm:$0xff] %v8493_v58  ;;  %v8650_v58 = vmax.f32 (%p835_p4), %v8578_v35, 0.0  ;;  %v8610_v35 = vld [vmem:[%s11871_s20 + $0x130] sm:$0xff] (%p835_p4) }
 0x6b8   : > { %8721 = vst [vmem:[%s11871_s20 + $0x28] sm:$0xff] (%p835_p4), %v8649_v4  ;;  %v8681_v4 = vmax.f32 (%p835_p4), %v8609_v14, 0.0  ;;  %v8641_v14 = vld [vmem:[%s11871_s20 + $0x228] sm:$0xff] (%p835_p4) }
 0x6b9   : > { %8722 = vst [vmem:[%s11871_s20 + $0x30] sm:$0xff] (%p835_p4), %v8650_v58  ;;  %v8682_v58 = vmax.f32 (%p835_p4), %v8610_v35, 0.0  ;;  %v8642_v35 = vld [vmem:[%s11871_s20 + $0x230] sm:$0xff] (%p835_p4) }
 0x6ba   : > { %8724 = vst [vmem:[%s11871_s20 + $0x40] sm:$0xff] (%p835_p4), %v8652_v62  ;;  %v8684_v62 = vmax.f32 (%p835_p4), %v8612_v13, 0.0  ;;  %v8714_v13 = vmax.f32 (%p835_p4), %v8642_v35, 0.0 }
 0x6bb   : > { %8753 = vst [vmem:[%s11871_s20 + $0x128] sm:$0xff] (%p835_p4), %v8681_v4  ;;  %v8713_v4 = vmax.f32 (%p835_p4), %v8641_v14, 0.0 }
 0x6bc   : >> { %v8441_v6 = vpop.f32.mrf.mxu3  ;;  %8754 = vst [vmem:[%s11871_s20 + $0x130] sm:$0xff] (%p835_p4), %v8682_v58 }
 0x6bd   : >> { %v8494_v46 = vadd.f32 %v8441_v6, %v4920_v43  ;;  %v8651_v6 = vmax.f32 (%p835_p4), %v8579_v24, 0.0  ;;  %v8611_v24 = vld [vmem:[%s11871_s20 + $0x138] sm:$0xff] (%p835_p4)  ;;  %8756 = vst [vmem:[%s11871_s20 + $0x140] sm:$0xff] (%p835_p4), %v8684_v62 }
 0x6be   : > { %8785 = vst [vmem:[%s11871_s20 + $0x228] sm:$0xff] (%p835_p4), %v8713_v4 }
 0x6bf   : >> { %v8526_v8 = vsel %vm12024_vm12, %v8494_v46, %v4920_v43  ;;  %v8581_v43 = vld [vmem:[%s11871_s20 + $0x48] sm:$0xff] (%p835_p4)  ;;  %v8582_v46 = vld [vmem:[%s11871_s20 + $0x50] sm:$0xff] (%p835_p4)  ;;  %8723 = vst [vmem:[%s11871_s20 + $0x38] sm:$0xff] (%p835_p4), %v8651_v6  ;;  %v8683_v6 = vmax.f32 (%p835_p4), %v8611_v24, 0.0  ;;  %v8643_v24 = vld [vmem:[%s11871_s20 + $0x238] sm:$0xff] (%p835_p4) }
 0x6c0   : >> { %8558 = vst [vmem:[%s11871_s20 + $0x1b0] sm:$0xff] %v8526_v8  ;;  %v8583_v8 = vld [vmem:[%s11871_s20 + $0x58] sm:$0xff] (%p835_p4)  ;;  %v8715_v58 = vmax.f32 (%p835_p4), %v8643_v24, 0.0 }
 0x6c1   : > { %v8655_v19 = vmax.f32 (%p835_p4), %v8583_v8, 0.0  ;;  %v8615_v8 = vld [vmem:[%s11871_s20 + $0x158] sm:$0xff] (%p835_p4)  ;;  %8755 = vst [vmem:[%s11871_s20 + $0x138] sm:$0xff] (%p835_p4), %v8683_v6 }
 0x6c2   : > { %8786 = vst [vmem:[%s11871_s20 + $0x230] sm:$0xff] (%p835_p4), %v8714_v13 }
 0x6c3   : > { %8727 = vst [vmem:[%s11871_s20 + $0x58] sm:$0xff] (%p835_p4), %v8655_v19  ;;  %v8687_v19 = vmax.f32 (%p835_p4), %v8615_v8, 0.0 }
 0x6c4   : >> { %v8443_v12 = vpop.f32.mrf.mxu3  ;;  %8787 = vst [vmem:[%s11871_s20 + $0x238] sm:$0xff] (%p835_p4), %v8715_v58 }
 0x6c5   : > { %v8653_v12 = vmax.f32 (%p835_p4), %v8581_v43, 0.0  ;;  %v8613_v43 = vld [vmem:[%s11871_s20 + $0x148] sm:$0xff] (%p835_p4)  ;;  %8759 = vst [vmem:[%s11871_s20 + $0x158] sm:$0xff] (%p835_p4), %v8687_v19 }
 0x6c7   : > { %8725 = vst [vmem:[%s11871_s20 + $0x48] sm:$0xff] (%p835_p4), %v8653_v12  ;;  %v8685_v12 = vmax.f32 (%p835_p4), %v8613_v43, 0.0 }
 0x6c9   : > { %8757 = vst [vmem:[%s11871_s20 + $0x148] sm:$0xff] (%p835_p4), %v8685_v12 }
 0x6cc   : >> { %v8446_v56 = vpop.f32.mrf.mxu3 }
 0x6cd   : >> { %v8496_v11 = vadd.f32 %v8446_v56, %v4922_v0  ;;  %v8654_v56 = vmax.f32 (%p835_p4), %v8582_v46, 0.0  ;;  %v8614_v46 = vld [vmem:[%s11871_s20 + $0x150] sm:$0xff] (%p835_p4) }
 0x6cf   : >> { %v8528_v30 = vsel %vm11994_vm5, %v8496_v11, %v4922_v0  ;;  %v8584_v0 = vld [vmem:[%s11871_s20 + $0x60] sm:$0xff] (%p835_p4)  ;;  %v8585_v11 = vld [vmem:[%s11871_s20 + $0x68] sm:$0xff] (%p835_p4)  ;;  %8726 = vst [vmem:[%s11871_s20 + $0x50] sm:$0xff] (%p835_p4), %v8654_v56  ;;  %v8686_v56 = vmax.f32 (%p835_p4), %v8614_v46, 0.0 }
 0x6d0   : >> { %8560 = vst [vmem:[%s11871_s20 + $0x1c0] sm:$0xff] %v8528_v30  ;;  %v8586_v30 = vld [vmem:[%s11871_s20 + $0x70] sm:$0xff] (%p835_p4) }
 0x6d1   : > { %8758 = vst [vmem:[%s11871_s20 + $0x150] sm:$0xff] (%p835_p4), %v8686_v56 }
 0x6d4   : >> { %v8448_v47 = vpop.f32.mrf.mxu3 }
 0x6d5   : >> { %v8497_v22 = vadd.f32 %v8448_v47, %v4923_v3  ;;  %v8656_v3 = vmax.f32 (%p835_p4), %v8584_v0, 0.0  ;;  %v8587_v47 = vld [vmem:[%s11871_s20 + $0x78] sm:$0xff] (%p835_p4)  ;;  %v8616_v0 = vld [vmem:[%s11871_s20 + $0x160] sm:$0xff] (%p835_p4) }
 0x6d6   : > { %v8659_v10 = vmax.f32 (%p835_p4), %v8587_v47, 0.0  ;;  %v8619_v47 = vld [vmem:[%s11871_s20 + $0x178] sm:$0xff] (%p835_p4) }
 0x6d7   : >> { %8561 = vst [vmem:[%s11871_s20 + $0x1c8] sm:$0xff] %v8497_v22  ;;  %v8657_v22 = vmax.f32 (%p835_p4), %v8585_v11, 0.0  ;;  %v8617_v11 = vld [vmem:[%s11871_s20 + $0x168] sm:$0xff] (%p835_p4) }
 0x6d8   : > { %8728 = vst [vmem:[%s11871_s20 + $0x60] sm:$0xff] (%p835_p4), %v8656_v3  ;;  %v8688_v3 = vmax.f32 (%p835_p4), %v8616_v0, 0.0 }
 0x6d9   : > { %8729 = vst [vmem:[%s11871_s20 + $0x68] sm:$0xff] (%p835_p4), %v8657_v22  ;;  %v8689_v22 = vmax.f32 (%p835_p4), %v8617_v11, 0.0 }
 0x6da   : > { %8731 = vst [vmem:[%s11871_s20 + $0x78] sm:$0xff] (%p835_p4), %v8659_v10  ;;  %v8691_v10 = vmax.f32 (%p835_p4), %v8619_v47, 0.0 }
 0x6db   : > { %8760 = vst [vmem:[%s11871_s20 + $0x160] sm:$0xff] (%p835_p4), %v8688_v3 }
 0x6dc   : >> { %v8451_v53 = vpop.f32.mrf.mxu3  ;;  %8761 = vst [vmem:[%s11871_s20 + $0x168] sm:$0xff] (%p835_p4), %v8689_v22 }
 0x6dd   : >> { %v8498_v63 = vadd.f32 %v8451_v53, %v4924_v41  ;;  %v8658_v53 = vmax.f32 (%p835_p4), %v8586_v30, 0.0  ;;  %v8618_v30 = vld [vmem:[%s11871_s20 + $0x170] sm:$0xff] (%p835_p4)  ;;  %8763 = vst [vmem:[%s11871_s20 + $0x178] sm:$0xff] (%p835_p4), %v8691_v10 }
 0x6df   : >> { %v8530_v18 = vsel %vm12030_vm13, %v8498_v63, %v4924_v41  ;;  %v8588_v41 = vld [vmem:[%s11871_s20 + $0x80] sm:$0xff] (%p835_p4)  ;;  %v8589_v63 = vld [vmem:[%s11871_s20 + $0x88] sm:$0xff] (%p835_p4)  ;;  %8730 = vst [vmem:[%s11871_s20 + $0x70] sm:$0xff] (%p835_p4), %v8658_v53  ;;  %v8690_v53 = vmax.f32 (%p835_p4), %v8618_v30, 0.0 }
 0x6e0   : >> { %8562 = vst [vmem:[%s11871_s20 + $0x1d0] sm:$0xff] %v8530_v18  ;;  %v8590_v18 = vld [vmem:[%s11871_s20 + $0x90] sm:$0xff] (%p835_p4) }
 0x6e1   : > { %v8662_v48 = vmax.f32 (%p835_p4), %v8590_v18, 0.0  ;;  %v8622_v18 = vld [vmem:[%s11871_s20 + $0x190] sm:$0xff] (%p835_p4)  ;;  %8762 = vst [vmem:[%s11871_s20 + $0x170] sm:$0xff] (%p835_p4), %v8690_v53 }
 0x6e3   : > { %8734 = vst [vmem:[%s11871_s20 + $0x90] sm:$0xff] (%p835_p4), %v8662_v48  ;;  %v8694_v48 = vmax.f32 (%p835_p4), %v8622_v18, 0.0 }
 0x6e4   : >> { %v8453_v15 = vpop.f32.mrf.mxu3 }
 0x6e5   : > { %v8660_v15 = vmax.f32 (%p835_p4), %v8588_v41, 0.0  ;;  %v8620_v41 = vld [vmem:[%s11871_s20 + $0x180] sm:$0xff] (%p835_p4)  ;;  %8766 = vst [vmem:[%s11871_s20 + $0x190] sm:$0xff] (%p835_p4), %v8694_v48 }
 0x6e7   : > { %8732 = vst [vmem:[%s11871_s20 + $0x80] sm:$0xff] (%p835_p4), %v8660_v15  ;;  %v8692_v15 = vmax.f32 (%p835_p4), %v8620_v41, 0.0 }
 0x6e9   : > { %8764 = vst [vmem:[%s11871_s20 + $0x180] sm:$0xff] (%p835_p4), %v8692_v15 }
 0x6ec   : >> { %v8456_v49 = vpop.f32.mrf.mxu3 }
 0x6ed   : >> { %v8500_v5 = vadd.f32 %v8456_v49, %v4926_v9  ;;  %v8661_v49 = vmax.f32 (%p835_p4), %v8589_v63, 0.0  ;;  %v8621_v63 = vld [vmem:[%s11871_s20 + $0x188] sm:$0xff] (%p835_p4) }
 0x6ef   : >> { %v8532_v54 = vsel %vm11998_vm6, %v8500_v5, %v4926_v9  ;;  %v8591_v9 = vld [vmem:[%s11871_s20 + $0x98] sm:$0xff] (%p835_p4)  ;;  %v8592_v5 = vld [vmem:[%s11871_s20 + $0xa0] sm:$0xff] (%p835_p4)  ;;  %8733 = vst [vmem:[%s11871_s20 + $0x88] sm:$0xff] (%p835_p4), %v8661_v49  ;;  %v8693_v49 = vmax.f32 (%p835_p4), %v8621_v63, 0.0 }
 0x6f0   : >> { %8564 = vst [vmem:[%s11871_s20 + $0x1e0] sm:$0xff] %v8532_v54  ;;  %v8593_v54 = vld [vmem:[%s11871_s20 + $0xa8] sm:$0xff] (%p835_p4) }
 0x6f1   : > { %8765 = vst [vmem:[%s11871_s20 + $0x188] sm:$0xff] (%p835_p4), %v8693_v49 }
 0x6f4   : >> { %v8458_v16 = vpop.f32.mrf.mxu3 }
 0x6f5   : >> { %v8501_v59 = vadd.f32 %v8458_v16, %v4927_v7  ;;  %v8663_v7 = vmax.f32 (%p835_p4), %v8591_v9, 0.0  ;;  %v8594_v16 = vld [vmem:[%s11871_s20 + $0xb0] sm:$0xff] (%p835_p4)  ;;  %v8623_v9 = vld [vmem:[%s11871_s20 + $0x198] sm:$0xff] (%p835_p4) }
 0x6f6   : > { %v8666_v32 = vmax.f32 (%p835_p4), %v8594_v16, 0.0  ;;  %v8626_v16 = vld [vmem:[%s11871_s20 + $0x1b0] sm:$0xff] (%p835_p4) }
 0x6f7   : >> { %8565 = vst [vmem:[%s11871_s20 + $0x1e8] sm:$0xff] %v8501_v59  ;;  %v8664_v59 = vmax.f32 (%p835_p4), %v8592_v5, 0.0  ;;  %v8624_v5 = vld [vmem:[%s11871_s20 + $0x1a0] sm:$0xff] (%p835_p4) }
 0x6f8   : > { %8735 = vst [vmem:[%s11871_s20 + $0x98] sm:$0xff] (%p835_p4), %v8663_v7  ;;  %v8695_v7 = vmax.f32 (%p835_p4), %v8623_v9, 0.0 }
 0x6f9   : > { %8736 = vst [vmem:[%s11871_s20 + $0xa0] sm:$0xff] (%p835_p4), %v8664_v59  ;;  %v8696_v59 = vmax.f32 (%p835_p4), %v8624_v5, 0.0 }
 0x6fa   : > { %8738 = vst [vmem:[%s11871_s20 + $0xb0] sm:$0xff] (%p835_p4), %v8666_v32  ;;  %v8698_v32 = vmax.f32 (%p835_p4), %v8626_v16, 0.0 }
 0x6fb   : > { %8767 = vst [vmem:[%s11871_s20 + $0x198] sm:$0xff] (%p835_p4), %v8695_v7 }
 0x6fc   : >> { %v8461_v28 = vpop.f32.mrf.mxu3  ;;  %8768 = vst [vmem:[%s11871_s20 + $0x1a0] sm:$0xff] (%p835_p4), %v8696_v59 }
 0x6fd   : >> { %v8502_v34 = vadd.f32 %v8461_v28, %v4928_v42  ;;  %v8665_v28 = vmax.f32 (%p835_p4), %v8593_v54, 0.0  ;;  %v8625_v54 = vld [vmem:[%s11871_s20 + $0x1a8] sm:$0xff] (%p835_p4)  ;;  %8770 = vst [vmem:[%s11871_s20 + $0x1b0] sm:$0xff] (%p835_p4), %v8698_v32 }
 0x6ff   : >> { %v8534_v29 = vsel %vm14115_vm7, %v8502_v34, %v4928_v42  ;;  %v8595_v42 = vld [vmem:[%s11871_s20 + $0xb8] sm:$0xff] (%p835_p4)  ;;  %v8596_v34 = vld [vmem:[%s11871_s20 + $0xc0] sm:$0xff] (%p835_p4)  ;;  %8737 = vst [vmem:[%s11871_s20 + $0xa8] sm:$0xff] (%p835_p4), %v8665_v28  ;;  %v8697_v28 = vmax.f32 (%p835_p4), %v8625_v54, 0.0 }
 0x700   : >> { %8566 = vst [vmem:[%s11871_s20 + $0x1f0] sm:$0xff] %v8534_v29  ;;  %v8597_v29 = vld [vmem:[%s11871_s20 + $0xc8] sm:$0xff] (%p835_p4) }
 0x701   : > { %v8669_v57 = vmax.f32 (%p835_p4), %v8597_v29, 0.0  ;;  %v8629_v29 = vld [vmem:[%s11871_s20 + $0x1c8] sm:$0xff] (%p835_p4)  ;;  %8769 = vst [vmem:[%s11871_s20 + $0x1a8] sm:$0xff] (%p835_p4), %v8697_v28 }
 0x703   : > { %8741 = vst [vmem:[%s11871_s20 + $0xc8] sm:$0xff] (%p835_p4), %v8669_v57  ;;  %v8701_v57 = vmax.f32 (%p835_p4), %v8629_v29, 0.0 }
 0x704   : >> { %v8463_v61 = vpop.f32.mrf.mxu3 }
 0x705   : > { %v8667_v61 = vmax.f32 (%p835_p4), %v8595_v42, 0.0  ;;  %v8627_v42 = vld [vmem:[%s11871_s20 + $0x1b8] sm:$0xff] (%p835_p4)  ;;  %8773 = vst [vmem:[%s11871_s20 + $0x1c8] sm:$0xff] (%p835_p4), %v8701_v57 }
 0x707   : > { %8739 = vst [vmem:[%s11871_s20 + $0xb8] sm:$0xff] (%p835_p4), %v8667_v61  ;;  %v8699_v61 = vmax.f32 (%p835_p4), %v8627_v42, 0.0 }
 0x709   : > { %8771 = vst [vmem:[%s11871_s20 + $0x1b8] sm:$0xff] (%p835_p4), %v8699_v61 }
 0x70c   : >> { %v8466_v55 = vpop.f32.mrf.mxu3 }
 0x70d   : >> { %v8504_v23 = vadd.f32 %v8466_v55, %v4930_v21  ;;  %v8668_v55 = vmax.f32 (%p835_p4), %v8596_v34, 0.0  ;;  %v8628_v34 = vld [vmem:[%s11871_s20 + $0x1c0] sm:$0xff] (%p835_p4) }
 0x70f   : >> { %v8536_v52 = vsel %vm14117_vm15, %v8504_v23, %v4930_v21  ;;  %v8598_v21 = vld [vmem:[%s11871_s20 + $0xd0] sm:$0xff] (%p835_p4)  ;;  %v8599_v23 = vld [vmem:[%s11871_s20 + $0xd8] sm:$0xff] (%p835_p4)  ;;  %8740 = vst [vmem:[%s11871_s20 + $0xc0] sm:$0xff] (%p835_p4), %v8668_v55  ;;  %v8700_v55 = vmax.f32 (%p835_p4), %v8628_v34, 0.0 }
 0x710   : >> { %8568 = vst [vmem:[%s11871_s20 + $0x200] sm:$0xff] %v8536_v52  ;;  %v8600_v52 = vld [vmem:[%s11871_s20 + $0xe0] sm:$0xff] (%p835_p4) }
 0x711   : > { %8772 = vst [vmem:[%s11871_s20 + $0x1c0] sm:$0xff] (%p835_p4), %v8700_v55 }
 0x714   : >> { %v8468_v17 = vpop.f32.mrf.mxu3 }
 0x715   : >> { %v8505_v44 = vadd.f32 %v8468_v17, %v4931_v50  ;;  %v8670_v50 = vmax.f32 (%p835_p4), %v8598_v21, 0.0  ;;  %v8601_v17 = vld [vmem:[%s11871_s20 + $0xe8] sm:$0xff] (%p835_p4)  ;;  %v8630_v21 = vld [vmem:[%s11871_s20 + $0x1d0] sm:$0xff] (%p835_p4) }
 0x716   : > { %v8673_v27 = vmax.f32 (%p835_p4), %v8601_v17, 0.0  ;;  %v8633_v17 = vld [vmem:[%s11871_s20 + $0x1e8] sm:$0xff] (%p835_p4) }
 0x717   : >> { %8569 = vst [vmem:[%s11871_s20 + $0x208] sm:$0xff] %v8505_v44  ;;  %v8671_v44 = vmax.f32 (%p835_p4), %v8599_v23, 0.0  ;;  %v8631_v23 = vld [vmem:[%s11871_s20 + $0x1d8] sm:$0xff] (%p835_p4) }
 0x718   : > { %8742 = vst [vmem:[%s11871_s20 + $0xd0] sm:$0xff] (%p835_p4), %v8670_v50  ;;  %v8702_v50 = vmax.f32 (%p835_p4), %v8630_v21, 0.0 }
 0x719   : > { %8743 = vst [vmem:[%s11871_s20 + $0xd8] sm:$0xff] (%p835_p4), %v8671_v44  ;;  %v8703_v44 = vmax.f32 (%p835_p4), %v8631_v23, 0.0 }
 0x71a   : > { %8745 = vst [vmem:[%s11871_s20 + $0xe8] sm:$0xff] (%p835_p4), %v8673_v27  ;;  %v8705_v27 = vmax.f32 (%p835_p4), %v8633_v17, 0.0 }
 0x71b   : > { %8774 = vst [vmem:[%s11871_s20 + $0x1d0] sm:$0xff] (%p835_p4), %v8702_v50 }
 0x71c   : >> { %v8471_v33 = vpop.f32.mrf.mxu3  ;;  %8775 = vst [vmem:[%s11871_s20 + $0x1d8] sm:$0xff] (%p835_p4), %v8703_v44 }
 0x71d   : >> { %v8506_v2 = vadd.f32 %v8471_v33, %v4932_v51  ;;  %v8672_v33 = vmax.f32 (%p835_p4), %v8600_v52, 0.0  ;;  %v8632_v52 = vld [vmem:[%s11871_s20 + $0x1e0] sm:$0xff] (%p835_p4)  ;;  %8777 = vst [vmem:[%s11871_s20 + $0x1e8] sm:$0xff] (%p835_p4), %v8705_v27 }
 0x71e   : > { %v8637_v37 = vld [vmem:[%s11871_s20 + $0x208] sm:$0xff] (%p835_p4) }
 0x71f   : >> { %v8538_v60 = vsel %vm14086_vm14, %v8506_v2, %v4932_v51  ;;  %v8602_v51 = vld [vmem:[%s11871_s20 + $0xf0] sm:$0xff] (%p835_p4)  ;;  %v8603_v2 = vld [vmem:[%s11871_s20 + $0xf8] sm:$0xff] (%p835_p4)  ;;  %8744 = vst [vmem:[%s11871_s20 + $0xe0] sm:$0xff] (%p835_p4), %v8672_v33  ;;  %v8704_v33 = vmax.f32 (%p835_p4), %v8632_v52, 0.0  ;;  %v8709_v26 = vmax.f32 (%p835_p4), %v8637_v37, 0.0 }
 0x720   : >> { %8570 = vst [vmem:[%s11871_s20 + $0x210] sm:$0xff] %v8538_v60  ;;  %837 = sbr.rel (!%p835_p4) target bundleno = 108 (0x6c), region = 79  ;;  %v8604_v60 = vld [vmem:[%s11871_s20 + $0x100] sm:$0xff] (%p835_p4)  ;;  %v8675_v31 = vmax.f32 (%p835_p4), %v8603_v2, 0.0  ;;  %v8635_v2 = vld [vmem:[%s11871_s20 + $0x1f8] sm:$0xff] (%p835_p4) }
 0x721   : > { %v8676_v45 = vmax.f32 (%p835_p4), %v8604_v60, 0.0  ;;  %v8636_v60 = vld [vmem:[%s11871_s20 + $0x200] sm:$0xff] (%p835_p4)  ;;  %8776 = vst [vmem:[%s11871_s20 + $0x1e0] sm:$0xff] (%p835_p4), %v8704_v33 }
 0x722   : > { %8747 = vst [vmem:[%s11871_s20 + $0xf8] sm:$0xff] (%p835_p4), %v8675_v31  ;;  %v8707_v31 = vmax.f32 (%p835_p4), %v8635_v2, 0.0 }
 0x723   : > { %8748 = vst [vmem:[%s11871_s20 + $0x100] sm:$0xff] (%p835_p4), %v8676_v45  ;;  %v8708_v45 = vmax.f32 (%p835_p4), %v8636_v60, 0.0 }
 0x724   : >> { %v8473_v39 = vpop.f32.mrf.mxu3  ;;  %8779 = vst [vmem:[%s11871_s20 + $0x1f8] sm:$0xff] (%p835_p4), %v8707_v31 }
 0x725   : > { %v8674_v39 = vmax.f32 %v8602_v51, 0.0  ;;  %v8634_v51 = vld [vmem:[%s11871_s20 + $0x1f0] sm:$0xff]  ;;  %8780 = vst [vmem:[%s11871_s20 + $0x200] sm:$0xff] %v8708_v45 }
 0x726   : > { %8781 = vst [vmem:[%s11871_s20 + $0x208] sm:$0xff] %v8709_v26 }
 0x727   : > { %8746 = vst [vmem:[%s11871_s20 + $0xf0] sm:$0xff] %v8674_v39  ;;  %v8706_v39 = vmax.f32 %v8634_v51, 0.0  ;;  %v8638_v20 = vld [vmem:[%s11871_s20 + $0x210] sm:$0xff] }
 0x728   : > { %v8710_v38 = vmax.f32 %v8638_v20, 0.0 }
 0x729   : > { %8778 = vst [vmem:[%s11871_s20 + $0x1f0] sm:$0xff] %v8706_v39 }
 0x72a   : > { %8782 = vst [vmem:[%s11871_s20 + $0x210] sm:$0xff] %v8710_v38 }
 0x72b PF: > { %s13_s12 = sadd.s32 1, %s11828_s12  }
 0x72c   : > { %p10_p5 = scmp.ge.s32.totalorder %s13_s12, 4  }
 0x72e   :  { %12 = sbr.rel (!%p10_p5) target bundleno = 1 (0x1), region = 90 }

</bundles_post_ra>
